<compile_context>
chip_gen: v5e
topology: v5e:2x2
jax: 0.10.0
libtpu: 0.0.40
codegen_flags: <defaults>
</compile_context>

<pallas_src>
import functools

import jax
import jax.numpy as jnp
from jax.experimental import pallas as pl
from jax.experimental.pallas import tpu as pltpu

R_REGIONS = 49   # fixed by fc14 output dim
T_TOKENS = 20    # fixed by fc14 input dim
_LANE = 128
_SUBLANE = 8


def _round_up(x, m):
    return ((x + m - 1) // m) * m


def _vmem_bytes_estimate(tb, img_dim, ques_dim, att_p, ns1):
    """Rough f32 VMEM footprint for one grid step (blocks + weights + temps)."""
    r = R_REGIONS
    blocks = 2 * tb * r * (img_dim + ques_dim)        # double-buffered grid inputs
    out = 2 * tb * att_p                              # double-buffered output block
    weights = (tb * r * att_p                         # tiled folded bias b14t
               + 2 * tb * tb * r                      # seg + rep
               + (ques_dim + img_dim + 1) * att_p     # w11, w12, w13
               + ns1 * (att_p * att_p + att_p + img_dim * att_p + att_p))
    temps = 8 * tb * r * att_p                        # q2 / img_emb / h / e*v ...
    return 4 * (blocks + out + weights + temps)


def _segment_attention(logits, values, seg, rep, region_zero):
    """sum_r softmax_r(logits) * values per batch element, MXU-formulated.

    logits:      (tb*R, 1) raw (finite) logits.
    values:      (tb*R, att_p) rows to be attention-weighted.
    seg:         (tb, tb*R) 0/1 block segment-sum matrix.
    rep:         (tb*R, tb) = seg.T, per-batch-element row broadcast.
    region_zero: (tb*R, 1) bool; masked rows contribute zero weight.

    Stabilised with a per-segment MEAN shift (exact by softmax shift
    invariance) so batch elements with very different logit levels in the same
    tile cannot underflow each other's denominators (the tile-wide-max issue
    flagged in review).  Residual risk only if a single element's logit spread
    exceeds ~88, impossible here since |logit| <= sum|w13| + |b13| (tanh-bounded
    activations) for any sane weights.  Normalisation happens after the segment
    sum, so only a (tb, 1) reciprocal is needed.
    """
    f32 = jnp.float32
    shift = jnp.dot(seg, logits, preferred_element_type=f32) * (1.0 / R_REGIONS)   # (tb, 1)
    centered = logits - jnp.dot(rep, shift, preferred_element_type=f32)            # (tb*R, 1)
    e = jnp.where(region_zero, 0.0, jnp.exp(centered))                             # (tb*R, 1)
    num = jnp.dot(seg, e * values, preferred_element_type=f32)                     # (tb, att_p)
    den = jnp.dot(seg, e, preferred_element_type=f32)                              # (tb, 1)
    # Fully-masked element -> den == 0 -> contribution 0 (reference yields NaN).
    # approx=True (EUP) is available if the accuracy budget allows.
    inv_den = jnp.where(den > 0.0, pl.reciprocal(den, approx=False), 0.0)
    return num * inv_den                                                           # (tb, att_p)


def san_kernel(num_stacks_m1,
               img_ref, q14_ref,
               b14t_ref, seg_ref, rep_ref,
               w11_ref, w12_ref, w13_ref,
               wq_ref, bq_ref, wi_ref, wh_ref,
               b13_ref, bh_ref,
               out_ref):
    """Processes tb batch elements per grid step (grid = (b_pad // tb,))."""
    f32 = jnp.float32
    img = img_ref[...]        # (tb*R, IMG)
    q14 = q14_ref[...]        # (tb*R, QUES) = per-element W14 @ ques_feat (from wrapper)
    seg = seg_ref[...]        # (tb, tb*R)
    rep = rep_ref[...]        # (tb*R, tb)

    # Region mask hoisted: computed once from the raw image rows, reused by all
    # stacks.  The reference masks on the projected rows; differs only when a
    # nonzero image row projects to exactly zero (measure-zero).
    region_zero = jnp.sum(jnp.abs(img), axis=-1, keepdims=True) == 0.0   # (tb*R, 1)

    # ---- stack 0: one dense MXU matmul per projection ----
    q2 = jnp.dot(q14, w11_ref[...], preferred_element_type=f32) + b14t_ref[...]   # (tb*R, att_p)
    img_emb = jnp.dot(img, w12_ref[...], preferred_element_type=f32)              # (tb*R, att_p)
    h1 = jnp.tanh(q2 + img_emb)
    # fc13 folded into a VPU multiply + lane reduce (avoids an N=1 MXU matmul).
    logits = jnp.sum(h1 * w13_ref[...], axis=-1, keepdims=True) + b13_ref[0, 0]   # (tb*R, 1)

    u = (jnp.dot(seg, q2, preferred_element_type=f32)                             # sum_r ques_emb
         + _segment_attention(logits, img_emb, seg, rep, region_zero))            # sum_r p*img_emb

    # ---- remaining stacks (unrolled at trace time) ----
    for s in range(num_stacks_m1):
        q_emb = jnp.dot(u, wq_ref[s], preferred_element_type=f32) + bq_ref[s:s + 1, :]  # (tb, att_p)
        i_emb = jnp.dot(img, wi_ref[s], preferred_element_type=f32)                     # (tb*R, att_p)
        # Broadcast each element's query to its 49 region rows via REP (MXU).
        h = jnp.tanh(jnp.dot(rep, q_emb, preferred_element_type=f32) + i_emb)
        lg = jnp.sum(h * wh_ref[s], axis=-1, keepdims=True) + bh_ref[s, 0]              # (tb*R, 1)
        u = u + _segment_attention(lg, i_emb, seg, rep, region_zero)

    out_ref[...] = u.astype(out_ref.dtype)


def stacked_attention(img_feat, ques_feat, params, num_stacks, *, batch_tile=32):
    B, R, IMG = img_feat.shape
    _, T, QUES = ques_feat.shape
    assert R == R_REGIONS and T == T_TOKENS, "fc14 fixes R=49 regions, T=20 tokens"
    ATT = params["w11"].shape[1]
    ns1 = num_stacks - 1
    f32 = jnp.float32

    att_p = _round_up(ATT, _LANE)    # lane-dense intermediates and output store
    pa = att_p - ATT

    # ---- batch tile selection -------------------------------------------
    # Multiple of 8 (sublanes); default 32 so the (tb*R, .) projections present
    # >= 256 rows to the v6e/v7x MXU.  Prefer >= 2 grid steps when the batch
    # allows it (v7x shards the "parallel" axis across its 2 TensorCores), and
    # clamp by a VMEM budget that also fits v7x's 64 MiB.
    if B > _SUBLANE:
        tb = min(batch_tile, _round_up((B + 1) // 2, _SUBLANE))
    else:
        tb = _SUBLANE
    tb = _round_up(max(tb, _SUBLANE), _SUBLANE)
    vmem_budget = 44 * 2**20
    while tb > _SUBLANE and _vmem_bytes_estimate(tb, IMG, QUES, att_p, ns1) > vmem_budget:
        tb -= _SUBLANE
    b_pad = _round_up(max(B, 1), tb)

    # ---- fc14 folded into the wrapper (kills the kron block-diagonal) ----
    w14 = params["w14"].astype(f32)                                   # (R, T)
    ques14 = jnp.einsum("rt,btq->brq", w14, ques_feat.astype(f32))    # (B, R, QUES)
    # q2 = ques14 @ W11 + b14eff, where b14eff absorbs both biases; padded ATT
    # lanes are zero so no lane-mask is needed downstream.
    b14eff = (params["b14"].astype(f32)
              + jnp.sum(w14, axis=1, keepdims=True) * params["b11"].astype(f32))  # (R, ATT)
    b14t = jnp.tile(jnp.pad(b14eff, ((0, 0), (0, pa))), (tb, 1))      # (tb*R, att_p)

    # ---- batch padding: only when the batch is not tile-aligned ----------
    img = img_feat.astype(f32)
    pad_b = b_pad - B
    if pad_b:
        # Replicate the last element into the tail (zero rows would look like a
        # fully-masked image).  TODO(synk): a clamped Element-offset index_map
        # would avoid even this tail copy for ragged batches.
        img = jnp.concatenate(
            [img, jnp.broadcast_to(img[-1:], (pad_b, R, IMG))], axis=0)
        ques14 = jnp.concatenate(
            [ques14, jnp.broadcast_to(ques14[-1:], (pad_b, R, QUES))], axis=0)
    img2d = img.reshape(b_pad * R, IMG)          # free collapse of leading dims
    q14_2d = ques14.reshape(b_pad * R, QUES)

    # Per-batch-element structure as small 0/1 matrices (segment sums /
    # broadcasts run on the MXU, no sublane reshapes in the kernel).
    eye = jnp.eye(tb, dtype=f32)
    seg = jnp.kron(eye, jnp.ones((1, R), f32))   # (tb, tb*R)
    rep = seg.T                                  # (tb*R, tb)

    pad_cols = lambda a: jnp.pad(a.astype(f32), ((0, 0), (0, pa)))
    w11 = pad_cols(params["w11"])                                          # (QUES, att_p)
    w12 = pad_cols(params["w12"])                                          # (IMG, att_p)
    w13 = jnp.pad(params["w13"].astype(f32).reshape(1, ATT), ((0, 0), (0, pa)))
    b13 = params["b13"].astype(f32)                                        # (1, 1) -> SMEM

    if ns1 > 0:
        wq = jnp.pad(params["wq"].astype(f32), ((0, 0), (0, pa), (0, pa)))
        bq = jnp.pad(params["bq"].astype(f32), ((0, 0), (0, pa)))
        wi = jnp.pad(params["wi"].astype(f32), ((0, 0), (0, 0), (0, pa)))
        wh = jnp.pad(jnp.swapaxes(params["wh"].astype(f32), 1, 2),
                     ((0, 0), (0, 0), (0, pa)))                            # (ns1, 1, att_p)
        bh = params["bh"].astype(f32)                                      # (ns1, 1) -> SMEM
    else:  # dummies; the stack loop never runs
        wq = jnp.zeros((1, att_p, att_p), f32)
        bq = jnp.zeros((1, att_p), f32)
        wi = jnp.zeros((1, IMG, att_p), f32)
        wh = jnp.zeros((1, 1, att_p), f32)
        bh = jnp.zeros((1, 1), f32)

    # Grid-invariant weights: whole-array VMEM residency (one copy, not
    # double-buffered by the grid pipeline).  (1,1)/(ns1,1) scalars in SMEM.
    vmem_whole = pl.BlockSpec(memory_space=pltpu.MemorySpace.VMEM)
    smem_whole = pl.BlockSpec(memory_space=pltpu.MemorySpace.SMEM)

    in_specs = [
        pl.BlockSpec((tb * R, IMG), lambda i: (i, 0)),     # img rows of this tile
        pl.BlockSpec((tb * R, QUES), lambda i: (i, 0)),    # ques14 rows of this tile
        vmem_whole, vmem_whole, vmem_whole,                # b14t, seg, rep
        vmem_whole, vmem_whole, vmem_whole,                # w11, w12, w13
        vmem_whole, vmem_whole, vmem_whole, vmem_whole,    # wq, bq, wi, wh
        smem_whole, smem_whole,                            # b13, bh
    ]
    out_spec = pl.BlockSpec((tb, att_p), lambda i: (i, 0))

    est = _vmem_bytes_estimate(tb, IMG, QUES, att_p, ns1)
    vmem_limit = int(min(64 * 2**20, max(32 * 2**20, 2 * est)))   # explicit scoped VMEM

    kernel = functools.partial(san_kernel, ns1)
    out = pl.pallas_call(
        kernel,
        out_shape=jax.ShapeDtypeStruct((b_pad, att_p), jnp.float32),
        grid=(b_pad // tb,),
        in_specs=in_specs,
        out_specs=out_spec,
        compiler_params=pltpu.CompilerParams(
            dimension_semantics=("parallel",),
            vmem_limit_bytes=vmem_limit),
    )(img2d, q14_2d, b14t, seg, rep, w11, w12, w13, wq, bq, wi, wh, b13, bh)
    return out[:B, :ATT]


def init_params(key, img_feat_size, ques_feat_size, att_size, num_stacks):
    ks = jax.random.split(key, 12)
    ns1 = num_stacks - 1
    s = 0.1
    return {
        "w11": jax.random.normal(ks[0], (ques_feat_size, att_size), jnp.float32) * s,
        "b11": jax.random.normal(ks[1], (1, att_size), jnp.float32) * s,
        "w12": jax.random.normal(ks[2], (img_feat_size, att_size), jnp.float32) * s,
        "w14": jax.random.normal(ks[3], (R_REGIONS, T_TOKENS), jnp.float32) * s,
        "b14": jax.random.normal(ks[4], (R_REGIONS, 1), jnp.float32) * s,
        "w13": jax.random.normal(ks[5], (att_size, 1), jnp.float32) * s,
        "b13": jax.random.normal(ks[6], (1, 1), jnp.float32) * s,
        "wq": jax.random.normal(ks[7], (ns1, att_size, att_size), jnp.float32) * s,
        "bq": jax.random.normal(ks[8], (ns1, att_size), jnp.float32) * s,
        "wi": jax.random.normal(ks[9], (ns1, img_feat_size, att_size), jnp.float32) * s,
        "wh": jax.random.normal(ks[10], (ns1, att_size, 1), jnp.float32) * s,
        "bh": jax.random.normal(ks[11], (ns1, 1), jnp.float32) * s,
    }


def stacked_attention_ref(img_feat, ques_feat, params, num_stacks):
    """Pure-JAX reference mirroring the PyTorch forward (eval mode)."""
    ques_emb = ques_feat @ params["w11"] + params["b11"]                     # (B,T,ATT)
    img_emb = img_feat @ params["w12"]                                       # (B,R,ATT)
    q2 = jnp.einsum("rt,bta->bra", params["w14"], ques_emb) \
        + params["b14"].reshape(1, -1, 1)                                    # (B,R,ATT)
    h1 = jnp.tanh(q2 + img_emb)
    h1e = h1 @ params["w13"] + params["b13"]                                 # (B,R,1)
    mask = jnp.sum(jnp.abs(img_emb), axis=2, keepdims=True) == 0.0
    h1e = jnp.where(mask, -jnp.inf, h1e)
    p = jax.nn.softmax(h1e, axis=1)
    u = jnp.sum(q2, axis=1) + jnp.sum(img_emb * p, axis=1)                   # (B,ATT)
    for s in range(num_stacks - 1):
        qe = u @ params["wq"][s] + params["bq"][s]                           # (B,ATT)
        ie = img_feat @ params["wi"][s]                                      # (B,R,ATT)
        h = jnp.tanh(qe[:, None, :] + ie)
        he = h @ params["wh"][s] + params["bh"][s]                           # (B,R,1)
        m = jnp.sum(jnp.abs(ie), axis=2, keepdims=True) == 0.0
        he = jnp.where(m, -jnp.inf, he)
        pp = jax.nn.softmax(he, axis=1)
        u = u + jnp.sum(ie * pp, axis=1)
    return u


if __name__ == "__main__":
    IMG_FEAT = 32
    QUES_FEAT = 24
    ATT = 64
    NUM_STACKS = 3

    key = jax.random.PRNGKey(0)
    k_img, k_ques, k_par = jax.random.split(key, 3)
    params = init_params(k_par, IMG_FEAT, QUES_FEAT, ATT, NUM_STACKS)

    # Case 1: tiny batch (one 8-wide batch tile, grid = 1).
    B1 = 2
    img1 = jax.random.normal(k_img, (B1, R_REGIONS, IMG_FEAT), jnp.float32)
    ques1 = jax.random.normal(k_ques, (B1, T_TOKENS, QUES_FEAT), jnp.float32)
    out1 = jax.block_until_ready(stacked_attention(img1, ques1, params, NUM_STACKS))
    ref1 = stacked_attention_ref(img1, ques1, params, NUM_STACKS)
    assert out1.shape == (B1, ATT)
    assert jnp.allclose(out1, ref1, rtol=2e-4, atol=2e-4), "mismatch vs reference (B=2)"

    # Case 2: ragged batch -> tail replication AND >= 2 grid steps.
    B2 = 11
    img2 = jax.random.normal(jax.random.fold_in(k_img, 1),
                             (B2, R_REGIONS, IMG_FEAT), jnp.float32)
    ques2 = jax.random.normal(jax.random.fold_in(k_ques, 1),
                              (B2, T_TOKENS, QUES_FEAT), jnp.float32)
    out2 = jax.block_until_ready(stacked_attention(img2, ques2, params, NUM_STACKS))
    ref2 = stacked_attention_ref(img2, ques2, params, NUM_STACKS)
    assert out2.shape == (B2, ATT)
    assert jnp.allclose(out2, ref2, rtol=2e-4, atol=2e-4), "mismatch vs reference (B=11)"

    print("KERNEL_OK")
</pallas_src>

<mosaic_0001>
module attributes {stable_mosaic.version = 11 : i64} {
  func.func @san_kernel(%arg0: i32, %arg1: memref<392x32xf32, #tpu.memory_space<vmem>>, %arg2: memref<392x24xf32, #tpu.memory_space<vmem>>, %arg3: memref<392x128xf32, #tpu.memory_space<vmem>>, %arg4: memref<8x392xf32, #tpu.memory_space<vmem>>, %arg5: memref<392x8xf32, #tpu.memory_space<vmem>>, %arg6: memref<24x128xf32, #tpu.memory_space<vmem>>, %arg7: memref<32x128xf32, #tpu.memory_space<vmem>>, %arg8: memref<1x128xf32, #tpu.memory_space<vmem>>, %arg9: memref<2x128x128xf32, #tpu.memory_space<vmem>>, %arg10: memref<2x128xf32, #tpu.memory_space<vmem>>, %arg11: memref<2x32x128xf32, #tpu.memory_space<vmem>>, %arg12: memref<2x1x128xf32, #tpu.memory_space<vmem>>, %arg13: memref<1x1xf32, #tpu.memory_space<smem>>, %arg14: memref<2x1xf32, #tpu.memory_space<smem>>, %arg15: memref<8x128xf32, #tpu.memory_space<vmem>>) attributes {dimension_semantics = [#tpu.dimension_semantics<parallel>], iteration_bounds = array<i64: 1>, scalar_prefetch = 0 : i64, scratch_operands = 0 : i64, tpu.core_type = #tpu.core_type<tc>, window_params = [{transform_indices = @transform_0, window_bounds = array<i64: 392, 32>}, {transform_indices = @transform_1, window_bounds = array<i64: 392, 24>}, {pipeline_mode = #tpu.pipeline_mode<synchronous>, transform_indices = @transform_2, window_bounds = array<i64: 392, 128>}, {pipeline_mode = #tpu.pipeline_mode<synchronous>, transform_indices = @transform_3, window_bounds = array<i64: 8, 392>}, {pipeline_mode = #tpu.pipeline_mode<synchronous>, transform_indices = @transform_4, window_bounds = array<i64: 392, 8>}, {pipeline_mode = #tpu.pipeline_mode<synchronous>, transform_indices = @transform_5, window_bounds = array<i64: 24, 128>}, {pipeline_mode = #tpu.pipeline_mode<synchronous>, transform_indices = @transform_6, window_bounds = array<i64: 32, 128>}, {pipeline_mode = #tpu.pipeline_mode<synchronous>, transform_indices = @transform_7, window_bounds = array<i64: 1, 128>}, {pipeline_mode = #tpu.pipeline_mode<synchronous>, transform_indices = @transform_8, window_bounds = array<i64: 2, 128, 128>}, {pipeline_mode = #tpu.pipeline_mode<synchronous>, transform_indices = @transform_9, window_bounds = array<i64: 2, 128>}, {pipeline_mode = #tpu.pipeline_mode<synchronous>, transform_indices = @transform_10, window_bounds = array<i64: 2, 32, 128>}, {pipeline_mode = #tpu.pipeline_mode<synchronous>, transform_indices = @transform_11, window_bounds = array<i64: 2, 1, 128>}, {transform_indices = @transform_12, window_bounds = array<i64: 1, 1>}, {transform_indices = @transform_13, window_bounds = array<i64: 2, 1>}, {transform_indices = @transform_14, window_bounds = array<i64: 8, 128>}]} {
    %c0 = arith.constant 0 : index
    %c0_0 = arith.constant 0 : index
    %0 = vector.load %arg1[%c0, %c0_0] : memref<392x32xf32, #tpu.memory_space<vmem>>, vector<392x32xf32>
    %c0_1 = arith.constant 0 : index
    %c0_2 = arith.constant 0 : index
    %1 = vector.load %arg2[%c0_1, %c0_2] : memref<392x24xf32, #tpu.memory_space<vmem>>, vector<392x24xf32>
    %c0_3 = arith.constant 0 : index
    %c0_4 = arith.constant 0 : index
    %2 = vector.load %arg4[%c0_3, %c0_4] : memref<8x392xf32, #tpu.memory_space<vmem>>, vector<8x392xf32>
    %c0_5 = arith.constant 0 : index
    %c0_6 = arith.constant 0 : index
    %3 = vector.load %arg5[%c0_5, %c0_6] : memref<392x8xf32, #tpu.memory_space<vmem>>, vector<392x8xf32>
    %4 = math.absf %0 : vector<392x32xf32>
    %cst = arith.constant dense<0.000000e+00> : vector<392xf32>
    %5 = vector.multi_reduction <add>, %4, %cst [1] : vector<392x32xf32> to vector<392xf32>
    %6 = vector.shape_cast %5 : vector<392xf32> to vector<392x1xf32>
    %cst_7 = arith.constant 0.000000e+00 : f32
    %7 = vector.broadcast %cst_7 : f32 to vector<392x1xf32>
    %8 = arith.cmpf oeq, %6, %7 : vector<392x1xf32>
    %c0_8 = arith.constant 0 : index
    %c0_9 = arith.constant 0 : index
    %9 = vector.load %arg6[%c0_8, %c0_9] : memref<24x128xf32, #tpu.memory_space<vmem>>, vector<24x128xf32>
    %cst_10 = arith.constant dense<0.000000e+00> : vector<392x128xf32>
    %10 = tpu.matmul %1, %9, %cst_10 {dimension_numbers = #tpu.dot_dimension_numbers<[1], [0], [0], [1], [0, 0, 1, 1], [], []>} : vector<392x24xf32>, vector<24x128xf32>, vector<392x128xf32> -> vector<392x128xf32>
    %c0_11 = arith.constant 0 : index
    %c0_12 = arith.constant 0 : index
    %11 = vector.load %arg3[%c0_11, %c0_12] : memref<392x128xf32, #tpu.memory_space<vmem>>, vector<392x128xf32>
    %12 = arith.addf %10, %11 : vector<392x128xf32>
    %c0_13 = arith.constant 0 : index
    %c0_14 = arith.constant 0 : index
    %13 = vector.load %arg7[%c0_13, %c0_14] : memref<32x128xf32, #tpu.memory_space<vmem>>, vector<32x128xf32>
    %cst_15 = arith.constant dense<0.000000e+00> : vector<392x128xf32>
    %14 = tpu.matmul %0, %13, %cst_15 {dimension_numbers = #tpu.dot_dimension_numbers<[1], [0], [0], [1], [0, 0, 1, 1], [], []>} : vector<392x32xf32>, vector<32x128xf32>, vector<392x128xf32> -> vector<392x128xf32>
    %15 = arith.addf %12, %14 : vector<392x128xf32>
    %16 = math.tanh %15 : vector<392x128xf32>
    %c0_16 = arith.constant 0 : index
    %c0_17 = arith.constant 0 : index
    %17 = vector.load %arg8[%c0_16, %c0_17] : memref<1x128xf32, #tpu.memory_space<vmem>>, vector<1x128xf32>
    %18 = vector.broadcast %17 : vector<1x128xf32> to vector<392x128xf32>
    %19 = arith.mulf %16, %18 : vector<392x128xf32>
    %cst_18 = arith.constant dense<0.000000e+00> : vector<392xf32>
    %20 = vector.multi_reduction <add>, %19, %cst_18 [1] : vector<392x128xf32> to vector<392xf32>
    %21 = vector.shape_cast %20 : vector<392xf32> to vector<392x1xf32>
    %c0_19 = arith.constant 0 : index
    %c0_20 = arith.constant 0 : index
    %22 = memref.load %arg13[%c0_19, %c0_20] : memref<1x1xf32, #tpu.memory_space<smem>>
    %23 = vector.broadcast %22 : f32 to vector<392x1xf32>
    %24 = arith.addf %21, %23 : vector<392x1xf32>
    %cst_21 = arith.constant dense<0.000000e+00> : vector<8x128xf32>
    %25 = tpu.matmul %2, %12, %cst_21 {dimension_numbers = #tpu.dot_dimension_numbers<[1], [0], [0], [1], [0, 0, 1, 1], [], []>} : vector<8x392xf32>, vector<392x128xf32>, vector<8x128xf32> -> vector<8x128xf32>
    %cst_22 = arith.constant dense<0.000000e+00> : vector<8x1xf32>
    %26 = tpu.matmul %2, %24, %cst_22 {dimension_numbers = #tpu.dot_dimension_numbers<[1], [0], [0], [1], [0, 0, 1, 1], [], []>} : vector<8x392xf32>, vector<392x1xf32>, vector<8x1xf32> -> vector<8x1xf32>
    %cst_23 = arith.constant 0.0204081628 : f32
    %27 = vector.broadcast %cst_23 : f32 to vector<8x1xf32>
    %28 = arith.mulf %26, %27 : vector<8x1xf32>
    %cst_24 = arith.constant dense<0.000000e+00> : vector<392x1xf32>
    %29 = tpu.matmul %3, %28, %cst_24 {dimension_numbers = #tpu.dot_dimension_numbers<[1], [0], [0], [1], [0, 0, 1, 1], [], []>} : vector<392x8xf32>, vector<8x1xf32>, vector<392x1xf32> -> vector<392x1xf32>
    %30 = arith.subf %24, %29 : vector<392x1xf32>
    %31 = math.exp %30 : vector<392x1xf32>
    %cst_25 = arith.constant 0.000000e+00 : f32
    %32 = vector.broadcast %cst_25 : f32 to vector<392x1xf32>
    %33 = arith.select %8, %32, %31 : vector<392x1xi1>, vector<392x1xf32>
    %34 = vector.broadcast %33 : vector<392x1xf32> to vector<392x128xf32>
    %35 = arith.mulf %34, %14 : vector<392x128xf32>
    %cst_26 = arith.constant dense<0.000000e+00> : vector<8x128xf32>
    %36 = tpu.matmul %2, %35, %cst_26 {dimension_numbers = #tpu.dot_dimension_numbers<[1], [0], [0], [1], [0, 0, 1, 1], [], []>} : vector<8x392xf32>, vector<392x128xf32>, vector<8x128xf32> -> vector<8x128xf32>
    %cst_27 = arith.constant dense<0.000000e+00> : vector<8x1xf32>
    %37 = tpu.matmul %2, %33, %cst_27 {dimension_numbers = #tpu.dot_dimension_numbers<[1], [0], [0], [1], [0, 0, 1, 1], [], []>} : vector<8x392xf32>, vector<392x1xf32>, vector<8x1xf32> -> vector<8x1xf32>
    %cst_28 = arith.constant 0.000000e+00 : f32
    %38 = vector.broadcast %cst_28 : f32 to vector<8x1xf32>
    %39 = arith.cmpf ogt, %37, %38 : vector<8x1xf32>
    %40 = tpu.reciprocal %37 : vector<8x1xf32> -> vector<8x1xf32>
    %cst_29 = arith.constant 0.000000e+00 : f32
    %41 = vector.broadcast %cst_29 : f32 to vector<8x1xf32>
    %42 = arith.select %39, %40, %41 : vector<8x1xi1>, vector<8x1xf32>
    %43 = vector.broadcast %42 : vector<8x1xf32> to vector<8x128xf32>
    %44 = arith.mulf %36, %43 : vector<8x128xf32>
    %45 = arith.addf %25, %44 : vector<8x128xf32>
    %c0_30 = arith.constant 0 : index
    %c0_31 = arith.constant 0 : index
    %c0_32 = arith.constant 0 : index
    %46 = vector.load %arg9[%c0_30, %c0_31, %c0_32] : memref<2x128x128xf32, #tpu.memory_space<vmem>>, vector<1x128x128xf32>
    %47 = vector.shape_cast %46 : vector<1x128x128xf32> to vector<128x128xf32>
    %cst_33 = arith.constant dense<0.000000e+00> : vector<8x128xf32>
    %48 = tpu.matmul %45, %47, %cst_33 {dimension_numbers = #tpu.dot_dimension_numbers<[1], [0], [0], [1], [0, 0, 1, 1], [], []>} : vector<8x128xf32>, vector<128x128xf32>, vector<8x128xf32> -> vector<8x128xf32>
    %c0_34 = arith.constant 0 : index
    %c0_35 = arith.constant 0 : index
    %49 = vector.load %arg10[%c0_34, %c0_35] : memref<2x128xf32, #tpu.memory_space<vmem>>, vector<1x128xf32>
    %50 = vector.broadcast %49 : vector<1x128xf32> to vector<8x128xf32>
    %51 = arith.addf %48, %50 : vector<8x128xf32>
    %c0_36 = arith.constant 0 : index
    %c0_37 = arith.constant 0 : index
    %c0_38 = arith.constant 0 : index
    %52 = vector.load %arg11[%c0_36, %c0_37, %c0_38] : memref<2x32x128xf32, #tpu.memory_space<vmem>>, vector<1x32x128xf32>
    %53 = vector.shape_cast %52 : vector<1x32x128xf32> to vector<32x128xf32>
    %cst_39 = arith.constant dense<0.000000e+00> : vector<392x128xf32>
    %54 = tpu.matmul %0, %53, %cst_39 {dimension_numbers = #tpu.dot_dimension_numbers<[1], [0], [0], [1], [0, 0, 1, 1], [], []>} : vector<392x32xf32>, vector<32x128xf32>, vector<392x128xf32> -> vector<392x128xf32>
    %cst_40 = arith.constant dense<0.000000e+00> : vector<392x128xf32>
    %55 = tpu.matmul %3, %51, %cst_40 {dimension_numbers = #tpu.dot_dimension_numbers<[1], [0], [0], [1], [0, 0, 1, 1], [], []>} : vector<392x8xf32>, vector<8x128xf32>, vector<392x128xf32> -> vector<392x128xf32>
    %56 = arith.addf %55, %54 : vector<392x128xf32>
    %57 = math.tanh %56 : vector<392x128xf32>
    %c0_41 = arith.constant 0 : index
    %c0_42 = arith.constant 0 : index
    %c0_43 = arith.constant 0 : index
    %58 = vector.load %arg12[%c0_41, %c0_42, %c0_43] : memref<2x1x128xf32, #tpu.memory_space<vmem>>, vector<1x1x128xf32>
    %59 = vector.shape_cast %58 : vector<1x1x128xf32> to vector<1x128xf32>
    %60 = vector.broadcast %59 : vector<1x128xf32> to vector<392x128xf32>
    %61 = arith.mulf %57, %60 : vector<392x128xf32>
    %cst_44 = arith.constant dense<0.000000e+00> : vector<392xf32>
    %62 = vector.multi_reduction <add>, %61, %cst_44 [1] : vector<392x128xf32> to vector<392xf32>
    %63 = vector.shape_cast %62 : vector<392xf32> to vector<392x1xf32>
    %c0_45 = arith.constant 0 : index
    %c0_46 = arith.constant 0 : index
    %64 = memref.load %arg14[%c0_45, %c0_46] : memref<2x1xf32, #tpu.memory_space<smem>>
    %65 = vector.broadcast %64 : f32 to vector<392x1xf32>
    %66 = arith.addf %63, %65 : vector<392x1xf32>
    %cst_47 = arith.constant dense<0.000000e+00> : vector<8x1xf32>
    %67 = tpu.matmul %2, %66, %cst_47 {dimension_numbers = #tpu.dot_dimension_numbers<[1], [0], [0], [1], [0, 0, 1, 1], [], []>} : vector<8x392xf32>, vector<392x1xf32>, vector<8x1xf32> -> vector<8x1xf32>
    %cst_48 = arith.constant 0.0204081628 : f32
    %68 = vector.broadcast %cst_48 : f32 to vector<8x1xf32>
    %69 = arith.mulf %67, %68 : vector<8x1xf32>
    %cst_49 = arith.constant dense<0.000000e+00> : vector<392x1xf32>
    %70 = tpu.matmul %3, %69, %cst_49 {dimension_numbers = #tpu.dot_dimension_numbers<[1], [0], [0], [1], [0, 0, 1, 1], [], []>} : vector<392x8xf32>, vector<8x1xf32>, vector<392x1xf32> -> vector<392x1xf32>
    %71 = arith.subf %66, %70 : vector<392x1xf32>
    %72 = math.exp %71 : vector<392x1xf32>
    %cst_50 = arith.constant 0.000000e+00 : f32
    %73 = vector.broadcast %cst_50 : f32 to vector<392x1xf32>
    %74 = arith.select %8, %73, %72 : vector<392x1xi1>, vector<392x1xf32>
    %75 = vector.broadcast %74 : vector<392x1xf32> to vector<392x128xf32>
    %76 = arith.mulf %75, %54 : vector<392x128xf32>
    %cst_51 = arith.constant dense<0.000000e+00> : vector<8x128xf32>
    %77 = tpu.matmul %2, %76, %cst_51 {dimension_numbers = #tpu.dot_dimension_numbers<[1], [0], [0], [1], [0, 0, 1, 1], [], []>} : vector<8x392xf32>, vector<392x128xf32>, vector<8x128xf32> -> vector<8x128xf32>
    %cst_52 = arith.constant dense<0.000000e+00> : vector<8x1xf32>
    %78 = tpu.matmul %2, %74, %cst_52 {dimension_numbers = #tpu.dot_dimension_numbers<[1], [0], [0], [1], [0, 0, 1, 1], [], []>} : vector<8x392xf32>, vector<392x1xf32>, vector<8x1xf32> -> vector<8x1xf32>
    %cst_53 = arith.constant 0.000000e+00 : f32
    %79 = vector.broadcast %cst_53 : f32 to vector<8x1xf32>
    %80 = arith.cmpf ogt, %78, %79 : vector<8x1xf32>
    %81 = tpu.reciprocal %78 : vector<8x1xf32> -> vector<8x1xf32>
    %cst_54 = arith.constant 0.000000e+00 : f32
    %82 = vector.broadcast %cst_54 : f32 to vector<8x1xf32>
    %83 = arith.select %80, %81, %82 : vector<8x1xi1>, vector<8x1xf32>
    %84 = vector.broadcast %83 : vector<8x1xf32> to vector<8x128xf32>
    %85 = arith.mulf %77, %84 : vector<8x128xf32>
    %86 = arith.addf %45, %85 : vector<8x128xf32>
    %c1 = arith.constant 1 : index
    %c0_55 = arith.constant 0 : index
    %c0_56 = arith.constant 0 : index
    %87 = vector.load %arg9[%c1, %c0_55, %c0_56] : memref<2x128x128xf32, #tpu.memory_space<vmem>>, vector<1x128x128xf32>
    %88 = vector.shape_cast %87 : vector<1x128x128xf32> to vector<128x128xf32>
    %cst_57 = arith.constant dense<0.000000e+00> : vector<8x128xf32>
    %89 = tpu.matmul %86, %88, %cst_57 {dimension_numbers = #tpu.dot_dimension_numbers<[1], [0], [0], [1], [0, 0, 1, 1], [], []>} : vector<8x128xf32>, vector<128x128xf32>, vector<8x128xf32> -> vector<8x128xf32>
    %c1_58 = arith.constant 1 : index
    %c0_59 = arith.constant 0 : index
    %90 = vector.load %arg10[%c1_58, %c0_59] : memref<2x128xf32, #tpu.memory_space<vmem>>, vector<1x128xf32>
    %91 = vector.broadcast %90 : vector<1x128xf32> to vector<8x128xf32>
    %92 = arith.addf %89, %91 : vector<8x128xf32>
    %c1_60 = arith.constant 1 : index
    %c0_61 = arith.constant 0 : index
    %c0_62 = arith.constant 0 : index
    %93 = vector.load %arg11[%c1_60, %c0_61, %c0_62] : memref<2x32x128xf32, #tpu.memory_space<vmem>>, vector<1x32x128xf32>
    %94 = vector.shape_cast %93 : vector<1x32x128xf32> to vector<32x128xf32>
    %cst_63 = arith.constant dense<0.000000e+00> : vector<392x128xf32>
    %95 = tpu.matmul %0, %94, %cst_63 {dimension_numbers = #tpu.dot_dimension_numbers<[1], [0], [0], [1], [0, 0, 1, 1], [], []>} : vector<392x32xf32>, vector<32x128xf32>, vector<392x128xf32> -> vector<392x128xf32>
    %cst_64 = arith.constant dense<0.000000e+00> : vector<392x128xf32>
    %96 = tpu.matmul %3, %92, %cst_64 {dimension_numbers = #tpu.dot_dimension_numbers<[1], [0], [0], [1], [0, 0, 1, 1], [], []>} : vector<392x8xf32>, vector<8x128xf32>, vector<392x128xf32> -> vector<392x128xf32>
    %97 = arith.addf %96, %95 : vector<392x128xf32>
    %98 = math.tanh %97 : vector<392x128xf32>
    %c1_65 = arith.constant 1 : index
    %c0_66 = arith.constant 0 : index
    %c0_67 = arith.constant 0 : index
    %99 = vector.load %arg12[%c1_65, %c0_66, %c0_67] : memref<2x1x128xf32, #tpu.memory_space<vmem>>, vector<1x1x128xf32>
    %100 = vector.shape_cast %99 : vector<1x1x128xf32> to vector<1x128xf32>
    %101 = vector.broadcast %100 : vector<1x128xf32> to vector<392x128xf32>
    %102 = arith.mulf %98, %101 : vector<392x128xf32>
    %cst_68 = arith.constant dense<0.000000e+00> : vector<392xf32>
    %103 = vector.multi_reduction <add>, %102, %cst_68 [1] : vector<392x128xf32> to vector<392xf32>
    %104 = vector.shape_cast %103 : vector<392xf32> to vector<392x1xf32>
    %c1_69 = arith.constant 1 : index
    %c0_70 = arith.constant 0 : index
    %105 = memref.load %arg14[%c1_69, %c0_70] : memref<2x1xf32, #tpu.memory_space<smem>>
    %106 = vector.broadcast %105 : f32 to vector<392x1xf32>
    %107 = arith.addf %104, %106 : vector<392x1xf32>
    %cst_71 = arith.constant dense<0.000000e+00> : vector<8x1xf32>
    %108 = tpu.matmul %2, %107, %cst_71 {dimension_numbers = #tpu.dot_dimension_numbers<[1], [0], [0], [1], [0, 0, 1, 1], [], []>} : vector<8x392xf32>, vector<392x1xf32>, vector<8x1xf32> -> vector<8x1xf32>
    %cst_72 = arith.constant 0.0204081628 : f32
    %109 = vector.broadcast %cst_72 : f32 to vector<8x1xf32>
    %110 = arith.mulf %108, %109 : vector<8x1xf32>
    %cst_73 = arith.constant dense<0.000000e+00> : vector<392x1xf32>
    %111 = tpu.matmul %3, %110, %cst_73 {dimension_numbers = #tpu.dot_dimension_numbers<[1], [0], [0], [1], [0, 0, 1, 1], [], []>} : vector<392x8xf32>, vector<8x1xf32>, vector<392x1xf32> -> vector<392x1xf32>
    %112 = arith.subf %107, %111 : vector<392x1xf32>
    %113 = math.exp %112 : vector<392x1xf32>
    %cst_74 = arith.constant 0.000000e+00 : f32
    %114 = vector.broadcast %cst_74 : f32 to vector<392x1xf32>
    %115 = arith.select %8, %114, %113 : vector<392x1xi1>, vector<392x1xf32>
    %116 = vector.broadcast %115 : vector<392x1xf32> to vector<392x128xf32>
    %117 = arith.mulf %116, %95 : vector<392x128xf32>
    %cst_75 = arith.constant dense<0.000000e+00> : vector<8x128xf32>
    %118 = tpu.matmul %2, %117, %cst_75 {dimension_numbers = #tpu.dot_dimension_numbers<[1], [0], [0], [1], [0, 0, 1, 1], [], []>} : vector<8x392xf32>, vector<392x128xf32>, vector<8x128xf32> -> vector<8x128xf32>
    %cst_76 = arith.constant dense<0.000000e+00> : vector<8x1xf32>
    %119 = tpu.matmul %2, %115, %cst_76 {dimension_numbers = #tpu.dot_dimension_numbers<[1], [0], [0], [1], [0, 0, 1, 1], [], []>} : vector<8x392xf32>, vector<392x1xf32>, vector<8x1xf32> -> vector<8x1xf32>
    %cst_77 = arith.constant 0.000000e+00 : f32
    %120 = vector.broadcast %cst_77 : f32 to vector<8x1xf32>
    %121 = arith.cmpf ogt, %119, %120 : vector<8x1xf32>
    %122 = tpu.reciprocal %119 : vector<8x1xf32> -> vector<8x1xf32>
    %cst_78 = arith.constant 0.000000e+00 : f32
    %123 = vector.broadcast %cst_78 : f32 to vector<8x1xf32>
    %124 = arith.select %121, %122, %123 : vector<8x1xi1>, vector<8x1xf32>
    %125 = vector.broadcast %124 : vector<8x1xf32> to vector<8x128xf32>
    %126 = arith.mulf %118, %125 : vector<8x128xf32>
    %127 = arith.addf %86, %126 : vector<8x128xf32>
    %c0_79 = arith.constant 0 : index
    %c0_80 = arith.constant 0 : index
    %128 = vector.load %arg15[%c0_79, %c0_80] : memref<8x128xf32, #tpu.memory_space<vmem>>, vector<8x128xf32>
    tpu.vector_store %arg15[%c0_79, %c0_80], %127 {strides = array<i32>} : memref<8x128xf32, #tpu.memory_space<vmem>>, vector<8x128xf32>,
    return
  }
  func.func @transform_0(%arg0: i32) -> (i32, i32) {
    %c0_i32 = arith.constant 0 : i32
    %c0_i32_0 = arith.constant 0 : i32
    return %arg0, %c0_i32 : i32, i32
  }
  func.func @transform_1(%arg0: i32) -> (i32, i32) {
    %c0_i32 = arith.constant 0 : i32
    %c0_i32_0 = arith.constant 0 : i32
    return %arg0, %c0_i32 : i32, i32
  }
  func.func @transform_2(%arg0: i32) -> (i32, i32) {
    %c0_i32 = arith.constant 0 : i32
    %c0_i32_0 = arith.constant 0 : i32
    %c0_i32_1 = arith.constant 0 : i32
    return %c0_i32, %c0_i32_0 : i32, i32
  }
  func.func @transform_3(%arg0: i32) -> (i32, i32) {
    %c0_i32 = arith.constant 0 : i32
    %c0_i32_0 = arith.constant 0 : i32
    %c0_i32_1 = arith.constant 0 : i32
    return %c0_i32, %c0_i32_0 : i32, i32
  }
  func.func @transform_4(%arg0: i32) -> (i32, i32) {
    %c0_i32 = arith.constant 0 : i32
    %c0_i32_0 = arith.constant 0 : i32
    %c0_i32_1 = arith.constant 0 : i32
    return %c0_i32, %c0_i32_0 : i32, i32
  }
  func.func @transform_5(%arg0: i32) -> (i32, i32) {
    %c0_i32 = arith.constant 0 : i32
    %c0_i32_0 = arith.constant 0 : i32
    %c0_i32_1 = arith.constant 0 : i32
    return %c0_i32, %c0_i32_0 : i32, i32
  }
  func.func @transform_6(%arg0: i32) -> (i32, i32) {
    %c0_i32 = arith.constant 0 : i32
    %c0_i32_0 = arith.constant 0 : i32
    %c0_i32_1 = arith.constant 0 : i32
    return %c0_i32, %c0_i32_0 : i32, i32
  }
  func.func @transform_7(%arg0: i32) -> (i32, i32) {
    %c0_i32 = arith.constant 0 : i32
    %c0_i32_0 = arith.constant 0 : i32
    %c0_i32_1 = arith.constant 0 : i32
    return %c0_i32, %c0_i32_0 : i32, i32
  }
  func.func @transform_8(%arg0: i32) -> (i32, i32, i32) {
    %c0_i32 = arith.constant 0 : i32
    %c0_i32_0 = arith.constant 0 : i32
    %c0_i32_1 = arith.constant 0 : i32
    %c0_i32_2 = arith.constant 0 : i32
    return %c0_i32, %c0_i32_0, %c0_i32_1 : i32, i32, i32
  }
  func.func @transform_9(%arg0: i32) -> (i32, i32) {
    %c0_i32 = arith.constant 0 : i32
    %c0_i32_0 = arith.constant 0 : i32
    %c0_i32_1 = arith.constant 0 : i32
    return %c0_i32, %c0_i32_0 : i32, i32
  }
  func.func @transform_10(%arg0: i32) -> (i32, i32, i32) {
    %c0_i32 = arith.constant 0 : i32
    %c0_i32_0 = arith.constant 0 : i32
    %c0_i32_1 = arith.constant 0 : i32
    %c0_i32_2 = arith.constant 0 : i32
    return %c0_i32, %c0_i32_0, %c0_i32_1 : i32, i32, i32
  }
  func.func @transform_11(%arg0: i32) -> (i32, i32, i32) {
    %c0_i32 = arith.constant 0 : i32
    %c0_i32_0 = arith.constant 0 : i32
    %c0_i32_1 = arith.constant 0 : i32
    %c0_i32_2 = arith.constant 0 : i32
    return %c0_i32, %c0_i32_0, %c0_i32_1 : i32, i32, i32
  }
  func.func @transform_12(%arg0: i32) -> (i32, i32) {
    %c0_i32 = arith.constant 0 : i32
    %c0_i32_0 = arith.constant 0 : i32
    %c0_i32_1 = arith.constant 0 : i32
    return %c0_i32, %c0_i32_0 : i32, i32
  }
  func.func @transform_13(%arg0: i32) -> (i32, i32) {
    %c0_i32 = arith.constant 0 : i32
    %c0_i32_0 = arith.constant 0 : i32
    %c0_i32_1 = arith.constant 0 : i32
    return %c0_i32, %c0_i32_0 : i32, i32
  }
  func.func @transform_14(%arg0: i32) -> (i32, i32) {
    %c0_i32 = arith.constant 0 : i32
    %c0_i32_0 = arith.constant 0 : i32
    return %arg0, %c0_i32 : i32, i32
  }
}

</mosaic_0001>

<bundles_post_ra>
// kernel: tpu_custom_call.1
= control target key start
LH: loop header
LB: loop body
LE: loop exit
PB: predicated region body
PF: predicated region fallthrough
CT: control target
= control target key end

     0   :  { %20 = vsyncpa [#allocation5], 0  ;;  %s13685_s0 = inlined_call_operand.vmem [shape: f32[392,32], index: 0, kind: input, shape index: {}]   ;;  %s13686_s1 = inlined_call_operand.vmem [shape: f32[392,24], index: 1, kind: input, shape index: {}]   ;;  %s13687_s2 = inlined_call_operand.vmem [shape: f32[392,128], index: 2, kind: input, shape index: {}]   ;;  %s13688_s3 = inlined_call_operand.vmem [shape: f32[8,392], index: 3, kind: input, shape index: {}]   ;;  %s13689_s4 = inlined_call_operand.vmem [shape: f32[392,8], index: 4, kind: input, shape index: {}]   ;;  %s13690_s5 = inlined_call_operand.vmem [shape: f32[24,128], index: 5, kind: input, shape index: {}]   ;;  %s13691_s6 = inlined_call_operand.vmem [shape: f32[32,128], index: 6, kind: input, shape index: {}]   ;;  %s13692_s7 = inlined_call_operand.vmem [shape: f32[1,128], index: 7, kind: input, shape index: {}]   ;;  %s13693_s8 = inlined_call_operand.vmem [shape: f32[2,128,128], index: 8, kind: input, shape index: {}]   ;;  %s13694_s9 = inlined_call_operand.vmem [shape: f32[2,128], index: 9, kind: input, shape index: {}]   ;;  %s13695_s10 = inlined_call_operand.vmem [shape: f32[2,32,128], index: 10, kind: input, shape index: {}]   ;;  %s13696_s11 = inlined_call_operand.vmem [shape: f32[2,1,128], index: 11, kind: input, shape index: {}]   ;;  %s13697_s12 = inlined_call_operand.<no memory space> [shape: f32[1,1], index: 12, kind: input, shape index: {}]   ;;  %s13698_s13 = inlined_call_operand.vmem [shape: f32[2,1], index: 13, kind: input, shape index: {}]   ;;  %s13699_s14 = inlined_call_operand.hbm [shape: f32[8,128], index: 14, kind: output, shape index: {}]  }
   0x1   :  { %21 = vsyncpa [#allocation4], 0  ;;  %s53_s15 = sshll.u32 %s13698_s13, 4  ;;  %s7463_s16 = smov [#allocation3]   ;;  %s54_s15 = int_to_ptr.vmem [resolvable:$true] %s53_s15 }
   0x2   :  { %56 = dma.vmem_to_smem %s54_s15, 32, %s7463_s16, [#allocation5]  }
   0x3   :  { %7459 = dma.done.wait [#allocation5], 32  }
   0x4   :  { %7460 = vsyncadd [#allocation5], 4294967264 }
   0x5   :  { %61 = sfence }
   0x6   :  { %v461_v0 = vld [vmem:[%s13690_s5 + $0x10] sm:$0xff]  ;;  %v826_v1 = vld [vmem:[%s13691_s6 + $0x18] sm:$0xff]  ;;  %v460_v2 = vld [vmem:[%s13690_s5 + $0x8] sm:$0xff]  ;;  %vm511_vm0 = vcmask 195584   ;;  %vm13914_vm1 = vcmask 261120   ;;  %vm13946_vm2 = vcmask 64512  }
   0x7   :  { %672 = vmatpush.msra.mxu0 %v461_v0  ;;  %986 = vmatpush.msra.mxu1 %v826_v1  ;;  %v825_v3 = vld [vmem:[%s13691_s6 + $0x10] sm:$0xff]  ;;  %v459_v4 = vld [vmem:[%s13690_s5] sm:$0xff]  ;;  %v824_v5 = vld [vmem:[%s13691_s6 + $0x8] sm:$0xff]  ;;  %s3156_s25 = sld [smem:[#allocation3]] }
   0x8   :  { %6452 = vmatpush.msra.mxu3 %v826_v1  ;;  %v111_v6 = vld [vmem:[%s13686_s1] sm:$0xff]  ;;  %v112_v9 = vld [vmem:[%s13686_s1 + $0x8] sm:$0xff]  ;;  %v113_v11 = vld [vmem:[%s13686_s1 + $0x10] sm:$0xff]  ;;  %s6301_s5 = sld [smem:[#allocation3 + $0x80]] }
   0x9   :  { %673 = vmatpush.msra.mxu0 %v460_v2  ;;  %987 = vmatpush.msra.mxu1 %v825_v3  ;;  %v823_v7 = vld [vmem:[%s13691_s6] sm:$0xff]  ;;  %v63_v10 = vld [vmem:[%s13685_s0 + $0x8] sm:$0xff]  ;;  %v64_v12 = vld [vmem:[%s13685_s0 + $0x10] sm:$0xff] }
   0xa   :  { %6453 = vmatpush.msra.mxu3 %v825_v3  ;;  %v62_v8 = vld [vmem:[%s13685_s0] sm:$0xff]  ;;  %v114_v13 = vld [vmem:[%s13686_s1 + $0x18] sm:$0xff]  ;;  %v116_v17 = vld [vmem:[%s13686_s1 + $0x28] sm:$0xff] }
   0xb   :  { %674 = vmatpush.msra.mxu0 %v459_v4  ;;  %988 = vmatpush.msra.mxu1 %v824_v5  ;;  %v65_v14 = vld [vmem:[%s13685_s0 + $0x18] sm:$0xff]  ;;  %v115_v15 = vld [vmem:[%s13686_s1 + $0x20] sm:$0xff]  ;;  %v67_v18 = vld [vmem:[%s13685_s0 + $0x28] sm:$0xff] }
   0xc   :  { %5685 = vmatmul.msk.f32.vlgmr.msra.gmra.mxu0 %vm511_vm0, %v111_v6  ;;  %6454 = vmatpush.msra.mxu3 %v824_v5  ;;  %v66_v16 = vld [vmem:[%s13685_s0 + $0x20] sm:$0xff]  ;;  %v117_v19 = vld [vmem:[%s13686_s1 + $0x30] sm:$0xff]  ;;  %v118_v21 = vld [vmem:[%s13686_s1 + $0x38] sm:$0xff] }
   0xd   :  { %989 = vmatpush.msra.mxu1 %v823_v7  ;;  %v68_v20 = vld [vmem:[%s13685_s0 + $0x30] sm:$0xff]  ;;  %v69_v22 = vld [vmem:[%s13685_s0 + $0x38] sm:$0xff]  ;;  %v119_v23 = vld [vmem:[%s13686_s1 + $0x40] sm:$0xff] }
   0xe   :  { %5734 = vmatmul.msk.f32.vlgmr.msra.gmra.mxu1 %vm13914_vm1, %v62_v8  ;;  %6455 = vmatpush.msra.mxu3 %v823_v7  ;;  %v70_v24 = vld [vmem:[%s13685_s0 + $0x40] sm:$0xff]  ;;  %v120_v25 = vld [vmem:[%s13686_s1 + $0x48] sm:$0xff]  ;;  %v121_v27 = vld [vmem:[%s13686_s1 + $0x50] sm:$0xff] }
   0xf   :  { %v71_v26 = vld [vmem:[%s13685_s0 + $0x48] sm:$0xff]  ;;  %v72_v28 = vld [vmem:[%s13685_s0 + $0x50] sm:$0xff]  ;;  %v122_v29 = vld [vmem:[%s13686_s1 + $0x58] sm:$0xff] }
  0x10   :  { %v73_v30 = vld [vmem:[%s13685_s0 + $0x58] sm:$0xff]  ;;  %v123_v31 = vld [vmem:[%s13686_s1 + $0x60] sm:$0xff]  ;;  %v124_v33 = vld [vmem:[%s13686_s1 + $0x68] sm:$0xff] }
  0x11   :  { %v74_v32 = vld [vmem:[%s13685_s0 + $0x60] sm:$0xff]  ;;  %v75_v34 = vld [vmem:[%s13685_s0 + $0x68] sm:$0xff]  ;;  %v125_v35 = vld [vmem:[%s13686_s1 + $0x70] sm:$0xff] }
  0x12   :  { %v76_v36 = vld [vmem:[%s13685_s0 + $0x70] sm:$0xff]  ;;  %v126_v37 = vld [vmem:[%s13686_s1 + $0x78] sm:$0xff]  ;;  %v127_v40 = vld [vmem:[%s13686_s1 + $0x80] sm:$0xff] }
  0x13   :  { %v77_v38 = vld [vmem:[%s13685_s0 + $0x78] sm:$0xff]  ;;  %v78_v42 = vld [vmem:[%s13685_s0 + $0x80] sm:$0xff]  ;;  %v128_v44 = vld [vmem:[%s13686_s1 + $0x88] sm:$0xff] }
  0x14   :  { %5686 = vmatmul.msk.f32.gmra.mxu0 %vm511_vm0, %v112_v9  ;;  %v79_v46 = vld [vmem:[%s13685_s0 + $0x88] sm:$0xff]  ;;  %v129_v48 = vld [vmem:[%s13686_s1 + $0x90] sm:$0xff]  ;;  %v130_v52 = vld [vmem:[%s13686_s1 + $0x98] sm:$0xff] }
  0x15   :  { %v80_v50 = vld [vmem:[%s13685_s0 + $0x90] sm:$0xff]  ;;  %v81_v54 = vld [vmem:[%s13685_s0 + $0x98] sm:$0xff]  ;;  %v131_v56 = vld [vmem:[%s13686_s1 + $0xa0] sm:$0xff] }
  0x16   :  { %5735 = vmatmul.msk.f32.gmra.mxu1 %vm13914_vm1, %v63_v10  ;;  %v82_v58 = vld [vmem:[%s13685_s0 + $0xa0] sm:$0xff]  ;;  %v132_v60 = vld [vmem:[%s13686_s1 + $0xa8] sm:$0xff]  ;;  %v133_v0 = vld [vmem:[%s13686_s1 + $0xb0] sm:$0xff] }
  0x17   :  { %v83_v62 = vld [vmem:[%s13685_s0 + $0xa8] sm:$0xff]  ;;  %v84_v2 = vld [vmem:[%s13685_s0 + $0xb0] sm:$0xff]  ;;  %v469_v3 = vld [vmem:[%s13687_s2 + $0x38] sm:$0xff] }
  0x18   :  { %v134_v5 = vld [vmem:[%s13686_s1 + $0xb8] sm:$0xff]  ;;  %v470_v10 = vld [vmem:[%s13687_s2 + $0x40] sm:$0xff] }
  0x19   :  { %v85_v8 = vld [vmem:[%s13685_s0 + $0xb8] sm:$0xff] }
  0x1c   :  { %5687 = vmatmul.msk.f32.gmra.mxu0 %vm511_vm0, %v113_v11 }
  0x1e   :  { %5736 = vmatmul.msk.f32.gmra.mxu1 %vm13914_vm1, %v64_v12  ;;  %v135_v12 = vld [vmem:[%s13686_s1 + $0xc0] sm:$0xff] }
  0x24   :  { %5688 = vmatmul.msk.f32.gmra.mxu0 %vm511_vm0, %v114_v13 }
  0x26   :  { %5737 = vmatmul.msk.f32.gmra.mxu1 %vm13914_vm1, %v65_v14 }
  0x2c   :  { %5689 = vmatmul.msk.f32.gmra.mxu0 %vm511_vm0, %v115_v15  ;;  %v86_v15 = vld [vmem:[%s13685_s0 + $0xc0] sm:$0xff] }
  0x2e   :  { %5738 = vmatmul.msk.f32.gmra.mxu1 %vm13914_vm1, %v66_v16  ;;  %v7810_v16 = vld [vmem:[%s13692_s7] ss:$0 sm:$0xff] }
  0x34   :  { %5690 = vmatmul.msk.f32.gmra.mxu0 %vm511_vm0, %v116_v17 }
  0x36   :  { %5739 = vmatmul.msk.f32.gmra.mxu1 %vm13914_vm1, %v67_v18 }
  0x3c   :  { %5691 = vmatmul.msk.f32.gmra.mxu0 %vm511_vm0, %v117_v19 }
  0x3e   :  { %5740 = vmatmul.msk.f32.gmra.mxu1 %vm13914_vm1, %v68_v20  ;;  %v471_v20 = vld [vmem:[%s13687_s2 + $0x48] sm:$0xff] }
  0x44   :  { %5692 = vmatmul.msk.f32.gmra.mxu0 %vm511_vm0, %v118_v21 }
  0x46   :  { %5741 = vmatmul.msk.f32.gmra.mxu1 %vm13914_vm1, %v69_v22  ;;  %v136_v22 = vld [vmem:[%s13686_s1 + $0xc8] sm:$0xff] }
  0x4c   :  { %5693 = vmatmul.msk.f32.gmra.mxu0 %vm511_vm0, %v119_v23 }
  0x4e   :  { %5742 = vmatmul.msk.f32.gmra.mxu1 %vm13914_vm1, %v70_v24 }
  0x54   :  { %5694 = vmatmul.msk.f32.gmra.mxu0 %vm511_vm0, %v120_v25  ;;  %v87_v25 = vld [vmem:[%s13685_s0 + $0xc8] sm:$0xff] }
  0x56   :  { %5743 = vmatmul.msk.f32.gmra.mxu1 %vm13914_vm1, %v71_v26 }
  0x5c   :  { %5695 = vmatmul.msk.f32.gmra.mxu0 %vm511_vm0, %v121_v27 }
  0x5e   :  { %5744 = vmatmul.msk.f32.gmra.mxu1 %vm13914_vm1, %v72_v28 }
  0x64   :  { %5696 = vmatmul.msk.f32.gmra.mxu0 %vm511_vm0, %v122_v29  ;;  %v472_v29 = vld [vmem:[%s13687_s2 + $0x50] sm:$0xff] }
  0x66   :  { %5745 = vmatmul.msk.f32.gmra.mxu1 %vm13914_vm1, %v73_v30 }
  0x6c   :  { %5697 = vmatmul.msk.f32.gmra.mxu0 %vm511_vm0, %v123_v31  ;;  %v137_v31 = vld [vmem:[%s13686_s1 + $0xd0] sm:$0xff] }
  0x6e   :  { %5746 = vmatmul.msk.f32.gmra.mxu1 %vm13914_vm1, %v74_v32 }
  0x74   :  { %5698 = vmatmul.msk.f32.gmra.mxu0 %vm511_vm0, %v124_v33 }
  0x76   :  { %5747 = vmatmul.msk.f32.gmra.mxu1 %vm13914_vm1, %v75_v34  ;;  %v88_v34 = vld [vmem:[%s13685_s0 + $0xd0] sm:$0xff] }
  0x7c   :  { %5699 = vmatmul.msk.f32.gmra.mxu0 %vm511_vm0, %v125_v35 }
  0x7e   :  { %5748 = vmatmul.msk.f32.gmra.mxu1 %vm13914_vm1, %v76_v36 }
  0x84   :  { %5700 = vmatmul.msk.f32.gmra.mxu0 %vm511_vm0, %v126_v37 }
  0x86   :  { %5749 = vmatmul.msk.f32.gmra.mxu1 %vm13914_vm1, %v77_v38  ;;  %v473_v38 = vld [vmem:[%s13687_s2 + $0x58] sm:$0xff] }
  0x89   :  { %v7693_v39 = vpop.f32.mrf.mxu0 }
  0x8b   :  { %v7698_v41 = vpop.f32.mrf.mxu1 }
  0x8c   :  { %14313 = vst [vmem:[#allocation9_spill] sm:$0xff] %v7698_v41  ;;  %5701 = vmatmul.msk.f32.gmra.mxu0 %vm511_vm0, %v127_v40 }
  0x8e   :  { %5750 = vmatmul.msk.f32.gmra.mxu1 %vm13914_vm1, %v78_v42  ;;  %v138_v42 = vld [vmem:[%s13686_s1 + $0xd8] sm:$0xff] }
  0x91   :  { %v7705_v43 = vpop.f32.mrf.mxu0 }
  0x93   :  { %v7710_v45 = vpop.f32.mrf.mxu1 }
  0x94   :  { %14314 = vst [vmem:[#allocation10_spill] sm:$0xff] %v7710_v45  ;;  %5702 = vmatmul.msk.f32.gmra.mxu0 %vm511_vm0, %v128_v44 }
  0x96   :  { %5751 = vmatmul.msk.f32.gmra.mxu1 %vm13914_vm1, %v79_v46 }
  0x99   :  { %v7717_v47 = vpop.f32.mrf.mxu0 }
  0x9b   :  { %v7722_v49 = vpop.f32.mrf.mxu1 }
  0x9c   :  { %5703 = vmatmul.msk.f32.gmra.mxu0 %vm511_vm0, %v129_v48  ;;  %v89_v48 = vld [vmem:[%s13685_s0 + $0xd8] sm:$0xff] }
  0x9e   :  { %5752 = vmatmul.msk.f32.gmra.mxu1 %vm13914_vm1, %v80_v50 }
  0xa1   :  { %v7729_v51 = vpop.f32.mrf.mxu0 }
  0xa3   :  { %v7734_v53 = vpop.f32.mrf.mxu1 }
  0xa4   :  { %5704 = vmatmul.msk.f32.gmra.mxu0 %vm511_vm0, %v130_v52 }
  0xa6   :  { %5753 = vmatmul.msk.f32.gmra.mxu1 %vm13914_vm1, %v81_v54 }
  0xa9   :  { %v7741_v55 = vpop.f32.mrf.mxu0 }
  0xab   :  { %v7746_v57 = vpop.f32.mrf.mxu1 }
  0xac   :  { %5705 = vmatmul.msk.f32.gmra.mxu0 %vm511_vm0, %v131_v56  ;;  %v474_v56 = vld [vmem:[%s13687_s2 + $0x60] sm:$0xff] }
  0xae   :  { %5754 = vmatmul.msk.f32.gmra.mxu1 %vm13914_vm1, %v82_v58 }
  0xb1   :  { %v7753_v59 = vpop.f32.mrf.mxu0 }
  0xb3   :  { %v7758_v61 = vpop.f32.mrf.mxu1 }
  0xb4   :  { %5706 = vmatmul.msk.f32.gmra.mxu0 %vm511_vm0, %v132_v60  ;;  %v139_v60 = vld [vmem:[%s13686_s1 + $0xe0] sm:$0xff] }
  0xb6   :  { %5755 = vmatmul.msk.f32.gmra.mxu1 %vm13914_vm1, %v83_v62 }
  0xb9   :  { %v7765_v63 = vpop.f32.mrf.mxu0 }
  0xbb   :  { %v7770_v1 = vpop.f32.mrf.mxu1 }
  0xbc   :  { %5707 = vmatmul.msk.f32.gmra.mxu0 %vm511_vm0, %v133_v0 }
  0xbe   :  { %5756 = vmatmul.msk.f32.gmra.mxu1 %vm13914_vm1, %v84_v2  ;;  %v90_v2 = vld [vmem:[%s13685_s0 + $0xe0] sm:$0xff] }
  0xc1   :  { %v697_v4 = vpop.f32.mrf.mxu0 }
  0xc2   :  { %v7783_v6 = vadd.f32 %v697_v4, %v469_v3 }
  0xc3   :  { %v7785_v7 = vpop.f32.mrf.mxu1 }
  0xc4   :  { %14315 = vst [vmem:[#allocation11_spill] sm:$0xff] %v7783_v6  ;;  %v1145_v9 = vadd.f32 %v7785_v7, %v7783_v6  ;;  %5708 = vmatmul.msk.f32.gmra.mxu0 %vm511_vm0, %v134_v5 }
  0xc6   :  { %6467 = vtanh.f32 %v1145_v9  ;;  %5757 = vmatmul.msk.f32.gmra.mxu1 %vm13914_vm1, %v85_v8  ;;  %v475_v8 = vld [vmem:[%s13687_s2 + $0x68] sm:$0xff] }
  0xc9   :  { %v700_v11 = vpop.f32.mrf.mxu0 }
  0xca   :  { %v7800_v13 = vadd.f32 %v700_v11, %v470_v10  ;;  %v140_v10 = vld [vmem:[%s13686_s1 + $0xe8] sm:$0xff] }
  0xcb   :  { %v7802_v14 = vpop.f32.mrf.mxu1 }
  0xcc   :  { %14316 = vst [vmem:[#allocation12_spill] sm:$0xff] %v7800_v13  ;;  %v6468_v17 = vpop.eup %6467  ;;  %v1146_v18 = vadd.f32 %v7802_v14, %v7800_v13  ;;  %5709 = vmatmul.msk.f32.gmra.mxu0 %vm511_vm0, %v135_v12 }
  0xcd   :  { %v1247_v19 = vmul.f32 %v6468_v17, %v7810_v16 }
  0xce   :  { %6469 = vtanh.f32 %v1146_v18  ;;  %5758 = vmatmul.msk.f32.gmra.mxu1 %vm13914_vm1, %v86_v15  ;;  %v91_v15 = vld [vmem:[%s13685_s0 + $0xe8] sm:$0xff] }
  0xcf   :  { %1303 = vadd.xlane.f32.xlu1 %v1247_v19 }
  0xd1   :  { %v703_v21 = vpop.f32.mrf.mxu0 }
  0xd2   :  { %v7823_v23 = vadd.f32 %v703_v21, %v471_v20  ;;  %v476_v20 = vld [vmem:[%s13687_s2 + $0x70] sm:$0xff] }
  0xd3   :  { %v7825_v24 = vpop.f32.mrf.mxu1 }
  0xd4   :  { %14317 = vst [vmem:[#allocation13_spill] sm:$0xff] %v7823_v23  ;;  %v6470_v26 = vpop.eup %6469  ;;  %v1147_v27 = vadd.f32 %v7825_v24, %v7823_v23  ;;  %5710 = vmatmul.msk.f32.gmra.mxu0 %vm511_vm0, %v136_v22  ;;  %v141_v22 = vld [vmem:[%s13686_s1 + $0xf0] sm:$0xff] }
  0xd5   :  { %v1248_v28 = vmul.f32 %v6470_v26, %v7810_v16 }
  0xd6   :  { %6471 = vtanh.f32 %v1147_v27  ;;  %5759 = vmatmul.msk.f32.gmra.mxu1 %vm13914_vm1, %v87_v25  ;;  %v92_v27 = vld [vmem:[%s13685_s0 + $0xf0] sm:$0xff] }
  0xd7   :  { %1305 = vadd.xlane.f32.xlu1 %v1248_v28 }
  0xd9   :  { %v706_v30 = vpop.f32.mrf.mxu0 }
  0xda   :  { %v7841_v32 = vadd.f32 %v706_v30, %v472_v29 }
  0xdb   :  { %v7843_v33 = vpop.f32.mrf.mxu1 }
  0xdc   :  { %14318 = vst [vmem:[#allocation14_spill] sm:$0xff] %v7841_v32  ;;  %v6472_v35 = vpop.eup %6471  ;;  %v1148_v36 = vadd.f32 %v7843_v33, %v7841_v32  ;;  %5711 = vmatmul.msk.f32.gmra.mxu0 %vm511_vm0, %v137_v31  ;;  %v477_v31 = vld [vmem:[%s13687_s2 + $0x78] sm:$0xff] }
  0xdd   :  { %v1249_v37 = vmul.f32 %v6472_v35, %v7810_v16  ;;  %v142_v35 = vld [vmem:[%s13686_s1 + $0xf8] sm:$0xff] }
  0xde   :  { %6473 = vtanh.f32 %v1148_v36  ;;  %5760 = vmatmul.msk.f32.gmra.mxu1 %vm13914_vm1, %v88_v34 }
  0xdf   :  { %1307 = vadd.xlane.f32.xlu1 %v1249_v37 }
  0xe1   :  { %v709_v40 = vpop.f32.mrf.mxu0 }
  0xe2   :  { %v7859_v44 = vadd.f32 %v709_v40, %v473_v38  ;;  %v93_v38 = vld [vmem:[%s13685_s0 + $0xf8] sm:$0xff] }
  0xe3   :  { %v7861_v46 = vpop.f32.mrf.mxu1 }
  0xe4   :  { %14319 = vst [vmem:[#allocation15_spill] sm:$0xff] %v7859_v44  ;;  %v6474_v50 = vpop.eup %6473  ;;  %v1149_v52 = vadd.f32 %v7861_v46, %v7859_v44  ;;  %5712 = vmatmul.msk.f32.gmra.mxu0 %vm511_vm0, %v138_v42 }
  0xe5   :  { %v1250_v54 = vmul.f32 %v6474_v50, %v7810_v16 }
  0xe6   :  { %6475 = vtanh.f32 %v1149_v52  ;;  %5761 = vmatmul.msk.f32.gmra.mxu1 %vm13914_vm1, %v89_v48  ;;  %v143_v52 = vld [vmem:[%s13686_s1 + $0x100] sm:$0xff] }
  0xe7   :  { %1309 = vadd.xlane.f32.xlu1 %v1250_v54 }
  0xe9   :  { %v712_v58 = vpop.f32.mrf.mxu0 }
  0xea   :  { %v7877_v62 = vadd.f32 %v712_v58, %v474_v56  ;;  %v94_v56 = vld [vmem:[%s13685_s0 + $0x100] sm:$0xff] }
  0xeb   :  { %v7879_v0 = vpop.f32.mrf.mxu1 }
  0xec   :  { %14320 = vst [vmem:[#allocation16_spill] sm:$0xff] %v7877_v62  ;;  %v6476_v3 = vpop.eup %6475  ;;  %v1150_v4 = vadd.f32 %v7879_v0, %v7877_v62  ;;  %5713 = vmatmul.msk.f32.gmra.mxu0 %vm511_vm0, %v139_v60 }
  0xed   :  { %v1251_v5 = vmul.f32 %v6476_v3, %v7810_v16 }
  0xee   :  { %6477 = vtanh.f32 %v1150_v4  ;;  %5762 = vmatmul.msk.f32.gmra.mxu1 %vm13914_vm1, %v90_v2  ;;  %v99_v2 = vld [vmem:[%s13685_s0 + $0x128] sm:$0xff] }
  0xef   :  { %1311 = vadd.xlane.f32.xlu1 %v1251_v5  ;;  %5771 = vmatmul.msk.f32.vlgmr.msra.gmra.mxu3 %vm13914_vm1, %v99_v2  ;;  %v144_v4 = vld [vmem:[%s13686_s1 + $0x108] sm:$0xff]  ;;  %v98_v2 = vld [vmem:[%s13685_s0 + $0x120] sm:$0xff] }
  0xf1   :  { %v715_v9 = vpop.f32.mrf.mxu0 }
  0xf2   :  { %v7895_v11 = vadd.f32 %v715_v9, %v475_v8  ;;  %v95_v8 = vld [vmem:[%s13685_s0 + $0x108] sm:$0xff]  ;;  %v480_v9 = vld [vmem:[%s13687_s2 + $0x90] sm:$0xff] }
  0xf3   :  { %v7897_v12 = vpop.f32.mrf.mxu1 }
  0xf4   :  { %14321 = vst [vmem:[#allocation17_spill] sm:$0xff] %v7895_v11  ;;  %v6478_v17 = vpop.eup %6477  ;;  %v1151_v18 = vadd.f32 %v7897_v12, %v7895_v11  ;;  %5714 = vmatmul.msk.f32.gmra.mxu0 %vm511_vm0, %v140_v10  ;;  %v100_v10 = vld [vmem:[%s13685_s0 + $0x130] sm:$0xff] }
  0xf5   :  { %v1252_v19 = vmul.f32 %v6478_v17, %v7810_v16  ;;  %v145_v17 = vld [vmem:[%s13686_s1 + $0x110] sm:$0xff] }
  0xf6   :  { %6479 = vtanh.f32 %v1151_v18  ;;  %5763 = vmatmul.msk.f32.gmra.mxu1 %vm13914_vm1, %v91_v15 }
  0xf7   :  { %1313 = vadd.xlane.f32.xlu1 %v1252_v19  ;;  %5772 = vmatmul.msk.f32.gmra.mxu3 %vm13914_vm1, %v100_v10  ;;  %v483_v10 = vld [vmem:[%s13687_s2 + $0xa8] sm:$0xff] }
  0xf9   :  { %v718_v21 = vpop.f32.mrf.mxu0 }
  0xfa   :  { %v7913_v25 = vadd.f32 %v718_v21, %v476_v20  ;;  %v96_v20 = vld [vmem:[%s13685_s0 + $0x110] sm:$0xff] }
  0xfb   :  { %v7915_v26 = vpop.f32.mrf.mxu1 }
  0xfc   :  { %14322 = vst [vmem:[#allocation18_spill] sm:$0xff] %v7913_v25  ;;  %v6480_v28 = vpop.eup %6479  ;;  %v1152_v29 = vadd.f32 %v7915_v26, %v7913_v25  ;;  %5715 = vmatmul.msk.f32.gmra.mxu0 %vm511_vm0, %v141_v22  ;;  %v481_v22 = vld [vmem:[%s13687_s2 + $0x98] sm:$0xff] }
  0xfd   :  { %v1253_v30 = vmul.f32 %v6480_v28, %v7810_v16 }
  0xfe   :  { %6481 = vtanh.f32 %v1152_v29  ;;  %5764 = vmatmul.msk.f32.gmra.mxu1 %vm13914_vm1, %v92_v27  ;;  %v101_v27 = vld [vmem:[%s13685_s0 + $0x138] sm:$0xff] }
  0xff   :  { %1315 = vadd.xlane.f32.xlu1 %v1253_v30  ;;  %5773 = vmatmul.msk.f32.gmra.mxu3 %vm13914_vm1, %v101_v27  ;;  %v146_v29 = vld [vmem:[%s13686_s1 + $0x118] sm:$0xff] }
 0x101   :  { %v721_v34 = vpop.f32.mrf.mxu0 }
 0x102   :  { %v7931_v36 = vadd.f32 %v721_v34, %v477_v31  ;;  %v97_v34 = vld [vmem:[%s13685_s0 + $0x118] sm:$0xff] }
 0x103   :  { %v7933_v37 = vpop.f32.mrf.mxu1 }
 0x104   :  { %14323 = vst [vmem:[#allocation19_spill] sm:$0xff] %v7931_v36  ;;  %v6482_v40 = vpop.eup %6481  ;;  %v1153_v42 = vadd.f32 %v7933_v37, %v7931_v36  ;;  %5716 = vmatmul.msk.f32.gmra.mxu0 %vm511_vm0, %v142_v35 }
 0x105   :  { %v1254_v48 = vmul.f32 %v6482_v40, %v7810_v16 }
 0x106   :  { %6483 = vtanh.f32 %v1153_v42  ;;  %5765 = vmatmul.msk.f32.gmra.mxu1 %vm13914_vm1, %v93_v38  ;;  %v482_v42 = vld [vmem:[%s13687_s2 + $0xa0] sm:$0xff] }
 0x107   :  { %1317 = vadd.xlane.f32.xlu1 %v1254_v48  ;;  %v102_v48 = vld [vmem:[%s13685_s0 + $0x140] sm:$0xff] }
 0x108   :  { %5774 = vmatmul.msk.f32.gmra.mxu3 %vm13914_vm1, %v102_v48 }
 0x109   :  { %v7943_v50 = vpop.f32.mrf.mxu0 }
 0x10b   :  { %v7948_v54 = vpop.f32.mrf.mxu1 }
 0x10c   :  { %14324 = vst [vmem:[#allocation20_spill] sm:$0xff] %v7948_v54  ;;  %v6484_v58 = vpop.eup %6483  ;;  %5717 = vmatmul.msk.f32.gmra.mxu0 %vm511_vm0, %v143_v52 }
 0x10d   :  { %v1255_v60 = vmul.f32 %v6484_v58, %v7810_v16 }
 0x10e   :  { %5766 = vmatmul.msk.f32.gmra.mxu1 %vm13914_vm1, %v94_v56  ;;  %v147_v56 = vld [vmem:[%s13686_s1 + $0x120] sm:$0xff] }
 0x10f   :  { %1319 = vadd.xlane.f32.xlu1 %v1255_v60 }
 0x111   :  { %v7960_v3 = vpop.f32.mrf.mxu0 }
 0x113   :  { %v7965_v5 = vpop.f32.mrf.mxu1 }
 0x114   :  { %14325 = vst [vmem:[#allocation21_spill] sm:$0xff] %v7965_v5  ;;  %5718 = vmatmul.msk.f32.gmra.mxu0 %vm511_vm0, %v144_v4 }
 0x116   :  { %5767 = vmatmul.msk.f32.gmra.mxu1 %vm13914_vm1, %v95_v8 }
 0x119   :  { %v730_v15 = vpop.f32.mrf.mxu0 }
 0x11a   :  { %v7982_v18 = vadd.f32 %v730_v15, %v480_v9  ;;  %v103_v15 = vld [vmem:[%s13685_s0 + $0x148] sm:$0xff] }
 0x11b   :  { %v7984_v19 = vpop.f32.mrf.mxu1  ;;  %5775 = vmatmul.msk.f32.gmra.mxu3 %vm13914_vm1, %v103_v15 }
 0x11c   :  { %14326 = vst [vmem:[#allocation22_spill] sm:$0xff] %v7982_v18  ;;  %v1156_v21 = vadd.f32 %v7984_v19, %v7982_v18  ;;  %5719 = vmatmul.msk.f32.gmra.mxu0 %vm511_vm0, %v145_v17  ;;  %v153_v18 = vld [vmem:[%s13686_s1 + $0x150] sm:$0xff] }
 0x11d   :  { %14327 = vst [vmem:[#allocation23_spill] sm:$0xff] %v7984_v19 }
 0x11e   :  { %6485 = vtanh.f32 %v1156_v21  ;;  %5768 = vmatmul.msk.f32.gmra.mxu1 %vm13914_vm1, %v96_v20  ;;  %v148_v20 = vld [vmem:[%s13686_s1 + $0x128] sm:$0xff] }
 0x121   :  { %v733_v28 = vpop.f32.mrf.mxu0 }
 0x122   :  { %v8003_v30 = vadd.f32 %v733_v28, %v481_v22 }
 0x123   :  { %v8005_v31 = vpop.f32.mrf.mxu1 }
 0x124   :  { %14328 = vst [vmem:[#allocation24_spill] sm:$0xff] %v8003_v30  ;;  %v6486_v35 = vpop.eup %6485  ;;  %v1157_v38 = vadd.f32 %v8005_v31, %v8003_v30  ;;  %5720 = vmatmul.msk.f32.gmra.mxu0 %vm511_vm0, %v146_v29 }
 0x125   :  { %14329 = vst [vmem:[#allocation25_spill] sm:$0xff] %v8005_v31  ;;  %v1258_v40 = vmul.f32 %v6486_v35, %v7810_v16  ;;  %v104_v35 = vld [vmem:[%s13685_s0 + $0x150] sm:$0xff] }
 0x126   :  { %6487 = vtanh.f32 %v1157_v38  ;;  %5769 = vmatmul.msk.f32.gmra.mxu1 %vm13914_vm1, %v97_v34  ;;  %v484_v34 = vld [vmem:[%s13687_s2 + $0xb0] sm:$0xff]  ;;  %5776 = vmatmul.msk.f32.gmra.mxu3 %vm13914_vm1, %v104_v35  ;;  %v106_v35 = vld [vmem:[%s13685_s0 + $0x160] sm:$0xff] }
 0x127   :  { %1325 = vadd.xlane.f32.xlu2 %v1258_v40  ;;  %v149_v40 = vld [vmem:[%s13686_s1 + $0x130] sm:$0xff] }
 0x129   :  { %v736_v52 = vpop.f32.mrf.mxu0 }
 0x12a   :  { %v8025_v58 = vadd.f32 %v736_v52, %v482_v42 }
 0x12b   :  { %v8027_v60 = vpop.f32.mrf.mxu1 }
 0x12c   :  { %14330 = vst [vmem:[#allocation26_spill] sm:$0xff] %v8025_v58  ;;  %v6488_v4 = vpop.eup %6487  ;;  %v1158_v8 = vadd.f32 %v8027_v60, %v8025_v58  ;;  %5721 = vmatmul.msk.f32.gmra.mxu0 %vm511_vm0, %v147_v56 }
 0x12d   :  { %14331 = vst [vmem:[#allocation27_spill] sm:$0xff] %v8027_v60  ;;  %v1259_v9 = vmul.f32 %v6488_v4, %v7810_v16  ;;  %v485_v4 = vld [vmem:[%s13687_s2 + $0xb8] sm:$0xff] }
 0x12e   :  { %6489 = vtanh.f32 %v1158_v8  ;;  %5770 = vmatmul.msk.f32.gmra.mxu1 %vm13914_vm1, %v98_v2  ;;  %v105_v8 = vld [vmem:[%s13685_s0 + $0x158] sm:$0xff] }
 0x12f   :  { %1327 = vadd.xlane.f32.xlu2 %v1259_v9  ;;  %5777 = vmatmul.msk.f32.gmra.mxu3 %vm13914_vm1, %v105_v8 }
 0x131   :  { %v739_v17 = vpop.f32.mrf.mxu0 }
 0x132   :  { %v8047_v21 = vadd.f32 %v739_v17, %v483_v10  ;;  %v150_v10 = vld [vmem:[%s13686_s1 + $0x138] sm:$0xff] }
 0x133   :  { %v8049_v22 = vpop.f32.mrf.mxu1 }
 0x134   :  { %14332 = vst [vmem:[#allocation28_spill] sm:$0xff] %v8047_v21  ;;  %v6490_v27 = vpop.eup %6489  ;;  %v1159_v28 = vadd.f32 %v8049_v22, %v8047_v21  ;;  %5722 = vmatmul.msk.f32.gmra.mxu0 %vm511_vm0, %v148_v20 }
 0x135   :  { %14333 = vst [vmem:[#allocation29_spill] sm:$0xff] %v8049_v22  ;;  %v1260_v29 = vmul.f32 %v6490_v27, %v7810_v16 }
 0x136   :  { %6491 = vtanh.f32 %v1159_v28 }
 0x137   :  { %1329 = vadd.xlane.f32.xlu2 %v1260_v29  ;;  %5778 = vmatmul.msk.f32.gmra.mxu3 %vm13914_vm1, %v106_v35 }
 0x139   :  { %v742_v38 = vpop.f32.mrf.mxu0 }
 0x13a   :  { %v8065_v42 = vadd.f32 %v742_v38, %v484_v34  ;;  %v486_v34 = vld [vmem:[%s13687_s2 + $0xc0] sm:$0xff] }
 0x13b   :  { %v8067_v48 = vpop.f32.mrf.mxu1 }
 0x13c   :  { %14334 = vst [vmem:[#allocation30_spill] sm:$0xff] %v8065_v42  ;;  %v6492_v52 = vpop.eup %6491  ;;  %v1160_v56 = vadd.f32 %v8067_v48, %v8065_v42  ;;  %5723 = vmatmul.msk.f32.gmra.mxu0 %vm511_vm0, %v149_v40  ;;  %v151_v40 = vld [vmem:[%s13686_s1 + $0x140] sm:$0xff] }
 0x13d   :  { %14335 = vst [vmem:[#allocation31_spill] sm:$0xff] %v8067_v48  ;;  %v1261_v2 = vmul.f32 %v6492_v52, %v7810_v16 }
 0x13e   :  { %6493 = vtanh.f32 %v1160_v56 }
 0x13f   :  { %1331 = vadd.xlane.f32.xlu2 %v1261_v2 }
 0x141   :  { %v745_v9 = vpop.f32.mrf.mxu0 }
 0x142   :  { %v8083_v15 = vadd.f32 %v745_v9, %v485_v4  ;;  %v8085_v17 = vpop.xlane.xlu1 %1303 }
 0x143   :  { %v8087_v20 = vpop.f32.mrf.mxu1 }
 0x144   :  { %14336 = vst [vmem:[#allocation32_spill] sm:$0xff] %v8083_v15  ;;  %v6494_v27 = vpop.eup %6493  ;;  %v1161_v28 = vadd.f32 %v8087_v20, %v8083_v15  ;;  %5724 = vmatmul.msk.f32.gmra.mxu0 %vm511_vm0, %v150_v10  ;;  %v487_v10 = vld [vmem:[%s13687_s2 + $0xc8] sm:$0xff] }
 0x145   :  { %14337 = vst [vmem:[#allocation33_spill] sm:$0xff] %v8087_v20  ;;  %v1262_v29 = vmul.f32 %v6494_v27, %v7810_v16  ;;  %v8119_v27 = vld [vmem:[%s13685_s0 + $0x168] sm:$0xff] }
 0x146   :  { %6495 = vtanh.f32 %v1161_v28  ;;  %5779 = vmatmul.msk.f32.gmra.mxu3 %vm13914_vm1, %v8119_v27 }
 0x147   :  { %1333 = vadd.xlane.f32.xlu2 %v1262_v29  ;;  %v152_v29 = vld [vmem:[%s13686_s1 + $0x148] sm:$0xff] }
 0x149   :  { %v748_v38 = vpop.f32.mrf.mxu0 }
 0x14a   :  { %v8103_v52 = vadd.f32 %v748_v38, %v486_v34  ;;  %v8105_v56 = vpop.xlane.xlu1 %1305 }
 0x14b   :  { %v8107_v2 = vpop.f32.mrf.mxu1 }
 0x14c   :  { %14338 = vst [vmem:[#allocation34_spill] sm:$0xff] %v8103_v52  ;;  %v6496_v4 = vpop.eup %6495  ;;  %v1162_v8 = vadd.f32 %v8107_v2, %v8103_v52  ;;  %5725 = vmatmul.msk.f32.gmra.mxu0 %vm511_vm0, %v151_v40 }
 0x14d   :  { %14339 = vst [vmem:[#allocation35_spill] sm:$0xff] %v8107_v2  ;;  %v1263_v9 = vmul.f32 %v6496_v4, %v7810_v16 }
 0x14e   :  { %6497 = vtanh.f32 %v1162_v8 }
 0x14f   :  { %1335 = vadd.xlane.f32.xlu2 %v1263_v9  ;;  %v488_v9 = vld [vmem:[%s13687_s2 + $0xd0] sm:$0xff] }
 0x151   :  { %v751_v28 = vpop.f32.mrf.mxu0 }
 0x152   :  { %v8126_v34 = vadd.f32 %v751_v28, %v487_v10  ;;  %v8128_v35 = vpop.xlane.xlu1 %1307  ;;  %v108_v10 = vld [vmem:[%s13685_s0 + $0x170] sm:$0xff] }
 0x153   :  { %v8130_v38 = vpop.f32.mrf.mxu1  ;;  %5780 = vmatmul.msk.f32.gmra.mxu3 %vm13914_vm1, %v108_v10  ;;  %v489_v10 = vld [vmem:[%s13687_s2 + $0xd8] sm:$0xff] }
 0x154   :  { %14340 = vst [vmem:[#allocation36_spill] sm:$0xff] %v8126_v34  ;;  %v6498_v40 = vpop.eup %6497  ;;  %v1163_v4 = vadd.f32 %v8130_v38, %v8126_v34  ;;  %5726 = vmatmul.msk.f32.gmra.mxu0 %vm511_vm0, %v152_v29 }
 0x155   :  { %14341 = vst [vmem:[#allocation37_spill] sm:$0xff] %v8130_v38  ;;  %v1264_v8 = vmul.f32 %v6498_v40, %v7810_v16 }
 0x156   :  { %6499 = vtanh.f32 %v1163_v4 }
 0x157   :  { %1337 = vadd.xlane.f32.xlu2 %v1264_v8 }
 0x159   :  { %v754_v28 = vpop.f32.mrf.mxu0 }
 0x15a   :  { %v8146_v29 = vadd.f32 %v754_v28, %v488_v9  ;;  %v8148_v40 = vpop.xlane.xlu1 %1309  ;;  %v109_v9 = vld [vmem:[%s13685_s0 + $0x178] sm:$0xff]  ;;  %v479_v28 = vld [vmem:[%s13687_s2 + $0x88] sm:$0xff] }
 0x15b   :  { %v8150_v4 = vpop.f32.mrf.mxu1  ;;  %5781 = vmatmul.msk.f32.gmra.mxu3 %vm13914_vm1, %v109_v9  ;;  %v8176_v15 = vadd.f32 %v7960_v3, %v479_v28  ;;  %v155_v3 = vld [vmem:[%s13686_s1 + $0x160] sm:$0xff] }
 0x15c   :  { %14342 = vst [vmem:[#allocation38_spill] sm:$0xff] %v8146_v29  ;;  %v6500_v8 = vpop.eup %6499  ;;  %v1164_v30 = vadd.f32 %v8150_v4, %v8146_v29  ;;  %5727 = vmatmul.msk.f32.gmra.mxu0 %vm511_vm0, %v153_v18  ;;  %v154_v18 = vld [vmem:[%s13686_s1 + $0x158] sm:$0xff] }
 0x15d   :  { %14343 = vst [vmem:[#allocation39_spill] sm:$0xff] %v8150_v4  ;;  %v1265_v58 = vmul.f32 %v6500_v8, %v7810_v16 }
 0x15e   :  { %6501 = vtanh.f32 %v1164_v30  ;;  %14346 = vst [vmem:[#allocation42_spill] sm:$0xff] %v8176_v15 }
 0x15f   :  { %1339 = vadd.xlane.f32.xlu2 %v1265_v58 }
 0x161   :  { %v757_v21 = vpop.f32.mrf.mxu0 }
 0x162   :  { %v8169_v30 = vadd.f32 %v757_v21, %v489_v10  ;;  %v8171_v58 = vpop.xlane.xlu1 %1311  ;;  %v490_v21 = vld [vmem:[%s13687_s2 + $0xe0] sm:$0xff]  ;;  %v1155_v10 = vadd.f32 %v7965_v5, %v8176_v15 }
 0x163   :  { %v8173_v8 = vpop.f32.mrf.mxu1 }
 0x164   :  { %14344 = vst [vmem:[#allocation40_spill] sm:$0xff] %v8169_v30  ;;  %v6502_v42 = vpop.eup %6501  ;;  %v1165_v9 = vadd.f32 %v8173_v8, %v8169_v30  ;;  %5728 = vmatmul.msk.f32.gmra.mxu0 %vm511_vm0, %v154_v18 }
 0x165   :  { %14345 = vst [vmem:[#allocation41_spill] sm:$0xff] %v8173_v8  ;;  %v1266_v52 = vmul.f32 %v6502_v42, %v7810_v16 }
 0x166   :  { %6503 = vtanh.f32 %v1165_v9 }
 0x167   :  { %1341 = vadd.xlane.f32.xlu2 %v1266_v52  ;;  %6505 = vtanh.f32 %v1155_v10  ;;  %v156_v10 = vld [vmem:[%s13686_s1 + $0x168] sm:$0xff] }
 0x169   :  { %v760_v34 = vpop.f32.mrf.mxu0 }
 0x16a   :  { %v8190_v28 = vadd.f32 %v760_v34, %v490_v21  ;;  %v8192_v29 = vpop.xlane.xlu1 %1313  ;;  %v491_v34 = vld [vmem:[%s13687_s2 + $0xe8] sm:$0xff]  ;;  %v468_v21 = vld [vmem:[%s13687_s2 + $0x30] sm:$0xff] }
 0x16b   :  { %v8194_v18 = vpop.f32.mrf.mxu1 }
 0x16c   :  { %14347 = vst [vmem:[#allocation43_spill] sm:$0xff] %v8190_v28  ;;  %v6504_v42 = vpop.eup %6503  ;;  %v1166_v52 = vadd.f32 %v8194_v18, %v8190_v28  ;;  %5729 = vmatmul.msk.f32.gmra.mxu0 %vm511_vm0, %v155_v3 }
 0x16d   :  { %14348 = vst [vmem:[#allocation44_spill] sm:$0xff] %v8194_v18  ;;  %v1267_v9 = vmul.f32 %v6504_v42, %v7810_v16  ;;  %v6506_v30 = vpop.eup %6505 }
 0x16e   :  { %6507 = vtanh.f32 %v1166_v52  ;;  %v1257_v13 = vmul.f32 %v6506_v30, %v7810_v16  ;;  %v157_v30 = vld [vmem:[%s13686_s1 + $0x170] sm:$0xff] }
 0x16f   :  { %1343 = vadd.xlane.f32.xlu2 %v1267_v9  ;;  %v8214_v9 = vadd.f32 %v7765_v63, %v468_v21 }
 0x171   :  { %v763_v15 = vpop.f32.mrf.mxu0  ;;  %14351 = vst [vmem:[#allocation47_spill] sm:$0xff] %v8214_v9  ;;  %v1144_v63 = vadd.f32 %v7770_v1, %v8214_v9 }
 0x172   :  { %v8209_v28 = vadd.f32 %v763_v15, %v491_v34  ;;  %v1316_v3 = vpop.xlane.xlu1 %1315  ;;  %v492_v15 = vld [vmem:[%s13687_s2 + $0xf0] sm:$0xff]  ;;  %v467_v34 = vld [vmem:[%s13687_s2 + $0x28] sm:$0xff] }
 0x173   :  { %v8211_v42 = vpop.f32.mrf.mxu1 }
 0x174   :  { %14349 = vst [vmem:[#allocation45_spill] sm:$0xff] %v8209_v28  ;;  %v6508_v52 = vpop.eup %6507  ;;  %v1167_v6 = vadd.f32 %v8211_v42, %v8209_v28  ;;  %5730 = vmatmul.msk.f32.gmra.mxu0 %vm511_vm0, %v156_v10 }
 0x175   :  { %14350 = vst [vmem:[#allocation46_spill] sm:$0xff] %v8211_v42  ;;  %v1268_v23 = vmul.f32 %v6508_v52, %v7810_v16  ;;  %v8237_v52 = vadd.f32 %v7753_v59, %v467_v34 }
 0x176   :  { %6509 = vtanh.f32 %v1167_v6 }
 0x177   :  { %1323 = vadd.xlane.f32.xlu2 %v1257_v13  ;;  %1345 = vadd.xlane.f32.xlu1 %v1268_v23  ;;  %14354 = vst [vmem:[#allocation50_spill] sm:$0xff] %v8237_v52  ;;  %6511 = vtanh.f32 %v1144_v63  ;;  %v1143_v59 = vadd.f32 %v7758_v61, %v8237_v52  ;;  %v466_v63 = vld [vmem:[%s13687_s2 + $0x20] sm:$0xff] }
 0x178   :  { %v8271_v44 = vadd.f32 %v7741_v55, %v466_v63 }
 0x179   :  { %v766_v21 = vpop.f32.mrf.mxu0 }
 0x17a   :  { %v8232_v10 = vadd.f32 %v766_v21, %v492_v15  ;;  %v1318_v6 = vpop.xlane.xlu1 %1317  ;;  %v493_v15 = vld [vmem:[%s13687_s2 + $0xf8] sm:$0xff]  ;;  %v110_v21 = vld [vmem:[%s13685_s0 + $0x180] sm:$0xff]  ;;  %14357 = vst [vmem:[#allocation53_spill] sm:$0xff] %v8271_v44 }
 0x17b   :  { %v8234_v13 = vpop.f32.mrf.mxu1  ;;  %5782 = vmatmul.msk.f32.gmra.mxu3 %vm13914_vm1, %v110_v21 }
 0x17c   :  { %14352 = vst [vmem:[#allocation48_spill] sm:$0xff] %v8232_v10  ;;  %v6510_v23 = vpop.eup %6509  ;;  %v1168_v28 = vadd.f32 %v8234_v13, %v8232_v10  ;;  %5731 = vmatmul.msk.f32.gmra.mxu0 %vm511_vm0, %v157_v30  ;;  %v8263_v10 = vstv %s13697_s12 }
 0x17d   :  { %14353 = vst [vmem:[#allocation49_spill] sm:$0xff] %v8234_v13  ;;  %v1269_v9 = vmul.f32 %v6510_v23, %v7810_v16  ;;  %v8284_v55 = vadd.f32 %v8263_v10, %v1316_v3  ;;  %v8303_v3 = vadd.f32 %v8263_v10, %v8171_v58  ;;  %v495_v58 = vld [vmem:[%s13687_s2 + $0x108] sm:$0xff] }
 0x17e   :  { %6513 = vtanh.f32 %v1168_v28  ;;  %v158_v28 = vld [vmem:[%s13686_s1 + $0x178] sm:$0xff] }
 0x17f   :  { %1347 = vadd.xlane.f32.xlu1 %v1269_v9  ;;  %v6512_v9 = vpop.eup %6511  ;;  %6515 = vtanh.f32 %v1143_v59  ;;  %v1142_v59 = vadd.f32 %v7746_v57, %v8271_v44 }
 0x180   :  { %v1246_v62 = vmul.f32 %v6512_v9, %v7810_v16 }
 0x181   :  { %v769_v34 = vpop.f32.mrf.mxu0 }
 0x182   :  { %v8258_v30 = vadd.f32 %v769_v34, %v493_v15  ;;  %v1320_v23 = vpop.xlane.xlu1 %1319  ;;  %v8278_v34 = vadd.f32 %v8263_v10, %v1318_v6  ;;  %v8293_v6 = vadd.f32 %v8263_v10, %v8192_v29  ;;  %v8309_v29 = vadd.f32 %v8263_v10, %v8148_v40  ;;  %v463_v40 = vld [vmem:[%s13687_s2 + $0x8] sm:$0xff] }
 0x183   :  { %v8265_v52 = vpop.f32.mrf.mxu1  ;;  %v8268_v21 = vadd.f32 %v8263_v10, %v1320_v23 }
 0x184   :  { %14355 = vst [vmem:[#allocation51_spill] sm:$0xff] %v8258_v30  ;;  %v6514_v32 = vpop.eup %6513  ;;  %v1169_v15 = vadd.f32 %v8265_v52, %v8258_v30  ;;  %5732 = vmatmul.msk.f32.gmra.mxu0 %vm511_vm0, %v158_v28 }
 0x185   :  { %14356 = vst [vmem:[#allocation52_spill] sm:$0xff] %v8265_v52  ;;  %1442 = vmatpush.msrb.mxu0 %v8268_v21  ;;  %v1270_v23 = vmul.f32 %v6514_v32, %v7810_v16  ;;  %v159_v32 = vld [vmem:[%s13686_s1 + $0x180] sm:$0xff] }
 0x186   :  { %6517 = vtanh.f32 %v1169_v15 }
 0x187   :  { %1443 = vmatpush.msrb.mxu0 %v8278_v34  ;;  %1301 = vadd.xlane.f32.xlu1 %v1246_v62  ;;  %v6516_v62 = vpop.eup %6515  ;;  %6519 = vtanh.f32 %v1142_v59  ;;  %v8319_v59 = vadd.f32 %v8263_v10, %v8128_v35  ;;  %v8336_v35 = vadd.f32 %v8263_v10, %v8085_v17 }
 0x188   :  { %1349 = vadd.xlane.f32.xlu0 %v1270_v23  ;;  %v1245_v15 = vmul.f32 %v6516_v62, %v7810_v16  ;;  %v8327_v62 = vadd.f32 %v8263_v10, %v8105_v56 }
 0x189   :  { %v8288_v63 = vpop.f32.mrf.mxu0  ;;  %1444 = vmatpush.msrb.mxu0 %v8284_v55 }
 0x18b   :  { %v8298_v28 = vpop.f32.mrf.mxu1  ;;  %1445 = vmatpush.msrb.mxu0 %v8293_v6 }
 0x18c   :  { %14358 = vst [vmem:[#allocation54_spill] sm:$0xff] %v8298_v28  ;;  %v6518_v9 = vpop.eup %6517  ;;  %5733 = vmatmul.msk.f32.gmra.mxu0 %vm511_vm0, %v159_v32 }
 0x18d   :  { %1446 = vmatpush.msrb.mxu0 %v8303_v3  ;;  %v1271_v23 = vmul.f32 %v6518_v9, %v7810_v16  ;;  %v6520_v9 = vpop.eup %6519 }
 0x18e   :  { %v1244_v56 = vmul.f32 %v6520_v9, %v7810_v16 }
 0x18f   :  { %1447 = vmatpush.msrb.mxu0 %v8309_v29  ;;  %1299 = vadd.xlane.f32.xlu1 %v1245_v15 }
 0x190   :  { %1351 = vadd.xlane.f32.xlu0 %v1271_v23  ;;  %v8339_v23 = vadd.f32 %v7705_v43, %v463_v40  ;;  %v8352_v40 = vpop.f32.mrf.mxu3 }
 0x191   :  { %v775_v32 = vpop.f32.mrf.mxu0  ;;  %1448 = vmatpush.msrb.mxu0 %v8319_v59  ;;  %14363 = vst [vmem:[#allocation59_spill] sm:$0xff] %v8352_v40 }
 0x192   :  { %v8329_v15 = vadd.f32 %v775_v32, %v495_v58  ;;  %14361 = vst [vmem:[#allocation57_spill] sm:$0xff] %v8339_v23  ;;  %v1139_v58 = vadd.f32 %v7710_v45, %v8339_v23 }
 0x193   :  { %v8331_v30 = vpop.f32.mrf.mxu1  ;;  %1449 = vmatpush.msrb.mxu0 %v8327_v62 }
 0x194   :  { %14359 = vst [vmem:[#allocation55_spill] sm:$0xff] %v8329_v15  ;;  %v1171_v44 = vadd.f32 %v8331_v30, %v8329_v15 }
 0x195   :  { %14360 = vst [vmem:[#allocation56_spill] sm:$0xff] %v8331_v30  ;;  %1450 = vmatpush.msrb.mxu0 %v8336_v35 }
 0x196   :  { %6521 = vtanh.f32 %v1171_v44 }
 0x197   :  { %1297 = vadd.xlane.f32.xlu1 %v1244_v56  ;;  %6523 = vtanh.f32 %v1139_v58  ;;  %v498_v56 = vld [vmem:[%s13687_s2 + $0x120] sm:$0xff] }
 0x198   :  { %v8362_v23 = vpop.f32.mrf.mxu3 }
 0x199   :  { %v8347_v32 = vpop.f32.mrf.mxu0  ;;  %14365 = vst [vmem:[#allocation61_spill] sm:$0xff] %v8362_v23 }
 0x19a   :  { %v8370_v30 = vpop.xlane.xlu2 %1325 }
 0x19b   :  { %v8349_v11 = vpop.f32.mrf.mxu1 }
 0x19c   :  { %14362 = vst [vmem:[#allocation58_spill] sm:$0xff] %v8349_v11  ;;  %v6522_v17 = vpop.eup %6521 }
 0x19d   :  { %v1273_v43 = vmul.f32 %v6522_v17, %v7810_v16  ;;  %v6524_v25 = vpop.eup %6523 }
 0x19e   :  { %v1241_v44 = vmul.f32 %v6524_v25, %v7810_v16  ;;  %v499_v25 = vld [vmem:[%s13687_s2 + $0x128] sm:$0xff] }
 0x19f   :  { %1355 = vadd.xlane.f32.xlu1 %v1273_v43 }
 0x1a0   :  { %v8375_v5 = vpop.f32.mrf.mxu3 }
 0x1a1   :  { %v8354_v15 = vpop.f32.mrf.mxu0  ;;  %14368 = vst [vmem:[#allocation64_spill] sm:$0xff] %v8375_v5 }
 0x1a3   :  { %v8356_v9 = vpop.f32.mrf.mxu1 }
 0x1a4   :  { %14364 = vst [vmem:[#allocation60_spill] sm:$0xff] %v8356_v9 }
 0x1a7   :  { %1291 = vadd.xlane.f32.xlu1 %v1241_v44 }
 0x1a8   :  { %v8389_v22 = vpop.f32.mrf.mxu3 }
 0x1a9   :  { %v784_v58 = vpop.f32.mrf.mxu0  ;;  %14371 = vst [vmem:[#allocation67_spill] sm:$0xff] %v8389_v22 }
 0x1aa   :  { %v8364_v36 = vadd.f32 %v784_v58, %v498_v56 }
 0x1ab   :  { %v8366_v17 = vpop.f32.mrf.mxu1 }
 0x1ac   :  { %14366 = vst [vmem:[#allocation62_spill] sm:$0xff] %v8364_v36  ;;  %v1174_v43 = vadd.f32 %v8366_v17, %v8364_v36  ;;  %v8385_v36 = vpop.xlane.xlu2 %1327 }
 0x1ad   :  { %14367 = vst [vmem:[#allocation63_spill] sm:$0xff] %v8366_v17 }
 0x1ae   :  { %6525 = vtanh.f32 %v1174_v43  ;;  %v500_v43 = vld [vmem:[%s13687_s2 + $0x130] sm:$0xff] }
 0x1b1   :  { %v787_v44 = vpop.f32.mrf.mxu0 }
 0x1b2   :  { %v8377_v19 = vadd.f32 %v787_v44, %v499_v25 }
 0x1b4   :  { %14369 = vst [vmem:[#allocation65_spill] sm:$0xff] %v8377_v19  ;;  %v6526_v31 = vpop.eup %6525  ;;  %v1175_v56 = vadd.f32 %v8352_v40, %v8377_v19  ;;  %v8399_v40 = vpop.xlane.xlu2 %1329 }
 0x1b5   :  { %v1276_v58 = vmul.f32 %v6526_v31, %v7810_v16  ;;  %v501_v31 = vld [vmem:[%s13687_s2 + $0x138] sm:$0xff] }
 0x1b6   :  { %6527 = vtanh.f32 %v1175_v56 }
 0x1b7   :  { %1361 = vadd.xlane.f32.xlu0 %v1276_v58 }
 0x1b9   :  { %v790_v17 = vpop.f32.mrf.mxu0 }
 0x1ba   :  { %v8387_v60 = vadd.f32 %v790_v17, %v500_v43 }
 0x1bc   :  { %14370 = vst [vmem:[#allocation66_spill] sm:$0xff] %v8387_v60  ;;  %v6528_v25 = vpop.eup %6527  ;;  %v1176_v44 = vadd.f32 %v8362_v23, %v8387_v60  ;;  %v8404_v60 = vpop.f32.mrf.mxu3 }
 0x1bd   :  { %v1277_v19 = vmul.f32 %v6528_v25, %v7810_v16  ;;  %14373 = vst [vmem:[#allocation69_spill] sm:$0xff] %v8404_v60  ;;  %v8413_v23 = vpop.xlane.xlu2 %1331 }
 0x1be   :  { %6529 = vtanh.f32 %v1176_v44 }
 0x1bf   :  { %1363 = vadd.xlane.f32.xlu0 %v1277_v19  ;;  %v502_v19 = vld [vmem:[%s13687_s2 + $0x140] sm:$0xff] }
 0x1c1   :  { %v793_v56 = vpop.f32.mrf.mxu0 }
 0x1c2   :  { %v8397_v58 = vadd.f32 %v793_v56, %v501_v31 }
 0x1c4   :  { %14372 = vst [vmem:[#allocation68_spill] sm:$0xff] %v8397_v58  ;;  %v6530_v17 = vpop.eup %6529  ;;  %v1177_v43 = vadd.f32 %v8375_v5, %v8397_v58 }
 0x1c5   :  { %v1278_v48 = vmul.f32 %v6530_v17, %v7810_v16  ;;  %v8419_v17 = vpop.f32.mrf.mxu3 }
 0x1c6   :  { %6531 = vtanh.f32 %v1177_v43  ;;  %14375 = vst [vmem:[#allocation71_spill] sm:$0xff] %v8419_v17 }
 0x1c7   :  { %1365 = vadd.xlane.f32.xlu0 %v1278_v48  ;;  %v503_v48 = vld [vmem:[%s13687_s2 + $0x148] sm:$0xff] }
 0x1c9   :  { %v796_v25 = vpop.f32.mrf.mxu0 }
 0x1ca   :  { %v8409_v44 = vadd.f32 %v796_v25, %v502_v19 }
 0x1cc   :  { %14374 = vst [vmem:[#allocation70_spill] sm:$0xff] %v8409_v44  ;;  %v6532_v31 = vpop.eup %6531  ;;  %v1178_v56 = vadd.f32 %v8389_v22, %v8409_v44  ;;  %v8426_v22 = vpop.xlane.xlu2 %1333 }
 0x1cd   :  { %v1279_v58 = vmul.f32 %v6532_v31, %v7810_v16 }
 0x1ce   :  { %6533 = vtanh.f32 %v1178_v56  ;;  %v8431_v56 = vpop.f32.mrf.mxu3 }
 0x1cf   :  { %1367 = vadd.xlane.f32.xlu0 %v1279_v58  ;;  %v504_v58 = vld [vmem:[%s13687_s2 + $0x150] sm:$0xff]  ;;  %14377 = vst [vmem:[#allocation73_spill] sm:$0xff] %v8431_v56 }
 0x1d1   :  { %v799_v43 = vpop.f32.mrf.mxu0 }
 0x1d2   :  { %v8421_v5 = vadd.f32 %v799_v43, %v503_v48 }
 0x1d4   :  { %14376 = vst [vmem:[#allocation72_spill] sm:$0xff] %v8421_v5  ;;  %v6534_v19 = vpop.eup %6533  ;;  %v1179_v25 = vadd.f32 %v8404_v60, %v8421_v5 }
 0x1d5   :  { %v1280_v44 = vmul.f32 %v6534_v19, %v7810_v16  ;;  %v8441_v19 = vpop.xlane.xlu2 %1335 }
 0x1d6   :  { %6535 = vtanh.f32 %v1179_v25  ;;  %v8445_v2 = vpop.f32.mrf.mxu3 }
 0x1d7   :  { %1369 = vadd.xlane.f32.xlu0 %v1280_v44  ;;  %v505_v44 = vld [vmem:[%s13687_s2 + $0x158] sm:$0xff]  ;;  %14380 = vst [vmem:[#allocation76_spill] sm:$0xff] %v8445_v2 }
 0x1d9   :  { %v802_v31 = vpop.f32.mrf.mxu0 }
 0x1da   :  { %v8433_v20 = vadd.f32 %v802_v31, %v504_v58 }
 0x1dc   :  { %14378 = vst [vmem:[#allocation74_spill] sm:$0xff] %v8433_v20  ;;  %v6536_v48 = vpop.eup %6535  ;;  %v1180_v43 = vadd.f32 %v8419_v17, %v8433_v20 }
 0x1dd   :  { %v1281_v5 = vmul.f32 %v6536_v48, %v7810_v16 }
 0x1de   :  { %6537 = vtanh.f32 %v1180_v43 }
 0x1df   :  { %1371 = vadd.xlane.f32.xlu0 %v1281_v5  ;;  %v506_v5 = vld [vmem:[%s13687_s2 + $0x160] sm:$0xff] }
 0x1e1   :  { %v805_v25 = vpop.f32.mrf.mxu0 }
 0x1e2   :  { %v8443_v60 = vadd.f32 %v805_v25, %v505_v44  ;;  %v8457_v44 = vpop.xlane.xlu2 %1337 }
 0x1e4   :  { %14379 = vst [vmem:[#allocation75_spill] sm:$0xff] %v8443_v60  ;;  %v6538_v58 = vpop.eup %6537  ;;  %v1181_v31 = vadd.f32 %v8431_v56, %v8443_v60 }
 0x1e5   :  { %v1282_v20 = vmul.f32 %v6538_v58, %v7810_v16  ;;  %v8462_v58 = vpop.f32.mrf.mxu3 }
 0x1e6   :  { %6539 = vtanh.f32 %v1181_v31  ;;  %14382 = vst [vmem:[#allocation78_spill] sm:$0xff] %v8462_v58 }
 0x1e7   :  { %1373 = vadd.xlane.f32.xlu0 %v1282_v20  ;;  %v507_v20 = vld [vmem:[%s13687_s2 + $0x168] sm:$0xff] }
 0x1e9   :  { %v808_v48 = vpop.f32.mrf.mxu0 }
 0x1ea   :  { %v8453_v43 = vadd.f32 %v808_v48, %v506_v5  ;;  %v8455_v17 = vpop.xlane.xlu1 %1345  ;;  %v8471_v8 = vpop.xlane.xlu2 %1339 }
 0x1ec   :  { %14381 = vst [vmem:[#allocation77_spill] sm:$0xff] %v8453_v43  ;;  %v6540_v25 = vpop.eup %6539  ;;  %v1182_v38 = vadd.f32 %v8445_v2, %v8453_v43 }
 0x1ed   :  { %v1283_v60 = vmul.f32 %v6540_v25, %v7810_v16 }
 0x1ee   :  { %6541 = vtanh.f32 %v1182_v38  ;;  %v8477_v38 = vpop.f32.mrf.mxu3 }
 0x1ef   :  { %1375 = vadd.xlane.f32.xlu0 %v1283_v60  ;;  %v508_v60 = vld [vmem:[%s13687_s2 + $0x170] sm:$0xff]  ;;  %14384 = vst [vmem:[#allocation80_spill] sm:$0xff] %v8477_v38 }
 0x1f1   :  { %v811_v31 = vpop.f32.mrf.mxu0 }
 0x1f2   :  { %v8467_v5 = vadd.f32 %v811_v31, %v507_v20  ;;  %v1348_v48 = vpop.xlane.xlu1 %1347  ;;  %v497_v20 = vld [vmem:[%s13687_s2 + $0x118] sm:$0xff]  ;;  %v1342_v42 = vpop.xlane.xlu2 %1341 }
 0x1f4   :  { %14383 = vst [vmem:[#allocation79_spill] sm:$0xff] %v8467_v5  ;;  %v6542_v56 = vpop.eup %6541  ;;  %v1183_v4 = vadd.f32 %v8462_v58, %v8467_v5 }
 0x1f5   :  { %v1284_v25 = vmul.f32 %v6542_v56, %v7810_v16  ;;  %v8488_v56 = vadd.f32 %v8354_v15, %v497_v20  ;;  %v478_v20 = vld [vmem:[%s13687_s2 + $0x80] sm:$0xff] }
 0x1f6   :  { %6543 = vtanh.f32 %v1183_v4 }
 0x1f7   :  { %1377 = vadd.xlane.f32.xlu0 %v1284_v25  ;;  %14386 = vst [vmem:[#allocation82_spill] sm:$0xff] %v8488_v56  ;;  %v1173_v15 = vadd.f32 %v8356_v9, %v8488_v56  ;;  %v8516_v56 = vadd.f32 %v7943_v50, %v478_v20  ;;  %v8546_v20 = vadd.f32 %v8263_v10, %v8455_v17 }
 0x1f9   :  { %v814_v31 = vpop.f32.mrf.mxu0  ;;  %14390 = vst [vmem:[#allocation86_spill] sm:$0xff] %v8516_v56 }
 0x1fa   :  { %v8482_v43 = vadd.f32 %v814_v31, %v508_v60  ;;  %v1302_v5 = vpop.xlane.xlu1 %1301  ;;  %v509_v60 = vld [vmem:[%s13687_s2 + $0x178] sm:$0xff] }
 0x1fb   :  { %v1350_v2 = vpop.xlane.xlu0 %1349  ;;  %v8485_v58 = vadd.f32 %v8263_v10, %v1302_v5  ;;  %v465_v5 = vld [vmem:[%s13687_s2 + $0x18] sm:$0xff] }
 0x1fc   :  { %14385 = vst [vmem:[#allocation81_spill] sm:$0xff] %v8482_v43  ;;  %v6544_v4 = vpop.eup %6543  ;;  %v1184_v25 = vadd.f32 %v8477_v38, %v8482_v43  ;;  %v8510_v43 = vadd.f32 %v7729_v51, %v465_v5  ;;  %v1154_v5 = vadd.f32 %v7948_v54, %v8516_v56 }
 0x1fd   :  { %1451 = vmatpush.msrb.mxu0 %v8485_v58  ;;  %v1285_v18 = vmul.f32 %v6544_v4, %v7810_v16  ;;  %v8505_v4 = vpop.f32.mrf.mxu3 }
 0x1fe   :  { %6545 = vtanh.f32 %v1184_v25  ;;  %14387 = vst [vmem:[#allocation83_spill] sm:$0xff] %v8505_v4  ;;  %v1141_v50 = vadd.f32 %v7734_v53, %v8510_v43 }
 0x1ff   :  { %1379 = vadd.xlane.f32.xlu0 %v1285_v18  ;;  %14389 = vst [vmem:[#allocation85_spill] sm:$0xff] %v8510_v43  ;;  %6547 = vtanh.f32 %v1173_v15 }
 0x201   :  { %v817_v31 = vpop.f32.mrf.mxu0 }
 0x202   :  { %v8507_v25 = vadd.f32 %v817_v31, %v509_v60  ;;  %v1300_v18 = vpop.xlane.xlu1 %1299  ;;  %v8527_v60 = vadd.f32 %v8263_v10, %v1350_v2  ;;  %v496_v2 = vld [vmem:[%s13687_s2 + $0x110] sm:$0xff] }
 0x203   :  { %v1352_v38 = vpop.xlane.xlu0 %1351  ;;  %v8513_v13 = vadd.f32 %v8263_v10, %v1300_v18 }
 0x204   :  { %14388 = vst [vmem:[#allocation84_spill] sm:$0xff] %v8507_v25  ;;  %v6546_v52 = vpop.eup %6545  ;;  %v1185_v9 = vadd.f32 %v8505_v4, %v8507_v25  ;;  %v8521_v45 = vadd.f32 %v8263_v10, %v1352_v38  ;;  %v494_v38 = vld [vmem:[%s13687_s2 + $0x100] sm:$0xff] }
 0x205   :  { %1452 = vmatpush.msrb.mxu0 %v8513_v13  ;;  %v1286_v51 = vmul.f32 %v6546_v52, %v7810_v16  ;;  %v8538_v16 = vadd.f32 %v8263_v10, %v1348_v48  ;;  %v1344_v52 = vpop.xlane.xlu2 %1343  ;;  %v8549_v31 = vadd.f32 %v8288_v63, %v494_v38  ;;  %v8565_v63 = vld [vmem:[%s13692_s7] ss:$0 sm:$0xff] }
 0x206   :  { %6549 = vtanh.f32 %v1185_v9  ;;  %1462 = vmatpush.msrb.mxu3 %v8521_v45  ;;  %v6548_v9 = vpop.eup %6547  ;;  %v8559_v25 = vadd.f32 %v8263_v10, %v1344_v52  ;;  %v462_v38 = vld [vmem:[%s13687_s2] sm:$0xff]  ;;  %v8583_v52 = vadd.f32 %v8263_v10, %v8471_v8  ;;  %v8602_v8 = vadd.f32 %v8263_v10, %v8441_v19 }
 0x207   :  { %1381 = vadd.xlane.f32.xlu0 %v1286_v51  ;;  %6551 = vtanh.f32 %v1141_v50  ;;  %14391 = vst [vmem:[#allocation87_spill] sm:$0xff] %v8549_v31  ;;  %v8555_v51 = vadd.f32 %v8347_v32, %v496_v2  ;;  %v1275_v50 = vmul.f32 %v8565_v63, %v6548_v9  ;;  %v8571_v32 = vadd.f32 %v8263_v10, %v1342_v42  ;;  %v464_v9 = vld [vmem:[%s13687_s2 + $0x10] sm:$0xff]  ;;  %v510_v19 = vld [vmem:[%s13687_s2 + $0x180] sm:$0xff] }
 0x208   :  { %1463 = vmatpush.msrb.mxu3 %v8527_v60  ;;  %6553 = vtanh.f32 %v1154_v5  ;;  %v1170_v5 = vadd.f32 %v8298_v28, %v8549_v31 }
 0x209   :  { %14392 = vst [vmem:[#allocation88_spill] sm:$0xff] %v8555_v51  ;;  %v1172_v2 = vadd.f32 %v8349_v11, %v8555_v51 }
 0x20a   :  { %1464 = vmatpush.msrb.mxu3 %v8538_v16  ;;  %v1298_v15 = vpop.xlane.xlu1 %1297  ;;  %6555 = vtanh.f32 %v1170_v5 }
 0x20b   :  { %v8552_v48 = vadd.f32 %v8263_v10, %v1298_v15  ;;  %6557 = vtanh.f32 %v1172_v2 }
 0x20c   :  { %v6550_v18 = vpop.eup %6549  ;;  %1465 = vmatpush.msrb.mxu3 %v8546_v20 }
 0x20d   :  { %1453 = vmatpush.msrb.mxu0 %v8552_v48  ;;  %v1287_v17 = vmul.f32 %v8565_v63, %v6550_v18  ;;  %v6552_v42 = vpop.eup %6551  ;;  %v8591_v18 = vadd.f32 %v8263_v10, %v8457_v44  ;;  %v820_v44 = vpop.f32.mrf.mxu0 }
 0x20e   :  { %1466 = vmatpush.msrb.mxu3 %v8559_v25  ;;  %v6554_v15 = vpop.eup %6553  ;;  %v1243_v51 = vmul.f32 %v8565_v63, %v6552_v42  ;;  %v8630_v42 = vpop.f32.mrf.mxu3 }
 0x20f   :  { %1383 = vadd.xlane.f32.xlu2 %v1287_v17  ;;  %1359 = vadd.xlane.f32.xlu0 %v1275_v50  ;;  %v8594_v17 = vadd.f32 %v7693_v39, %v462_v38  ;;  %v8597_v50 = vadd.f32 %v7717_v47, %v464_v9  ;;  %v1256_v31 = vmul.f32 %v8565_v63, %v6554_v15  ;;  %v1324_v9 = vpop.xlane.xlu2 %1323 }
 0x210   :  { %1467 = vmatpush.msrb.mxu3 %v8571_v32  ;;  %v8609_v39 = vadd.f32 %v8263_v10, %v8426_v22  ;;  %v8621_v38 = vadd.f32 %v8263_v10, %v8413_v23  ;;  %v6556_v22 = vpop.eup %6555  ;;  %14398 = vst [vmem:[#allocation94_spill] sm:$0xff] %v8630_v42  ;;  %v8635_v23 = vadd.f32 %v8263_v10, %v8385_v36 }
 0x211   :  { %14393 = vst [vmem:[#allocation89_spill] sm:$0xff] %v8594_v17  ;;  %v1138_v47 = vadd.f32 %v7698_v41, %v8594_v17  ;;  %v1140_v5 = vadd.f32 %v7722_v49, %v8597_v50  ;;  %v6558_v2 = vpop.eup %6557  ;;  %v1272_v56 = vmul.f32 %v8565_v63, %v6556_v22  ;;  %v8648_v36 = vadd.f32 %v8263_v10, %v1324_v9 }
 0x212   :  { %1468 = vmatpush.msrb.mxu3 %v8583_v52  ;;  %14394 = vst [vmem:[#allocation90_spill] sm:$0xff] %v8597_v50  ;;  %v1274_v15 = vmul.f32 %v8565_v63, %v6558_v2 }
 0x213   :  { %14395 = vst [vmem:[#allocation91_spill] sm:$0xff] %v8621_v38  ;;  %6559 = vtanh.f32 %v1138_v47 }
 0x214   :  { %1469 = vmatpush.msrb.mxu3 %v8591_v18  ;;  %6561 = vtanh.f32 %v1140_v5  ;;  %14399 = vst [vmem:[#allocation95_spill] sm:$0xff] %v8635_v23 }
 0x215   :  { %14401 = vst [vmem:[#allocation97_spill] sm:$0xff] %v8648_v36 }
 0x216   :  { %1470 = vmatpush.msrb.mxu3 %v8602_v8 }
 0x217   :  { %1321 = vadd.xlane.f32.xlu2 %v1256_v31  ;;  %1295 = vadd.xlane.f32.xlu0 %v1243_v51  ;;  %v8626_v31 = vadd.f32 %v8263_v10, %v8399_v40  ;;  %v8628_v51 = vadd.f32 %v820_v44, %v510_v19  ;;  %v8642_v40 = vadd.f32 %v8263_v10, %v8370_v30 }
 0x218   :  { %1471 = vmatpush.msrb.mxu3 %v8609_v39 }
 0x219   :  { %14396 = vst [vmem:[#allocation92_spill] sm:$0xff] %v8626_v31  ;;  %v1186_v47 = vadd.f32 %v8630_v42, %v8628_v51  ;;  %v6560_v19 = vpop.eup %6559 }
 0x21a   :  { %1472 = vmatpush.msrb.mxu3 %v8621_v38  ;;  %14397 = vst [vmem:[#allocation93_spill] sm:$0xff] %v8628_v51  ;;  %v6562_v44 = vpop.eup %6561  ;;  %v1240_v30 = vmul.f32 %v8565_v63, %v6560_v19 }
 0x21b   :  { %14400 = vst [vmem:[#allocation96_spill] sm:$0xff] %v8642_v40  ;;  %6563 = vtanh.f32 %v1186_v47  ;;  %v1242_v5 = vmul.f32 %v8565_v63, %v6562_v44 }
 0x21c   :  { %1473 = vmatpush.msrb.mxu3 %v8626_v31 }
 0x21e   :  { %1474 = vmatpush.msrb.mxu3 %v8635_v23 }
 0x21f   :  { %1357 = vadd.xlane.f32.xlu2 %v1274_v15  ;;  %1353 = vadd.xlane.f32.xlu0 %v1272_v56 }
 0x220   :  { %1475 = vmatpush.msrb.mxu3 %v8642_v40 }
 0x221   :  { %v6564_v22 = vpop.eup %6563 }
 0x222   :  { %1476 = vmatpush.msrb.mxu3 %v8648_v36  ;;  %v1288_v56 = vmul.f32 %v8565_v63, %v6564_v22  ;;  %v7063_v36 = vld [vmem:[%s13685_s0 + $0x60] sm:$0xff] }
 0x227   :  { %1293 = vadd.xlane.f32.xlu2 %v1242_v5  ;;  %1289 = vadd.xlane.f32.xlu0 %v1240_v30  ;;  %v7062_v5 = vld [vmem:[%s13685_s0 + $0x78] sm:$0xff] }
 0x228   :  { %v228_v30 = vand.u32 2147483647, %v7062_v5  ;;  %v225_v5 = vand.u32 2147483647, %v7063_v36 }
 0x22a   :  { %v1362_v2 = vpop.xlane.xlu0 %1361 }
 0x22f   :  { %1385 = vadd.xlane.f32.xlu2 %v1288_v56  ;;  %v308_v56 = vsel %vm13914_vm1, %v228_v30, 0.0 }
 0x230   :  { %309 = vadd.xlane.f32.xlu1 %v308_v56 }
 0x232   :  { %v1364_v15 = vpop.xlane.xlu0 %1363 }
 0x23a   :  { %v1366_v51 = vpop.xlane.xlu0 %1365 }
 0x242   :  { %v1368_v9 = vpop.xlane.xlu0 %1367 }
 0x24a   :  { %v1370_v17 = vpop.xlane.xlu0 %1369 }
 0x252   :  { %v1372_v50 = vpop.xlane.xlu0 %1371 }
 0x253   :  { %v8698_v40 = vadd.f32 %v8263_v10, %v1372_v50  ;;  %v8713_v50 = vadd.f32 %v8263_v10, %v1366_v51 }
 0x255   :  { %14409 = vst [vmem:[#allocation105_spill] sm:$0xff] %v8698_v40 }
 0x256   :  { %14412 = vst [vmem:[#allocation108_spill] sm:$0xff] %v8713_v50 }
 0x25a   :  { %v1374_v43 = vpop.xlane.xlu0 %1373 }
 0x25b   :  { %v8693_v36 = vadd.f32 %v8263_v10, %v1374_v43  ;;  %v7064_v43 = vld [vmem:[%s13685_s0 + $0x48] sm:$0xff] }
 0x25d   :  { %14408 = vst [vmem:[#allocation104_spill] sm:$0xff] %v8693_v36 }
 0x262   :  { %v1376_v42 = vpop.xlane.xlu0 %1375 }
 0x263   :  { %v8687_v56 = vadd.f32 %v8263_v10, %v1376_v42 }
 0x265   :  { %14407 = vst [vmem:[#allocation103_spill] sm:$0xff] %v8687_v56 }
 0x26a   :  { %v1378_v28 = vpop.xlane.xlu0 %1377 }
 0x272   :  { %v1380_v47 = vpop.xlane.xlu0 %1379 }
 0x273   :  { %v8666_v22 = vadd.f32 %v8263_v10, %v1380_v47 }
 0x275   :  { %14404 = vst [vmem:[#allocation100_spill] sm:$0xff] %v8666_v22 }
 0x27a   :  { %v1382_v11 = vpop.xlane.xlu0 %1381 }
 0x27b   :  { %v8659_v63 = vadd.f32 %v8263_v10, %v1382_v11 }
 0x27d   :  { %14403 = vst [vmem:[#allocation99_spill] sm:$0xff] %v8659_v63 }
 0x282   :  { %v1384_v44 = vpop.xlane.xlu2 %1383  ;;  %v1360_v4 = vpop.xlane.xlu0 %1359 }
 0x283   :  { %v8655_v19 = vadd.f32 %v8263_v10, %v1384_v44  ;;  %v8671_v44 = vadd.f32 %v8263_v10, %v1378_v28  ;;  %v161_v28 = vld [vmem:[%s13688_s3 + $0x8] sm:$0xff] }
 0x285   :  { %14402 = vst [vmem:[#allocation98_spill] sm:$0xff] %v8655_v19  ;;  %1482 = vmatpush.msra.mxu2 %v8655_v19 }
 0x286   :  { %14405 = vst [vmem:[#allocation101_spill] sm:$0xff] %v8671_v44 }
 0x287   :  { %1483 = vmatpush.msra.mxu2 %v8659_v63 }
 0x289   :  { %1484 = vmatpush.msra.mxu2 %v8666_v22  ;;  %v181_v22 = vld [vmem:[%s13689_s4 + $0x88] sm:$0xff] }
 0x28a   :  { %v1322_v11 = vpop.xlane.xlu2 %1321  ;;  %v1296_v54 = vpop.xlane.xlu0 %1295 }
 0x28b   :  { %1485 = vmatpush.msra.mxu2 %v8671_v44  ;;  %v8678_v47 = vadd.f32 %v8263_v10, %v1296_v54  ;;  %v8681_v30 = vadd.f32 %v8263_v10, %v1322_v11  ;;  %v299_v54 = vsel %vm13914_vm1, %v225_v5, 0.0  ;;  %v1356_v11 = vpop.xlane.xlu1 %1355  ;;  %v8709_v5 = vadd.f32 %v8263_v10, %v1368_v9 }
 0x28c   :  { %300 = vadd.xlane.f32.xlu1 %v299_v54  ;;  %v8722_v9 = vadd.f32 %v8263_v10, %v1362_v2 }
 0x28d   :  { %14406 = vst [vmem:[#allocation102_spill] sm:$0xff] %v8681_v30  ;;  %1454 = vmatpush.msrb.mxu0 %v8678_v47  ;;  %1477 = vmatpush.msrb.mxu3 %v8681_v30  ;;  %v8702_v30 = vadd.f32 %v8263_v10, %v1370_v17  ;;  %v8718_v17 = vadd.f32 %v8263_v10, %v1364_v15 }
 0x28e   :  { %1486 = vmatpush.msra.mxu2 %v8687_v56  ;;  %1478 = vmatmul.f32.vlgmr.msrb.gmra.mxu3 %v161_v28  ;;  %v222_v28 = vand.u32 2147483647, %v7064_v43  ;;  %14411 = vst [vmem:[#allocation107_spill] sm:$0xff] %v8709_v5 }
 0x28f   :  { %14410 = vst [vmem:[#allocation106_spill] sm:$0xff] %v8702_v30 }
 0x290   :  { %1487 = vmatpush.msra.mxu2 %v8693_v36  ;;  %v290_v54 = vsel %vm13914_vm1, %v222_v28, 0.0  ;;  %14413 = vst [vmem:[#allocation109_spill] sm:$0xff] %v8718_v17  ;;  %v8729_v28 = vadd.f32 %v8263_v10, %v1360_v4  ;;  %v160_v4 = vld [vmem:[%s13688_s3] sm:$0xff] }
 0x291   :  { %14414 = vst [vmem:[#allocation110_spill] sm:$0xff] %v8722_v9 }
 0x292   :  { %1488 = vmatpush.msra.mxu2 %v8698_v40  ;;  %v1358_v42 = vpop.xlane.xlu2 %1357  ;;  %v1354_v23 = vpop.xlane.xlu0 %1353  ;;  %14415 = vst [vmem:[#allocation111_spill] sm:$0xff] %v8729_v28 }
 0x293   :  { %v1292_v31 = vpop.xlane.xlu1 %1291 }
 0x294   :  { %1489 = vmatpush.msra.mxu2 %v8702_v30  ;;  %291 = vadd.xlane.f32.xlu1 %v290_v54  ;;  %v8733_v15 = vadd.f32 %v8263_v10, %v1292_v31  ;;  %v8737_v54 = vadd.f32 %v8263_v10, %v1358_v42  ;;  %v8753_v42 = vadd.f32 %v8263_v10, %v1354_v23  ;;  %v7065_v23 = vld [vmem:[%s13685_s0 + $0x30] sm:$0xff] }
 0x296   :  { %1490 = vmatpush.msra.mxu2 %v8709_v5  ;;  %14416 = vst [vmem:[#allocation112_spill] sm:$0xff] %v8737_v54 }
 0x297   :  { %14418 = vst [vmem:[#allocation114_spill] sm:$0xff] %v8753_v42 }
 0x298   :  { %1491 = vmatpush.msra.mxu2 %v8713_v50 }
 0x29a   :  { %1492 = vmatpush.msra.mxu2 %v8718_v17  ;;  %v1294_v43 = vpop.xlane.xlu2 %1293  ;;  %v1290_v51 = vpop.xlane.xlu0 %1289 }
 0x29b   :  { %v8725_v5 = vadd.f32 %v8263_v10, %v1294_v43  ;;  %v8741_v2 = vadd.f32 %v8263_v10, %v1290_v51  ;;  %v8748_v43 = vadd.f32 %v8263_v10, %v1356_v11  ;;  %v162_v51 = vld [vmem:[%s13688_s3 + $0x10] sm:$0xff]  ;;  %v163_v11 = vld [vmem:[%s13688_s3 + $0x18] sm:$0xff] }
 0x29c   :  { %1493 = vmatpush.msra.mxu2 %v8722_v9 }
 0x29d   :  { %1455 = vmatpush.msrb.mxu0 %v8725_v5  ;;  %14417 = vst [vmem:[#allocation113_spill] sm:$0xff] %v8748_v43 }
 0x29e   :  { %1494 = vmatpush.msra.mxu2 %v8729_v28  ;;  %v7074_v28 = vld [vmem:[%s13685_s0 + $0x50] sm:$0xff] }
 0x29f   :  { %1456 = vmatpush.msrb.mxu0 %v8733_v15 }
 0x2a0   :  { %1495 = vmatpush.msra.mxu2 %v8737_v54 }
 0x2a1   :  { %1457 = vmatpush.msrb.mxu0 %v8741_v2 }
 0x2a2   :  { %1496 = vmatpush.msra.mxu2 %v8748_v43  ;;  %v1386_v31 = vpop.xlane.xlu2 %1385  ;;  %1458 = vmatmul.f32.vlgmr.msrb.gmra.mxu0 %v160_v4  ;;  %v219_v4 = vand.u32 2147483647, %v7065_v23  ;;  %v7068_v23 = vld [vmem:[%s13685_s0 + $0x58] sm:$0xff] }
 0x2a3   :  { %v8759_v9 = vadd.f32 %v8263_v10, %v1386_v31  ;;  %v7066_v31 = vld [vmem:[%s13685_s0 + $0x70] sm:$0xff] }
 0x2a4   :  { %1497 = vmatpush.msra.mxu2 %v8753_v42  ;;  %v281_v10 = vsel %vm13914_vm1, %v219_v4, 0.0  ;;  %v227_v43 = vand.u32 2147483647, %v7066_v31  ;;  %v224_v4 = vand.u32 2147483647, %v7068_v23 }
 0x2a5   :  { %14419 = vst [vmem:[#allocation115_spill] sm:$0xff] %v8759_v9  ;;  %1498 = vmatmul.f32.vlgmr.msra.gmra.mxu2 %v162_v51  ;;  %1517 = vmatpush.msra.mxu3 %v8759_v9  ;;  %v7067_v51 = vld [vmem:[%s13685_s0 + $0x18] sm:$0xff] }
 0x2a6   :  { %5783 = vmatmul.msk.f32.vlgmr.msra.gmra.mxu3 %vm13946_vm2, %v163_v11  ;;  %282 = vadd.xlane.f32.xlu1 %v281_v10  ;;  %v305_v42 = vsel %vm13914_vm1, %v227_v43, 0.0  ;;  %v216_v11 = vand.u32 2147483647, %v7067_v51  ;;  %v7069_v10 = vld [vmem:[%s13685_s0 + $0xf0] sm:$0xff]  ;;  %v296_v43 = vsel %vm13914_vm1, %v224_v4, 0.0 }
 0x2a7   :  { %306 = vadd.xlane.f32.xlu2 %v305_v42  ;;  %v243_v31 = vand.u32 2147483647, %v7069_v10  ;;  %v7072_v10 = vld [vmem:[%s13685_s0] sm:$0xff] }
 0x2a8   :  { %v272_v9 = vsel %vm13914_vm1, %v216_v11, 0.0  ;;  %v7071_v11 = vld [vmem:[%s13685_s0 + $0x68] sm:$0xff]  ;;  %v213_v54 = vand.u32 2147483647, %v7072_v10  ;;  %v223_v10 = vand.u32 2147483647, %v7074_v28 }
 0x2a9   :  { %v353_v42 = vsel %vm13914_vm1, %v243_v31, 0.0  ;;  %v226_v23 = vand.u32 2147483647, %v7071_v11  ;;  %v7076_v28 = vld [vmem:[%s13685_s0 + $0xf8] sm:$0xff] }
 0x2aa   :  { %v244_v17 = vand.u32 2147483647, %v7076_v28  ;;  %v164_v28 = vld [vmem:[%s13689_s4] sm:$0xff] }
 0x2ab   :  { %v302_v31 = vsel %vm13914_vm1, %v226_v23, 0.0 }
 0x2ac   :  { %303 = vadd.xlane.f32.xlu0 %v302_v31  ;;  %v356_v19 = vsel %vm13914_vm1, %v244_v17, 0.0  ;;  %v7080_v17 = vld [vmem:[%s13685_s0 + $0xc0] sm:$0xff] }
 0x2ae   :  { %273 = vadd.xlane.f32.xlu1 %v272_v9  ;;  %v7070_v9 = vld [vmem:[%s13685_s0 + $0x40] sm:$0xff] }
 0x2af   :  { %297 = vadd.xlane.f32.xlu2 %v296_v43  ;;  %v221_v51 = vand.u32 2147483647, %v7070_v9  ;;  %v263_v43 = vsel %vm13914_vm1, %v213_v54, 0.0  ;;  %v7073_v9 = vld [vmem:[%s13685_s0 + $0x28] sm:$0xff]  ;;  %v293_v54 = vsel %vm13914_vm1, %v223_v10, 0.0 }
 0x2b0   :  { %v218_v11 = vand.u32 2147483647, %v7073_v9  ;;  %v258_v10 = vand.u32 2147483647, %v8119_v27  ;;  %v7078_v27 = vld [vmem:[%s13685_s0 + $0x8] sm:$0xff] }
 0x2b1   :  { %v287_v4 = vsel %vm13914_vm1, %v221_v51, 0.0  ;;  %v7075_v51 = vld [vmem:[%s13685_s0 + $0xd8] sm:$0xff] }
 0x2b2   :  { %v240_v23 = vand.u32 2147483647, %v7075_v51  ;;  %v7077_v51 = vld [vmem:[%s13685_s0 + $0x38] sm:$0xff] }
 0x2b3   :  { %v220_v50 = vand.u32 2147483647, %v7077_v51  ;;  %v237_v51 = vand.u32 2147483647, %v7080_v17 }
 0x2b4   :  { %294 = vadd.xlane.f32.xlu0 %v293_v54 }
 0x2b6   :  { %354 = vadd.xlane.f32.xlu1 %v353_v42 }
 0x2b7   :  { %288 = vadd.xlane.f32.xlu2 %v287_v4  ;;  %v278_v4 = vsel %vm13914_vm1, %v218_v11, 0.0 }
 0x2be   :  { %264 = vadd.xlane.f32.xlu1 %v263_v43  ;;  %v344_v43 = vsel %vm13914_vm1, %v240_v23, 0.0 }
 0x2bf   :  { %279 = vadd.xlane.f32.xlu2 %v278_v4 }
 0x2c6   :  { %345 = vadd.xlane.f32.xlu1 %v344_v43 }
 0x2c7   :  { %357 = vadd.xlane.f32.xlu2 %v356_v19  ;;  %v7079_v19 = vld [vmem:[%s13685_s0 + $0x20] sm:$0xff] }
 0x311   :  { %v1479_v42 = vpop.f32.mrf.mxu3 }
 0x31f   :  { %v1459_v31 = vpop.f32.mrf.mxu0 }
 0x320   :  { %v1480_v9 = vadd.f32 %v1479_v42, %v1459_v31  ;;  %v284_v42 = vsel %vm13914_vm1, %v220_v50, 0.0  ;;  %v398_v31 = vsel %vm13914_vm1, %v258_v10, 0.0  ;;  %v217_v50 = vand.u32 2147483647, %v7079_v19  ;;  %v7083_v19 = vld [vmem:[%s13685_s0 + $0x148] sm:$0xff] }
 0x321   :  { %285 = vadd.xlane.f32.xlu0 %v284_v42  ;;  %399 = vadd.xlane.f32.xlu1 %v398_v31  ;;  %v7081_v42 = vld [vmem:[%s13685_s0 + $0x10] sm:$0xff] }
 0x322   :  { %v275_v10 = vsel %vm13914_vm1, %v217_v50, 0.0  ;;  %v7082_v31 = vld [vmem:[%s13685_s0 + $0x150] sm:$0xff]  ;;  %v254_v50 = vand.u32 2147483647, %v7083_v19 }
 0x324   :  { %v386_v17 = vsel %vm13914_vm1, %v254_v50, 0.0 }
 0x328   :  { %v1499_v11 = vpop.f32.mrf.mxu2 }
 0x329   :  { %v1500_v4 = vadd.f32 %v1499_v11, %v1480_v9  ;;  %v1519_v54 = vpop.f32.mrf.mxu3  ;;  %v214_v9 = vand.u32 2147483647, %v7078_v27  ;;  %276 = vadd.xlane.f32.xlu0 %v275_v10 }
 0x32b   :  { %v1520_v23 = vadd.f32 %v1519_v54, %v1500_v4  ;;  %v266_v11 = vsel %vm13914_vm1, %v214_v9, 0.0  ;;  %v335_v4 = vsel %vm13914_vm1, %v237_v51, 0.0  ;;  %v165_v54 = vld [vmem:[%s13689_s4 + $0x8] sm:$0xff]  ;;  %v166_v9 = vld [vmem:[%s13689_s4 + $0x10] sm:$0xff]  ;;  %v167_v51 = vld [vmem:[%s13689_s4 + $0x18] sm:$0xff] }
 0x32c   :  { %267 = vadd.xlane.f32.xlu2 %v266_v11  ;;  %336 = vadd.xlane.f32.xlu1 %v335_v4  ;;  %v7084_v11 = vld [vmem:[%s13685_s0 + $0xa8] sm:$0xff] }
 0x32d   :  { %v1522_v43 = vmul.f32 0.020408163, %v1520_v23  ;;  %v215_v23 = vand.u32 2147483647, %v7081_v42  ;;  %v234_v10 = vand.u32 2147483647, %v7084_v11 }
 0x32e   :  { %v7085_v42 = vld [vmem:[%s13685_s0 + $0x140] sm:$0xff]  ;;  %v7088_v11 = vld [vmem:[%s13685_s0 + $0x178] sm:$0xff] }
 0x32f   :  { %1685 = vmatpush.msrb.mxu3 %v1522_v43  ;;  %v255_v43 = vand.u32 2147483647, %v7082_v31  ;;  %v326_v4 = vsel %vm13914_vm1, %v234_v10, 0.0  ;;  %v260_v10 = vand.u32 2147483647, %v7088_v11 }
 0x330   :  { %5784 = vmatmul.msk.f32.vlgmr.msrb.gmra.mxu3 %vm13946_vm2, %v164_v28  ;;  %v269_v28 = vsel %vm13914_vm1, %v215_v23, 0.0  ;;  %v253_v23 = vand.u32 2147483647, %v7085_v42 }
 0x331   :  { %270 = vadd.xlane.f32.xlu0 %v269_v28  ;;  %v389_v27 = vsel %vm13914_vm1, %v255_v43, 0.0  ;;  %v169_v43 = vld [vmem:[%s13689_s4 + $0x28] sm:$0xff]  ;;  %v404_v42 = vsel %vm13914_vm1, %v260_v10, 0.0  ;;  %v7093_v10 = vld [vmem:[%s13685_s0 + $0x120] sm:$0xff] }
 0x332   :  { %v383_v31 = vsel %vm13914_vm1, %v253_v23, 0.0  ;;  %v7086_v28 = vld [vmem:[%s13685_s0 + $0xe8] sm:$0xff] }
 0x334   :  { %390 = vadd.xlane.f32.xlu1 %v389_v27  ;;  %v242_v27 = vand.u32 2147483647, %v7086_v28 }
 0x336   :  { %v350_v50 = vsel %vm13914_vm1, %v242_v27, 0.0  ;;  %v7091_v27 = vld [vmem:[%s13685_s0 + $0x88] sm:$0xff] }
 0x338   :  { %5785 = vmatmul.msk.f32.gmra.mxu3 %vm13946_vm2, %v165_v54  ;;  %v168_v54 = vld [vmem:[%s13689_s4 + $0x20] sm:$0xff] }
 0x339   :  { %351 = vadd.xlane.f32.xlu0 %v350_v50 }
 0x33c   :  { %387 = vadd.xlane.f32.xlu1 %v386_v17 }
 0x340   :  { %5786 = vmatmul.msk.f32.gmra.mxu3 %vm13946_vm2, %v166_v9  ;;  %v7087_v9 = vld [vmem:[%s13685_s0 + $0xa0] sm:$0xff] }
 0x341   :  { %v233_v19 = vand.u32 2147483647, %v7087_v9  ;;  %405 = vadd.xlane.f32.xlu0 %v404_v42  ;;  %v230_v9 = vand.u32 2147483647, %v7091_v27 }
 0x343   :  { %v323_v17 = vsel %vm13914_vm1, %v233_v19, 0.0  ;;  %v314_v50 = vsel %vm13914_vm1, %v230_v9, 0.0 }
 0x344   :  { %327 = vadd.xlane.f32.xlu1 %v326_v4  ;;  %v7089_v4 = vld [vmem:[%s13685_s0 + $0x130] sm:$0xff] }
 0x348   :  { %5787 = vmatmul.msk.f32.gmra.mxu3 %vm13946_vm2, %v167_v51  ;;  %v170_v51 = vld [vmem:[%s13689_s4 + $0x30] sm:$0xff] }
 0x34c   :  { %384 = vadd.xlane.f32.xlu1 %v383_v31  ;;  %v171_v31 = vld [vmem:[%s13689_s4 + $0x38] sm:$0xff] }
 0x350   :  { %5788 = vmatmul.msk.f32.gmra.mxu3 %vm13946_vm2, %v168_v54  ;;  %v251_v54 = vand.u32 2147483647, %v7089_v4  ;;  %v249_v4 = vand.u32 2147483647, %v7093_v10  ;;  %v7097_v10 = vld [vmem:[%s13685_s0 + $0xe0] sm:$0xff] }
 0x352   :  { %v377_v23 = vsel %vm13914_vm1, %v251_v54, 0.0  ;;  %v371_v42 = vsel %vm13914_vm1, %v249_v4, 0.0  ;;  %v241_v4 = vand.u32 2147483647, %v7097_v10 }
 0x354   :  { %324 = vadd.xlane.f32.xlu1 %v323_v17  ;;  %v172_v17 = vld [vmem:[%s13689_s4 + $0x40] sm:$0xff] }
 0x358   :  { %5789 = vmatmul.msk.f32.gmra.mxu3 %vm13946_vm2, %v169_v43  ;;  %v7090_v43 = vld [vmem:[%s13685_s0 + $0xd0] sm:$0xff] }
 0x359   :  { %v239_v28 = vand.u32 2147483647, %v7090_v43 }
 0x35b   :  { %v341_v19 = vsel %vm13914_vm1, %v239_v28, 0.0  ;;  %v7095_v28 = vld [vmem:[%s13685_s0 + $0x110] sm:$0xff] }
 0x35c   :  { %378 = vadd.xlane.f32.xlu1 %v377_v23  ;;  %342 = vadd.xlane.f32.xlu0 %v341_v19  ;;  %v173_v23 = vld [vmem:[%s13689_s4 + $0x48] sm:$0xff]  ;;  %v247_v27 = vand.u32 2147483647, %v7095_v28  ;;  %v175_v28 = vld [vmem:[%s13689_s4 + $0x58] sm:$0xff] }
 0x35e   :  { %v365_v19 = vsel %vm13914_vm1, %v247_v27, 0.0 }
 0x360   :  { %5790 = vmatmul.msk.f32.gmra.mxu3 %vm13946_vm2, %v170_v51  ;;  %v7092_v51 = vld [vmem:[%s13685_s0 + $0x160] sm:$0xff] }
 0x361   :  { %v257_v11 = vand.u32 2147483647, %v7092_v51  ;;  %v7096_v51 = vld [vmem:[%s13685_s0 + $0xb0] sm:$0xff] }
 0x363   :  { %v395_v54 = vsel %vm13914_vm1, %v257_v11, 0.0  ;;  %v235_v11 = vand.u32 2147483647, %v7096_v51 }
 0x364   :  { %315 = vadd.xlane.f32.xlu1 %v314_v50  ;;  %396 = vadd.xlane.f32.xlu0 %v395_v54  ;;  %v174_v50 = vld [vmem:[%s13689_s4 + $0x50] sm:$0xff]  ;;  %v7098_v54 = vld [vmem:[%s13685_s0 + $0x100] sm:$0xff] }
 0x368   :  { %5791 = vmatmul.msk.f32.gmra.mxu3 %vm13946_vm2, %v171_v31  ;;  %v7094_v31 = vld [vmem:[%s13685_s0 + $0xb8] sm:$0xff] }
 0x369   :  { %v236_v43 = vand.u32 2147483647, %v7094_v31  ;;  %v347_v31 = vsel %vm13914_vm1, %v241_v4, 0.0  ;;  %v176_v4 = vld [vmem:[%s13689_s4 + $0x60] sm:$0xff] }
 0x36a   :  { %348 = vadd.xlane.f32.xlu2 %v347_v31 }
 0x36b   :  { %v332_v9 = vsel %vm13914_vm1, %v236_v43, 0.0 }
 0x36c   :  { %372 = vadd.xlane.f32.xlu1 %v371_v42  ;;  %333 = vadd.xlane.f32.xlu0 %v332_v9  ;;  %v245_v42 = vand.u32 2147483647, %v7098_v54  ;;  %v7099_v9 = vld [vmem:[%s13685_s0 + $0x98] sm:$0xff]  ;;  %v8968_v54 = vpop.xlane.xlu2 %306 }
 0x36d   :  { %14422 = vst [vmem:[#allocation118_spill] sm:$0xff] %v8968_v54 }
 0x36e   :  { %v359_v43 = vsel %vm13914_vm1, %v245_v42, 0.0 }
 0x370   :  { %5792 = vmatmul.msk.f32.gmra.mxu3 %vm13946_vm2, %v172_v17  ;;  %v8936_v17 = vpop.xlane.xlu1 %309 }
 0x371   :  { %14420 = vst [vmem:[#allocation116_spill] sm:$0xff] %v8936_v17 }
 0x374   :  { %366 = vadd.xlane.f32.xlu1 %v365_v19  ;;  %v232_v19 = vand.u32 2147483647, %v7099_v9 }
 0x378   :  { %5793 = vmatmul.msk.f32.gmra.mxu3 %vm13946_vm2, %v173_v23  ;;  %v329_v23 = vsel %vm13914_vm1, %v235_v11, 0.0  ;;  %v8954_v27 = vpop.xlane.xlu1 %300  ;;  %v320_v11 = vsel %vm13914_vm1, %v232_v19, 0.0  ;;  %v177_v19 = vld [vmem:[%s13689_s4 + $0x68] sm:$0xff] }
 0x379   :  { %330 = vadd.xlane.f32.xlu0 %v329_v23  ;;  %14421 = vst [vmem:[#allocation117_spill] sm:$0xff] %v8954_v27  ;;  %v7101_v23 = vld [vmem:[%s13685_s0 + $0x128] sm:$0xff]  ;;  %vm13935_vm15 = vcmp.eq.f32.partialorder %v8954_v27, 0.0 }
 0x37a   :  { %v250_v31 = vand.u32 2147483647, %v7101_v23 }
 0x37c   :  { %360 = vadd.xlane.f32.xlu1 %v359_v43  ;;  %v374_v43 = vsel %vm13914_vm1, %v250_v31, 0.0  ;;  %v7104_v31 = vld [vmem:[%s13685_s0 + $0x158] sm:$0xff] }
 0x380   :  { %5794 = vmatmul.msk.f32.gmra.mxu3 %vm13946_vm2, %v174_v50  ;;  %v7100_v50 = vld [vmem:[%s13685_s0 + $0x170] sm:$0xff]  ;;  %v8971_v42 = vpop.xlane.xlu1 %291 }
 0x381   :  { %v259_v51 = vand.u32 2147483647, %v7100_v50  ;;  %321 = vadd.xlane.f32.xlu0 %v320_v11  ;;  %14423 = vst [vmem:[#allocation119_spill] sm:$0xff] %v8971_v42  ;;  %v7103_v11 = vld [vmem:[%s13685_s0 + $0x80] sm:$0xff]  ;;  %vm13938_vm12 = vcmp.eq.f32.partialorder %v8971_v42, 0.0 }
 0x383   :  { %v401_v10 = vsel %vm13914_vm1, %v259_v51, 0.0  ;;  %v8985_v51 = vpop.xlane.xlu2 %297 }
 0x384   :  { %402 = vadd.xlane.f32.xlu2 %v401_v10  ;;  %14424 = vst [vmem:[#allocation120_spill] sm:$0xff] %v8985_v51  ;;  %v229_v10 = vand.u32 2147483647, %v7103_v11  ;;  %vm13936_vm14 = vcmp.eq.f32.partialorder %v8985_v51, 0.0 }
 0x386   :  { %v311_v23 = vsel %vm13914_vm1, %v229_v10, 0.0  ;;  %v7105_v10 = vld [vmem:[%s13685_s0 + $0x138] sm:$0xff] }
 0x388   :  { %5795 = vmatmul.msk.f32.gmra.mxu3 %vm13946_vm2, %v175_v28  ;;  %v7102_v28 = vld [vmem:[%s13685_s0 + $0xc8] sm:$0xff] }
 0x389   :  { %375 = vadd.xlane.f32.xlu0 %v374_v43  ;;  %v238_v9 = vand.u32 2147483647, %v7102_v28  ;;  %v256_v43 = vand.u32 2147483647, %v7104_v31  ;;  %v178_v28 = vld [vmem:[%s13689_s4 + $0x70] sm:$0xff]  ;;  %v179_v31 = vld [vmem:[%s13689_s4 + $0x78] sm:$0xff] }
 0x38b   :  { %v338_v50 = vsel %vm13914_vm1, %v238_v9, 0.0  ;;  %v392_v9 = vsel %vm13914_vm1, %v256_v43, 0.0  ;;  %v9003_v11 = vpop.xlane.xlu2 %288 }
 0x38c   :  { %339 = vadd.xlane.f32.xlu2 %v338_v50  ;;  %v9001_v50 = vpop.xlane.xlu0 %303  ;;  %14427 = vst [vmem:[#allocation123_spill] sm:$0xff] %v9003_v11  ;;  %vm13941_vm11 = vcmp.eq.f32.partialorder %v9003_v11, 0.0 }
 0x38d   :  { %14426 = vst [vmem:[#allocation122_spill] sm:$0xff] %v9001_v50  ;;  %vm13934_vm0 = vcmp.eq.f32.partialorder %v9001_v50, 0.0 }
 0x390   :  { %5796 = vmatmul.msk.f32.gmra.mxu3 %vm13946_vm2, %v176_v4  ;;  %v8990_v4 = vpop.xlane.xlu1 %282 }
 0x391   :  { %14425 = vst [vmem:[#allocation121_spill] sm:$0xff] %v8990_v4  ;;  %312 = vadd.xlane.f32.xlu0 %v311_v23  ;;  %v252_v23 = vand.u32 2147483647, %v7105_v10  ;;  %v180_v10 = vld [vmem:[%s13689_s4 + $0x80] sm:$0xff]  ;;  %vm13953_vm9 = vcmp.eq.f32.partialorder %v8990_v4, 0.0 }
 0x393   :  { %v9023_v38 = vpop.xlane.xlu2 %279 }
 0x394   :  { %393 = vadd.xlane.f32.xlu2 %v392_v9  ;;  %v380_v9 = vsel %vm13914_vm1, %v252_v23, 0.0  ;;  %14430 = vst [vmem:[#allocation126_spill] sm:$0xff] %v9023_v38  ;;  %vm13902_vm8 = vcmp.eq.f32.partialorder %v9023_v38, 0.0 }
 0x398   :  { %5797 = vmatmul.msk.f32.gmra.mxu3 %vm13946_vm2, %v177_v19  ;;  %v7464_v19 = vmov 0   ;;  %v9011_v43 = vpop.xlane.xlu1 %273 }
 0x399   :  { %6459 = vset.pattern.permute.xlu1 %v7464_v19  ;;  %6460 = vset.pattern.permute.xlu0 %v7464_v19  ;;  %14428 = vst [vmem:[#allocation124_spill] sm:$0xff] %v9011_v43  ;;  %vm13862_vm6 = vcmp.eq.f32.partialorder %v9011_v43, 0.0 }
 0x39a   :  { %6461 = vset.pattern.permute.xlu2 %v7464_v19  ;;  %v7106_v19 = vld [vmem:[%s13685_s0 + $0x90] sm:$0xff] }
 0x39b   :  { %v231_v30 = vand.u32 2147483647, %v7106_v19 }
 0x39c   :  { %381 = vadd.xlane.f32.xlu2 %v380_v9  ;;  %v7107_v9 = vld [vmem:[%s13685_s0 + $0x118] sm:$0xff] }
 0x39d   :  { %v317_v63 = vsel %vm13914_vm1, %v231_v30, 0.0  ;;  %v248_v19 = vand.u32 2147483647, %v7107_v9  ;;  %v7108_v9 = vld [vmem:[%s13685_s0 + $0x108] sm:$0xff] }
 0x39f   :  { %v368_v56 = vsel %vm13914_vm1, %v248_v19, 0.0  ;;  %v182_v19 = vld [vmem:[%s13689_s4 + $0x90] sm:$0xff] }
 0x3a0   :  { %5798 = vmatmul.msk.f32.gmra.mxu3 %vm13946_vm2, %v178_v28  ;;  %v9015_v28 = vpop.xlane.xlu0 %294  ;;  %v9026_v40 = vpop.xlane.xlu1 %354 }
 0x3a1   :  { %14429 = vst [vmem:[#allocation125_spill] sm:$0xff] %v9015_v28  ;;  %vm13937_vm13 = vcmp.eq.f32.partialorder %v9015_v28, 0.0 }
 0x3a2   :  { %14431 = vst [vmem:[#allocation127_spill] sm:$0xff] %v9026_v40 }
 0x3a4   :  { %318 = vadd.xlane.f32.xlu2 %v317_v63  ;;  %v9039_v63 = vpop.xlane.xlu2 %357 }
 0x3a5   :  { %14433 = vst [vmem:[#allocation129_spill] sm:$0xff] %v9039_v63 }
 0x3a8   :  { %5799 = vmatmul.msk.f32.gmra.mxu3 %vm13946_vm2, %v179_v31  ;;  %v9036_v44 = vpop.xlane.xlu0 %285 }
 0x3a9   :  { %14432 = vst [vmem:[#allocation128_spill] sm:$0xff] %v9036_v44  ;;  %vm13947_vm10 = vcmp.eq.f32.partialorder %v9036_v44, 0.0 }
 0x3ac   :  { %369 = vadd.xlane.f32.xlu2 %v368_v56 }
 0x3b0   :  { %5800 = vmatmul.msk.f32.gmra.mxu3 %vm13946_vm2, %v180_v10 }
 0x3b3   :  { %v1687_v23 = vpop.f32.mrf.mxu3 }
 0x3b4   :  { %v1834_v31 = vsub.f32 %v8741_v2, %v1687_v23  ;;  %v9042_v2 = vpop.xlane.xlu1 %264 }
 0x3b5   :  { %14434 = vst [vmem:[#allocation130_spill] sm:$0xff] %v9042_v2  ;;  %vm13819_vm3 = vcmp.eq.f32.partialorder %v9042_v2, 0.0 }
 0x3b6   :  { %v1883_v30 = vmul.f32 1.442695, %v1834_v31  ;;  %v246_v31 = vand.u32 2147483647, %v7108_v9  ;;  %v9061_v9 = vpop.xlane.xlu2 %267 }
 0x3b7   :  { %14437 = vst [vmem:[#allocation133_spill] sm:$0xff] %v9061_v9  ;;  %vm13823_vm4 = vcmp.eq.f32.partialorder %v9061_v9, 0.0 }
 0x3b8   :  { %6565 = vpow2.f32 %v1883_v30  ;;  %5801 = vmatmul.msk.f32.gmra.mxu3 %vm13946_vm2, %v181_v22  ;;  %v362_v22 = vsel %vm13914_vm1, %v246_v31, 0.0 }
 0x3b9   :  { %363 = vadd.xlane.f32.xlu2 %v362_v22  ;;  %v184_v22 = vld [vmem:[%s13689_s4 + $0xa0] sm:$0xff] }
 0x3bb   :  { %v1690_v10 = vpop.f32.mrf.mxu3 }
 0x3bc   :  { %v1835_v23 = vsub.f32 %v8733_v15, %v1690_v10  ;;  %v9058_v10 = vpop.xlane.xlu0 %276 }
 0x3bd   :  { %14436 = vst [vmem:[#allocation132_spill] sm:$0xff] %v9058_v10  ;;  %vm13898_vm7 = vcmp.eq.f32.partialorder %v9058_v10, 0.0 }
 0x3be   :  { %v9052_v56 = vpop.eup %6565  ;;  %v1885_v30 = vmul.f32 1.442695, %v1835_v23  ;;  %v183_v23 = vld [vmem:[%s13689_s4 + $0x98] sm:$0xff] }
 0x3bf   :  { %14435 = vst [vmem:[#allocation131_spill] sm:$0xff] %v9052_v56  ;;  %v1981_v15 = vsel %vm13819_vm3, 0.0, %v9052_v56  ;;  %vm13933_vm3 = vcmp.eq.f32.partialorder %v8968_v54, 0.0 }
 0x3c0   :  { %6567 = vpow2.f32 %v1885_v30  ;;  %5802 = vmatmul.msk.f32.gmra.mxu3 %vm13946_vm2, %v182_v19  ;;  %2032 = vperm.xlu1 %6459, %v1981_v15  }
 0x3c3   :  { %v1693_v36 = vpop.f32.mrf.mxu3 }
 0x3c4   :  { %v1836_v41 = vsub.f32 %v8725_v5, %v1693_v36  ;;  %v9074_v19 = vpop.xlane.xlu0 %270 }
 0x3c5   :  { %14439 = vst [vmem:[#allocation135_spill] sm:$0xff] %v9074_v19  ;;  %vm13858_vm5 = vcmp.eq.f32.partialorder %v9074_v19, 0.0 }
 0x3c6   :  { %v9068_v31 = vpop.eup %6567  ;;  %v1887_v56 = vmul.f32 1.442695, %v1836_v41 }
 0x3c7   :  { %14438 = vst [vmem:[#allocation134_spill] sm:$0xff] %v9068_v31  ;;  %v1982_v30 = vsel %vm13823_vm4, 0.0, %v9068_v31  ;;  %vm13932_vm4 = vcmp.eq.f32.partialorder %v8936_v17, 0.0 }
 0x3c8   :  { %6569 = vpow2.f32 %v1887_v56  ;;  %5803 = vmatmul.msk.f32.gmra.mxu3 %vm13946_vm2, %v183_v23  ;;  %2037 = vperm.xlu1 %6459, %v1982_v30   ;;  %v185_v30 = vld [vmem:[%s13689_s4 + $0xa8] sm:$0xff] }
 0x3cb   :  { %v1696_v36 = vpop.f32.mrf.mxu3 }
 0x3cc   :  { %v1837_v5 = vsub.f32 %v8678_v47, %v1696_v36 }
 0x3ce   :  { %v9081_v41 = vpop.eup %6569  ;;  %v1889_v15 = vmul.f32 1.442695, %v1837_v5 }
 0x3cf   :  { %14440 = vst [vmem:[#allocation136_spill] sm:$0xff] %v9081_v41  ;;  %v1983_v56 = vsel %vm13858_vm5, 0.0, %v9081_v41 }
 0x3d0   :  { %6571 = vpow2.f32 %v1889_v15  ;;  %5804 = vmatmul.msk.f32.gmra.mxu3 %vm13946_vm2, %v184_v22  ;;  %2042 = vperm.xlu0 %6460, %v1983_v56   ;;  %v186_v15 = vld [vmem:[%s13689_s4 + $0xb0] sm:$0xff] }
 0x3d3   :  { %v1699_v23 = vpop.f32.mrf.mxu3 }
 0x3d4   :  { %v1838_v47 = vsub.f32 %v8552_v48, %v1699_v23 }
 0x3d6   :  { %v9092_v36 = vpop.eup %6571  ;;  %v1891_v5 = vmul.f32 1.442695, %v1838_v47 }
 0x3d7   :  { %14441 = vst [vmem:[#allocation137_spill] sm:$0xff] %v9092_v36  ;;  %v1984_v2 = vsel %vm13862_vm6, 0.0, %v9092_v36 }
 0x3d8   :  { %6573 = vpow2.f32 %v1891_v5  ;;  %5805 = vmatmul.msk.f32.gmra.mxu3 %vm13946_vm2, %v185_v30  ;;  %2047 = vperm.xlu0 %6460, %v1984_v2   ;;  %v187_v30 = vld [vmem:[%s13689_s4 + $0xb8] sm:$0xff] }
 0x3db   :  { %v1702_v22 = vpop.f32.mrf.mxu3 }
 0x3dc   :  { %v1839_v48 = vsub.f32 %v8513_v13, %v1702_v22 }
 0x3de   :  { %v9103_v56 = vpop.eup %6573  ;;  %v1893_v23 = vmul.f32 1.442695, %v1839_v48 }
 0x3df   :  { %14442 = vst [vmem:[#allocation138_spill] sm:$0xff] %v9103_v56  ;;  %v1985_v47 = vsel %vm13898_vm7, 0.0, %v9103_v56 }
 0x3e0   :  { %6575 = vpow2.f32 %v1893_v23  ;;  %5806 = vmatmul.msk.f32.gmra.mxu3 %vm13946_vm2, %v186_v15  ;;  %2052 = vperm.xlu1 %6459, %v1985_v47   ;;  %v188_v23 = vld [vmem:[%s13689_s4 + $0xc0] sm:$0xff] }
 0x3e3   :  { %v1705_v2 = vpop.f32.mrf.mxu3 }
 0x3e4   :  { %v1840_v13 = vsub.f32 %v8485_v58, %v1705_v2 }
 0x3e6   :  { %v9114_v5 = vpop.eup %6575  ;;  %v1895_v22 = vmul.f32 1.442695, %v1840_v13 }
 0x3e7   :  { %14443 = vst [vmem:[#allocation139_spill] sm:$0xff] %v9114_v5  ;;  %v1986_v48 = vsel %vm13902_vm8, 0.0, %v9114_v5 }
 0x3e8   :  { %6577 = vpow2.f32 %v1895_v22  ;;  %5807 = vmatmul.msk.f32.gmra.mxu3 %vm13946_vm2, %v187_v30  ;;  %2057 = vperm.xlu0 %6460, %v1986_v48   ;;  %v189_v22 = vld [vmem:[%s13689_s4 + $0xc8] sm:$0xff] }
 0x3eb   :  { %v1708_v15 = vpop.f32.mrf.mxu3 }
 0x3ec   :  { %v1841_v58 = vsub.f32 %v8336_v35, %v1708_v15 }
 0x3ee   :  { %v9125_v47 = vpop.eup %6577  ;;  %v1897_v2 = vmul.f32 1.442695, %v1841_v58 }
 0x3ef   :  { %14444 = vst [vmem:[#allocation140_spill] sm:$0xff] %v9125_v47  ;;  %v1987_v13 = vsel %vm13953_vm9, 0.0, %v9125_v47  ;;  %v198_v47 = vld [vmem:[%s13689_s4 + $0x110] sm:$0xff] }
 0x3f0   :  { %6579 = vpow2.f32 %v1897_v2  ;;  %5808 = vmatmul.msk.f32.gmra.mxu3 %vm13946_vm2, %v188_v23  ;;  %2062 = vperm.xlu0 %6460, %v1987_v13   ;;  %v190_v2 = vld [vmem:[%s13689_s4 + $0xd0] sm:$0xff] }
 0x3f3   :  { %v1711_v30 = vpop.f32.mrf.mxu3 }
 0x3f4   :  { %v1842_v35 = vsub.f32 %v8327_v62, %v1711_v30 }
 0x3f6   :  { %v9136_v48 = vpop.eup %6579  ;;  %v1899_v15 = vmul.f32 1.442695, %v1842_v35 }
 0x3f7   :  { %14445 = vst [vmem:[#allocation141_spill] sm:$0xff] %v9136_v48  ;;  %v1988_v58 = vsel %vm13947_vm10, 0.0, %v9136_v48 }
 0x3f8   :  { %6581 = vpow2.f32 %v1899_v15  ;;  %5809 = vmatmul.msk.f32.gmra.mxu3 %vm13946_vm2, %v189_v22  ;;  %2067 = vperm.xlu0 %6460, %v1988_v58   ;;  %v9152_v15 = vpop.xlane.xlu1 %345  ;;  %v191_v58 = vld [vmem:[%s13689_s4 + $0xd8] sm:$0xff] }
 0x3f9   :  { %14447 = vst [vmem:[#allocation143_spill] sm:$0xff] %v9152_v15 }
 0x3fb   :  { %v1714_v23 = vpop.f32.mrf.mxu3 }
 0x3fc   :  { %v1843_v62 = vsub.f32 %v8319_v59, %v1714_v23 }
 0x3fe   :  { %v9147_v13 = vpop.eup %6581  ;;  %v1901_v30 = vmul.f32 1.442695, %v1843_v62 }
 0x3ff   :  { %14446 = vst [vmem:[#allocation142_spill] sm:$0xff] %v9147_v13  ;;  %v1989_v35 = vsel %vm13941_vm11, 0.0, %v9147_v13 }
 0x400   :  { %6583 = vpow2.f32 %v1901_v30  ;;  %5810 = vmatmul.msk.f32.gmra.mxu3 %vm13946_vm2, %v190_v2  ;;  %2072 = vperm.xlu2 %6461, %v1989_v35   ;;  %v9166_v2 = vpop.xlane.xlu1 %399  ;;  %v192_v35 = vld [vmem:[%s13689_s4 + $0xe0] sm:$0xff] }
 0x401   :  { %14449 = vst [vmem:[#allocation145_spill] sm:$0xff] %v9166_v2 }
 0x403   :  { %v1717_v22 = vpop.f32.mrf.mxu3 }
 0x404   :  { %v1844_v59 = vsub.f32 %v8309_v29, %v1717_v22 }
 0x406   :  { %v9160_v23 = vpop.eup %6583  ;;  %v1903_v62 = vmul.f32 1.442695, %v1844_v59 }
 0x407   :  { %14448 = vst [vmem:[#allocation144_spill] sm:$0xff] %v9160_v23  ;;  %v1990_v31 = vsel %vm13938_vm12, 0.0, %v9160_v23 }
 0x408   :  { %6585 = vpow2.f32 %v1903_v62  ;;  %5811 = vmatmul.msk.f32.gmra.mxu3 %vm13946_vm2, %v191_v58  ;;  %2077 = vperm.xlu1 %6459, %v1990_v31   ;;  %v9179_v31 = vpop.xlane.xlu0 %351 }
 0x409   :  { %14451 = vst [vmem:[#allocation147_spill] sm:$0xff] %v9179_v31 }
 0x40b   :  { %v1720_v30 = vpop.f32.mrf.mxu3 }
 0x40c   :  { %v1845_v29 = vsub.f32 %v8303_v3, %v1720_v30  ;;  %v9182_v3 = vpop.xlane.xlu1 %336 }
 0x40d   :  { %14452 = vst [vmem:[#allocation148_spill] sm:$0xff] %v9182_v3 }
 0x40e   :  { %v9173_v22 = vpop.eup %6585  ;;  %v1905_v59 = vmul.f32 1.442695, %v1845_v29  ;;  %v193_v29 = vld [vmem:[%s13689_s4 + $0xe8] sm:$0xff] }
 0x40f   :  { %14450 = vst [vmem:[#allocation146_spill] sm:$0xff] %v9173_v22  ;;  %v1991_v62 = vsel %vm13937_vm13, 0.0, %v9173_v22 }
 0x410   :  { %6587 = vpow2.f32 %v1905_v59  ;;  %5812 = vmatmul.msk.f32.gmra.mxu3 %vm13946_vm2, %v192_v35  ;;  %2082 = vperm.xlu0 %6460, %v1991_v62   ;;  %v9195_v62 = vpop.xlane.xlu0 %405 }
 0x411   :  { %14454 = vst [vmem:[#allocation150_spill] sm:$0xff] %v9195_v62 }
 0x413   :  { %v1723_v58 = vpop.f32.mrf.mxu3 }
 0x414   :  { %v1846_v30 = vsub.f32 %v8293_v6, %v1723_v58  ;;  %v194_v58 = vld [vmem:[%s13689_s4 + $0xf0] sm:$0xff]  ;;  %v9203_v19 = vpop.xlane.xlu1 %390 }
 0x415   :  { %14456 = vst [vmem:[#allocation152_spill] sm:$0xff] %v9203_v19 }
 0x416   :  { %v9188_v9 = vpop.eup %6587  ;;  %v1907_v41 = vmul.f32 1.442695, %v1846_v30 }
 0x417   :  { %14453 = vst [vmem:[#allocation149_spill] sm:$0xff] %v9188_v9  ;;  %v1992_v35 = vsel %vm13936_vm14, 0.0, %v9188_v9 }
 0x418   :  { %6589 = vpow2.f32 %v1907_v41  ;;  %5813 = vmatmul.msk.f32.gmra.mxu3 %vm13946_vm2, %v193_v29  ;;  %2087 = vperm.xlu2 %6461, %v1992_v35   ;;  %v195_v35 = vld [vmem:[%s13689_s4 + $0xf8] sm:$0xff] }
 0x41b   :  { %v1726_v59 = vpop.f32.mrf.mxu3 }
 0x41c   :  { %v1847_v6 = vsub.f32 %v8284_v55, %v1726_v59 }
 0x41e   :  { %v9201_v30 = vpop.eup %6589  ;;  %v1909_v36 = vmul.f32 1.442695, %v1847_v6  ;;  %v9216_v6 = vpop.xlane.xlu0 %342 }
 0x41f   :  { %14455 = vst [vmem:[#allocation151_spill] sm:$0xff] %v9201_v30  ;;  %v1993_v41 = vsel %vm13935_vm15, 0.0, %v9201_v30 }
 0x420   :  { %6591 = vpow2.f32 %v1909_v36  ;;  %5814 = vmatmul.msk.f32.gmra.mxu3 %vm13946_vm2, %v194_v58  ;;  %2092 = vperm.xlu1 %6459, %v1993_v41   ;;  %14458 = vst [vmem:[#allocation154_spill] sm:$0xff] %v9216_v6  ;;  %v9221_v58 = vpop.xlane.xlu1 %387 }
 0x421   :  { %14459 = vst [vmem:[#allocation155_spill] sm:$0xff] %v9221_v58 }
 0x423   :  { %v1729_v29 = vpop.f32.mrf.mxu3 }
 0x424   :  { %v1848_v55 = vsub.f32 %v8278_v34, %v1729_v29  ;;  %v9224_v34 = vpop.xlane.xlu2 %348 }
 0x425   :  { %14460 = vst [vmem:[#allocation156_spill] sm:$0xff] %v9224_v34 }
 0x426   :  { %v9214_v59 = vpop.eup %6591  ;;  %v1911_v43 = vmul.f32 1.442695, %v1848_v55  ;;  %v196_v55 = vld [vmem:[%s13689_s4 + $0x100] sm:$0xff] }
 0x427   :  { %14457 = vst [vmem:[#allocation153_spill] sm:$0xff] %v9214_v59  ;;  %v1994_v36 = vsel %vm13934_vm0, 0.0, %v9214_v59 }
 0x428   :  { %6593 = vpow2.f32 %v1911_v43  ;;  %5815 = vmatmul.msk.f32.gmra.mxu3 %vm13946_vm2, %v195_v35  ;;  %2097 = vperm.xlu2 %6461, %v1994_v36   ;;  %v9236_v35 = vpop.xlane.xlu0 %396  ;;  %v9239_v36 = vpop.xlane.xlu1 %327 }
 0x429   :  { %14462 = vst [vmem:[#allocation158_spill] sm:$0xff] %v9236_v35 }
 0x42a   :  { %14463 = vst [vmem:[#allocation159_spill] sm:$0xff] %v9239_v36 }
 0x42b   :  { %v1732_v41 = vpop.f32.mrf.mxu3 }
 0x42c   :  { %v1849_v29 = vsub.f32 %v8268_v21, %v1732_v41  ;;  %v9244_v41 = vpop.xlane.xlu2 %402 }
 0x42d   :  { %14464 = vst [vmem:[#allocation160_spill] sm:$0xff] %v9244_v41  ;;  %vm13901_vm7 = vcmp.eq.f32.partialorder %v9244_v41, 0.0 }
 0x42e   :  { %v9231_v56 = vpop.eup %6593  ;;  %v1913_v10 = vmul.f32 1.442695, %v1849_v29  ;;  %v197_v29 = vld [vmem:[%s13689_s4 + $0x108] sm:$0xff] }
 0x42f   :  { %14461 = vst [vmem:[#allocation157_spill] sm:$0xff] %v9231_v56  ;;  %v1995_v43 = vsel %vm13933_vm3, 0.0, %v9231_v56 }
 0x430   :  { %6595 = vpow2.f32 %v1913_v10  ;;  %5816 = vmatmul.msk.f32.gmra.mxu3 %vm13946_vm2, %v196_v55  ;;  %2102 = vperm.xlu0 %6460, %v1995_v43   ;;  %v9255_v55 = vpop.xlane.xlu0 %333  ;;  %v9259_v38 = vpop.xlane.xlu1 %384 }
 0x431   :  { %14466 = vst [vmem:[#allocation162_spill] sm:$0xff] %v9255_v55  ;;  %vm13871_vm6 = vcmp.eq.f32.partialorder %v9255_v55, 0.0 }
 0x432   :  { %14467 = vst [vmem:[#allocation163_spill] sm:$0xff] %v9259_v38 }
 0x433   :  { %v9241_v21 = vpop.f32.mrf.mxu3 }
 0x434   :  { %v9264_v4 = vpop.xlane.xlu2 %339 }
 0x435   :  { %14468 = vst [vmem:[#allocation164_spill] sm:$0xff] %v9264_v4 }
 0x436   :  { %v9249_v5 = vpop.eup %6595 }
 0x437   :  { %14465 = vst [vmem:[#allocation161_spill] sm:$0xff] %v9249_v5  ;;  %v1996_v10 = vsel %vm13932_vm4, 0.0, %v9249_v5 }
 0x438   :  { %5817 = vmatmul.msk.f32.gmra.mxu3 %vm13946_vm2, %v197_v29  ;;  %2107 = vperm.xlu2 %6461, %v1996_v10   ;;  %v9269_v44 = vpop.xlane.xlu0 %330  ;;  %v199_v29 = vld [vmem:[%s13689_s4 + $0x118] sm:$0xff]  ;;  %v9274_v10 = vpop.xlane.xlu1 %324 }
 0x439   :  { %14469 = vst [vmem:[#allocation165_spill] sm:$0xff] %v9269_v44  ;;  %vm13865_vm5 = vcmp.eq.f32.partialorder %v9269_v44, 0.0  ;;  %vm13907_vm8 = vcmp.eq.f32.partialorder %v9274_v10, 0.0 }
 0x43a   :  { %14470 = vst [vmem:[#allocation166_spill] sm:$0xff] %v9274_v10 }
 0x43b   :  { %v9257_v43 = vpop.f32.mrf.mxu3 }
 0x43c   :  { %v9276_v13 = vpop.xlane.xlu2 %393 }
 0x43d   :  { %14471 = vst [vmem:[#allocation167_spill] sm:$0xff] %v9276_v13 }
 0x440   :  { %5818 = vmatmul.msk.f32.gmra.mxu3 %vm13946_vm2, %v198_v47  ;;  %v200_v47 = vld [vmem:[%s13689_s4 + $0x120] sm:$0xff]  ;;  %v9284_v23 = vpop.xlane.xlu0 %321  ;;  %v9286_v42 = vpop.xlane.xlu1 %378 }
 0x441   :  { %14472 = vst [vmem:[#allocation168_spill] sm:$0xff] %v9284_v23 }
 0x442   :  { %14473 = vst [vmem:[#allocation169_spill] sm:$0xff] %v9286_v42 }
 0x443   :  { %v9267_v48 = vpop.f32.mrf.mxu3 }
 0x444   :  { %v9289_v22 = vpop.xlane.xlu2 %381 }
 0x445   :  { %14474 = vst [vmem:[#allocation170_spill] sm:$0xff] %v9289_v22 }
 0x448   :  { %5819 = vmatmul.msk.f32.gmra.mxu3 %vm13946_vm2, %v199_v29  ;;  %v201_v29 = vld [vmem:[%s13689_s4 + $0x128] sm:$0xff]  ;;  %v9296_v9 = vpop.xlane.xlu0 %375  ;;  %v9299_v51 = vpop.xlane.xlu1 %315 }
 0x449   :  { %14475 = vst [vmem:[#allocation171_spill] sm:$0xff] %v9296_v9 }
 0x44a   :  { %14476 = vst [vmem:[#allocation172_spill] sm:$0xff] %v9299_v51 }
 0x44b   :  { %v9279_v11 = vpop.f32.mrf.mxu3 }
 0x44c   :  { %v9303_v27 = vpop.xlane.xlu2 %318 }
 0x44d   :  { %14477 = vst [vmem:[#allocation173_spill] sm:$0xff] %v9303_v27 }
 0x450   :  { %5820 = vmatmul.msk.f32.gmra.mxu3 %vm13946_vm2, %v200_v47  ;;  %v202_v47 = vld [vmem:[%s13689_s4 + $0x130] sm:$0xff]  ;;  %v9309_v59 = vpop.xlane.xlu0 %312  ;;  %v9311_v56 = vpop.xlane.xlu1 %372 }
 0x451   :  { %14478 = vst [vmem:[#allocation174_spill] sm:$0xff] %v9309_v59 }
 0x452   :  { %14479 = vst [vmem:[#allocation175_spill] sm:$0xff] %v9311_v56 }
 0x453   :  { %v9291_v28 = vpop.f32.mrf.mxu3 }
 0x454   :  { %v9317_v5 = vpop.xlane.xlu2 %369 }
 0x455   :  { %14480 = vst [vmem:[#allocation176_spill] sm:$0xff] %v9317_v5 }
 0x458   :  { %5821 = vmatmul.msk.f32.gmra.mxu3 %vm13946_vm2, %v201_v29  ;;  %v203_v29 = vld [vmem:[%s13689_s4 + $0x138] sm:$0xff]  ;;  %v9329_v56 = vpop.xlane.xlu1 %366 }
 0x459   :  { %14482 = vst [vmem:[#allocation178_spill] sm:$0xff] %v9329_v56 }
 0x45b   :  { %v9301_v30 = vpop.f32.mrf.mxu3 }
 0x460   :  { %5822 = vmatmul.msk.f32.gmra.mxu3 %vm13946_vm2, %v202_v47  ;;  %v9321_v47 = vpop.permute.xlu0 %2042 }
 0x463   :  { %v1753_v50 = vpop.f32.mrf.mxu3 }
 0x464   :  { %v1856_v54 = vsub.f32 %v8609_v39, %v1753_v50  ;;  %v204_v39 = vld [vmem:[%s13689_s4 + $0x140] sm:$0xff] }
 0x466   :  { %v1927_v17 = vmul.f32 1.442695, %v1856_v54  ;;  %v9334_v54 = vpop.xlane.xlu2 %363 }
 0x467   :  { %14483 = vst [vmem:[#allocation179_spill] sm:$0xff] %v9334_v54 }
 0x468   :  { %6597 = vpow2.f32 %v1927_v17  ;;  %5823 = vmatmul.msk.f32.gmra.mxu3 %vm13946_vm2, %v203_v29  ;;  %v205_v29 = vld [vmem:[%s13689_s4 + $0x148] sm:$0xff]  ;;  %v9344_v56 = vpop.permute.xlu0 %2047 }
 0x46b   :  { %v1756_v51 = vpop.f32.mrf.mxu3 }
 0x46c   :  { %v1857_v59 = vsub.f32 %v8602_v8, %v1756_v51 }
 0x46e   :  { %v9327_v50 = vpop.eup %6597  ;;  %v1929_v5 = vmul.f32 1.442695, %v1857_v59 }
 0x46f   :  { %14481 = vst [vmem:[#allocation177_spill] sm:$0xff] %v9327_v50  ;;  %v2003_v17 = vsel %vm13865_vm5, 0.0, %v9327_v50  ;;  %vm13876_vm5 = vcmp.eq.f32.partialorder %v9182_v3, 0.0 }
 0x470   :  { %6599 = vpow2.f32 %v1929_v5  ;;  %5824 = vmatmul.msk.f32.gmra.mxu3 %vm13946_vm2, %v204_v39  ;;  %2142 = vperm.xlu2 %6461, %v2003_v17   ;;  %v9349_v39 = vpop.xlane.xlu1 %360 }
 0x471   :  { %14485 = vst [vmem:[#allocation181_spill] sm:$0xff] %v9349_v39 }
 0x473   :  { %v1759_v8 = vpop.f32.mrf.mxu3 }
 0x474   :  { %v1858_v51 = vsub.f32 %v8591_v18, %v1759_v8  ;;  %v9352_v18 = vpop.permute.xlu2 %2072 }
 0x476   :  { %v9342_v59 = vpop.eup %6599  ;;  %v1931_v50 = vmul.f32 1.442695, %v1858_v51  ;;  %v206_v51 = vld [vmem:[%s13689_s4 + $0x150] sm:$0xff] }
 0x477   :  { %14484 = vst [vmem:[#allocation180_spill] sm:$0xff] %v9342_v59  ;;  %v2004_v5 = vsel %vm13871_vm6, 0.0, %v9342_v59  ;;  %v9361_v59 = vpop.permute.xlu0 %2057  ;;  %vm13881_vm6 = vcmp.eq.f32.partialorder %v9264_v4, 0.0 }
 0x478   :  { %6601 = vpow2.f32 %v1931_v50  ;;  %5825 = vmatmul.msk.f32.gmra.mxu3 %vm13946_vm2, %v205_v29  ;;  %2147 = vperm.xlu0 %6460, %v2004_v5   ;;  %v9367_v29 = vpop.permute.xlu1 %2032 }
 0x47b   :  { %v1762_v17 = vpop.f32.mrf.mxu3 }
 0x47c   :  { %v1859_v8 = vsub.f32 %v8583_v52, %v1762_v17  ;;  %v9369_v52 = vpop.permute.xlu2 %2087 }
 0x47e   :  { %v9359_v44 = vpop.eup %6601  ;;  %v1933_v55 = vmul.f32 1.442695, %v1859_v8  ;;  %v207_v8 = vld [vmem:[%s13689_s4 + $0x158] sm:$0xff] }
 0x47f   :  { %14486 = vst [vmem:[#allocation182_spill] sm:$0xff] %v9359_v44  ;;  %v2005_v50 = vsel %vm13876_vm5, 0.0, %v9359_v44  ;;  %vm13883_vm5 = vcmp.eq.f32.partialorder %v9216_v6, 0.0 }
 0x480   :  { %6603 = vpow2.f32 %v1933_v55  ;;  %5826 = vmatmul.msk.f32.gmra.mxu3 %vm13946_vm2, %v206_v51  ;;  %2152 = vperm.xlu1 %6459, %v2005_v50   ;;  %v9381_v51 = vpop.permute.xlu0 %2062 }
 0x483   :  { %v1765_v5 = vpop.f32.mrf.mxu3 }
 0x484   :  { %v1860_v17 = vsub.f32 %v8571_v32, %v1765_v5  ;;  %v2098_v50 = vpop.permute.xlu2 %2097  ;;  %v9385_v32 = vpop.permute.xlu1 %2037 }
 0x486   :  { %v9376_v39 = vpop.eup %6603  ;;  %v1935_v44 = vmul.f32 1.442695, %v1860_v17  ;;  %v208_v17 = vld [vmem:[%s13689_s4 + $0x160] sm:$0xff] }
 0x487   :  { %14487 = vst [vmem:[#allocation183_spill] sm:$0xff] %v9376_v39  ;;  %v2006_v55 = vsel %vm13881_vm6, 0.0, %v9376_v39  ;;  %vm13887_vm6 = vcmp.eq.f32.partialorder %v9152_v15, 0.0  ;;  %v211_v15 = vld [vmem:[%s13689_s4 + $0x178] sm:$0xff] }
 0x488   :  { %6605 = vpow2.f32 %v1935_v44  ;;  %5827 = vmatmul.msk.f32.gmra.mxu3 %vm13946_vm2, %v207_v8  ;;  %2157 = vperm.xlu2 %6461, %v2006_v55   ;;  %v9397_v8 = vpop.permute.xlu0 %2067 }
 0x48b   :  { %v1768_v3 = vpop.f32.mrf.mxu3 }
 0x48c   :  { %v1861_v5 = vsub.f32 %v8559_v25, %v1768_v3  ;;  %v9401_v3 = vpop.permute.xlu1 %2052 }
 0x48e   :  { %v9391_v4 = vpop.eup %6605  ;;  %v1937_v39 = vmul.f32 1.442695, %v1861_v5 }
 0x48f   :  { %14488 = vst [vmem:[#allocation184_spill] sm:$0xff] %v9391_v4  ;;  %v2007_v44 = vsel %vm13883_vm5, 0.0, %v9391_v4  ;;  %vm13890_vm5 = vcmp.eq.f32.partialorder %v9224_v34, 0.0 }
 0x490   :  { %6607 = vpow2.f32 %v1937_v39  ;;  %5828 = vmatmul.msk.f32.gmra.mxu3 %vm13946_vm2, %v208_v17  ;;  %2162 = vperm.xlu0 %6460, %v2007_v44   ;;  %v209_v39 = vld [vmem:[%s13689_s4 + $0x168] sm:$0xff] }
 0x492   :  { %v2108_v55 = vpop.permute.xlu2 %2107 }
 0x493   :  { %v1771_v54 = vpop.f32.mrf.mxu3  ;;  %v2290_v25 = vmul.f32 %v2108_v55, %v7933_v37  ;;  %v2083_v37 = vpop.permute.xlu0 %2082 }
 0x494   :  { %v1862_v5 = vsub.f32 %v8546_v20, %v1771_v54  ;;  %v2078_v20 = vpop.permute.xlu1 %2077 }
 0x495   :  { %2324 = vmatpush.msrb.mxu2 %v2290_v25  ;;  %v210_v25 = vld [vmem:[%s13689_s4 + $0x170] sm:$0xff] }
 0x496   :  { %v9407_v4 = vpop.eup %6607  ;;  %v1939_v17 = vmul.f32 1.442695, %v1862_v5 }
 0x497   :  { %14489 = vst [vmem:[#allocation185_spill] sm:$0xff] %v9407_v4  ;;  %v2008_v44 = vsel %vm13887_vm6, 0.0, %v9407_v4  ;;  %vm13891_vm6 = vcmp.eq.f32.partialorder %v9179_v31, 0.0 }
 0x498   :  { %6609 = vpow2.f32 %v1939_v17  ;;  %5829 = vmatmul.msk.f32.gmra.mxu3 %vm13946_vm2, %v209_v39  ;;  %2167 = vperm.xlu1 %6459, %v2008_v44  }
 0x49b   :  { %v1774_v55 = vpop.f32.mrf.mxu3 }
 0x49c   :  { %v1863_v54 = vsub.f32 %v8538_v16, %v1774_v55  ;;  %v2093_v16 = vpop.permute.xlu1 %2092 }
 0x49e   :  { %v9418_v5 = vpop.eup %6609  ;;  %v1941_v6 = vmul.f32 1.442695, %v1863_v54  ;;  %v2288_v54 = vmul.f32 %v2098_v50, %v7897_v12  ;;  %v2286_v12 = vmul.f32 %v9369_v52, %v7861_v46  ;;  %v2281_v52 = vmul.f32 %v9381_v51, %v7770_v1 }
 0x49f   :  { %v2009_v17 = vsel %vm13890_vm5, 0.0, %v9418_v5  ;;  %vm13892_vm5 = vcmp.eq.f32.partialorder %v9026_v40, 0.0  ;;  %v2278_v1 = vmul.f32 %v9344_v56, %v7734_v53 }
 0x4a0   :  { %6611 = vpow2.f32 %v1941_v6  ;;  %5830 = vmatmul.msk.f32.gmra.mxu3 %vm13946_vm2, %v210_v25  ;;  %2172 = vperm.xlu2 %6461, %v2009_v17   ;;  %v2287_v17 = vmul.f32 %v2093_v16, %v7879_v0  ;;  %v212_v0 = vld [vmem:[%s13689_s4 + $0x180] sm:$0xff] }
 0x4a2   :  { %v2103_v39 = vpop.permute.xlu0 %2102 }
 0x4a3   :  { %v1777_v44 = vpop.f32.mrf.mxu3  ;;  %v2289_v4 = vmul.f32 %v2103_v39, %v7915_v26  ;;  %v2284_v39 = vmul.f32 %v2078_v20, %v7825_v24  ;;  %v14491_v20 = vld [vmem:[#allocation9_spill] sm:$0xff] }
 0x4a4   :  { %v1864_v55 = vsub.f32 %v8527_v60, %v1777_v44  ;;  %v2275_v16 = vmul.f32 %v9367_v29, %v14491_v20 }
 0x4a5   :  { %2325 = vmatpush.msrb.mxu2 %v2289_v4  ;;  %v2285_v4 = vmul.f32 %v2083_v37, %v7843_v33  ;;  %v2283_v33 = vmul.f32 %v9352_v18, %v7802_v14  ;;  %v2280_v14 = vmul.f32 %v9361_v59, %v7758_v61  ;;  %v2277_v61 = vmul.f32 %v9321_v47, %v7722_v49  ;;  %v14490_v59 = vld [vmem:[#allocation10_spill] sm:$0xff] }
 0x4a6   :  { %v9431_v6 = vpop.eup %6611  ;;  %v1943_v25 = vmul.f32 1.442695, %v1864_v55 }
 0x4a7   :  { %2326 = vmatpush.msrb.mxu2 %v2288_v54  ;;  %v2010_v26 = vsel %vm13891_vm6, 0.0, %v9431_v6  ;;  %vm13893_vm6 = vcmp.eq.f32.partialorder %v9039_v63, 0.0 }
 0x4a8   :  { %6613 = vpow2.f32 %v1943_v25  ;;  %5831 = vmatmul.msk.f32.gmra.mxu3 %vm13946_vm2, %v211_v15  ;;  %2177 = vperm.xlu0 %6460, %v2010_v26  }
 0x4a9   :  { %2327 = vmatpush.msrb.mxu2 %v2287_v17  ;;  %v14492_v17 = vld [vmem:[#allocation104_spill] sm:$0xff] }
 0x4ab   :  { %v1780_v60 = vpop.f32.mrf.mxu3  ;;  %2328 = vmatpush.msrb.mxu2 %v2286_v12 }
 0x4ac   :  { %v1865_v50 = vsub.f32 %v8521_v45, %v1780_v60  ;;  %v2282_v45 = vmul.f32 %v9397_v8, %v7785_v7  ;;  %v2279_v7 = vmul.f32 %v9401_v3, %v7746_v57  ;;  %v2276_v8 = vmul.f32 %v9385_v32, %v14490_v59  ;;  %v9484_v57 = vld [vmem:[%s13688_s3] sm:$0xff] }
 0x4ad   :  { %2329 = vmatpush.msrb.mxu2 %v2285_v4 }
 0x4ae   :  { %v9447_v15 = vpop.eup %6613  ;;  %v1945_v44 = vmul.f32 1.442695, %v1865_v50 }
 0x4af   :  { %2330 = vmatpush.msrb.mxu2 %v2284_v39  ;;  %v2011_v46 = vsel %vm13892_vm5, 0.0, %v9447_v15  ;;  %vm13894_vm5 = vcmp.eq.f32.partialorder %v9203_v19, 0.0 }
 0x4b0   :  { %6615 = vpow2.f32 %v1945_v44  ;;  %5832 = vmatmul.msk.f32.gmra.mxu3 %vm13946_vm2, %v212_v0  ;;  %2182 = vperm.xlu0 %6460, %v2011_v46   ;;  %v14493_v0 = vld [vmem:[#allocation103_spill] sm:$0xff] }
 0x4b1   :  { %2331 = vmatpush.msrb.mxu2 %v2283_v33 }
 0x4b3   :  { %v9457_v24 = vpop.f32.mrf.mxu3  ;;  %2332 = vmatpush.msrb.mxu2 %v2282_v45 }
 0x4b5   :  { %2333 = vmatpush.msrb.mxu2 %v2281_v52 }
 0x4b6   :  { %v9464_v18 = vpop.eup %6615 }
 0x4b7   :  { %2334 = vmatpush.msrb.mxu2 %v2280_v14  ;;  %v2012_v37 = vsel %vm13893_vm6, 0.0, %v9464_v18  ;;  %vm13895_vm6 = vcmp.eq.f32.partialorder %v9276_v13, 0.0 }
 0x4b8   :  { %2187 = vperm.xlu2 %6461, %v2012_v37   ;;  %v14495_v37 = vld [vmem:[#allocation52_spill] sm:$0xff] }
 0x4b9   :  { %2335 = vmatpush.msrb.mxu2 %v2279_v7 }
 0x4bb   :  { %v9473_v51 = vpop.f32.mrf.mxu3  ;;  %2336 = vmatpush.msrb.mxu2 %v2278_v1 }
 0x4bd   :  { %2337 = vmatpush.msrb.mxu2 %v2277_v61  ;;  %v14496_v61 = vld [vmem:[#allocation101_spill] sm:$0xff] }
 0x4bf   :  { %2338 = vmatpush.msrb.mxu2 %v2276_v8 }
 0x4c1   :  { %2339 = vmatpush.msrb.mxu2 %v2275_v16 }
 0x4c2   :  { %2340 = vmatmul.f32.vlgmr.msrb.gmra.mxu2 %v9484_v57 }
 0x4c3   :  { %v9487_v53 = vpop.f32.mrf.mxu3 }
 0x4ca   :  { %v9501_v55 = vpop.permute.xlu2 %2142 }
 0x4cb   :  { %v9489_v56 = vpop.f32.mrf.mxu3 }
 0x4d3   :  { %v9491_v49 = vpop.f32.mrf.mxu3 }
 0x4db   :  { %v9493_v47 = vpop.f32.mrf.mxu3 }
 0x4e2   :  { %v9503_v25 = vpop.permute.xlu2 %2157 }
 0x4e3   :  { %v9495_v32 = vpop.f32.mrf.mxu3 }
 0x4ea   :  { %v9506_v4 = vpop.permute.xlu0 %2147 }
 0x4eb   :  { %v9497_v3 = vpop.f32.mrf.mxu3 }
 0x4f3   :  { %v9499_v29 = vpop.f32.mrf.mxu3 }
 0x4fa   :  { %v2173_v50 = vpop.permute.xlu2 %2172 }
 0x4fb   :  { %v1810_v54 = vpop.f32.mrf.mxu3 }
 0x502   :  { %v2163_v52 = vpop.permute.xlu0 %2162 }
 0x503   :  { %v1813_v26 = vpop.f32.mrf.mxu3 }
 0x504   :  { %v1876_v12 = vsub.f32 %v14492_v17, %v1813_v26 }
 0x506   :  { %v1967_v60 = vmul.f32 1.442695, %v1876_v12  ;;  %v14497_v12 = vld [vmem:[#allocation100_spill] sm:$0xff] }
 0x508   :  { %6617 = vpow2.f32 %v1967_v60 }
 0x50b   :  { %v1816_v39 = vpop.f32.mrf.mxu3 }
 0x50c   :  { %v1877_v44 = vsub.f32 %v14493_v0, %v1816_v39  ;;  %v2153_v0 = vpop.permute.xlu1 %2152 }
 0x50e   :  { %v9510_v46 = vpop.eup %6617  ;;  %v1969_v33 = vmul.f32 1.442695, %v1877_v44  ;;  %v14498_v44 = vld [vmem:[#allocation105_spill] sm:$0xff] }
 0x50f   :  { %14494 = vst [vmem:[#allocation10_spill] sm:$0xff] %v9510_v46  ;;  %v2023_v45 = vsel %vm13894_vm5, 0.0, %v9510_v46  ;;  %vm13897_vm5 = vcmp.eq.f32.partialorder %v9236_v35, 0.0 }
 0x510   :  { %6619 = vpow2.f32 %v1969_v33  ;;  %2242 = vperm.xlu1 %6459, %v2023_v45   ;;  %v1875_v33 = vsub.f32 %v14498_v44, %v1810_v54 }
 0x512   :  { %v2188_v14 = vpop.permute.xlu2 %2187 }
 0x513   :  { %v2306_v7 = vmul.f32 %v2188_v14, %v14495_v37  ;;  %v1819_v1 = vpop.f32.mrf.mxu3  ;;  %v1965_v37 = vmul.f32 1.442695, %v1875_v33  ;;  %v14503_v33 = vld [vmem:[#allocation106_spill] sm:$0xff] }
 0x514   :  { %v1878_v59 = vsub.f32 %v14496_v61, %v1819_v1  ;;  %v14499_v1 = vld [vmem:[#allocation49_spill] sm:$0xff]  ;;  %v1874_v46 = vsub.f32 %v14503_v33, %v9499_v29  ;;  %v14507_v29 = vld [vmem:[#allocation98_spill] sm:$0xff] }
 0x515   :  { %2344 = vmatpush.msra.mxu2 %v2306_v7 }
 0x516   :  { %v9518_v8 = vpop.eup %6619  ;;  %v1971_v20 = vmul.f32 1.442695, %v1878_v59 }
 0x517   :  { %v2024_v16 = vsel %vm13895_vm6, 0.0, %v9518_v8  ;;  %vm13899_vm6 = vcmp.eq.f32.partialorder %v9166_v2, 0.0 }
 0x518   :  { %6621 = vpow2.f32 %v1971_v20  ;;  %2247 = vperm.xlu2 %6461, %v2024_v16   ;;  %v14500_v20 = vld [vmem:[#allocation99_spill] sm:$0xff] }
 0x51a   :  { %v2178_v26 = vpop.permute.xlu0 %2177 }
 0x51b   :  { %v1822_v17 = vpop.f32.mrf.mxu3 }
 0x51c   :  { %v1879_v60 = vsub.f32 %v14497_v12, %v1822_v17  ;;  %v14501_v17 = vld [vmem:[#allocation46_spill] sm:$0xff] }
 0x51d   :  { %v2304_v12 = vmul.f32 %v2178_v26, %v14501_v17  ;;  %v14505_v26 = vld [vmem:[#allocation41_spill] sm:$0xff] }
 0x51e   :  { %v9524_v39 = vpop.eup %6621  ;;  %v1973_v45 = vmul.f32 1.442695, %v1879_v60  ;;  %v14502_v60 = vld [vmem:[#allocation91_spill] sm:$0xff] }
 0x51f   :  { %v2025_v14 = vsel %vm13897_vm5, 0.0, %v9524_v39  ;;  %v1855_v44 = vsub.f32 %v14502_v60, %v9301_v30  ;;  %v1963_v30 = vmul.f32 1.442695, %v1874_v46  ;;  %vm13900_vm5 = vcmp.eq.f32.partialorder %v9221_v58, 0.0  ;;  %v14509_v46 = vld [vmem:[#allocation92_spill] sm:$0xff] }
 0x520   :  { %6623 = vpow2.f32 %v1973_v45  ;;  %2252 = vperm.xlu0 %6460, %v2025_v14   ;;  %v2168_v45 = vpop.permute.xlu1 %2167 }
 0x521   :  { %6625 = vpow2.f32 %v1965_v37  ;;  %v14506_v37 = vld [vmem:[#allocation39_spill] sm:$0xff] }
 0x522   :  { %v2183_v7 = vpop.permute.xlu0 %2182  ;;  %v2301_v17 = vmul.f32 %v2163_v52, %v14506_v37  ;;  %v14510_v52 = vld [vmem:[#allocation107_spill] sm:$0xff] }
 0x523   :  { %v2305_v61 = vmul.f32 %v2183_v7, %v14499_v1  ;;  %v1825_v59 = vpop.f32.mrf.mxu3  ;;  %v14504_v7 = vld [vmem:[#allocation44_spill] sm:$0xff]  ;;  %v1873_v33 = vsub.f32 %v14510_v52, %v9497_v3 }
 0x524   :  { %v1880_v16 = vsub.f32 %v14500_v20, %v1825_v59  ;;  %v2303_v1 = vmul.f32 %v2173_v50, %v14504_v7  ;;  %v1925_v20 = vmul.f32 1.442695, %v1855_v44  ;;  %v1854_v44 = vsub.f32 %v14509_v46, %v9291_v28  ;;  %v14512_v28 = vld [vmem:[#allocation33_spill] sm:$0xff] }
 0x525   :  { %2345 = vmatpush.msra.mxu2 %v2305_v61  ;;  %v2302_v61 = vmul.f32 %v2168_v45, %v14505_v26 }
 0x526   :  { %v9535_v54 = vpop.eup %6623  ;;  %v1975_v14 = vmul.f32 1.442695, %v1880_v16  ;;  %v1923_v3 = vmul.f32 1.442695, %v1854_v44 }
 0x527   :  { %2346 = vmatpush.msra.mxu2 %v2304_v12  ;;  %v2026_v59 = vsel %vm13899_vm6, 0.0, %v9535_v54  ;;  %v9547_v60 = vpop.eup %6625  ;;  %v14508_v12 = vld [vmem:[#allocation37_spill] sm:$0xff]  ;;  %vm13905_vm6 = vcmp.eq.f32.partialorder %v9239_v36, 0.0 }
 0x528   :  { %6627 = vpow2.f32 %v1975_v14  ;;  %2257 = vperm.xlu1 %6459, %v2026_v59   ;;  %v2300_v14 = vmul.f32 %v9503_v25, %v14508_v12  ;;  %v2022_v25 = vsel %vm13900_vm5, 0.0, %v9547_v60  ;;  %vm13904_vm5 = vcmp.eq.f32.partialorder %v9259_v38, 0.0 }
 0x529   :  { %2347 = vmatpush.msra.mxu2 %v2303_v1  ;;  %6629 = vpow2.f32 %v1925_v20  ;;  %v14511_v1 = vld [vmem:[#allocation35_spill] sm:$0xff] }
 0x52a   :  { %v2299_v59 = vmul.f32 %v2153_v0, %v14511_v1  ;;  %6631 = vpow2.f32 %v1963_v30  ;;  %v14513_v20 = vld [vmem:[#allocation31_spill] sm:$0xff]  ;;  %v1961_v30 = vmul.f32 1.442695, %v1873_v33  ;;  %v14516_v33 = vld [vmem:[#allocation96_spill] sm:$0xff]  ;;  %v14517_v1 = vld [vmem:[#allocation109_spill] sm:$0xff] }
 0x52b   :  { %v1828_v16 = vpop.f32.mrf.mxu3  ;;  %2348 = vmatpush.msra.mxu2 %v2302_v61  ;;  %v2298_v61 = vmul.f32 %v9506_v4, %v14512_v28  ;;  %v2297_v0 = vmul.f32 %v9501_v55, %v14513_v20  ;;  %v14514_v4 = vld [vmem:[#allocation95_spill] sm:$0xff]  ;;  %v14515_v55 = vld [vmem:[#allocation108_spill] sm:$0xff] }
 0x52c   :  { %v1881_v50 = vsub.f32 %v14507_v29, %v1828_v16  ;;  %v1853_v29 = vsub.f32 %v14514_v4, %v9279_v11 }
 0x52d   :  { %2349 = vmatpush.msra.mxu2 %v2301_v17 }
 0x52e   :  { %v9554_v45 = vpop.eup %6627  ;;  %v1977_v7 = vmul.f32 1.442695, %v1881_v50  ;;  %v1872_v50 = vsub.f32 %v14515_v55, %v9495_v32  ;;  %v1921_v11 = vmul.f32 1.442695, %v1853_v29 }
 0x52f   :  { %2350 = vmatpush.msra.mxu2 %v2300_v14  ;;  %v2027_v26 = vsel %vm13901_vm7, 0.0, %v9554_v45  ;;  %v9571_v37 = vpop.eup %6629  ;;  %vm13903_vm7 = vcmp.eq.f32.partialorder %v9195_v62, 0.0 }
 0x530   :  { %6633 = vpow2.f32 %v1977_v7  ;;  %2262 = vperm.xlu2 %6461, %v2027_v26   ;;  %2237 = vperm.xlu1 %6459, %v2022_v25   ;;  %v9574_v17 = vpop.eup %6631  ;;  %v2002_v14 = vsel %vm13905_vm6, 0.0, %v9571_v37  ;;  %v1959_v44 = vmul.f32 1.442695, %v1872_v50  ;;  %v1852_v7 = vsub.f32 %v14516_v33, %v9267_v48 }
 0x531   :  { %2351 = vmatpush.msra.mxu2 %v2299_v59  ;;  %6635 = vpow2.f32 %v1923_v3  ;;  %v2021_v46 = vsel %vm13904_vm5, 0.0, %v9574_v17  ;;  %v1871_v59 = vsub.f32 %v14517_v1, %v9493_v47  ;;  %vm13909_vm5 = vcmp.eq.f32.partialorder %v9284_v23, 0.0  ;;  %v14519_v47 = vld [vmem:[#allocation97_spill] sm:$0xff] }
 0x532   :  { %6637 = vpow2.f32 %v1961_v30  ;;  %v1919_v28 = vmul.f32 1.442695, %v1852_v7  ;;  %vm13908_vm6 = vcmp.eq.f32.partialorder %v9286_v42, 0.0  ;;  %v1851_v20 = vsub.f32 %v14519_v47, %v9257_v43 }
 0x533   :  { %2352 = vmatpush.msra.mxu2 %v2298_v61  ;;  %6639 = vpow2.f32 %v1921_v11  ;;  %v1957_v61 = vmul.f32 1.442695, %v1871_v59 }
 0x534   :  { %6641 = vpow2.f32 %v1959_v44  ;;  %v1917_v55 = vmul.f32 1.442695, %v1851_v20 }
 0x535   :  { %2353 = vmatpush.msra.mxu2 %v2297_v0  ;;  %6643 = vpow2.f32 %v1919_v28  ;;  %v14520_v0 = vld [vmem:[#allocation102_spill] sm:$0xff] }
 0x536   :  { %v9577_v16 = vpop.eup %6633  ;;  %v1850_v30 = vsub.f32 %v14520_v0, %v9241_v21  ;;  %6645 = vpow2.f32 %v1957_v61  ;;  %v14522_v21 = vld [vmem:[#allocation111_spill] sm:$0xff]  ;;  %v14527_v61 = vld [vmem:[#allocation114_spill] sm:$0xff] }
 0x537   :  { %v2028_v12 = vsel %vm13903_vm7, 0.0, %v9577_v16  ;;  %v9593_v52 = vpop.eup %6635  ;;  %vm13906_vm7 = vcmp.eq.f32.partialorder %v9289_v22, 0.0  ;;  %6647 = vpow2.f32 %v1917_v55  ;;  %v1866_v47 = vsub.f32 %v14527_v61, %v9457_v24  ;;  %v14529_v24 = vld [vmem:[#allocation176_spill] sm:$0xff] }
 0x538   :  { %2267 = vperm.xlu0 %6460, %v2028_v12   ;;  %2137 = vperm.xlu2 %6461, %v2002_v14   ;;  %v9596_v32 = vpop.eup %6637  ;;  %v2001_v26 = vsel %vm13907_vm8, 0.0, %v9593_v52  ;;  %v1915_v50 = vmul.f32 1.442695, %v1850_v30  ;;  %vm13910_vm8 = vcmp.eq.f32.partialorder %v9296_v9, 0.0  ;;  %v1869_v14 = vsub.f32 %v14522_v21, %v9489_v56  ;;  %v14531_v21 = vld [vmem:[#allocation178_spill] sm:$0xff] }
 0x539   :  { %2232 = vperm.xlu1 %6459, %v2021_v46   ;;  %v2020_v25 = vsel %vm13906_vm7, 0.0, %v9596_v32  ;;  %v9609_v3 = vpop.eup %6639  ;;  %vm13963_vm7 = vcmp.eq.f32.partialorder %v9303_v27, 0.0  ;;  %v14523_v46 = vld [vmem:[#allocation112_spill] sm:$0xff] }
 0x53a   :  { %v9612_v48 = vpop.eup %6641  ;;  %v2000_v4 = vsel %vm13909_vm5, 0.0, %v9609_v3  ;;  %6649 = vpow2.f32 %v1915_v50  ;;  %v1868_v11 = vsub.f32 %v14523_v46, %v9487_v53  ;;  %v1953_v7 = vmul.f32 1.442695, %v1869_v14  ;;  %v14526_v53 = vld [vmem:[#allocation113_spill] sm:$0xff] }
 0x53b   :  { %14518 = vst [vmem:[#allocation9_spill] sm:$0xff] %v9612_v48  ;;  %v2019_v29 = vsel %vm13908_vm6, 0.0, %v9612_v48  ;;  %v9625_v12 = vpop.eup %6643  ;;  %v1867_v28 = vsub.f32 %v14526_v53, %v9473_v51  ;;  %v7110_v51 = vld [vmem:[%s13685_s0 + $0x180] sm:$0xff]  ;;  %v14546_v48 = vld [vmem:[#allocation83_spill] sm:$0xff] }
 0x53c   :  { %v9628_v43 = vpop.eup %6645  ;;  %v1999_v44 = vsel %vm13963_vm7, 0.0, %v9625_v12  ;;  %v1951_v1 = vmul.f32 1.442695, %v1868_v11  ;;  %6651 = vpow2.f32 %v1953_v7  ;;  %v14534_v7 = vld [vmem:[#allocation110_spill] sm:$0xff] }
 0x53d   :  { %14521 = vst [vmem:[#allocation104_spill] sm:$0xff] %v9628_v43  ;;  %v2018_v33 = vsel %vm13910_vm8, 0.0, %v9628_v43  ;;  %v9641_v59 = vpop.eup %6647  ;;  %v1949_v30 = vmul.f32 1.442695, %v1867_v28  ;;  %vm13913_vm8 = vcmp.eq.f32.partialorder %v14529_v24, 0.0  ;;  %v14536_v28 = vld [vmem:[#allocation181_spill] sm:$0xff] }
 0x53e   :  { %6653 = vpow2.f32 %v1951_v1  ;;  %v1870_v1 = vsub.f32 %v14534_v7, %v9491_v49  ;;  %v14543_v24 = vld [vmem:[#allocation21_spill] sm:$0xff] }
 0x53f   :  { %6655 = vpow2.f32 %v1949_v30  ;;  %v14538_v30 = vld [vmem:[#allocation175_spill] sm:$0xff] }
 0x540   :  { %2132 = vperm.xlu2 %6461, %v2001_v26   ;;  %v14524_v26 = vld [vmem:[#allocation172_spill] sm:$0xff]  ;;  %v9644_v56 = vpop.eup %6649 }
 0x541   :  { %2227 = vperm.xlu1 %6459, %v2020_v25   ;;  %vm13911_vm6 = vcmp.eq.f32.partialorder %v14524_v26, 0.0  ;;  %v14525_v25 = vld [vmem:[#allocation174_spill] sm:$0xff] }
 0x542   :  { %vm13912_vm5 = vcmp.eq.f32.partialorder %v14525_v25, 0.0  ;;  %v1998_v20 = vsel %vm13911_vm6, 0.0, %v9641_v59  ;;  %v9660_v55 = vpop.eup %6651  ;;  %vm13952_vm6 = vcmp.eq.f32.partialorder %v14531_v21, 0.0 }
 0x543   :  { %v1997_v0 = vsel %vm13912_vm5, 0.0, %v9644_v56  ;;  %14528 = vst [vmem:[#allocation103_spill] sm:$0xff] %v9660_v55  ;;  %v2016_v14 = vsel %vm13913_vm8, 0.0, %v9660_v55  ;;  %vm13929_vm8 = vcmp.eq.f32.partialorder %v14536_v28, 0.0  ;;  %v14541_v28 = vld [vmem:[#allocation25_spill] sm:$0xff] }
 0x544   :  { %v9663_v50 = vpop.eup %6653 }
 0x545   :  { %14530 = vst [vmem:[#allocation52_spill] sm:$0xff] %v9663_v50  ;;  %v2015_v11 = vsel %vm13952_vm6, 0.0, %v9663_v50  ;;  %v14542_v50 = vld [vmem:[#allocation23_spill] sm:$0xff] }
 0x548   :  { %2127 = vperm.xlu2 %6461, %v2000_v4   ;;  %v1947_v4 = vmul.f32 1.442695, %v1866_v47  ;;  %v1955_v47 = vmul.f32 1.442695, %v1870_v1 }
 0x549   :  { %2222 = vperm.xlu1 %6459, %v2019_v29   ;;  %v261_v29 = vand.u32 2147483647, %v7110_v51 }
 0x54a   :  { %6657 = vpow2.f32 %v1947_v4 }
 0x54b   :  { %v407_v46 = vsel %vm13914_vm1, %v261_v29, 0.0  ;;  %6659 = vpow2.f32 %v1955_v47  ;;  %vm13958_vm1 = vcmp.eq.f32.partialorder %v14538_v30, 0.0 }
 0x550   :  { %2122 = vperm.xlu2 %6461, %v1999_v44   ;;  %v9673_v44 = vpop.eup %6655 }
 0x551   :  { %2217 = vperm.xlu1 %6459, %v2018_v33   ;;  %14532 = vst [vmem:[#allocation101_spill] sm:$0xff] %v9673_v44  ;;  %v14533_v33 = vld [vmem:[#allocation179_spill] sm:$0xff]  ;;  %v9678_v53 = vpop.eup %6657 }
 0x552   :  { %vm13931_vm5 = vcmp.eq.f32.partialorder %v14533_v33, 0.0  ;;  %14535 = vst [vmem:[#allocation100_spill] sm:$0xff] %v9678_v53 }
 0x553   :  { %v2014_v61 = vsel %vm13931_vm5, 0.0, %v9673_v44  ;;  %vm9755_vm5 = vmneg %vm13933_vm3 }
 0x554   :  { %vm9773_vm3 = vmneg %vm13935_vm15 }
 0x555   :  { %vm9791_vm15 = vmneg %vm13937_vm13 }
 0x556   :  { %vm9809_vm13 = vmneg %vm13941_vm11 }
 0x557   :  { %vm9827_vm11 = vmneg %vm13953_vm9 }
 0x558   :  { %2117 = vperm.xlu2 %6461, %v1998_v20   ;;  %v2013_v20 = vsel %vm13929_vm8, 0.0, %v9678_v53 }
 0x559   :  { %2112 = vperm.xlu1 %6459, %v1997_v0   ;;  %v9687_v0 = vpop.eup %6659 }
 0x55a   :  { %14537 = vst [vmem:[#allocation105_spill] sm:$0xff] %v9687_v0  ;;  %v2017_v49 = vsel %vm13958_vm1, 0.0, %v9687_v0 }
 0x560   :  { %2207 = vperm.xlu2 %6461, %v2016_v14  }
 0x561   :  { %2202 = vperm.xlu1 %6459, %v2015_v11  }
 0x562   :  { %408 = vadd.xlane.f32.xlu0 %v407_v46  ;;  %v14539_v46 = vld [vmem:[#allocation29_spill] sm:$0xff] }
 0x568   :  { %2197 = vperm.xlu2 %6461, %v2014_v61   ;;  %v14540_v61 = vld [vmem:[#allocation27_spill] sm:$0xff] }
 0x569   :  { %2192 = vperm.xlu1 %6459, %v2013_v20  }
 0x572   :  { %v2248_v4 = vpop.permute.xlu2 %2247 }
 0x576   :  { %2212 = vperm.xlu0 %6460, %v2017_v49  }
 0x582   :  { %v2243_v29 = vpop.permute.xlu1 %2242 }
 0x58a   :  { %v2263_v51 = vpop.permute.xlu2 %2262 }
 0x592   :  { %v2138_v14 = vpop.permute.xlu2 %2137 }
 0x593   :  { %v2296_v11 = vmul.f32 %v2138_v14, %v14539_v46 }
 0x595   :  { %2354 = vmatpush.msra.mxu2 %v2296_v11  ;;  %v2253_v11 = vpop.permute.xlu0 %2252 }
 0x59a   :  { %v2133_v7 = vpop.permute.xlu2 %2132  ;;  %v2258_v1 = vpop.permute.xlu1 %2257 }
 0x59b   :  { %v2295_v47 = vmul.f32 %v2133_v7, %v14540_v61  ;;  %v1831_v7 = vpop.f32.mrf.mxu3  ;;  %v14544_v61 = vld [vmem:[#allocation115_spill] sm:$0xff] }
 0x59d   :  { %2355 = vmatpush.msra.mxu2 %v2295_v47  ;;  %v1882_v47 = vsub.f32 %v14544_v61, %v1831_v7  ;;  %v14549_v7 = vld [vmem:[#allocation76_spill] sm:$0xff] }
 0x59e   :  { %v2319_v61 = vmul.f32 %v2253_v11, %v14549_v7 }
 0x5a2   :  { %v2128_v20 = vpop.permute.xlu2 %2127  ;;  %v2238_v53 = vpop.permute.xlu1 %2237 }
 0x5a3   :  { %v2294_v44 = vmul.f32 %v2128_v20, %v14541_v28  ;;  %v1979_v28 = vmul.f32 1.442695, %v1882_v47  ;;  %v14552_v47 = vld [vmem:[#allocation71_spill] sm:$0xff] }
 0x5a5   :  { %2356 = vmatpush.msra.mxu2 %v2294_v44  ;;  %v14545_v44 = vld [vmem:[#allocation20_spill] sm:$0xff]  ;;  %6661 = vpow2.f32 %v1979_v28  ;;  %v2317_v28 = vmul.f32 %v2243_v29, %v14552_v47 }
 0x5aa   :  { %v2123_v33 = vpop.permute.xlu2 %2122  ;;  %v2268_v43 = vpop.permute.xlu0 %2267 }
 0x5ab   :  { %v2293_v49 = vmul.f32 %v2123_v33, %v14542_v50  ;;  %v2233_v21 = vpop.permute.xlu1 %2232  ;;  %v2322_v50 = vmul.f32 %v2268_v43, %v14546_v48  ;;  %v14547_v33 = vld [vmem:[#allocation80_spill] sm:$0xff] }
 0x5ad   :  { %2357 = vmatpush.msra.mxu2 %v2293_v49  ;;  %v2321_v49 = vmul.f32 %v2263_v51, %v14547_v33  ;;  %v9713_v51 = vpop.eup %6661 }
 0x5b2   :  { %v2118_v55 = vpop.permute.xlu2 %2117 }
 0x5b3   :  { %v2292_v0 = vmul.f32 %v2118_v55, %v14543_v24  ;;  %v2228_v14 = vpop.permute.xlu1 %2227  ;;  %v9705_v55 = vld [vmem:[%s13688_s3 + $0x8] sm:$0xff]  ;;  %v14548_v24 = vld [vmem:[#allocation78_spill] sm:$0xff] }
 0x5b5   :  { %2358 = vmatpush.msra.mxu2 %v2292_v0  ;;  %v2320_v0 = vmul.f32 %v2258_v1, %v14548_v24 }
 0x5ba   :  { %v2208_v7 = vpop.permute.xlu2 %2207 }
 0x5bb   :  { %v2223_v46 = vpop.permute.xlu1 %2222 }
 0x5c3   :  { %v2218_v30 = vpop.permute.xlu1 %2217 }
 0x5cb   :  { %v2113_v9 = vpop.permute.xlu1 %2112 }
 0x5cc   :  { %v2291_v20 = vmul.f32 %v2113_v9, %v14545_v44  ;;  %v14550_v9 = vld [vmem:[#allocation73_spill] sm:$0xff] }
 0x5cd   :  { %v2318_v48 = vmul.f32 %v2248_v4, %v14550_v9  ;;  %v14553_v44 = vld [vmem:[#allocation69_spill] sm:$0xff] }
 0x5ce   :  { %2359 = vmatpush.msra.mxu2 %v2291_v20  ;;  %v2316_v11 = vmul.f32 %v2238_v53, %v14553_v44  ;;  %v14554_v20 = vld [vmem:[#allocation67_spill] sm:$0xff]  ;;  %v14559_v53 = vld [vmem:[#allocation60_spill] sm:$0xff] }
 0x5cf   :  { %2360 = vmatmul.f32.vlgmr.msra.gmra.mxu2 %v9705_v55  ;;  %v2315_v4 = vmul.f32 %v2233_v21, %v14554_v20  ;;  %v2198_v21 = vpop.permute.xlu2 %2197  ;;  %v14562_v20 = vld [vmem:[#allocation54_spill] sm:$0xff] }
 0x5d0   :  { %2364 = vmatpush.msrb.mxu2 %v2322_v50  ;;  %v14555_v50 = vld [vmem:[#allocation64_spill] sm:$0xff] }
 0x5d1   :  { %v2314_v33 = vmul.f32 %v2228_v14, %v14555_v50 }
 0x5d2   :  { %2365 = vmatpush.msrb.mxu2 %v2321_v49  ;;  %v14556_v49 = vld [vmem:[#allocation61_spill] sm:$0xff] }
 0x5d3   :  { %v2313_v24 = vmul.f32 %v2223_v46, %v14556_v49 }
 0x5d4   :  { %2366 = vmatpush.msrb.mxu2 %v2320_v0  ;;  %v14557_v0 = vld [vmem:[#allocation59_spill] sm:$0xff] }
 0x5d5   :  { %v9711_v43 = vpop.xlane.xlu0 %408  ;;  %v2312_v29 = vmul.f32 %v2218_v30, %v14557_v0  ;;  %v14643_v0 = vld [vmem:[#allocation134_spill] sm:$0xff] }
 0x5d6   :  { %2367 = vmatpush.msrb.mxu2 %v2319_v61  ;;  %14551 = vst [vmem:[#allocation49_spill] sm:$0xff] %v9711_v43  ;;  %vm13930_vm8 = vcmp.eq.f32.partialorder %v9711_v43, 0.0  ;;  %v2203_v61 = vpop.permute.xlu1 %2202 }
 0x5d7   :  { %v2029_v1 = vsel %vm13930_vm8, 0.0, %v9713_v51  ;;  %vm9746_vm8 = vmneg %vm13932_vm4 }
 0x5d8   :  { %2368 = vmatpush.msrb.mxu2 %v2318_v48  ;;  %2272 = vperm.xlu0 %6460, %v2029_v1   ;;  %v14558_v48 = vld [vmem:[#allocation63_spill] sm:$0xff]  ;;  %v14560_v1 = vld [vmem:[#allocation58_spill] sm:$0xff]  ;;  %vm9764_vm4 = vmneg %vm13934_vm0 }
 0x5d9   :  { %v2309_v44 = vmul.f32 %v2203_v61, %v14560_v1  ;;  %v14580_v1 = vmov 0  ;;  %vm9782_vm0 = vmneg %vm13936_vm14  ;;  %v14649_v61 = vld [vmem:[#allocation131_spill] sm:$0xff] }
 0x5da   :  { %2369 = vmatpush.msrb.mxu2 %v2317_v28  ;;  %v2310_v28 = vmul.f32 %v2208_v7, %v14559_v53  ;;  %v14568_v7 = vld [vmem:[#allocation161_spill] sm:$0xff]  ;;  %v14575_v53 = vmov 0  ;;  %v14581_v1 = vsel %vm9773_vm3, 4294967295, %v14580_v1  ;;  %vm9800_vm14 = vmneg %vm13938_vm12 }
 0x5db   :  { %v14576_v53 = vsel %vm9764_vm4, 4294967295, %v14575_v53  ;;  %14582 = vst [vmem:[#allocation106_spill] sm:$0xff] %v14581_v1  ;;  %vm9818_vm12 = vmneg %vm13947_vm10  ;;  %v14619_v1 = vld [vmem:[#allocation139_spill] sm:$0xff] }
 0x5dc   :  { %2370 = vmatpush.msrb.mxu2 %v2316_v11  ;;  %v14561_v11 = vld [vmem:[#allocation56_spill] sm:$0xff]  ;;  %14577 = vst [vmem:[#allocation91_spill] sm:$0xff] %v14576_v53  ;;  %v14625_v53 = vld [vmem:[#allocation138_spill] sm:$0xff] }
 0x5dd   :  { %v2308_v46 = vmul.f32 %v2198_v21, %v14561_v11  ;;  %v14579_v21 = vld [vmem:[#allocation117_spill] sm:$0xff]  ;;  %v14585_v11 = vmov 0 }
 0x5de   :  { %2371 = vmatpush.msrb.mxu2 %v2315_v4  ;;  %v2193_v14 = vpop.permute.xlu1 %2192  ;;  %v9733_v4 = vld [vmem:[%s13688_s3 + $0x10] sm:$0xff]  ;;  %v14586_v11 = vsel %vm9782_vm0, 4294967295, %v14585_v11 }
 0x5df   :  { %v2307_v30 = vmul.f32 %v2193_v14, %v14562_v20  ;;  %v14584_v14 = vld [vmem:[#allocation120_spill] sm:$0xff]  ;;  %14587 = vst [vmem:[#allocation44_spill] sm:$0xff] %v14586_v11  ;;  %v14589_v20 = vld [vmem:[#allocation125_spill] sm:$0xff] }
 0x5e0   :  { %2372 = vmatpush.msrb.mxu2 %v2314_v33  ;;  %v14563_v33 = vld [vmem:[#allocation94_spill] sm:$0xff]  ;;  %v14613_v11 = vld [vmem:[#allocation140_spill] sm:$0xff] }
 0x5e2   :  { %2373 = vmatpush.msrb.mxu2 %v2313_v24  ;;  %v9740_v24 = vld [vmem:[%s13688_s3 + $0x18] sm:$0xff] }
 0x5e4   :  { %2374 = vmatpush.msrb.mxu2 %v2312_v29  ;;  %v14565_v29 = vmov 0 }
 0x5e5   :  { %v14566_v29 = vsel %vm9746_vm8, 4294967295, %v14565_v29 }
 0x5e6   :  { %14567 = vst [vmem:[#allocation99_spill] sm:$0xff] %v14566_v29  ;;  %v14637_v29 = vld [vmem:[#allocation136_spill] sm:$0xff] }
 0x5e8   :  { %v2213_v9 = vpop.permute.xlu0 %2212 }
 0x5e9   :  { %v2311_v47 = vmul.f32 %v2213_v9, %v14558_v48  ;;  %v14570_v9 = vmov 0  ;;  %v14573_v48 = vld [vmem:[#allocation157_spill] sm:$0xff] }
 0x5ea   :  { %v14571_v9 = vsel %vm9755_vm5, 4294967295, %v14570_v9 }
 0x5eb   :  { %2375 = vmatpush.msrb.mxu2 %v2311_v47  ;;  %14572 = vst [vmem:[#allocation46_spill] sm:$0xff] %v14571_v9  ;;  %v14574_v47 = vld [vmem:[#allocation122_spill] sm:$0xff]  ;;  %v14631_v9 = vld [vmem:[#allocation137_spill] sm:$0xff] }
 0x5ed   :  { %2376 = vmatpush.msrb.mxu2 %v2310_v28  ;;  %v14578_v28 = vld [vmem:[#allocation153_spill] sm:$0xff] }
 0x5ef   :  { %2377 = vmatpush.msrb.mxu2 %v2309_v44  ;;  %v14583_v44 = vld [vmem:[#allocation151_spill] sm:$0xff] }
 0x5f1   :  { %2378 = vmatpush.msrb.mxu2 %v2308_v46  ;;  %v14588_v46 = vld [vmem:[#allocation149_spill] sm:$0xff] }
 0x5f3   :  { %2379 = vmatpush.msrb.mxu2 %v2307_v30  ;;  %v14590_v30 = vmov 0 }
 0x5f4   :  { %2380 = vmatmul.f32.vlgmr.msrb.gmra.mxu2 %v9733_v4  ;;  %v14591_v30 = vsel %vm9791_vm15, 4294967295, %v14590_v30 }
 0x5f5   :  { %14592 = vst [vmem:[#allocation41_spill] sm:$0xff] %v14591_v30  ;;  %v14608_v30 = vld [vmem:[#allocation141_spill] sm:$0xff] }
 0x64a   :  { %v2273_v50 = vpop.permute.xlu0 %2272 }
 0x64b   :  { %v2323_v49 = vmul.f32 %v2273_v50, %v14563_v33  ;;  %v14593_v50 = vld [vmem:[#allocation146_spill] sm:$0xff]  ;;  %v14594_v33 = vld [vmem:[#allocation119_spill] sm:$0xff] }
 0x64d   :  { %2399 = vmatpush.msra.mxu2 %v2323_v49  ;;  %v14595_v49 = vmov 0 }
 0x64e   :  { %5833 = vmatmul.msk.f32.vlgmr.msra.gmra.mxu2 %vm13946_vm2, %v9740_v24  ;;  %v14596_v49 = vsel %vm9800_vm14, 4294967295, %v14595_v49 }
 0x64f   :  { %5835 = vmatpush.msk.msrb.mxu2 %vm9746_vm8, %v14568_v7  ;;  %14597 = vst [vmem:[#allocation39_spill] sm:$0xff] %v14596_v49  ;;  %v14598_v7 = vld [vmem:[#allocation144_spill] sm:$0xff]  ;;  %v14610_v49 = vmov 0 }
 0x650   :  { %v14611_v49 = vsel %vm9827_vm11, 4294967295, %v14610_v49 }
 0x651   :  { %5837 = vmatpush.msk.msrb.mxu2 %vm9755_vm5, %v14573_v48  ;;  %v14599_v48 = vld [vmem:[#allocation123_spill] sm:$0xff]  ;;  %14612 = vst [vmem:[#allocation92_spill] sm:$0xff] %v14611_v49  ;;  %v14628_v49 = vmov 0 }
 0x653   :  { %5839 = vmatpush.msk.msrb.mxu2 %vm9764_vm4, %v14578_v28  ;;  %v14600_v28 = vmov 0 }
 0x654   :  { %v14601_v28 = vsel %vm9809_vm13, 4294967295, %v14600_v28 }
 0x655   :  { %5841 = vmatpush.msk.msrb.mxu2 %vm9773_vm3, %v14583_v44  ;;  %14602 = vst [vmem:[#allocation98_spill] sm:$0xff] %v14601_v28  ;;  %v14603_v44 = vld [vmem:[#allocation142_spill] sm:$0xff]  ;;  %v14616_v28 = vmov 0 }
 0x657   :  { %5843 = vmatpush.msk.msrb.mxu2 %vm9782_vm0, %v14588_v46  ;;  %v14604_v46 = vld [vmem:[#allocation128_spill] sm:$0xff] }
 0x659   :  { %5845 = vmatpush.msk.msrb.mxu2 %vm9791_vm15, %v14593_v50  ;;  %v14605_v50 = vmov 0 }
 0x65a   :  { %v14606_v50 = vsel %vm9818_vm12, 4294967295, %v14605_v50 }
 0x65b   :  { %5847 = vmatpush.msk.msrb.mxu2 %vm9800_vm14, %v14598_v7  ;;  %14607 = vst [vmem:[#allocation37_spill] sm:$0xff] %v14606_v50  ;;  %v14609_v7 = vld [vmem:[#allocation121_spill] sm:$0xff]  ;;  %v14622_v50 = vmov 0 }
 0x65d   :  { %5849 = vmatpush.msk.msrb.mxu2 %vm9809_vm13, %v14603_v44  ;;  %v14614_v44 = vld [vmem:[#allocation126_spill] sm:$0xff] }
 0x65e   :  { %vm14615_vm2 = vcmp.eq.f32.partialorder %v14614_v44, 0.0 }
 0x65f   :  { %5851 = vmatpush.msk.msrb.mxu2 %vm9818_vm12, %v14608_v30  ;;  %vm9836_vm10 = vmneg %vm14615_vm2  ;;  %v14620_v30 = vld [vmem:[#allocation132_spill] sm:$0xff] }
 0x660   :  { %v14617_v28 = vsel %vm9836_vm10, 4294967295, %v14616_v28  ;;  %vm14621_vm6 = vcmp.eq.f32.partialorder %v14620_v30, 0.0 }
 0x661   :  { %5853 = vmatpush.msk.msrb.mxu2 %vm9827_vm11, %v14613_v11  ;;  %14618 = vst [vmem:[#allocation107_spill] sm:$0xff] %v14617_v28  ;;  %vm9845_vm9 = vmneg %vm14621_vm6  ;;  %v14626_v11 = vld [vmem:[#allocation124_spill] sm:$0xff]  ;;  %v14634_v28 = vmov 0 }
 0x662   :  { %v14623_v50 = vsel %vm9845_vm9, 4294967295, %v14622_v50  ;;  %vm14627_vm1 = vcmp.eq.f32.partialorder %v14626_v11, 0.0 }
 0x663   :  { %5855 = vmatpush.msk.msrb.mxu2 %vm9836_vm10, %v14619_v1  ;;  %14624 = vst [vmem:[#allocation35_spill] sm:$0xff] %v14623_v50  ;;  %vm9854_vm2 = vmneg %vm14627_vm1  ;;  %v14632_v1 = vld [vmem:[#allocation135_spill] sm:$0xff]  ;;  %v14640_v50 = vmov 0 }
 0x664   :  { %v14629_v49 = vsel %vm9854_vm2, 4294967295, %v14628_v49  ;;  %vm14633_vm7 = vcmp.eq.f32.partialorder %v14632_v1, 0.0 }
 0x665   :  { %5857 = vmatpush.msk.msrb.mxu2 %vm9845_vm9, %v14625_v53  ;;  %14630 = vst [vmem:[#allocation33_spill] sm:$0xff] %v14629_v49  ;;  %vm9863_vm6 = vmneg %vm14633_vm7  ;;  %v14638_v53 = vld [vmem:[#allocation133_spill] sm:$0xff]  ;;  %v14646_v49 = vmov 0 }
 0x666   :  { %v14635_v28 = vsel %vm9863_vm6, 4294967295, %v14634_v28  ;;  %vm14639_vm9 = vcmp.eq.f32.partialorder %v14638_v53, 0.0 }
 0x667   :  { %5859 = vmatpush.msk.msrb.mxu2 %vm9854_vm2, %v14631_v9  ;;  %14636 = vst [vmem:[#allocation31_spill] sm:$0xff] %v14635_v28  ;;  %vm9872_vm1 = vmneg %vm14639_vm9  ;;  %v14644_v9 = vld [vmem:[#allocation130_spill] sm:$0xff] }
 0x668   :  { %v14641_v50 = vsel %vm9872_vm1, 4294967295, %v14640_v50  ;;  %vm14645_vm2 = vcmp.eq.f32.partialorder %v14644_v9, 0.0  ;;  %v14689_v28 = vld [vmem:[#allocation182_spill] sm:$0xff] }
 0x669   :  { %5861 = vmatpush.msk.msrb.mxu2 %vm9863_vm6, %v14637_v29  ;;  %14642 = vst [vmem:[#allocation95_spill] sm:$0xff] %v14641_v50  ;;  %vm9881_vm7 = vmneg %vm14645_vm2  ;;  %vm14650_vm6 = vcmp.eq.f32.partialorder %v9039_v63, 0.0  ;;  %v14651_v29 = vmov 0  ;;  %v14683_v50 = vld [vmem:[#allocation183_spill] sm:$0xff]  ;;  %v14695_v63 = vld [vmem:[#allocation180_spill] sm:$0xff] }
 0x66a   :  { %v14647_v49 = vsel %vm9881_vm7, 4294967295, %v14646_v49  ;;  %vm9890_vm9 = vmneg %vm14650_vm6  ;;  %vm14658_vm6 = vcmp.eq.f32.partialorder %v9179_v31, 0.0 }
 0x66b   :  { %5863 = vmatpush.msk.msrb.mxu2 %vm9872_vm1, %v14643_v0  ;;  %14648 = vst [vmem:[#allocation108_spill] sm:$0xff] %v14647_v49  ;;  %v14652_v29 = vsel %vm9890_vm9, 4294967295, %v14651_v29  ;;  %vm14654_vm1 = vcmp.eq.f32.partialorder %v9026_v40, 0.0  ;;  %v14655_v0 = vmov 0  ;;  %v14677_v49 = vld [vmem:[#allocation184_spill] sm:$0xff]  ;;  %v14701_v40 = vld [vmem:[#allocation177_spill] sm:$0xff] }
 0x66c   :  { %14653 = vst [vmem:[#allocation96_spill] sm:$0xff] %v14652_v29  ;;  %vm9899_vm2 = vmneg %vm14654_vm1  ;;  %vm14662_vm1 = vcmp.eq.f32.partialorder %v9224_v34, 0.0  ;;  %v14671_v29 = vld [vmem:[#allocation185_spill] sm:$0xff] }
 0x66d   :  { %5865 = vmatpush.msk.msrb.mxu2 %vm9881_vm7, %v14649_v61  ;;  %v14656_v0 = vsel %vm9899_vm2, 4294967295, %v14655_v0  ;;  %vm9909_vm7 = vmneg %vm14658_vm6  ;;  %v14659_v61 = vmov 0 }
 0x66e   :  { %14657 = vst [vmem:[#allocation109_spill] sm:$0xff] %v14656_v0  ;;  %2420 = vmatmul.f32.vlgmr.msrb.gmra.mxu2 %v9484_v57  ;;  %v14660_v61 = vsel %vm9909_vm7, 4294967295, %v14659_v61  ;;  %v14668_v0 = vmov 0 }
 0x66f   :  { %5867 = vmatpush.msk.msra.mxu2 %vm9890_vm9, %v9464_v18  ;;  %14661 = vst [vmem:[#allocation97_spill] sm:$0xff] %v14660_v61  ;;  %vm9918_vm9 = vmneg %vm14662_vm1  ;;  %v14663_v18 = vmov 0  ;;  %v14674_v61 = vmov 0 }
 0x670   :  { %v14664_v18 = vsel %vm9918_vm9, 4294967295, %v14663_v18 }
 0x671   :  { %5869 = vmatpush.msk.msra.mxu2 %vm9899_vm2, %v9447_v15  ;;  %14665 = vst [vmem:[#allocation102_spill] sm:$0xff] %v14664_v18  ;;  %v14666_v15 = vld [vmem:[#allocation143_spill] sm:$0xff]  ;;  %v14680_v18 = vmov 0 }
 0x672   :  { %vm14667_vm2 = vcmp.eq.f32.partialorder %v14666_v15, 0.0 }
 0x673   :  { %5871 = vmatpush.msk.msra.mxu2 %vm9909_vm7, %v9431_v6  ;;  %vm9927_vm6 = vmneg %vm14667_vm2  ;;  %v14672_v6 = vld [vmem:[#allocation154_spill] sm:$0xff] }
 0x674   :  { %v14669_v0 = vsel %vm9927_vm6, 4294967295, %v14668_v0  ;;  %vm14673_vm7 = vcmp.eq.f32.partialorder %v14672_v6, 0.0 }
 0x675   :  { %5873 = vmatpush.msk.msra.mxu2 %vm9918_vm9, %v9418_v5  ;;  %14670 = vst [vmem:[#allocation111_spill] sm:$0xff] %v14669_v0  ;;  %vm9936_vm1 = vmneg %vm14673_vm7  ;;  %v14678_v5 = vld [vmem:[#allocation164_spill] sm:$0xff]  ;;  %v14686_v0 = vmov 0 }
 0x676   :  { %v14675_v61 = vsel %vm9936_vm1, 4294967295, %v14674_v61  ;;  %vm14679_vm9 = vcmp.eq.f32.partialorder %v14678_v5, 0.0 }
 0x677   :  { %5875 = vmatpush.msk.msra.mxu2 %vm9927_vm6, %v14671_v29  ;;  %14676 = vst [vmem:[#allocation112_spill] sm:$0xff] %v14675_v61  ;;  %vm9945_vm2 = vmneg %vm14679_vm9  ;;  %v14684_v29 = vld [vmem:[#allocation148_spill] sm:$0xff]  ;;  %v14692_v61 = vmov 0 }
 0x678   :  { %v14681_v18 = vsel %vm9945_vm2, 4294967295, %v14680_v18  ;;  %vm14685_vm6 = vcmp.eq.f32.partialorder %v14684_v29, 0.0 }
 0x679   :  { %5877 = vmatpush.msk.msra.mxu2 %vm9936_vm1, %v14677_v49  ;;  %14682 = vst [vmem:[#allocation113_spill] sm:$0xff] %v14681_v18  ;;  %vm9954_vm7 = vmneg %vm14685_vm6  ;;  %v14690_v49 = vld [vmem:[#allocation162_spill] sm:$0xff]  ;;  %v14698_v18 = vmov 0 }
 0x67a   :  { %v14687_v0 = vsel %vm9954_vm7, 4294967295, %v14686_v0  ;;  %vm14691_vm1 = vcmp.eq.f32.partialorder %v14690_v49, 0.0 }
 0x67b   :  { %5879 = vmatpush.msk.msra.mxu2 %vm9945_vm2, %v14683_v50  ;;  %14688 = vst [vmem:[#allocation114_spill] sm:$0xff] %v14687_v0  ;;  %vm9963_vm9 = vmneg %vm14691_vm1  ;;  %v14696_v50 = vld [vmem:[#allocation165_spill] sm:$0xff] }
 0x67c   :  { %v14693_v61 = vsel %vm9963_vm9, 4294967295, %v14692_v61  ;;  %vm14697_vm2 = vcmp.eq.f32.partialorder %v14696_v50, 0.0 }
 0x67d   :  { %5881 = vmatpush.msk.msra.mxu2 %vm9954_vm7, %v14689_v28  ;;  %14694 = vst [vmem:[#allocation110_spill] sm:$0xff] %v14693_v61  ;;  %vm9972_vm6 = vmneg %vm14697_vm2  ;;  %vm14702_vm7 = vcmp.eq.f32.partialorder %v9239_v36, 0.0  ;;  %v14703_v28 = vmov 0 }
 0x67e   :  { %v14699_v18 = vsel %vm9972_vm6, 4294967295, %v14698_v18  ;;  %vm9981_vm1 = vmneg %vm14702_vm7 }
 0x67f   :  { %5883 = vmatpush.msk.msra.mxu2 %vm9963_vm9, %v14695_v63  ;;  %14700 = vst [vmem:[#allocation29_spill] sm:$0xff] %v14699_v18  ;;  %v14704_v28 = vsel %vm9981_vm1, 4294967295, %v14703_v28  ;;  %vm14706_vm9 = vcmp.eq.f32.partialorder %v9274_v10, 0.0  ;;  %v14707_v63 = vmov 0 }
 0x680   :  { %14705 = vst [vmem:[#allocation27_spill] sm:$0xff] %v14704_v28  ;;  %vm9990_vm2 = vmneg %vm14706_vm9 }
 0x681   :  { %5885 = vmatpush.msk.msra.mxu2 %vm9972_vm6, %v14701_v40  ;;  %v14708_v63 = vsel %vm9990_vm2, 4294967295, %v14707_v63  ;;  %vm14710_vm6 = vcmp.eq.f32.partialorder %v9284_v23, 0.0  ;;  %v14711_v40 = vmov 0 }
 0x682   :  { %14709 = vst [vmem:[#allocation25_spill] sm:$0xff] %v14708_v63  ;;  %vm9999_vm7 = vmneg %vm14710_vm6  ;;  %v14823_v63 = vld [vmem:[#allocation57_spill] sm:$0xff] }
 0x683   :  { %5887 = vmatpush.msk.msra.mxu2 %vm9981_vm1, %v9571_v37  ;;  %v14712_v40 = vsel %vm9999_vm7, 4294967295, %v14711_v40  ;;  %vm14714_vm1 = vcmp.eq.f32.partialorder %v9303_v27, 0.0  ;;  %v14715_v37 = vmov 0 }
 0x684   :  { %14713 = vst [vmem:[#allocation23_spill] sm:$0xff] %v14712_v40  ;;  %vm10008_vm9 = vmneg %vm14714_vm1  ;;  %v14816_v40 = vld [vmem:[#allocation12_spill] sm:$0xff] }
 0x685   :  { %5889 = vmatpush.msk.msra.mxu2 %vm9990_vm2, %v9593_v52  ;;  %v14716_v37 = vsel %vm10008_vm9, 4294967295, %v14715_v37  ;;  %vm14718_vm2 = vcmp.eq.f32.partialorder %v14524_v26, 0.0  ;;  %v14719_v52 = vmov 0 }
 0x686   :  { %14717 = vst [vmem:[#allocation21_spill] sm:$0xff] %v14716_v37  ;;  %vm10017_vm6 = vmneg %vm14718_vm2  ;;  %vm14726_vm2 = vcmp.eq.f32.partialorder %v9195_v62, 0.0  ;;  %v14815_v37 = vld [vmem:[#allocation13_spill] sm:$0xff] }
 0x687   :  { %5891 = vmatpush.msk.msra.mxu2 %vm9999_vm7, %v9609_v3  ;;  %v14720_v52 = vsel %vm10017_vm6, 4294967295, %v14719_v52  ;;  %vm14722_vm7 = vcmp.eq.f32.partialorder %v14525_v25, 0.0  ;;  %v14723_v3 = vmov 0 }
 0x688   :  { %14721 = vst [vmem:[#allocation115_spill] sm:$0xff] %v14720_v52  ;;  %vm10026_vm1 = vmneg %vm14722_vm7  ;;  %vm14730_vm7 = vcmp.eq.f32.partialorder %v9244_v41, 0.0  ;;  %v14814_v52 = vld [vmem:[#allocation14_spill] sm:$0xff] }
 0x689   :  { %5893 = vmatpush.msk.msra.mxu2 %vm10008_vm9, %v9625_v12  ;;  %v14724_v3 = vsel %vm10026_vm1, 4294967295, %v14723_v3  ;;  %vm10036_vm9 = vmneg %vm14726_vm2  ;;  %v14727_v12 = vmov 0 }
 0x68a   :  { %14725 = vst [vmem:[#allocation20_spill] sm:$0xff] %v14724_v3  ;;  %v14728_v12 = vsel %vm10036_vm9, 4294967295, %v14727_v12  ;;  %v14803_v3 = vld [vmem:[#allocation100_spill] sm:$0xff] }
 0x68b   :  { %5895 = vmatpush.msk.msra.mxu2 %vm10017_vm6, %v9641_v59  ;;  %14729 = vst [vmem:[#allocation83_spill] sm:$0xff] %v14728_v12  ;;  %vm10045_vm6 = vmneg %vm14730_vm7  ;;  %v14731_v59 = vmov 0  ;;  %v14797_v12 = vld [vmem:[#allocation101_spill] sm:$0xff] }
 0x68c   :  { %v14732_v59 = vsel %vm10045_vm6, 4294967295, %v14731_v59 }
 0x68d   :  { %5897 = vmatpush.msk.msra.mxu2 %vm10026_vm1, %v9644_v56  ;;  %14733 = vst [vmem:[#allocation80_spill] sm:$0xff] %v14732_v59  ;;  %vm14734_vm1 = vcmp.eq.f32.partialorder %v9166_v2, 0.0  ;;  %v14735_v56 = vmov 0  ;;  %v14791_v59 = vld [vmem:[#allocation52_spill] sm:$0xff]  ;;  %v7192_v2 = vld [vmem:[%s13685_s0 + $0x168] sm:$0xff] }
 0x68e   :  { %2440 = vmatmul.f32.vlgmr.msra.gmra.mxu2 %v9705_v55  ;;  %vm10054_vm2 = vmneg %vm14734_vm1 }
 0x68f   :  { %5899 = vmatpush.msk.msrb.mxu2 %vm10036_vm9, %v9577_v16  ;;  %v14736_v56 = vsel %vm10054_vm2, 4294967295, %v14735_v56  ;;  %vm14738_vm9 = vcmp.eq.f32.partialorder %v9236_v35, 0.0  ;;  %v14739_v16 = vmov 0 }
 0x690   :  { %14737 = vst [vmem:[#allocation78_spill] sm:$0xff] %v14736_v56  ;;  %vm10063_vm7 = vmneg %vm14738_vm9  ;;  %v14750_v56 = vld [vmem:[#allocation10_spill] sm:$0xff] }
 0x691   :  { %5901 = vmatpush.msk.msrb.mxu2 %vm10045_vm6, %v9554_v45  ;;  %v14740_v16 = vsel %vm10063_vm7, 4294967295, %v14739_v16  ;;  %vm14742_vm6 = vcmp.eq.f32.partialorder %v9276_v13, 0.0  ;;  %v14743_v45 = vmov 0 }
 0x692   :  { %14741 = vst [vmem:[#allocation76_spill] sm:$0xff] %v14740_v16  ;;  %vm10072_vm1 = vmneg %vm14742_vm6  ;;  %v14785_v16 = vld [vmem:[#allocation103_spill] sm:$0xff] }
 0x693   :  { %5903 = vmatpush.msk.msrb.mxu2 %vm10054_vm2, %v9535_v54  ;;  %v14744_v45 = vsel %vm10072_vm1, 4294967295, %v14743_v45  ;;  %vm14746_vm2 = vcmp.eq.f32.partialorder %v9203_v19, 0.0  ;;  %v14747_v54 = vmov 0  ;;  %v7196_v19 = vld [vmem:[%s13685_s0 + $0x178] sm:$0xff] }
 0x694   :  { %14745 = vst [vmem:[#allocation73_spill] sm:$0xff] %v14744_v45  ;;  %vm10081_vm9 = vmneg %vm14746_vm2  ;;  %v14779_v45 = vld [vmem:[#allocation105_spill] sm:$0xff] }
 0x695   :  { %5905 = vmatpush.msk.msrb.mxu2 %vm10063_vm7, %v9524_v39  ;;  %v14748_v54 = vsel %vm10081_vm9, 4294967295, %v14747_v54  ;;  %vm14751_vm7 = vcmp.eq.f32.partialorder %v9221_v58, 0.0  ;;  %v14752_v39 = vmov 0 }
 0x696   :  { %14749 = vst [vmem:[#allocation71_spill] sm:$0xff] %v14748_v54  ;;  %vm10090_vm6 = vmneg %vm14751_vm7  ;;  %v14773_v54 = vld [vmem:[#allocation104_spill] sm:$0xff] }
 0x697   :  { %5907 = vmatpush.msk.msrb.mxu2 %vm10072_vm1, %v9518_v8  ;;  %v14753_v39 = vsel %vm10090_vm6, 4294967295, %v14752_v39  ;;  %vm14755_vm1 = vcmp.eq.f32.partialorder %v9259_v38, 0.0  ;;  %v14756_v8 = vmov 0 }
 0x698   :  { %14754 = vst [vmem:[#allocation69_spill] sm:$0xff] %v14753_v39  ;;  %vm10099_vm2 = vmneg %vm14755_vm1  ;;  %v14767_v39 = vld [vmem:[#allocation9_spill] sm:$0xff] }
 0x699   :  { %5909 = vmatpush.msk.msrb.mxu2 %vm10081_vm9, %v14750_v56  ;;  %v14757_v8 = vsel %vm10099_vm2, 4294967295, %v14756_v8  ;;  %vm14759_vm9 = vcmp.eq.f32.partialorder %v9289_v22, 0.0  ;;  %v14760_v56 = vmov 0 }
 0x69a   :  { %14758 = vst [vmem:[#allocation67_spill] sm:$0xff] %v14757_v8  ;;  %vm10108_vm7 = vmneg %vm14759_vm9  ;;  %v14770_v8 = vmov 0 }
 0x69b   :  { %5911 = vmatpush.msk.msrb.mxu2 %vm10090_vm6, %v9547_v60  ;;  %v14761_v56 = vsel %vm10108_vm7, 4294967295, %v14760_v56  ;;  %vm14763_vm6 = vcmp.eq.f32.partialorder %v9286_v42, 0.0  ;;  %v14764_v60 = vmov 0 }
 0x69c   :  { %14762 = vst [vmem:[#allocation64_spill] sm:$0xff] %v14761_v56  ;;  %vm10117_vm1 = vmneg %vm14763_vm6  ;;  %v14776_v56 = vmov 0 }
 0x69d   :  { %5913 = vmatpush.msk.msrb.mxu2 %vm10099_vm2, %v9574_v17  ;;  %v14765_v60 = vsel %vm10117_vm1, 4294967295, %v14764_v60  ;;  %v14768_v17 = vld [vmem:[#allocation171_spill] sm:$0xff] }
 0x69e   :  { %14766 = vst [vmem:[#allocation61_spill] sm:$0xff] %v14765_v60  ;;  %vm14769_vm2 = vcmp.eq.f32.partialorder %v14768_v17, 0.0  ;;  %v14782_v60 = vmov 0 }
 0x69f   :  { %5915 = vmatpush.msk.msrb.mxu2 %vm10108_vm7, %v9596_v32  ;;  %vm10126_vm9 = vmneg %vm14769_vm2  ;;  %v14774_v32 = vld [vmem:[#allocation175_spill] sm:$0xff] }
 0x6a0   :  { %v14771_v8 = vsel %vm10126_vm9, 4294967295, %v14770_v8  ;;  %vm14775_vm7 = vcmp.eq.f32.partialorder %v14774_v32, 0.0 }
 0x6a1   :  { %5917 = vmatpush.msk.msrb.mxu2 %vm10117_vm1, %v14767_v39  ;;  %14772 = vst [vmem:[#allocation59_spill] sm:$0xff] %v14771_v8  ;;  %vm10135_vm6 = vmneg %vm14775_vm7  ;;  %v14780_v39 = vld [vmem:[#allocation176_spill] sm:$0xff]  ;;  %v14788_v8 = vmov 0 }
 0x6a2   :  { %v14777_v56 = vsel %vm10135_vm6, 4294967295, %v14776_v56  ;;  %vm14781_vm1 = vcmp.eq.f32.partialorder %v14780_v39, 0.0 }
 0x6a3   :  { %5919 = vmatpush.msk.msrb.mxu2 %vm10126_vm9, %v14773_v54  ;;  %14778 = vst [vmem:[#allocation63_spill] sm:$0xff] %v14777_v56  ;;  %vm10144_vm2 = vmneg %vm14781_vm1  ;;  %v14786_v54 = vld [vmem:[#allocation178_spill] sm:$0xff]  ;;  %v14794_v56 = vmov 0 }
 0x6a4   :  { %v14783_v60 = vsel %vm10144_vm2, 4294967295, %v14782_v60  ;;  %vm14787_vm9 = vcmp.eq.f32.partialorder %v14786_v54, 0.0 }
 0x6a5   :  { %5921 = vmatpush.msk.msrb.mxu2 %vm10135_vm6, %v14779_v45  ;;  %14784 = vst [vmem:[#allocation60_spill] sm:$0xff] %v14783_v60  ;;  %vm10153_vm7 = vmneg %vm14787_vm9  ;;  %v14792_v45 = vld [vmem:[#allocation179_spill] sm:$0xff]  ;;  %v14800_v60 = vmov 0 }
 0x6a6   :  { %v14789_v8 = vsel %vm10153_vm7, 4294967295, %v14788_v8  ;;  %vm14793_vm6 = vcmp.eq.f32.partialorder %v14792_v45, 0.0  ;;  %v7170_v45 = vld [vmem:[%s13685_s0 + $0x110] sm:$0xff] }
 0x6a7   :  { %5923 = vmatpush.msk.msrb.mxu2 %vm10144_vm2, %v14785_v16  ;;  %14790 = vst [vmem:[#allocation58_spill] sm:$0xff] %v14789_v8  ;;  %vm10162_vm1 = vmneg %vm14793_vm6  ;;  %v14798_v16 = vld [vmem:[#allocation181_spill] sm:$0xff]  ;;  %vm14804_vm6 = vcmp.eq.f32.partialorder %v9711_v43, 0.0 }
 0x6a8   :  { %v14795_v56 = vsel %vm10162_vm1, 4294967295, %v14794_v56  ;;  %vm14799_vm2 = vcmp.eq.f32.partialorder %v14798_v16, 0.0  ;;  %v14810_v8 = vld [vmem:[#allocation17_spill] sm:$0xff] }
 0x6a9   :  { %5925 = vmatpush.msk.msrb.mxu2 %vm10153_vm7, %v14791_v59  ;;  %14796 = vst [vmem:[#allocation56_spill] sm:$0xff] %v14795_v56  ;;  %vm10171_vm9 = vmneg %vm14799_vm2  ;;  %v14805_v59 = vmov 0  ;;  %v14809_v56 = vld [vmem:[#allocation18_spill] sm:$0xff]  ;;  %vm14812_vm2 = vcmask 64512  }
 0x6aa   :  { %v14801_v60 = vsel %vm10171_vm9, 4294967295, %v14800_v60  ;;  %vm10181_vm7 = vmneg %vm14804_vm6 }
 0x6ab   :  { %5927 = vmatpush.msk.msrb.mxu2 %vm10162_vm1, %v14797_v12  ;;  %14802 = vst [vmem:[#allocation54_spill] sm:$0xff] %v14801_v60  ;;  %v14806_v59 = vsel %vm10181_vm7, 4294967295, %v14805_v59  ;;  %v14808_v12 = vld [vmem:[#allocation19_spill] sm:$0xff]  ;;  %v14811_v60 = vld [vmem:[#allocation16_spill] sm:$0xff]  ;;  %vm14858_vm6 = vmmov %vm14812_vm2 }
 0x6ac   :  { %14807 = vst [vmem:[#allocation94_spill] sm:$0xff] %v14806_v59  ;;  %v14822_v59 = vld [vmem:[#allocation90_spill] sm:$0xff] }
 0x6ad   :  { %5929 = vmatpush.msk.msrb.mxu2 %vm10171_vm9, %v14803_v3  ;;  %v14813_v3 = vld [vmem:[#allocation15_spill] sm:$0xff] }
 0x6ae   :  { %2460 = vmatmul.f32.vlgmr.msrb.gmra.mxu2 %v9733_v4 }
 0x6af   :  { %5931 = vmatpush.msk.msra.mxu2 %vm10181_vm7, %v9713_v51  ;;  %v14817_v51 = vld [vmem:[#allocation11_spill] sm:$0xff] }
 0x6b1   :  { %2506 = vmatpush.msrb.mxu2 %v14808_v12  ;;  %v14818_v12 = vld [vmem:[#allocation47_spill] sm:$0xff] }
 0x6b3   :  { %2507 = vmatpush.msrb.mxu2 %v14809_v56  ;;  %v14819_v56 = vld [vmem:[#allocation50_spill] sm:$0xff] }
 0x6b5   :  { %2508 = vmatpush.msrb.mxu2 %v14810_v8  ;;  %v14820_v8 = vld [vmem:[#allocation53_spill] sm:$0xff] }
 0x6b6   :  { %5932 = vmatmul.msk.f32.vlgmr.msra.gmra.mxu2 %vm14812_vm2, %v9740_v24 }
 0x6b7   :  { %2509 = vmatpush.msrb.mxu2 %v14811_v60  ;;  %v14821_v60 = vld [vmem:[#allocation85_spill] sm:$0xff] }
 0x6b9   :  { %2510 = vmatpush.msrb.mxu2 %v14813_v3  ;;  %v14824_v3 = vld [vmem:[#allocation89_spill] sm:$0xff] }
 0x6bb   :  { %2511 = vmatpush.msrb.mxu2 %v14814_v52  ;;  %v14825_v52 = vld [vmem:[#allocation51_spill] sm:$0xff] }
 0x6bd   :  { %2512 = vmatpush.msrb.mxu2 %v14815_v37  ;;  %v14827_v37 = vld [vmem:[#allocation45_spill] sm:$0xff] }
 0x6bf   :  { %2513 = vmatpush.msrb.mxu2 %v14816_v40  ;;  %v14826_v40 = vld [vmem:[#allocation48_spill] sm:$0xff] }
 0x6c1   :  { %2514 = vmatpush.msrb.mxu2 %v14817_v51  ;;  %v14828_v51 = vld [vmem:[#allocation43_spill] sm:$0xff] }
 0x6c3   :  { %2515 = vmatpush.msrb.mxu2 %v14818_v12  ;;  %v14829_v12 = vld [vmem:[#allocation40_spill] sm:$0xff] }
 0x6c5   :  { %2516 = vmatpush.msrb.mxu2 %v14819_v56  ;;  %v14830_v56 = vld [vmem:[#allocation38_spill] sm:$0xff] }
 0x6c7   :  { %2517 = vmatpush.msrb.mxu2 %v14820_v8  ;;  %v14831_v8 = vld [vmem:[#allocation36_spill] sm:$0xff] }
 0x6c9   :  { %2518 = vmatpush.msrb.mxu2 %v14821_v60  ;;  %v14834_v60 = vld [vmem:[#allocation30_spill] sm:$0xff] }
 0x6cb   :  { %2519 = vmatpush.msrb.mxu2 %v14822_v59  ;;  %v14832_v59 = vld [vmem:[#allocation34_spill] sm:$0xff] }
 0x6cd   :  { %2520 = vmatpush.msrb.mxu2 %v14823_v63  ;;  %v14833_v63 = vld [vmem:[#allocation32_spill] sm:$0xff] }
 0x6cf   :  { %2521 = vmatpush.msrb.mxu2 %v14824_v3  ;;  %v14835_v3 = vld [vmem:[#allocation28_spill] sm:$0xff] }
 0x6d0   :  { %2522 = vmatmul.f32.vlgmr.msrb.gmra.mxu2 %v9484_v57  ;;  %v14836_v57 = vld [vmem:[#allocation26_spill] sm:$0xff] }
 0x6d1   :  { %2526 = vmatpush.msra.mxu2 %v14825_v52  ;;  %v14837_v52 = vld [vmem:[#allocation24_spill] sm:$0xff] }
 0x6d3   :  { %2527 = vmatpush.msra.mxu2 %v14826_v40  ;;  %v14838_v40 = vld [vmem:[#allocation22_spill] sm:$0xff] }
 0x6d5   :  { %2528 = vmatpush.msra.mxu2 %v14827_v37  ;;  %v14839_v37 = vld [vmem:[#allocation42_spill] sm:$0xff] }
 0x6d7   :  { %2529 = vmatpush.msra.mxu2 %v14828_v51  ;;  %v14840_v51 = vld [vmem:[#allocation86_spill] sm:$0xff] }
 0x6d9   :  { %2530 = vmatpush.msra.mxu2 %v14829_v12  ;;  %v14841_v12 = vld [vmem:[#allocation84_spill] sm:$0xff] }
 0x6db   :  { %2531 = vmatpush.msra.mxu2 %v14830_v56  ;;  %v14842_v56 = vld [vmem:[#allocation81_spill] sm:$0xff] }
 0x6dd   :  { %2532 = vmatpush.msra.mxu2 %v14831_v8  ;;  %v14843_v8 = vld [vmem:[#allocation79_spill] sm:$0xff] }
 0x6df   :  { %2533 = vmatpush.msra.mxu2 %v14832_v59  ;;  %v14844_v59 = vld [vmem:[#allocation77_spill] sm:$0xff] }
 0x6e1   :  { %2534 = vmatpush.msra.mxu2 %v14833_v63  ;;  %v14845_v63 = vld [vmem:[#allocation75_spill] sm:$0xff] }
 0x6e3   :  { %2535 = vmatpush.msra.mxu2 %v14834_v60  ;;  %v14846_v60 = vld [vmem:[#allocation74_spill] sm:$0xff] }
 0x6e5   :  { %2536 = vmatpush.msra.mxu2 %v14835_v3  ;;  %v14847_v3 = vld [vmem:[#allocation72_spill] sm:$0xff] }
 0x6e7   :  { %2537 = vmatpush.msra.mxu2 %v14836_v57  ;;  %v10231_v57 = vpop.f32.mrf.mxu2 }
 0x6e9   :  { %2538 = vmatpush.msra.mxu2 %v14837_v52  ;;  %v14848_v52 = vld [vmem:[#allocation70_spill] sm:$0xff] }
 0x6eb   :  { %2539 = vmatpush.msra.mxu2 %v14838_v40  ;;  %v14849_v40 = vld [vmem:[#allocation68_spill] sm:$0xff] }
 0x6ed   :  { %2540 = vmatpush.msra.mxu2 %v14839_v37  ;;  %v14850_v37 = vld [vmem:[#allocation66_spill] sm:$0xff] }
 0x6ef   :  { %2541 = vmatpush.msra.mxu2 %v14840_v51  ;;  %v14852_v51 = vld [vmem:[#allocation62_spill] sm:$0xff] }
 0x6f0   :  { %2542 = vmatmul.f32.vlgmr.msra.gmra.mxu2 %v9705_v55  ;;  %v14851_v55 = vld [vmem:[#allocation65_spill] sm:$0xff] }
 0x6f1   :  { %2546 = vmatpush.msrb.mxu2 %v14841_v12  ;;  %v10238_v12 = vpop.f32.mrf.mxu2 }
 0x6f3   :  { %2547 = vmatpush.msrb.mxu2 %v14842_v56  ;;  %v14853_v56 = vld [vmem:[#allocation82_spill] sm:$0xff] }
 0x6f5   :  { %2548 = vmatpush.msrb.mxu2 %v14843_v8  ;;  %v14854_v8 = vld [vmem:[#allocation88_spill] sm:$0xff] }
 0x6f7   :  { %2549 = vmatpush.msrb.mxu2 %v14844_v59  ;;  %v14855_v59 = vld [vmem:[#allocation55_spill] sm:$0xff] }
 0x6f9   :  { %2550 = vmatpush.msrb.mxu2 %v14845_v63  ;;  %v14856_v63 = vld [vmem:[#allocation87_spill] sm:$0xff] }
 0x6fb   :  { %2551 = vmatpush.msrb.mxu2 %v14846_v60  ;;  %v14857_v60 = vld [vmem:[#allocation93_spill] sm:$0xff] }
 0x6fd   :  { %2552 = vmatpush.msrb.mxu2 %v14847_v3  ;;  %v10246_v3 = vpop.f32.mrf.mxu2 }
 0x6ff   :  { %2553 = vmatpush.msrb.mxu2 %v14848_v52 }
 0x701   :  { %2554 = vmatpush.msrb.mxu2 %v14849_v40 }
 0x703   :  { %2555 = vmatpush.msrb.mxu2 %v14850_v37 }
 0x705   :  { %2556 = vmatpush.msrb.mxu2 %v14851_v55  ;;  %v10250_v52 = vpop.f32.mrf.mxu2 }
 0x707   :  { %2557 = vmatpush.msrb.mxu2 %v14852_v51  ;;  %v2601_v51 = vld [vmem:[%s13693_s8 + $0x78] sm:$0xff] }
 0x708   :  { %2604 = vmatpush.msra.mxu0 %v2601_v51  ;;  %v2596_v51 = vld [vmem:[%s13693_s8 + $0x50] sm:$0xff] }
 0x709   :  { %2558 = vmatpush.msrb.mxu2 %v14853_v56  ;;  %v2600_v56 = vld [vmem:[%s13693_s8 + $0x70] sm:$0xff] }
 0x70a   :  { %2605 = vmatpush.msra.mxu0 %v2600_v56 }
 0x70b   :  { %2559 = vmatpush.msrb.mxu2 %v14854_v8  ;;  %v2598_v8 = vld [vmem:[%s13693_s8 + $0x60] sm:$0xff] }
 0x70d   :  { %2560 = vmatpush.msrb.mxu2 %v14855_v59  ;;  %v2421_v40 = vpop.f32.mrf.mxu2 }
 0x70f   :  { %2561 = vmatpush.msrb.mxu2 %v14856_v63  ;;  %v2597_v63 = vld [vmem:[%s13693_s8 + $0x58] sm:$0xff] }
 0x710   :  { %2562 = vmatmul.f32.vlgmr.msrb.gmra.mxu2 %v9733_v4  ;;  %v2599_v4 = vld [vmem:[%s13693_s8 + $0x68] sm:$0xff] }
 0x711   :  { %2581 = vmatpush.msra.mxu2 %v14857_v60  ;;  %2606 = vmatpush.msra.mxu0 %v2599_v4 }
 0x713   :  { %2607 = vmatpush.msra.mxu0 %v2598_v8 }
 0x715   :  { %v2441_v37 = vpop.f32.mrf.mxu2  ;;  %2608 = vmatpush.msra.mxu0 %v2597_v63  ;;  %v2595_v63 = vld [vmem:[%s13693_s8 + $0x48] sm:$0xff] }
 0x717   :  { %2609 = vmatpush.msra.mxu0 %v2596_v51  ;;  %v2594_v51 = vld [vmem:[%s13693_s8 + $0x40] sm:$0xff] }
 0x718   :  { %5933 = vmatmul.msk.f32.vlgmr.msra.gmra.mxu2 %vm14858_vm6, %v9740_v24  ;;  %v2442_v24 = vadd.f32 %v2441_v37, %v2421_v40 }
 0x719   :  { %2610 = vmatpush.msra.mxu0 %v2595_v63  ;;  %v2624_v63 = vld [vmem:[%s13695_s10] sm:$0xff] }
 0x71b   :  { %2611 = vmatpush.msra.mxu0 %v2594_v51 }
 0x731   :  { %v2461_v55 = vpop.f32.mrf.mxu2 }
 0x732   :  { %v2462_v59 = vadd.f32 %v2461_v55, %v2442_v24 }
 0x739   :  { %v2481_v60 = vpop.f32.mrf.mxu2 }
 0x73a   :  { %v2482_v28 = vadd.f32 %v2481_v60, %v2462_v59 }
 0x73c   :  { %6663 = vrcp.f32 %v2482_v28  ;;  %v2496_v18 = vand.u32 2147483648, %v2482_v28  ;;  %v2494_v55 = vand.u32 2147483647, %v2482_v28  ;;  %vm2490_vm6 = vweird.f32 %v2482_v28 }
 0x73d   :  { %vm2484_vm1 = vcmp.gt.f32.partialorder %v2482_v28, 0.0 }
 0x73e   :  { %v2497_v61 = vor.u32 1.1754944e-38, %v2496_v18  ;;  %vm2495_vm9 = vcmp.eq.f32.partialorder %v2494_v55, 8.507059e+37  ;;  %v2591_v18 = vld [vmem:[%s13693_s8 + $0x28] sm:$0xff]  ;;  %v2586_v55 = vld [vmem:[%s13693_s8] sm:$0xff] }
 0x742   :  { %v6664_v40 = vpop.eup %6663 }
 0x743   :  { %v2486_v37 = vmul.f32 %v6664_v40, %v2482_v28  ;;  %vm2491_vm2 = vweird.f32 %v6664_v40  ;;  %v2590_v28 = vld [vmem:[%s13693_s8 + $0x20] sm:$0xff] }
 0x744   :  { %vm2492_vm7 = vmor %vm2490_vm6, %vm2491_vm2 }
 0x745   :  { %v2487_v56 = vsub.f32 1.0, %v2486_v37  ;;  %v2593_v37 = vld [vmem:[%s13693_s8 + $0x38] sm:$0xff] }
 0x746   :  { %2612 = vmatpush.msra.mxu0 %v2593_v37  ;;  %v7114_v37 = vld [vmem:[%s13685_s0] sm:$0xff] }
 0x747   :  { %v2488_v4 = vmul.f32 %v6664_v40, %v2487_v56  ;;  %v2588_v56 = vld [vmem:[%s13693_s8 + $0x10] sm:$0xff] }
 0x749   :  { %v2489_v24 = vadd.f32 %v6664_v40, %v2488_v4  ;;  %v2587_v4 = vld [vmem:[%s13693_s8 + $0x8] sm:$0xff] }
 0x74b   :  { %v2493_v8 = vsel %vm2492_vm7, %v6664_v40, %v2489_v24  ;;  %v2589_v40 = vld [vmem:[%s13693_s8 + $0x18] sm:$0xff]  ;;  %vm14859_vm7 = vcmask 261120  }
 0x74c   :  { %v2498_v59 = vsel %vm2495_vm9, %v2497_v61, %v2493_v8  ;;  %v2592_v61 = vld [vmem:[%s13693_s8 + $0x30] sm:$0xff]  ;;  %v2627_v8 = vld [vmem:[%s13695_s10 + $0x18] sm:$0xff] }
 0x74d   :  { %v2499_v60 = vsel %vm2484_vm1, %v2498_v59, 0.0  ;;  %2613 = vmatpush.msra.mxu0 %v2592_v61  ;;  %v2626_v59 = vld [vmem:[%s13695_s10 + $0x10] sm:$0xff]  ;;  %2640 = vmatpush.msrb.mxu2 %v2627_v8  ;;  %v2362_v61 = vadd.f32 %v10238_v12, %v10231_v57  ;;  %vm14860_vm1 = vmmov %vm14859_vm7 }
 0x74e   :  { %2502 = vperm.xlu2 %6461, %v2499_v60   ;;  %v2625_v60 = vld [vmem:[%s13695_s10 + $0x8] sm:$0xff]  ;;  %vm14861_vm9 = vmmov %vm14860_vm1 }
 0x74f   :  { %2614 = vmatpush.msra.mxu0 %v2591_v18  ;;  %2641 = vmatpush.msrb.mxu2 %v2626_v59  ;;  %v7115_v18 = vld [vmem:[%s13685_s0 + $0x8] sm:$0xff]  ;;  %v7116_v59 = vld [vmem:[%s13685_s0 + $0x10] sm:$0xff]  ;;  %vm14863_vm2 = vmmov %vm14860_vm1 }
 0x750   :  { %vm14864_vm6 = vmmov %vm14860_vm1 }
 0x751   :  { %2615 = vmatpush.msra.mxu0 %v2590_v28  ;;  %2642 = vmatpush.msrb.mxu2 %v2625_v60 }
 0x753   :  { %2616 = vmatpush.msra.mxu0 %v2589_v40  ;;  %v2523_v24 = vpop.f32.mrf.mxu2  ;;  %2643 = vmatpush.msrb.mxu2 %v2624_v63  ;;  %v2382_v40 = vadd.f32 %v10246_v3, %v2362_v61  ;;  %v7117_v3 = vld [vmem:[%s13685_s0 + $0x18] sm:$0xff]  ;;  %v7122_v61 = vld [vmem:[%s13685_s0 + $0x40] sm:$0xff] }
 0x754   :  { %5934 = vmatmul.msk.f32.vlgmr.msrb.gmra.mxu2 %vm14859_vm7, %v7114_v37  ;;  %vm14865_vm7 = vmmov %vm14860_vm1  ;;  %v7121_v37 = vld [vmem:[%s13685_s0 + $0x38] sm:$0xff] }
 0x755   :  { %2617 = vmatpush.msra.mxu0 %v2588_v56  ;;  %v2402_v56 = vadd.f32 %v10250_v52, %v2382_v40  ;;  %v7118_v52 = vld [vmem:[%s13685_s0 + $0x20] sm:$0xff]  ;;  %v7125_v40 = vld [vmem:[%s13685_s0 + $0x58] sm:$0xff] }
 0x757   :  { %2618 = vmatpush.msra.mxu0 %v2587_v4 }
 0x759   :  { %2619 = vmatpush.msra.mxu0 %v2586_v55 }
 0x75c   :  { %5935 = vmatmul.msk.f32.gmra.mxu2 %vm14860_vm1, %v7115_v18  ;;  %v7123_v18 = vld [vmem:[%s13685_s0 + $0x48] sm:$0xff] }
 0x764   :  { %5936 = vmatmul.msk.f32.gmra.mxu2 %vm14861_vm9, %v7116_v59  ;;  %vm14866_vm9 = vmmov %vm14860_vm1  ;;  %v7130_v59 = vld [vmem:[%s13685_s0 + $0x80] sm:$0xff] }
 0x76c   :  { %5937 = vmatmul.msk.f32.gmra.mxu2 %vm14863_vm2, %v7117_v3  ;;  %vm14867_vm2 = vmmov %vm14860_vm1 }
 0x773   :  { %v2543_v51 = vpop.f32.mrf.mxu2 }
 0x774   :  { %5938 = vmatmul.msk.f32.gmra.mxu2 %vm14864_vm6, %v7118_v52  ;;  %vm14868_vm6 = vmmov %vm14860_vm1 }
 0x793   :  { %v2563_v28 = vpop.f32.mrf.mxu2 }
 0x79b   :  { %v2583_v12 = vpop.f32.mrf.mxu2 }
 0x7a8   :  { %v2503_v4 = vpop.permute.xlu2 %2502 }
 0x7a9   :  { %v2505_v55 = vmul.f32 %v2503_v4, %v2402_v56  ;;  %v7126_v56 = vld [vmem:[%s13685_s0 + $0x60] sm:$0xff]  ;;  %v7127_v4 = vld [vmem:[%s13685_s0 + $0x68] sm:$0xff] }
 0x7ab   :  { %v2524_v8 = vadd.f32 %v2523_v24, %v2505_v55  ;;  %v7119_v24 = vld [vmem:[%s13685_s0 + $0x28] sm:$0xff]  ;;  %v7128_v55 = vld [vmem:[%s13685_s0 + $0x70] sm:$0xff] }
 0x7ac   :  { %5939 = vmatmul.msk.f32.gmra.mxu2 %vm14865_vm7, %v7119_v24  ;;  %vm14869_vm7 = vmmov %vm14860_vm1  ;;  %v7133_v24 = vld [vmem:[%s13685_s0 + $0x98] sm:$0xff] }
 0x7ad   :  { %v2544_v57 = vadd.f32 %v2543_v51, %v2524_v8  ;;  %v7120_v51 = vld [vmem:[%s13685_s0 + $0x30] sm:$0xff]  ;;  %v7129_v8 = vld [vmem:[%s13685_s0 + $0x78] sm:$0xff] }
 0x7af   :  { %v2564_v60 = vadd.f32 %v2563_v28, %v2544_v57  ;;  %v7124_v28 = vld [vmem:[%s13685_s0 + $0x50] sm:$0xff]  ;;  %v7131_v57 = vld [vmem:[%s13685_s0 + $0x88] sm:$0xff] }
 0x7b1   :  { %v10328_v63 = vadd.f32 %v2583_v12, %v2564_v60  ;;  %v7132_v12 = vld [vmem:[%s13685_s0 + $0x90] sm:$0xff]  ;;  %v6463_v60 = vld [vmem:[%s13694_s9] ss:$0 sm:$0xff] }
 0x7b3   :  { %14862 = vst [vmem:[#allocation161_spill] sm:$0xff] %v10328_v63  ;;  %2620 = vmatmul.f32.vlgmr.msra.gmra.mxu0 %v10328_v63 }
 0x7b4   :  { %5940 = vmatmul.msk.f32.gmra.mxu2 %vm14860_vm1, %v7120_v51  ;;  %v7134_v51 = vld [vmem:[%s13689_s4] sm:$0xff] }
 0x7bc   :  { %5941 = vmatmul.msk.f32.gmra.mxu2 %vm14866_vm9, %v7121_v37  ;;  %vm14870_vm9 = vmmov %vm14860_vm1  ;;  %v7135_v37 = vld [vmem:[%s13685_s0 + $0xa0] sm:$0xff] }
 0x7c4   :  { %5942 = vmatmul.msk.f32.gmra.mxu2 %vm14867_vm2, %v7122_v61  ;;  %vm14871_vm2 = vmmov %vm14860_vm1  ;;  %v7136_v61 = vld [vmem:[%s13689_s4 + $0x8] sm:$0xff] }
 0x7cc   :  { %5943 = vmatmul.msk.f32.gmra.mxu2 %vm14868_vm6, %v7123_v18  ;;  %vm14872_vm6 = vmmov %vm14860_vm1  ;;  %v7137_v18 = vld [vmem:[%s13685_s0 + $0xa8] sm:$0xff] }
 0x7d4   :  { %5944 = vmatmul.msk.f32.gmra.mxu2 %vm14869_vm7, %v7124_v28  ;;  %vm14873_vm7 = vmmov %vm14860_vm1  ;;  %v7138_v28 = vld [vmem:[%s13689_s4 + $0x10] sm:$0xff] }
 0x7dc   :  { %5945 = vmatmul.msk.f32.gmra.mxu2 %vm14860_vm1, %v7125_v40  ;;  %v7139_v40 = vld [vmem:[%s13685_s0 + $0xb0] sm:$0xff] }
 0x7e4   :  { %5946 = vmatmul.msk.f32.gmra.mxu2 %vm14870_vm9, %v7126_v56  ;;  %vm14874_vm9 = vmmov %vm14860_vm1  ;;  %v7140_v56 = vld [vmem:[%s13689_s4 + $0x18] sm:$0xff] }
 0x7ec   :  { %5947 = vmatmul.msk.f32.gmra.mxu2 %vm14871_vm2, %v7127_v4  ;;  %vm14875_vm2 = vmmov %vm14860_vm1  ;;  %v7141_v4 = vld [vmem:[%s13685_s0 + $0xb8] sm:$0xff] }
 0x7f4   :  { %5948 = vmatmul.msk.f32.gmra.mxu2 %vm14872_vm6, %v7128_v55  ;;  %vm14876_vm6 = vmmov %vm14860_vm1  ;;  %v7142_v55 = vld [vmem:[%s13689_s4 + $0x20] sm:$0xff] }
 0x7fc   :  { %5949 = vmatmul.msk.f32.gmra.mxu2 %vm14873_vm7, %v7129_v8  ;;  %vm14877_vm7 = vcmask 64512   ;;  %v7143_v8 = vld [vmem:[%s13689_s4 + $0x28] sm:$0xff] }
 0x804   :  { %5950 = vmatmul.msk.f32.gmra.mxu2 %vm14860_vm1, %v7130_v59  ;;  %v7144_v59 = vld [vmem:[%s13689_s4 + $0x30] sm:$0xff] }
 0x80c   :  { %5951 = vmatmul.msk.f32.gmra.mxu2 %vm14874_vm9, %v7131_v57  ;;  %vm14878_vm9 = vmmov %vm14877_vm7  ;;  %v7145_v57 = vld [vmem:[%s13689_s4 + $0x38] sm:$0xff] }
 0x814   :  { %5952 = vmatmul.msk.f32.gmra.mxu2 %vm14875_vm2, %v7132_v12  ;;  %vm14879_vm2 = vmmov %vm14860_vm1  ;;  %v7146_v12 = vld [vmem:[%s13689_s4 + $0x40] sm:$0xff] }
 0x81c   :  { %5953 = vmatmul.msk.f32.gmra.mxu2 %vm14876_vm6, %v7133_v24  ;;  %vm14880_vm6 = vmmov %vm14877_vm7  ;;  %v10466_v24 = vpop.f32.mrf.mxu2 }
 0x824   :  { %5954 = vmatmul.msk.f32.gmra.mxu2 %vm14860_vm1, %v7135_v37  ;;  %v7151_v37 = vld [vmem:[%s13689_s4 + $0x60] sm:$0xff] }
 0x82c   :  { %5955 = vmatmul.msk.f32.gmra.mxu2 %vm14879_vm2, %v7137_v18  ;;  %v7152_v18 = vld [vmem:[%s13685_s0 + $0xc8] sm:$0xff] }
 0x830   :  { %v2621_v3 = vpop.f32.mrf.mxu0 }
 0x831   :  { %v2622_v52 = vadd.f32 %v6463_v60, %v2621_v3  ;;  %v7147_v60 = vld [vmem:[%s13689_s4 + $0x48] sm:$0xff]  ;;  %v7148_v3 = vld [vmem:[%s13689_s4 + $0x50] sm:$0xff] }
 0x833   :  { %2807 = vmatpush.msrb.mxu1 %v2622_v52  ;;  %v7149_v52 = vld [vmem:[%s13689_s4 + $0x58] sm:$0xff] }
 0x834   :  { %5983 = vmatmul.msk.f32.vlgmr.msrb.gmra.mxu1 %vm14877_vm7, %v7134_v51  ;;  %vm14881_vm7 = vmmov %vm14860_vm1  ;;  %v7150_v51 = vld [vmem:[%s13685_s0 + $0xc0] sm:$0xff] }
 0x835   :  { %5956 = vmatmul.msk.f32.gmra.mxu2 %vm14881_vm7, %v7139_v40  ;;  %vm14882_vm1 = vmmov %vm14880_vm6 }
 0x836   :  { %vm14886_vm7 = vmmov %vm14882_vm1 }
 0x83c   :  { %5984 = vmatmul.msk.f32.gmra.mxu1 %vm14878_vm9, %v7136_v61  ;;  %vm14883_vm9 = vmmov %vm14879_vm2  ;;  %v10476_v61 = vpop.f32.mrf.mxu2 }
 0x83d   :  { %5957 = vmatmul.msk.f32.gmra.mxu2 %vm14883_vm9, %v7141_v4  ;;  %vm14884_vm2 = vmmov %vm14882_vm1  ;;  %14893 = vst [vmem:[#allocation157_spill] sm:$0xff] %v10476_v61  ;;  %v7155_v4 = vld [vmem:[%s13689_s4 + $0x70] sm:$0xff] }
 0x83e   :  { %vm14887_vm9 = vmmov %vm14882_vm1 }
 0x844   :  { %5985 = vmatmul.msk.f32.gmra.mxu1 %vm14880_vm6, %v7138_v28  ;;  %vm14885_vm6 = vmmov %vm14882_vm1  ;;  %v7153_v28 = vld [vmem:[%s13689_s4 + $0x68] sm:$0xff]  ;;  %v10486_v40 = vpop.f32.mrf.mxu2 }
 0x845   :  { %14895 = vst [vmem:[#allocation153_spill] sm:$0xff] %v10486_v40 }
 0x84c   :  { %5986 = vmatmul.msk.f32.gmra.mxu1 %vm14882_vm1, %v7140_v56  ;;  %v7154_v56 = vld [vmem:[%s13685_s0 + $0xd0] sm:$0xff] }
 0x854   :  { %5987 = vmatmul.msk.f32.gmra.mxu1 %vm14884_vm2, %v7142_v55  ;;  %vm14888_vm2 = vmmov %vm14882_vm1  ;;  %v10496_v55 = vpop.f32.mrf.mxu2 }
 0x855   :  { %14898 = vst [vmem:[#allocation151_spill] sm:$0xff] %v10496_v55 }
 0x85c   :  { %5988 = vmatmul.msk.f32.gmra.mxu1 %vm14885_vm6, %v7143_v8  ;;  %vm14889_vm6 = vmmov %vm14882_vm1  ;;  %v7156_v8 = vld [vmem:[%s13685_s0 + $0xd8] sm:$0xff] }
 0x864   :  { %5989 = vmatmul.msk.f32.gmra.mxu1 %vm14886_vm7, %v7144_v59  ;;  %vm14890_vm7 = vmmov %vm14882_vm1  ;;  %v7157_v59 = vld [vmem:[%s13689_s4 + $0x78] sm:$0xff] }
 0x86c   :  { %5990 = vmatmul.msk.f32.gmra.mxu1 %vm14882_vm1, %v7145_v57  ;;  %vm14891_vm1 = vcmask 261120   ;;  %v10506_v57 = vpop.f32.mrf.mxu2 }
 0x86d   :  { %5958 = vmatmul.msk.f32.gmra.mxu2 %vm14891_vm1, %v7150_v51  ;;  %14901 = vst [vmem:[#allocation149_spill] sm:$0xff] %v10506_v57  ;;  %v7160_v51 = vld [vmem:[%s13685_s0 + $0xe8] sm:$0xff] }
 0x874   :  { %5991 = vmatmul.msk.f32.gmra.mxu1 %vm14887_vm9, %v7146_v12  ;;  %vm14892_vm9 = vmmov %vm14888_vm2  ;;  %v7158_v12 = vld [vmem:[%s13685_s0 + $0xe0] sm:$0xff] }
 0x87c   :  { %5992 = vmatmul.msk.f32.gmra.mxu1 %vm14888_vm2, %v7147_v60  ;;  %vm14894_vm2 = vmmov %vm14891_vm1 }
 0x87d   :  { %5959 = vmatmul.msk.f32.gmra.mxu2 %vm14894_vm2, %v7152_v18  ;;  %v7161_v18 = vld [vmem:[%s13689_s4 + $0x88] sm:$0xff] }
 0x884   :  { %5993 = vmatmul.msk.f32.gmra.mxu1 %vm14889_vm6, %v7148_v3  ;;  %v7159_v3 = vld [vmem:[%s13689_s4 + $0x80] sm:$0xff] }
 0x88c   :  { %5994 = vmatmul.msk.f32.gmra.mxu1 %vm14890_vm7, %v7149_v52  ;;  %vm14896_vm7 = vmmov %vm14891_vm1  ;;  %v10518_v52 = vpop.f32.mrf.mxu2 }
 0x88d   :  { %5960 = vmatmul.msk.f32.gmra.mxu2 %vm14896_vm7, %v7154_v56  ;;  %vm14897_vm1 = vmmov %vm14889_vm6  ;;  %14904 = vst [vmem:[#allocation146_spill] sm:$0xff] %v10518_v52  ;;  %v7162_v56 = vld [vmem:[%s13685_s0 + $0xf0] sm:$0xff] }
 0x894   :  { %5995 = vmatmul.msk.f32.gmra.mxu1 %vm14892_vm9, %v7151_v37  ;;  %vm14899_vm9 = vmmov %vm14894_vm2 }
 0x895   :  { %5961 = vmatmul.msk.f32.gmra.mxu2 %vm14899_vm9, %v7156_v8  ;;  %vm14900_vm2 = vmmov %vm14897_vm1  ;;  %v7163_v8 = vld [vmem:[%s13689_s4 + $0x90] sm:$0xff] }
 0x896   :  { %vm14906_vm9 = vmmov %vm14900_vm2 }
 0x89c   :  { %5996 = vmatmul.msk.f32.gmra.mxu1 %vm14889_vm6, %v7153_v28  ;;  %vm14902_vm6 = vmmov %vm14896_vm7  ;;  %v10530_v28 = vpop.f32.mrf.mxu2 }
 0x89d   :  { %5962 = vmatmul.msk.f32.gmra.mxu2 %vm14902_vm6, %v7158_v12  ;;  %vm14903_vm7 = vmmov %vm14897_vm1  ;;  %14907 = vst [vmem:[#allocation144_spill] sm:$0xff] %v10530_v28  ;;  %v7164_v12 = vld [vmem:[%s13685_s0 + $0xf8] sm:$0xff] }
 0x8a4   :  { %5997 = vmatmul.msk.f32.gmra.mxu1 %vm14897_vm1, %v7155_v4  ;;  %vm14905_vm1 = vmmov %vm14902_vm6 }
 0x8a5   :  { %5963 = vmatmul.msk.f32.gmra.mxu2 %vm14905_vm1, %v7160_v51  ;;  %vm14909_vm6 = vmmov %vm14903_vm7  ;;  %v7165_v51 = vld [vmem:[%s13689_s4 + $0x98] sm:$0xff] }
 0x8ac   :  { %5998 = vmatmul.msk.f32.gmra.mxu1 %vm14900_vm2, %v7157_v59  ;;  %vm14908_vm2 = vmmov %vm14905_vm1  ;;  %v10542_v59 = vpop.f32.mrf.mxu2 }
 0x8ad   :  { %5964 = vmatmul.msk.f32.gmra.mxu2 %vm14908_vm2, %v7162_v56  ;;  %14910 = vst [vmem:[#allocation142_spill] sm:$0xff] %v10542_v59  ;;  %v7166_v56 = vld [vmem:[%s13685_s0 + $0x100] sm:$0xff] }
 0x8b1   :  { %v10512_v60 = vpop.f32.mrf.mxu1 }
 0x8b4   :  { %5999 = vmatmul.msk.f32.gmra.mxu1 %vm14903_vm7, %v7159_v3  ;;  %vm14911_vm7 = vmmov %vm14905_vm1 }
 0x8b5   :  { %5965 = vmatmul.msk.f32.gmra.mxu2 %vm14911_vm7, %v7164_v12  ;;  %vm14912_vm1 = vmmov %vm14909_vm6  ;;  %v7167_v12 = vld [vmem:[%s13689_s4 + $0xa0] sm:$0xff] }
 0x8b9   :  { %v10524_v37 = vpop.f32.mrf.mxu1 }
 0x8bc   :  { %6000 = vmatmul.msk.f32.gmra.mxu1 %vm14906_vm9, %v7161_v18  ;;  %v10554_v18 = vpop.f32.mrf.mxu2  ;;  %vm14914_vm9 = vmmov %vm14908_vm2 }
 0x8bd   :  { %14913 = vst [vmem:[#allocation141_spill] sm:$0xff] %v10554_v18  ;;  %5966 = vmatmul.msk.f32.gmra.mxu2 %vm14914_vm9, %v7166_v56  ;;  %vm14915_vm2 = vmmov %vm14912_vm1  ;;  %v10574_v56 = vld [vmem:[%s13696_s11] ss:$0 sm:$0xff] }
 0x8be   :  { %vm14921_vm9 = vmmov %vm14915_vm2 }
 0x8c1   :  { %v10536_v4 = vpop.f32.mrf.mxu1 }
 0x8c4   :  { %6001 = vmatmul.msk.f32.gmra.mxu1 %vm14909_vm6, %v7163_v8  ;;  %v10565_v0 = vpop.f32.mrf.mxu2  ;;  %vm14917_vm6 = vmmov %vm14911_vm7 }
 0x8c5   :  { %14916 = vst [vmem:[#allocation140_spill] sm:$0xff] %v10565_v0  ;;  %vm14918_vm7 = vmmov %vm14912_vm1 }
 0x8c9   :  { %v10548_v3 = vpop.f32.mrf.mxu1 }
 0x8cc   :  { %6002 = vmatmul.msk.f32.gmra.mxu1 %vm14912_vm1, %v7165_v51  ;;  %v7168_v51 = vld [vmem:[%s13685_s0 + $0x108] sm:$0xff]  ;;  %vm14920_vm1 = vmmov %vm14917_vm6 }
 0x8cd   :  { %5967 = vmatmul.msk.f32.gmra.mxu2 %vm14917_vm6, %v7168_v51  ;;  %v10582_v51 = vpop.f32.mrf.mxu2  ;;  %vm14924_vm6 = vmmov %vm14918_vm7 }
 0x8ce   :  { %14919 = vst [vmem:[#allocation139_spill] sm:$0xff] %v10582_v51 }
 0x8d1   :  { %v2821_v8 = vpop.f32.mrf.mxu1 }
 0x8d2   :  { %v2822_v63 = vadd.f32 %v2821_v8, %v10506_v57 }
 0x8d4   :  { %6665 = vtanh.f32 %v2822_v63  ;;  %6003 = vmatmul.msk.f32.gmra.mxu1 %vm14915_vm2, %v7167_v12  ;;  %v7169_v12 = vld [vmem:[%s13689_s4 + $0xa8] sm:$0xff]  ;;  %vm14923_vm2 = vmmov %vm14920_vm1 }
 0x8d5   :  { %5968 = vmatmul.msk.f32.gmra.mxu2 %vm14920_vm1, %v7170_v45  ;;  %v7172_v45 = vld [vmem:[%s13685_s0 + $0x118] sm:$0xff] }
 0x8d9   :  { %v2824_v16 = vpop.f32.mrf.mxu1 }
 0x8da   :  { %v6666_v63 = vpop.eup %6665  ;;  %v2825_v8 = vadd.f32 %v2824_v16, %v10518_v52 }
 0x8db   :  { %v3013_v39 = vmul.f32 %v6666_v63, %v10574_v56 }
 0x8dc   :  { %6667 = vtanh.f32 %v2825_v8  ;;  %6004 = vmatmul.msk.f32.gmra.mxu1 %vm14918_vm7, %v7169_v12  ;;  %v7171_v12 = vld [vmem:[%s13689_s4 + $0xb0] sm:$0xff]  ;;  %vm14926_vm7 = vmmov %vm14920_vm1 }
 0x8dd   :  { %3066 = vadd.xlane.f32.xlu0 %v3013_v39  ;;  %v10594_v39 = vpop.f32.mrf.mxu2  ;;  %5969 = vmatmul.msk.f32.gmra.mxu2 %vm14923_vm2, %v7172_v45  ;;  %v7174_v45 = vld [vmem:[%s13685_s0 + $0x120] sm:$0xff]  ;;  %vm14927_vm1 = vmmov %vm14924_vm6 }
 0x8de   :  { %14922 = vst [vmem:[#allocation138_spill] sm:$0xff] %v10594_v39 }
 0x8e1   :  { %v2827_v26 = vpop.f32.mrf.mxu1 }
 0x8e2   :  { %v6668_v16 = vpop.eup %6667  ;;  %v2828_v63 = vadd.f32 %v2827_v26, %v10530_v28 }
 0x8e3   :  { %v3014_v8 = vmul.f32 %v6668_v16, %v10574_v56 }
 0x8e4   :  { %6669 = vtanh.f32 %v2828_v63  ;;  %6005 = vmatmul.msk.f32.gmra.mxu1 %vm14921_vm9, %v7171_v12  ;;  %v7173_v12 = vld [vmem:[%s13689_s4 + $0xb8] sm:$0xff]  ;;  %vm14929_vm9 = vmmov %vm14923_vm2 }
 0x8e5   :  { %3068 = vadd.xlane.f32.xlu0 %v3014_v8  ;;  %v10606_v8 = vpop.f32.mrf.mxu2  ;;  %5970 = vmatmul.msk.f32.gmra.mxu2 %vm14926_vm7, %v7174_v45  ;;  %v7176_v45 = vld [vmem:[%s13685_s0 + $0x128] sm:$0xff]  ;;  %vm14930_vm2 = vmmov %vm14927_vm1 }
 0x8e6   :  { %14925 = vst [vmem:[#allocation137_spill] sm:$0xff] %v10606_v8 }
 0x8e9   :  { %v2830_v43 = vpop.f32.mrf.mxu1 }
 0x8ea   :  { %v6670_v26 = vpop.eup %6669  ;;  %v2831_v16 = vadd.f32 %v2830_v43, %v10542_v59 }
 0x8eb   :  { %v3015_v63 = vmul.f32 %v6670_v26, %v10574_v56 }
 0x8ec   :  { %6671 = vtanh.f32 %v2831_v16  ;;  %6006 = vmatmul.msk.f32.gmra.mxu1 %vm14924_vm6, %v7173_v12  ;;  %v7175_v12 = vld [vmem:[%s13689_s4 + $0xc0] sm:$0xff]  ;;  %vm14932_vm6 = vmmov %vm14926_vm7 }
 0x8ed   :  { %3070 = vadd.xlane.f32.xlu0 %v3015_v63  ;;  %v10618_v63 = vpop.f32.mrf.mxu2  ;;  %5971 = vmatmul.msk.f32.gmra.mxu2 %vm14929_vm9, %v7176_v45  ;;  %v7178_v45 = vld [vmem:[%s13685_s0 + $0x130] sm:$0xff]  ;;  %vm14933_vm7 = vmmov %vm14927_vm1 }
 0x8ee   :  { %14928 = vst [vmem:[#allocation136_spill] sm:$0xff] %v10618_v63  ;;  %vm14936_vm9 = vmmov %vm14930_vm2 }
 0x8f1   :  { %v2833_v25 = vpop.f32.mrf.mxu1 }
 0x8f2   :  { %v6672_v43 = vpop.eup %6671  ;;  %v2834_v26 = vadd.f32 %v2833_v25, %v10554_v18 }
 0x8f3   :  { %v3016_v16 = vmul.f32 %v6672_v43, %v10574_v56 }
 0x8f4   :  { %6673 = vtanh.f32 %v2834_v26  ;;  %6007 = vmatmul.msk.f32.gmra.mxu1 %vm14927_vm1, %v7175_v12  ;;  %v7177_v12 = vld [vmem:[%s13689_s4 + $0xc8] sm:$0xff]  ;;  %vm14935_vm1 = vmmov %vm14932_vm6 }
 0x8f5   :  { %3072 = vadd.xlane.f32.xlu0 %v3016_v16  ;;  %v10630_v16 = vpop.f32.mrf.mxu2  ;;  %5972 = vmatmul.msk.f32.gmra.mxu2 %vm14932_vm6, %v7178_v45  ;;  %v7180_v45 = vld [vmem:[%s13685_s0 + $0x138] sm:$0xff]  ;;  %vm14939_vm6 = vmmov %vm14933_vm7 }
 0x8f6   :  { %14931 = vst [vmem:[#allocation134_spill] sm:$0xff] %v10630_v16 }
 0x8f9   :  { %v2836_v42 = vpop.f32.mrf.mxu1 }
 0x8fa   :  { %v6674_v25 = vpop.eup %6673  ;;  %v2837_v43 = vadd.f32 %v2836_v42, %v10565_v0 }
 0x8fb   :  { %v3017_v26 = vmul.f32 %v6674_v25, %v10574_v56 }
 0x8fc   :  { %6675 = vtanh.f32 %v2837_v43  ;;  %6008 = vmatmul.msk.f32.gmra.mxu1 %vm14930_vm2, %v7177_v12  ;;  %v7179_v12 = vld [vmem:[%s13689_s4 + $0xd0] sm:$0xff]  ;;  %vm14938_vm2 = vmmov %vm14935_vm1 }
 0x8fd   :  { %3074 = vadd.xlane.f32.xlu0 %v3017_v26  ;;  %v10642_v26 = vpop.f32.mrf.mxu2  ;;  %5973 = vmatmul.msk.f32.gmra.mxu2 %vm14935_vm1, %v7180_v45  ;;  %v7182_v45 = vld [vmem:[%s13685_s0 + $0x140] sm:$0xff] }
 0x8fe   :  { %14934 = vst [vmem:[#allocation131_spill] sm:$0xff] %v10642_v26 }
 0x901   :  { %v2839_v17 = vpop.f32.mrf.mxu1 }
 0x902   :  { %v6676_v42 = vpop.eup %6675  ;;  %v2840_v25 = vadd.f32 %v2839_v17, %v10582_v51 }
 0x903   :  { %v3018_v43 = vmul.f32 %v6676_v42, %v10574_v56 }
 0x904   :  { %6677 = vtanh.f32 %v2840_v25  ;;  %6009 = vmatmul.msk.f32.gmra.mxu1 %vm14933_vm7, %v7179_v12  ;;  %v7181_v12 = vld [vmem:[%s13689_s4 + $0xd8] sm:$0xff]  ;;  %vm14941_vm7 = vmmov %vm14935_vm1 }
 0x905   :  { %3076 = vadd.xlane.f32.xlu0 %v3018_v43  ;;  %v10654_v43 = vpop.f32.mrf.mxu2  ;;  %5974 = vmatmul.msk.f32.gmra.mxu2 %vm14938_vm2, %v7182_v45  ;;  %v7184_v45 = vld [vmem:[%s13685_s0 + $0x148] sm:$0xff]  ;;  %vm14942_vm1 = vmmov %vm14939_vm6 }
 0x906   :  { %14937 = vst [vmem:[#allocation185_spill] sm:$0xff] %v10654_v43 }
 0x909   :  { %v2842_v54 = vpop.f32.mrf.mxu1 }
 0x90a   :  { %v6678_v17 = vpop.eup %6677  ;;  %v2843_v42 = vadd.f32 %v2842_v54, %v10594_v39 }
 0x90b   :  { %v3019_v25 = vmul.f32 %v6678_v17, %v10574_v56 }
 0x90c   :  { %6679 = vtanh.f32 %v2843_v42  ;;  %6010 = vmatmul.msk.f32.gmra.mxu1 %vm14936_vm9, %v7181_v12  ;;  %v7183_v12 = vld [vmem:[%s13689_s4 + $0xe0] sm:$0xff]  ;;  %vm14944_vm9 = vmmov %vm14938_vm2 }
 0x90d   :  { %3078 = vadd.xlane.f32.xlu0 %v3019_v25  ;;  %v10666_v25 = vpop.f32.mrf.mxu2  ;;  %5975 = vmatmul.msk.f32.gmra.mxu2 %vm14941_vm7, %v7184_v45  ;;  %v7186_v45 = vld [vmem:[%s13685_s0 + $0x150] sm:$0xff]  ;;  %vm14945_vm2 = vmmov %vm14942_vm1 }
 0x90e   :  { %14940 = vst [vmem:[#allocation184_spill] sm:$0xff] %v10666_v25 }
 0x911   :  { %v2845_v62 = vpop.f32.mrf.mxu1 }
 0x912   :  { %v6680_v54 = vpop.eup %6679  ;;  %v2846_v17 = vadd.f32 %v2845_v62, %v10606_v8 }
 0x913   :  { %v3020_v42 = vmul.f32 %v6680_v54, %v10574_v56 }
 0x914   :  { %6681 = vtanh.f32 %v2846_v17  ;;  %6011 = vmatmul.msk.f32.gmra.mxu1 %vm14939_vm6, %v7183_v12  ;;  %v7185_v12 = vld [vmem:[%s13689_s4 + $0xe8] sm:$0xff]  ;;  %vm14947_vm6 = vmmov %vm14941_vm7 }
 0x915   :  { %3080 = vadd.xlane.f32.xlu0 %v3020_v42  ;;  %v10678_v42 = vpop.f32.mrf.mxu2  ;;  %5976 = vmatmul.msk.f32.gmra.mxu2 %vm14944_vm9, %v7186_v45  ;;  %v7188_v45 = vld [vmem:[%s13685_s0 + $0x158] sm:$0xff]  ;;  %vm14948_vm7 = vmmov %vm14942_vm1 }
 0x916   :  { %14943 = vst [vmem:[#allocation183_spill] sm:$0xff] %v10678_v42  ;;  %vm14951_vm9 = vmmov %vm14945_vm2 }
 0x919   :  { %v2848_v32 = vpop.f32.mrf.mxu1 }
 0x91a   :  { %v6682_v62 = vpop.eup %6681  ;;  %v2849_v54 = vadd.f32 %v2848_v32, %v10618_v63 }
 0x91b   :  { %v3021_v17 = vmul.f32 %v6682_v62, %v10574_v56 }
 0x91c   :  { %6683 = vtanh.f32 %v2849_v54  ;;  %6012 = vmatmul.msk.f32.gmra.mxu1 %vm14942_vm1, %v7185_v12  ;;  %v7187_v12 = vld [vmem:[%s13689_s4 + $0xf0] sm:$0xff]  ;;  %vm14950_vm1 = vmmov %vm14947_vm6 }
 0x91d   :  { %3082 = vadd.xlane.f32.xlu2 %v3021_v17  ;;  %v10690_v17 = vpop.f32.mrf.mxu2  ;;  %5977 = vmatmul.msk.f32.gmra.mxu2 %vm14947_vm6, %v7188_v45  ;;  %v7190_v45 = vld [vmem:[%s13685_s0 + $0x160] sm:$0xff]  ;;  %vm14954_vm6 = vmmov %vm14948_vm7 }
 0x91e   :  { %14946 = vst [vmem:[#allocation182_spill] sm:$0xff] %v10690_v17 }
 0x921   :  { %v2851_v23 = vpop.f32.mrf.mxu1 }
 0x922   :  { %v6684_v32 = vpop.eup %6683  ;;  %v2852_v62 = vadd.f32 %v2851_v23, %v10630_v16 }
 0x923   :  { %v3022_v54 = vmul.f32 %v6684_v32, %v10574_v56 }
 0x924   :  { %6685 = vtanh.f32 %v2852_v62  ;;  %6013 = vmatmul.msk.f32.gmra.mxu1 %vm14945_vm2, %v7187_v12  ;;  %v7189_v12 = vld [vmem:[%s13689_s4 + $0xf8] sm:$0xff]  ;;  %vm14953_vm2 = vmmov %vm14950_vm1 }
 0x925   :  { %3084 = vadd.xlane.f32.xlu1 %v3022_v54  ;;  %v10704_v27 = vpop.f32.mrf.mxu2  ;;  %5978 = vmatmul.msk.f32.gmra.mxu2 %vm14950_vm1, %v7190_v45  ;;  %v7193_v45 = vld [vmem:[%s13689_s4 + $0x108] sm:$0xff] }
 0x926   :  { %14949 = vst [vmem:[#allocation180_spill] sm:$0xff] %v10704_v27 }
 0x929   :  { %v2854_v41 = vpop.f32.mrf.mxu1 }
 0x92a   :  { %v6686_v23 = vpop.eup %6685  ;;  %v2855_v32 = vadd.f32 %v2854_v41, %v10642_v26 }
 0x92b   :  { %v3023_v62 = vmul.f32 %v6686_v23, %v10574_v56 }
 0x92c   :  { %6687 = vtanh.f32 %v2855_v32  ;;  %6014 = vmatmul.msk.f32.gmra.mxu1 %vm14948_vm7, %v7189_v12  ;;  %v7191_v32 = vld [vmem:[%s13689_s4 + $0x100] sm:$0xff]  ;;  %vm14956_vm7 = vmmov %vm14950_vm1 }
 0x92d   :  { %3086 = vadd.xlane.f32.xlu0 %v3023_v62  ;;  %v10717_v12 = vpop.f32.mrf.mxu2  ;;  %5979 = vmatmul.msk.f32.gmra.mxu2 %vm14953_vm2, %v7192_v2  ;;  %v7195_v2 = vld [vmem:[%s13689_s4 + $0x110] sm:$0xff]  ;;  %vm14957_vm1 = vmmov %vm14954_vm6 }
 0x92e   :  { %14952 = vst [vmem:[#allocation177_spill] sm:$0xff] %v10717_v12 }
 0x931   :  { %v10702_v54 = vpop.f32.mrf.mxu1 }
 0x932   :  { %v6688_v41 = vpop.eup %6687 }
 0x933   :  { %v3024_v23 = vmul.f32 %v6688_v41, %v10574_v56 }
 0x934   :  { %6015 = vmatmul.msk.f32.gmra.mxu1 %vm14951_vm9, %v7191_v32  ;;  %vm14959_vm9 = vmmov %vm14953_vm2 }
 0x935   :  { %3088 = vadd.xlane.f32.xlu2 %v3024_v23  ;;  %v10727_v35 = vpop.f32.mrf.mxu2  ;;  %v7194_v23 = vld [vmem:[%s13685_s0 + $0x170] sm:$0xff]  ;;  %vm14960_vm2 = vmmov %vm14957_vm1 }
 0x936   :  { %14955 = vst [vmem:[#allocation10_spill] sm:$0xff] %v10727_v35  ;;  %5980 = vmatmul.msk.f32.gmra.mxu2 %vm14956_vm7, %v7194_v23 }
 0x939   :  { %v10715_v62 = vpop.f32.mrf.mxu1 }
 0x93c   :  { %6016 = vmatmul.msk.f32.gmra.mxu1 %vm14954_vm6, %v7193_v45  ;;  %vm14962_vm6 = vmmov %vm14956_vm7 }
 0x93d   :  { %v10738_v45 = vpop.f32.mrf.mxu2  ;;  %vm14963_vm7 = vmmov %vm14957_vm1 }
 0x93e   :  { %14958 = vst [vmem:[#allocation9_spill] sm:$0xff] %v10738_v45  ;;  %5981 = vmatmul.msk.f32.gmra.mxu2 %vm14959_vm9, %v7196_v19  ;;  %v7198_v19 = vld [vmem:[%s13685_s0 + $0x180] sm:$0xff]  ;;  %vm14966_vm9 = vmmov %vm14957_vm1 }
 0x941   :  { %v2863_v41 = vpop.f32.mrf.mxu1 }
 0x942   :  { %v2864_v32 = vadd.f32 %v2863_v41, %v10678_v42 }
 0x944   :  { %6689 = vtanh.f32 %v2864_v32  ;;  %6017 = vmatmul.msk.f32.gmra.mxu1 %vm14957_vm1, %v7195_v2  ;;  %v7197_v32 = vld [vmem:[%s13689_s4 + $0x118] sm:$0xff] }
 0x945   :  { %v10750_v42 = vpop.f32.mrf.mxu2 }
 0x946   :  { %14961 = vst [vmem:[#allocation104_spill] sm:$0xff] %v10750_v42  ;;  %5982 = vmatmul.msk.f32.gmra.mxu2 %vm14962_vm6, %v7198_v19  ;;  %vm14970_vm6 = vmmov %vm14957_vm1 }
 0x949   :  { %v2866_v13 = vpop.f32.mrf.mxu1 }
 0x94a   :  { %v6690_v58 = vpop.eup %6689  ;;  %v2867_v23 = vadd.f32 %v2866_v13, %v10690_v17 }
 0x94b   :  { %v3027_v41 = vmul.f32 %v6690_v58, %v10574_v56 }
 0x94c   :  { %6691 = vtanh.f32 %v2867_v23  ;;  %6018 = vmatmul.msk.f32.gmra.mxu1 %vm14960_vm2, %v7197_v32  ;;  %v7199_v32 = vld [vmem:[%s13689_s4 + $0x120] sm:$0xff]  ;;  %vm14968_vm2 = vmmov %vm14957_vm1 }
 0x94d   :  { %3094 = vadd.xlane.f32.xlu2 %v3027_v41  ;;  %v10762_v17 = vpop.f32.mrf.mxu2 }
 0x94e   :  { %14964 = vst [vmem:[#allocation105_spill] sm:$0xff] %v10762_v17 }
 0x950   :  { %v10764_v22 = vpop.xlane.xlu0 %3066 }
 0x951   :  { %v2869_v2 = vpop.f32.mrf.mxu1 }
 0x952   :  { %v6692_v13 = vpop.eup %6691  ;;  %v2870_v58 = vadd.f32 %v2869_v2, %v10704_v27 }
 0x953   :  { %v3028_v23 = vmul.f32 %v6692_v13, %v10574_v56  ;;  %v7200_v13 = vld [vmem:[%s13689_s4 + $0x128] sm:$0xff] }
 0x954   :  { %6693 = vtanh.f32 %v2870_v58  ;;  %6019 = vmatmul.msk.f32.gmra.mxu1 %vm14963_vm7, %v7199_v32  ;;  %vm14972_vm7 = vmmov %vm14957_vm1 }
 0x955   :  { %3096 = vadd.xlane.f32.xlu2 %v3028_v23  ;;  %v10772_v23 = vpop.f32.mrf.mxu2 }
 0x956   :  { %14965 = vst [vmem:[#allocation103_spill] sm:$0xff] %v10772_v23 }
 0x958   :  { %v10776_v52 = vpop.xlane.xlu0 %3068 }
 0x959   :  { %v2872_v41 = vpop.f32.mrf.mxu1 }
 0x95a   :  { %v6694_v38 = vpop.eup %6693  ;;  %v2873_v19 = vadd.f32 %v2872_v41, %v10717_v12 }
 0x95b   :  { %v3029_v2 = vmul.f32 %v6694_v38, %v10574_v56  ;;  %v7201_v38 = vld [vmem:[%s13689_s4 + $0x130] sm:$0xff] }
 0x95c   :  { %6695 = vtanh.f32 %v2873_v19  ;;  %6020 = vmatmul.msk.f32.gmra.mxu1 %vm14957_vm1, %v7200_v13 }
 0x95d   :  { %3098 = vadd.xlane.f32.xlu2 %v3029_v2  ;;  %v10782_v19 = vpop.f32.mrf.mxu2 }
 0x95e   :  { %14967 = vst [vmem:[#allocation52_spill] sm:$0xff] %v10782_v19 }
 0x961   :  { %v2875_v58 = vpop.f32.mrf.mxu1 }
 0x962   :  { %v6696_v32 = vpop.eup %6695  ;;  %v2876_v27 = vadd.f32 %v2875_v58, %v10727_v35 }
 0x963   :  { %v3030_v57 = vmul.f32 %v6696_v32, %v10574_v56  ;;  %v10790_v32 = vpop.xlane.xlu0 %3070 }
 0x964   :  { %6697 = vtanh.f32 %v2876_v27  ;;  %6021 = vmatmul.msk.f32.gmra.mxu1 %vm14966_vm9, %v7201_v38  ;;  %v7202_v27 = vld [vmem:[%s13689_s4 + $0x138] sm:$0xff]  ;;  %vm14975_vm9 = vmmov %vm14957_vm1 }
 0x965   :  { %3100 = vadd.xlane.f32.xlu2 %v3030_v57  ;;  %v10792_v57 = vpop.f32.mrf.mxu2 }
 0x966   :  { %14969 = vst [vmem:[#allocation101_spill] sm:$0xff] %v10792_v57 }
 0x969   :  { %v2878_v41 = vpop.f32.mrf.mxu1 }
 0x96a   :  { %v6698_v2 = vpop.eup %6697  ;;  %v2879_v13 = vadd.f32 %v2878_v41, %v10738_v45 }
 0x96b   :  { %v3031_v58 = vmul.f32 %v6698_v2, %v10574_v56  ;;  %v7203_v2 = vld [vmem:[%s13689_s4 + $0x140] sm:$0xff] }
 0x96c   :  { %6699 = vtanh.f32 %v2879_v13  ;;  %6022 = vmatmul.msk.f32.gmra.mxu1 %vm14968_vm2, %v7202_v27  ;;  %v10800_v13 = vpop.xlane.xlu0 %3072  ;;  %vm14977_vm2 = vmmov %vm14957_vm1 }
 0x96d   :  { %3102 = vadd.xlane.f32.xlu2 %v3031_v58  ;;  %v10802_v27 = vpop.f32.mrf.mxu2 }
 0x96e   :  { %14971 = vst [vmem:[#allocation100_spill] sm:$0xff] %v10802_v27 }
 0x971   :  { %v2881_v38 = vpop.f32.mrf.mxu1 }
 0x972   :  { %v6700_v12 = vpop.eup %6699  ;;  %v2882_v35 = vadd.f32 %v2881_v38, %v10750_v42 }
 0x973   :  { %v3032_v41 = vmul.f32 %v6700_v12, %v10574_v56 }
 0x974   :  { %6701 = vtanh.f32 %v2882_v35  ;;  %6023 = vmatmul.msk.f32.gmra.mxu1 %vm14970_vm6, %v7203_v2  ;;  %v7204_v35 = vld [vmem:[%s13689_s4 + $0x148] sm:$0xff]  ;;  %v10813_v59 = vpop.xlane.xlu0 %3074  ;;  %vm14979_vm6 = vmmov %vm14957_vm1 }
 0x975   :  { %3104 = vadd.xlane.f32.xlu2 %v3032_v41  ;;  %v10810_v41 = vpop.f32.mrf.mxu2 }
 0x976   :  { %14973 = vst [vmem:[#allocation19_spill] sm:$0xff] %v10810_v41 }
 0x979   :  { %v2884_v58 = vpop.f32.mrf.mxu1 }
 0x97a   :  { %v6702_v45 = vpop.eup %6701  ;;  %v2885_v28 = vadd.f32 %v2884_v58, %v10762_v17 }
 0x97b   :  { %v3033_v38 = vmul.f32 %v6702_v45, %v10574_v56 }
 0x97c   :  { %6703 = vtanh.f32 %v2885_v28  ;;  %6024 = vmatmul.msk.f32.gmra.mxu1 %vm14972_vm7, %v7204_v35  ;;  %v7205_v28 = vld [vmem:[%s13689_s4 + $0x150] sm:$0xff]  ;;  %vm14980_vm7 = vmmov %vm14957_vm1 }
 0x97d   :  { %3106 = vadd.xlane.f32.xlu2 %v3033_v38  ;;  %v10820_v38 = vpop.f32.mrf.mxu2 }
 0x97e   :  { %14974 = vst [vmem:[#allocation18_spill] sm:$0xff] %v10820_v38 }
 0x981   :  { %v2887_v12 = vpop.f32.mrf.mxu1 }
 0x982   :  { %v6704_v2 = vpop.eup %6703  ;;  %v2888_v42 = vadd.f32 %v2887_v12, %v10772_v23 }
 0x983   :  { %v3034_v58 = vmul.f32 %v6704_v2, %v10574_v56  ;;  %v10828_v2 = vpop.xlane.xlu0 %3076 }
 0x984   :  { %6705 = vtanh.f32 %v2888_v42  ;;  %6025 = vmatmul.msk.f32.gmra.mxu1 %vm14957_vm1, %v7205_v28  ;;  %v7206_v42 = vld [vmem:[%s13689_s4 + $0x158] sm:$0xff] }
 0x985   :  { %3108 = vadd.xlane.f32.xlu2 %v3034_v58  ;;  %v10830_v58 = vpop.f32.mrf.mxu2 }
 0x986   :  { %14976 = vst [vmem:[#allocation17_spill] sm:$0xff] %v10830_v58 }
 0x989   :  { %v2890_v45 = vpop.f32.mrf.mxu1 }
 0x98a   :  { %v6706_v35 = vpop.eup %6705  ;;  %v2891_v17 = vadd.f32 %v2890_v45, %v10782_v19 }
 0x98b   :  { %v3035_v12 = vmul.f32 %v6706_v35, %v10574_v56  ;;  %v2861_v35 = vadd.f32 %v10715_v62, %v10666_v25  ;;  %v2858_v62 = vadd.f32 %v10702_v54, %v10654_v43 }
 0x98c   :  { %6707 = vtanh.f32 %v2891_v17  ;;  %6026 = vmatmul.msk.f32.gmra.mxu1 %vm14975_vm9, %v7206_v42  ;;  %v7207_v17 = vld [vmem:[%s13689_s4 + $0x160] sm:$0xff]  ;;  %vm14983_vm9 = vmmov %vm14957_vm1 }
 0x98d   :  { %3110 = vadd.xlane.f32.xlu1 %v3035_v12  ;;  %v3079_v12 = vpop.xlane.xlu0 %3078 }
 0x991   :  { %v2893_v28 = vpop.f32.mrf.mxu1 }
 0x992   :  { %v6708_v23 = vpop.eup %6707  ;;  %v2894_v18 = vadd.f32 %v2893_v28, %v10792_v57 }
 0x993   :  { %v3036_v45 = vmul.f32 %v6708_v23, %v10574_v56  ;;  %v10842_v23 = vpop.f32.mrf.mxu2 }
 0x994   :  { %6709 = vtanh.f32 %v2894_v18  ;;  %6027 = vmatmul.msk.f32.gmra.mxu1 %vm14977_vm2, %v7207_v17  ;;  %14978 = vst [vmem:[#allocation16_spill] sm:$0xff] %v10842_v23  ;;  %v7208_v18 = vld [vmem:[%s13689_s4 + $0x168] sm:$0xff]  ;;  %v3083_v17 = vpop.xlane.xlu2 %3082  ;;  %vm15002_vm2 = vmmov %vm14957_vm1 }
 0x995   :  { %3112 = vadd.xlane.f32.xlu0 %v3036_v45  ;;  %6711 = vtanh.f32 %v2861_v35  ;;  %v3081_v35 = vpop.xlane.xlu0 %3080 }
 0x999   :  { %v2896_v42 = vpop.f32.mrf.mxu1 }
 0x99a   :  { %v6710_v19 = vpop.eup %6709  ;;  %v2897_v0 = vadd.f32 %v2896_v42, %v10802_v27 }
 0x99b   :  { %v3037_v28 = vmul.f32 %v6710_v19, %v10574_v56  ;;  %v6712_v45 = vpop.eup %6711  ;;  %v10857_v54 = vpop.f32.mrf.mxu2 }
 0x99c   :  { %6713 = vtanh.f32 %v2897_v0  ;;  %6028 = vmatmul.msk.f32.gmra.mxu1 %vm14979_vm6, %v7208_v18  ;;  %v3026_v57 = vmul.f32 %v6712_v45, %v10574_v56  ;;  %14981 = vst [vmem:[#allocation15_spill] sm:$0xff] %v10857_v54  ;;  %v2819_v18 = vadd.f32 %v10548_v3, %v10496_v55  ;;  %vm15013_vm6 = vmmov %vm14957_vm1 }
 0x99d   :  { %3114 = vadd.xlane.f32.xlu2 %v3037_v28  ;;  %6715 = vtanh.f32 %v2858_v62  ;;  %v7209_v28 = vld [vmem:[%s13689_s4 + $0x170] sm:$0xff] }
 0x9a0   :  { %v3087_v43 = vpop.xlane.xlu0 %3086 }
 0x9a1   :  { %v2899_v42 = vpop.f32.mrf.mxu1 }
 0x9a2   :  { %v6714_v25 = vpop.eup %6713  ;;  %v2900_v19 = vadd.f32 %v2899_v42, %v10810_v41  ;;  %v10861_v42 = vstv %s3156_s25 }
 0x9a3   :  { %v3038_v0 = vmul.f32 %v6714_v25, %v10574_v56  ;;  %v6716_v62 = vpop.eup %6715  ;;  %v10871_v41 = vadd.f32 %v10861_v42, %v3087_v43 }
 0x9a4   :  { %6717 = vtanh.f32 %v2900_v19  ;;  %6029 = vmatmul.msk.f32.gmra.mxu1 %vm14980_vm7, %v7209_v28  ;;  %vm15014_vm7 = vmmov %vm14957_vm1 }
 0x9a5   :  { %3116 = vadd.xlane.f32.xlu1 %v3038_v0  ;;  %3092 = vadd.xlane.f32.xlu2 %v3026_v57  ;;  %6719 = vtanh.f32 %v2819_v18  ;;  %v3085_v0 = vpop.xlane.xlu1 %3084  ;;  %v3025_v57 = vmul.f32 %v6716_v62, %v10574_v56  ;;  %v2816_v18 = vadd.f32 %v10536_v4, %v10486_v40  ;;  %v10886_v62 = vadd.f32 %v10861_v42, %v3083_v17  ;;  %v7211_v17 = vld [vmem:[%s13689_s4 + $0x180] sm:$0xff] }
 0x9a8   :  { %v3089_v25 = vpop.xlane.xlu2 %3088 }
 0x9a9   :  { %v10864_v45 = vadd.f32 %v10861_v42, %v3089_v25  ;;  %v2902_v19 = vpop.f32.mrf.mxu1  ;;  %v7210_v25 = vld [vmem:[%s13689_s4 + $0x178] sm:$0xff] }
 0x9aa   :  { %v6718_v27 = vpop.eup %6717  ;;  %v2903_v28 = vadd.f32 %v2902_v19, %v10820_v38  ;;  %v10880_v19 = vadd.f32 %v10861_v42, %v3085_v0 }
 0x9ab   :  { %3207 = vmatpush.msrb.mxu0 %v10864_v45  ;;  %v3039_v3 = vmul.f32 %v6718_v27, %v10574_v56  ;;  %v10883_v27 = vpop.f32.mrf.mxu2  ;;  %v6720_v43 = vpop.eup %6719 }
 0x9ac   :  { %6721 = vtanh.f32 %v2903_v28  ;;  %6030 = vmatmul.msk.f32.gmra.mxu1 %vm14957_vm1, %v7210_v25  ;;  %14982 = vst [vmem:[#allocation14_spill] sm:$0xff] %v10883_v27  ;;  %v3012_v0 = vmul.f32 %v6720_v43, %v10574_v56  ;;  %v10898_v25 = vadd.f32 %v10861_v42, %v3079_v12  ;;  %v10914_v43 = vadd.f32 %v10861_v42, %v10813_v59 }
 0x9ad   :  { %3090 = vadd.xlane.f32.xlu2 %v3025_v57  ;;  %3118 = vadd.xlane.f32.xlu0 %v3039_v3  ;;  %6723 = vtanh.f32 %v2816_v18  ;;  %v10892_v3 = vadd.f32 %v10861_v42, %v3081_v35  ;;  %v2813_v35 = vadd.f32 %v10524_v37, %v10476_v61  ;;  %v10909_v18 = vadd.f32 %v10861_v42, %v10828_v2 }
 0x9ae   :  { %3208 = vmatpush.msrb.mxu0 %v10871_v41  ;;  %v10921_v37 = vadd.f32 %v10861_v42, %v10800_v13  ;;  %v10932_v59 = vadd.f32 %v10861_v42, %v10776_v52  ;;  %v10937_v13 = vadd.f32 %v10861_v42, %v10764_v22 }
 0x9af   :  { %6725 = vtanh.f32 %v2813_v35 }
 0x9b0   :  { %3209 = vmatpush.msrb.mxu0 %v10880_v19 }
 0x9b1   :  { %v10889_v28 = vpop.f32.mrf.mxu1 }
 0x9b2   :  { %v6722_v57 = vpop.eup %6721  ;;  %3210 = vmatpush.msrb.mxu0 %v10886_v62 }
 0x9b3   :  { %v3040_v4 = vmul.f32 %v6722_v57, %v10574_v56  ;;  %v6724_v12 = vpop.eup %6723 }
 0x9b4   :  { %3211 = vmatpush.msrb.mxu0 %v10892_v3  ;;  %6031 = vmatmul.msk.f32.gmra.mxu1 %vm14983_vm9, %v7211_v17  ;;  %v10917_v17 = vpop.f32.mrf.mxu2  ;;  %v3011_v2 = vmul.f32 %v6724_v12, %v10574_v56  ;;  %vm15015_vm9 = vmmov %vm14957_vm1 }
 0x9b5   :  { %3120 = vadd.xlane.f32.xlu1 %v3040_v4  ;;  %3064 = vadd.xlane.f32.xlu0 %v3012_v0  ;;  %14984 = vst [vmem:[#allocation13_spill] sm:$0xff] %v10917_v17  ;;  %v10927_v4 = vadd.f32 %v10861_v42, %v10790_v32  ;;  %v6726_v0 = vpop.eup %6725 }
 0x9b6   :  { %3212 = vmatpush.msrb.mxu0 %v10898_v25  ;;  %v3010_v32 = vmul.f32 %v6726_v0, %v10574_v56 }
 0x9b8   :  { %3213 = vmatpush.msrb.mxu0 %v10909_v18 }
 0x9b9   :  { %v2908_v57 = vpop.f32.mrf.mxu1 }
 0x9ba   :  { %3214 = vmatpush.msrb.mxu0 %v10914_v43 }
 0x9bc   :  { %3215 = vmatpush.msrb.mxu0 %v10921_v37  ;;  %v10944_v12 = vpop.f32.mrf.mxu2 }
 0x9bd   :  { %3062 = vadd.xlane.f32.xlu0 %v3011_v2  ;;  %14985 = vst [vmem:[#allocation12_spill] sm:$0xff] %v10944_v12 }
 0x9be   :  { %3216 = vmatpush.msrb.mxu0 %v10927_v4 }
 0x9c0   :  { %3217 = vmatpush.msrb.mxu0 %v10932_v59  ;;  %v10953_v0 = vpop.xlane.xlu2 %3094 }
 0x9c1   :  { %v10940_v35 = vpop.f32.mrf.mxu1 }
 0x9c2   :  { %3218 = vmatpush.msrb.mxu0 %v10937_v13 }
 0x9c4   :  { %v10946_v2 = vpop.f32.mrf.mxu2 }
 0x9c5   :  { %3060 = vadd.xlane.f32.xlu0 %v3010_v32  ;;  %14986 = vst [vmem:[#allocation11_spill] sm:$0xff] %v10946_v2 }
 0x9c9   :  { %v2914_v52 = vpop.f32.mrf.mxu1 }
 0x9ca   :  { %v2915_v32 = vadd.f32 %v2914_v52, %v10883_v27 }
 0x9cc   :  { %v10949_v22 = vpop.f32.mrf.mxu2 }
 0x9cd   :  { %14987 = vst [vmem:[#allocation47_spill] sm:$0xff] %v10949_v22 }
 0x9d1   :  { %v2917_v38 = vpop.f32.mrf.mxu1 }
 0x9d2   :  { %v2918_v61 = vadd.f32 %v2917_v38, %v10917_v17  ;;  %v2909_v17 = vadd.f32 %v2908_v57, %v10842_v23 }
 0x9d4   :  { %6727 = vtanh.f32 %v2918_v61  ;;  %v10958_v63 = vpop.f32.mrf.mxu2 }
 0x9d5   :  { %14988 = vst [vmem:[#allocation50_spill] sm:$0xff] %v10958_v63 }
 0x9d9   :  { %v2920_v40 = vpop.f32.mrf.mxu1 }
 0x9da   :  { %v6728_v55 = vpop.eup %6727  ;;  %v2921_v51 = vadd.f32 %v2920_v40, %v10944_v12  ;;  %v10962_v12 = vpop.xlane.xlu2 %3096 }
 0x9db   :  { %v3045_v39 = vmul.f32 %v6728_v55, %v10574_v56 }
 0x9dc   :  { %6729 = vtanh.f32 %v2921_v51  ;;  %v10966_v52 = vpop.f32.mrf.mxu2 }
 0x9dd   :  { %3130 = vadd.xlane.f32.xlu0 %v3045_v39  ;;  %6731 = vtanh.f32 %v2915_v32  ;;  %14989 = vst [vmem:[#allocation53_spill] sm:$0xff] %v10966_v52 }
 0x9de   :  { %6733 = vtanh.f32 %v2909_v17 }
 0x9e1   :  { %v10956_v8 = vpop.f32.mrf.mxu1 }
 0x9e2   :  { %v6730_v38 = vpop.eup %6729 }
 0x9e3   :  { %v3046_v61 = vmul.f32 %v6730_v38, %v10574_v56  ;;  %v6732_v40 = vpop.eup %6731  ;;  %v10968_v38 = vpop.xlane.xlu2 %3098 }
 0x9e4   :  { %v3044_v39 = vmul.f32 %v6732_v40, %v10574_v56  ;;  %v6734_v27 = vpop.eup %6733  ;;  %v10973_v17 = vpop.f32.mrf.mxu2 }
 0x9e5   :  { %3132 = vadd.xlane.f32.xlu2 %v3046_v61  ;;  %v3042_v23 = vmul.f32 %v6734_v27, %v10574_v56  ;;  %14990 = vst [vmem:[#allocation85_spill] sm:$0xff] %v10973_v17 }
 0x9e9   :  { %v2926_v55 = vpop.f32.mrf.mxu1 }
 0x9ea   :  { %v2927_v51 = vadd.f32 %v2926_v55, %v10949_v22 }
 0x9eb   :  { %v10977_v22 = vpop.xlane.xlu2 %3100 }
 0x9ec   :  { %6735 = vtanh.f32 %v2927_v51 }
 0x9ed   :  { %3128 = vadd.xlane.f32.xlu2 %v3044_v39 }
 0x9f1   :  { %v2929_v32 = vpop.f32.mrf.mxu1 }
 0x9f2   :  { %v6736_v16 = vpop.eup %6735  ;;  %v2930_v57 = vadd.f32 %v2929_v32, %v10958_v63  ;;  %v10979_v32 = vpop.f32.mrf.mxu2 }
 0x9f3   :  { %v3048_v61 = vmul.f32 %v6736_v16, %v10574_v56  ;;  %14991 = vst [vmem:[#allocation90_spill] sm:$0xff] %v10979_v32 }
 0x9f4   :  { %6737 = vtanh.f32 %v2930_v57  ;;  %v10983_v57 = vpop.xlane.xlu2 %3102 }
 0x9f5   :  { %3136 = vadd.xlane.f32.xlu1 %v3048_v61  ;;  %3124 = vadd.xlane.f32.xlu2 %v3042_v23 }
 0x9f9   :  { %v2932_v40 = vpop.f32.mrf.mxu1 }
 0x9fa   :  { %v6738_v55 = vpop.eup %6737  ;;  %v2933_v51 = vadd.f32 %v2932_v40, %v10966_v52  ;;  %v10985_v40 = vpop.f32.mrf.mxu2 }
 0x9fb   :  { %v3049_v39 = vmul.f32 %v6738_v55, %v10574_v56  ;;  %14992 = vst [vmem:[#allocation57_spill] sm:$0xff] %v10985_v40 }
 0x9fc   :  { %6739 = vtanh.f32 %v2933_v51 }
 0x9fd   :  { %3138 = vadd.xlane.f32.xlu1 %v3049_v39  ;;  %v10989_v39 = vpop.xlane.xlu2 %3104 }
 0xa01   :  { %v2935_v16 = vpop.f32.mrf.mxu1 }
 0xa02   :  { %v6740_v63 = vpop.eup %6739  ;;  %v2936_v27 = vadd.f32 %v2935_v16, %v10973_v17  ;;  %v3111_v17 = vpop.xlane.xlu1 %3110 }
 0xa03   :  { %v3050_v23 = vmul.f32 %v6740_v63, %v10574_v56 }
 0xa04   :  { %6741 = vtanh.f32 %v2936_v27 }
 0xa05   :  { %3140 = vadd.xlane.f32.xlu1 %v3050_v23  ;;  %v10993_v23 = vpop.f32.mrf.mxu2 }
 0xa06   :  { %14993 = vst [vmem:[#allocation89_spill] sm:$0xff] %v10993_v23 }
 0xa08   :  { %v3113_v31 = vpop.xlane.xlu0 %3112 }
 0xa09   :  { %v2938_v61 = vpop.f32.mrf.mxu1 }
 0xa0a   :  { %v6742_v55 = vpop.eup %6741  ;;  %v2939_v52 = vadd.f32 %v2938_v61, %v10979_v32  ;;  %v3107_v32 = vpop.xlane.xlu2 %3106 }
 0xa0b   :  { %v3051_v51 = vmul.f32 %v6742_v55, %v10574_v56 }
 0xa0c   :  { %6743 = vtanh.f32 %v2939_v52 }
 0xa0d   :  { %3142 = vadd.xlane.f32.xlu1 %v3051_v51  ;;  %v10997_v51 = vpop.f32.mrf.mxu2 }
 0xa0e   :  { %14994 = vst [vmem:[#allocation51_spill] sm:$0xff] %v10997_v51 }
 0xa11   :  { %v2941_v26 = vpop.f32.mrf.mxu1 }
 0xa12   :  { %v6744_v16 = vpop.eup %6743  ;;  %v2942_v63 = vadd.f32 %v2941_v26, %v10985_v40  ;;  %v3109_v6 = vpop.xlane.xlu2 %3108 }
 0xa13   :  { %v3052_v27 = vmul.f32 %v6744_v16, %v10574_v56 }
 0xa14   :  { %6745 = vtanh.f32 %v2942_v63 }
 0xa15   :  { %3144 = vadd.xlane.f32.xlu1 %v3052_v27  ;;  %v11001_v5 = vpop.f32.mrf.mxu2 }
 0xa16   :  { %14995 = vst [vmem:[#allocation48_spill] sm:$0xff] %v11001_v5 }
 0xa18   :  { %v3117_v26 = vpop.xlane.xlu1 %3116 }
 0xa19   :  { %v2944_v34 = vpop.f32.mrf.mxu1 }
 0xa1a   :  { %v6746_v61 = vpop.eup %6745  ;;  %v2945_v52 = vadd.f32 %v2944_v34, %v10993_v23 }
 0xa1b   :  { %v3053_v55 = vmul.f32 %v6746_v61, %v10574_v56 }
 0xa1c   :  { %6747 = vtanh.f32 %v2945_v52 }
 0xa1d   :  { %3146 = vadd.xlane.f32.xlu1 %v3053_v55 }
 0xa20   :  { %v3119_v40 = vpop.xlane.xlu0 %3118 }
 0xa21   :  { %v2947_v16 = vpop.f32.mrf.mxu1 }
 0xa22   :  { %v6748_v15 = vpop.eup %6747  ;;  %v2948_v63 = vadd.f32 %v2947_v16, %v10997_v51  ;;  %v11011_v16 = vadd.f32 %v10861_v42, %v3119_v40 }
 0xa23   :  { %v3054_v27 = vmul.f32 %v6748_v15, %v10574_v56 }
 0xa24   :  { %6749 = vtanh.f32 %v2948_v63  ;;  %v3115_v63 = vpop.xlane.xlu2 %3114 }
 0xa25   :  { %3148 = vadd.xlane.f32.xlu1 %v3054_v27  ;;  %v11017_v27 = vadd.f32 %v10861_v42, %v3117_v26  ;;  %v11023_v40 = vadd.f32 %v10861_v42, %v3115_v63  ;;  %v11037_v63 = vadd.f32 %v10861_v42, %v3111_v17 }
 0xa28   :  { %v3121_v34 = vpop.xlane.xlu1 %3120  ;;  %v3065_v23 = vpop.xlane.xlu0 %3064 }
 0xa29   :  { %v11004_v61 = vadd.f32 %v10861_v42, %v3121_v34  ;;  %v11007_v52 = vadd.f32 %v10861_v42, %v3065_v23  ;;  %v2950_v55 = vpop.f32.mrf.mxu1  ;;  %v2924_v23 = vadd.f32 %v10956_v8, %v10946_v2  ;;  %v11082_v2 = vadd.f32 %v10861_v42, %v10962_v12 }
 0xa2a   :  { %v6750_v29 = vpop.eup %6749  ;;  %v2951_v49 = vadd.f32 %v2950_v55, %v11001_v5  ;;  %v11027_v55 = vadd.f32 %v10861_v42, %v3113_v31  ;;  %v2906_v12 = vadd.f32 %v10889_v28, %v10830_v58 }
 0xa2b   :  { %3219 = vmatpush.msrb.mxu0 %v11007_v52  ;;  %3227 = vmatpush.msra.mxu3 %v11004_v61  ;;  %v3055_v15 = vmul.f32 %v6750_v29, %v10574_v56  ;;  %14997 = vst [vmem:[#allocation43_spill] sm:$0xff] %v11082_v2 }
 0xa2c   :  { %6751 = vtanh.f32 %v2951_v49  ;;  %v11033_v49 = vpop.f32.mrf.mxu2 }
 0xa2d   :  { %3150 = vadd.xlane.f32.xlu1 %v3055_v15  ;;  %3228 = vmatpush.msra.mxu3 %v11011_v16  ;;  %14996 = vst [vmem:[#allocation45_spill] sm:$0xff] %v11033_v49  ;;  %6753 = vtanh.f32 %v2924_v23  ;;  %v2810_v23 = vadd.f32 %v10512_v60, %v10466_v24  ;;  %v11062_v60 = vadd.f32 %v10861_v42, %v10983_v57 }
 0xa2e   :  { %v11076_v57 = vadd.f32 %v10861_v42, %v10968_v38 }
 0xa2f   :  { %3229 = vmatpush.msra.mxu3 %v11017_v27 }
 0xa30   :  { %v3063_v34 = vpop.xlane.xlu0 %3062 }
 0xa31   :  { %v11030_v29 = vadd.f32 %v10861_v42, %v3063_v34  ;;  %3230 = vmatpush.msra.mxu3 %v11023_v40  ;;  %v2953_v26 = vpop.f32.mrf.mxu1  ;;  %v11043_v34 = vadd.f32 %v10861_v42, %v3109_v6 }
 0xa32   :  { %v6752_v15 = vpop.eup %6751  ;;  %v2954_v8 = vadd.f32 %v2953_v26, %v11033_v49  ;;  %v11049_v26 = vadd.f32 %v10861_v42, %v3107_v32 }
 0xa33   :  { %3220 = vmatpush.msrb.mxu0 %v11030_v29  ;;  %3231 = vmatpush.msra.mxu3 %v11027_v55  ;;  %v3056_v31 = vmul.f32 %v6752_v15, %v10574_v56  ;;  %v6754_v17 = vpop.eup %6753  ;;  %v11054_v15 = vadd.f32 %v10861_v42, %v10989_v39  ;;  %v11069_v39 = vadd.f32 %v10861_v42, %v10977_v22 }
 0xa34   :  { %6755 = vtanh.f32 %v2954_v8  ;;  %v3047_v32 = vmul.f32 %v6754_v17, %v10574_v56 }
 0xa35   :  { %3152 = vadd.xlane.f32.xlu1 %v3056_v31  ;;  %3232 = vmatpush.msra.mxu3 %v11037_v63  ;;  %6757 = vtanh.f32 %v2810_v23  ;;  %v3093_v31 = vpop.xlane.xlu2 %3092 }
 0xa37   :  { %3233 = vmatpush.msra.mxu3 %v11043_v34 }
 0xa38   :  { %v3061_v49 = vpop.xlane.xlu0 %3060 }
 0xa39   :  { %v11057_v6 = vadd.f32 %v10861_v42, %v3061_v49  ;;  %3234 = vmatpush.msra.mxu3 %v11049_v26  ;;  %v2912_v49 = vadd.f32 %v10940_v35, %v10857_v54  ;;  %v11087_v35 = vadd.f32 %v10861_v42, %v10953_v0 }
 0xa3a   :  { %v6756_v8 = vpop.eup %6755 }
 0xa3b   :  { %3221 = vmatpush.msrb.mxu0 %v11057_v6  ;;  %3235 = vmatpush.msra.mxu3 %v11054_v15  ;;  %v3057_v23 = vmul.f32 %v6756_v8, %v10574_v56  ;;  %v6758_v17 = vpop.eup %6757  ;;  %6759 = vtanh.f32 %v2912_v49  ;;  %14998 = vst [vmem:[#allocation40_spill] sm:$0xff] %v11087_v35 }
 0xa3c   :  { %v3009_v22 = vmul.f32 %v6758_v17, %v10574_v56  ;;  %6761 = vtanh.f32 %v2906_v12 }
 0xa3d   :  { %3134 = vadd.xlane.f32.xlu1 %v3047_v32  ;;  %3236 = vmatpush.msra.mxu3 %v11062_v60  ;;  %v3091_v38 = vpop.xlane.xlu2 %3090  ;;  %v11092_v32 = vadd.f32 %v10861_v42, %v3093_v31  ;;  %v7212_v31 = vld [vmem:[%s13688_s3 + $0x8] sm:$0xff] }
 0xa3e   :  { %3154 = vadd.xlane.f32.xlu0 %v3057_v23  ;;  %v11098_v8 = vadd.f32 %v10861_v42, %v3091_v38 }
 0xa3f   :  { %3237 = vmatpush.msra.mxu3 %v11069_v39  ;;  %14999 = vst [vmem:[#allocation38_spill] sm:$0xff] %v11092_v32 }
 0xa40   :  { %15000 = vst [vmem:[#allocation36_spill] sm:$0xff] %v11098_v8 }
 0xa41   :  { %3238 = vmatpush.msra.mxu3 %v11076_v57  ;;  %v6760_v0 = vpop.eup %6759 }
 0xa42   :  { %v3043_v49 = vmul.f32 %v6760_v0, %v10574_v56  ;;  %v6762_v23 = vpop.eup %6761 }
 0xa43   :  { %3239 = vmatpush.msra.mxu3 %v11082_v2  ;;  %v3041_v28 = vmul.f32 %v6762_v23, %v10574_v56  ;;  %v7213_v56 = vld [vmem:[%s13688_s3 + $0x18] sm:$0xff] }
 0xa45   :  { %3240 = vmatpush.msra.mxu3 %v11087_v35  ;;  %3058 = vadd.xlane.f32.xlu1 %v3009_v22 }
 0xa47   :  { %3241 = vmatpush.msra.mxu3 %v11092_v32 }
 0xa49   :  { %3242 = vmatpush.msra.mxu3 %v11098_v8 }
 0xa4a   :  { %3243 = vmatmul.f32.vlgmr.msra.gmra.mxu3 %v7212_v31 }
 0xa4d   :  { %3126 = vadd.xlane.f32.xlu1 %v3043_v49 }
 0xa50   :  { %v3131_v8 = vpop.xlane.xlu0 %3130 }
 0xa55   :  { %3122 = vadd.xlane.f32.xlu1 %v3041_v28  ;;  %v11129_v28 = vld [vmem:[%s13688_s3] sm:$0xff] }
 0xa68   :  { %v3137_v17 = vpop.xlane.xlu1 %3136 }
 0xa70   :  { %v3139_v22 = vpop.xlane.xlu1 %3138 }
 0xa78   :  { %v3141_v38 = vpop.xlane.xlu1 %3140 }
 0xa80   :  { %v3143_v58 = vpop.xlane.xlu1 %3142 }
 0xa88   :  { %v3145_v54 = vpop.xlane.xlu1 %3144 }
 0xa90   :  { %v3147_v51 = vpop.xlane.xlu1 %3146 }
 0xa98   :  { %v3149_v5 = vpop.xlane.xlu1 %3148 }
 0xaa0   :  { %v3151_v12 = vpop.xlane.xlu1 %3150 }
 0xaa8   :  { %v3153_v32 = vpop.xlane.xlu1 %3152 }
 0xaa9   :  { %v11119_v23 = vadd.f32 %v10861_v42, %v3153_v32  ;;  %v3133_v32 = vpop.xlane.xlu2 %3132 }
 0xaab   :  { %15003 = vst [vmem:[#allocation32_spill] sm:$0xff] %v11119_v23 }
 0xab0   :  { %v3135_v2 = vpop.xlane.xlu1 %3134 }
 0xab1   :  { %v3155_v35 = vpop.xlane.xlu0 %3154 }
 0xab2   :  { %v11108_v31 = vadd.f32 %v10861_v42, %v3155_v35  ;;  %v11123_v35 = vadd.f32 %v10861_v42, %v3151_v12  ;;  %v11141_v12 = vadd.f32 %v10861_v42, %v3145_v54  ;;  %v11157_v54 = vadd.f32 %v10861_v42, %v3137_v17 }
 0xab4   :  { %15001 = vst [vmem:[#allocation34_spill] sm:$0xff] %v11108_v31  ;;  %3282 = vmatpush.msrb.mxu3 %v11108_v31  ;;  %v11145_v31 = vadd.f32 %v10861_v42, %v3143_v58 }
 0xab5   :  { %6032 = vmatmul.msk.f32.vlgmr.msrb.gmra.mxu3 %vm15002_vm2, %v7213_v56  ;;  %15004 = vst [vmem:[#allocation30_spill] sm:$0xff] %v11123_v35  ;;  %v11137_v56 = vadd.f32 %v10861_v42, %v3147_v51  ;;  %v11153_v51 = vadd.f32 %v10861_v42, %v3139_v22  ;;  %v11169_v22 = vadd.f32 %v10861_v42, %v3131_v8  ;;  %vm15016_vm2 = vmmov %vm14957_vm1 }
 0xab6   :  { %15007 = vst [vmem:[#allocation24_spill] sm:$0xff] %v11141_v12 }
 0xab7   :  { %15006 = vst [vmem:[#allocation26_spill] sm:$0xff] %v11137_v56 }
 0xab8   :  { %v3059_v0 = vpop.xlane.xlu1 %3058  ;;  %15010 = vst [vmem:[#allocation86_spill] sm:$0xff] %v11169_v22 }
 0xab9   :  { %v11116_v49 = vadd.f32 %v10861_v42, %v3059_v0  ;;  %v11133_v0 = vadd.f32 %v10861_v42, %v3149_v5  ;;  %v11149_v5 = vadd.f32 %v10861_v42, %v3141_v38  ;;  %v11165_v38 = vadd.f32 %v10861_v42, %v3133_v32 }
 0xabb   :  { %3222 = vmatpush.msrb.mxu0 %v11116_v49  ;;  %15005 = vst [vmem:[#allocation28_spill] sm:$0xff] %v11133_v0 }
 0xabc   :  { %3223 = vmatmul.f32.vlgmr.msrb.gmra.mxu0 %v11129_v28  ;;  %15009 = vst [vmem:[#allocation42_spill] sm:$0xff] %v11165_v38 }
 0xabd   :  { %3247 = vmatpush.msra.mxu0 %v11119_v23  ;;  %v3129_v23 = vpop.xlane.xlu2 %3128 }
 0xabe   :  { %v11173_v17 = vadd.f32 %v10861_v42, %v3129_v23  ;;  %v7215_v23 = vld [vmem:[%s13688_s3 + $0x10] sm:$0xff] }
 0xabf   :  { %3248 = vmatpush.msra.mxu0 %v11123_v35  ;;  %v11161_v35 = vadd.f32 %v10861_v42, %v3135_v2 }
 0xac0   :  { %v3127_v58 = vpop.xlane.xlu1 %3126  ;;  %15011 = vst [vmem:[#allocation84_spill] sm:$0xff] %v11173_v17 }
 0xac1   :  { %3249 = vmatpush.msra.mxu0 %v11133_v0  ;;  %15008 = vst [vmem:[#allocation22_spill] sm:$0xff] %v11161_v35  ;;  %v11177_v2 = vadd.f32 %v10861_v42, %v3127_v58 }
 0xac3   :  { %3250 = vmatpush.msra.mxu0 %v11137_v56  ;;  %15012 = vst [vmem:[#allocation81_spill] sm:$0xff] %v11177_v2 }
 0xac5   :  { %3251 = vmatpush.msra.mxu0 %v11141_v12  ;;  %v3125_v0 = vpop.xlane.xlu2 %3124 }
 0xac6   :  { %v11181_v56 = vadd.f32 %v10861_v42, %v3125_v0 }
 0xac7   :  { %3252 = vmatpush.msra.mxu0 %v11145_v31 }
 0xac8   :  { %v3123_v32 = vpop.xlane.xlu1 %3122 }
 0xac9   :  { %3253 = vmatpush.msra.mxu0 %v11149_v5  ;;  %v11185_v8 = vadd.f32 %v10861_v42, %v3123_v32  ;;  %v7216_v42 = vld [vmem:[%s13689_s4] sm:$0xff]  ;;  %v7217_v32 = vld [vmem:[%s13689_s4 + $0x8] sm:$0xff] }
 0xacb   :  { %3254 = vmatpush.msra.mxu0 %v11153_v51 }
 0xacd   :  { %3255 = vmatpush.msra.mxu0 %v11157_v54 }
 0xacf   :  { %3256 = vmatpush.msra.mxu0 %v11161_v35 }
 0xad1   :  { %3257 = vmatpush.msra.mxu0 %v11165_v38 }
 0xad3   :  { %3258 = vmatpush.msra.mxu0 %v11169_v22 }
 0xad5   :  { %3259 = vmatpush.msra.mxu0 %v11173_v17  ;;  %v3244_v17 = vpop.f32.mrf.mxu3 }
 0xad7   :  { %3260 = vmatpush.msra.mxu0 %v11177_v2 }
 0xad9   :  { %3261 = vmatpush.msra.mxu0 %v11181_v56 }
 0xadb   :  { %3262 = vmatpush.msra.mxu0 %v11185_v8 }
 0xadc   :  { %3263 = vmatmul.f32.vlgmr.msra.gmra.mxu0 %v7215_v23  ;;  %v7224_v23 = vld [vmem:[%s13689_s4 + $0x40] sm:$0xff] }
 0xb38   :  { %v3284_v0 = vpop.f32.mrf.mxu3 }
 0xb39   :  { %v3224_v58 = vpop.f32.mrf.mxu0 }
 0xb3a   :  { %v3245_v35 = vadd.f32 %v3244_v17, %v3224_v58  ;;  %v7218_v17 = vld [vmem:[%s13689_s4 + $0x10] sm:$0xff]  ;;  %v7225_v58 = vld [vmem:[%s13689_s4 + $0x48] sm:$0xff] }
 0xb59   :  { %v3264_v38 = vpop.f32.mrf.mxu0 }
 0xb5a   :  { %v3265_v22 = vadd.f32 %v3264_v38, %v3245_v35  ;;  %v7219_v35 = vld [vmem:[%s13689_s4 + $0x18] sm:$0xff]  ;;  %v7221_v38 = vld [vmem:[%s13689_s4 + $0x28] sm:$0xff] }
 0xb5c   :  { %v3285_v12 = vadd.f32 %v3284_v0, %v3265_v22  ;;  %v7222_v22 = vld [vmem:[%s13689_s4 + $0x30] sm:$0xff] }
 0xb5d   :  { %v7226_v0 = vld [vmem:[%s13689_s4 + $0x50] sm:$0xff] }
 0xb5e   :  { %v3287_v2 = vmul.f32 0.020408163, %v3285_v12  ;;  %v7220_v12 = vld [vmem:[%s13689_s4 + $0x20] sm:$0xff] }
 0xb60   :  { %3303 = vmatpush.msra.mxu3 %v3287_v2  ;;  %v7223_v2 = vld [vmem:[%s13689_s4 + $0x38] sm:$0xff] }
 0xb61   :  { %6033 = vmatmul.msk.f32.vlgmr.msra.gmra.mxu3 %vm15013_vm6, %v7216_v42  ;;  %vm15017_vm6 = vmmov %vm14957_vm1  ;;  %v7227_v42 = vld [vmem:[%s13689_s4 + $0x58] sm:$0xff] }
 0xb69   :  { %6034 = vmatmul.msk.f32.gmra.mxu3 %vm15014_vm7, %v7217_v32  ;;  %vm15018_vm7 = vmmov %vm14957_vm1  ;;  %v7228_v32 = vld [vmem:[%s13689_s4 + $0x60] sm:$0xff] }
 0xb71   :  { %6035 = vmatmul.msk.f32.gmra.mxu3 %vm14957_vm1, %v7218_v17  ;;  %v7229_v17 = vld [vmem:[%s13689_s4 + $0x68] sm:$0xff] }
 0xb79   :  { %6036 = vmatmul.msk.f32.gmra.mxu3 %vm15015_vm9, %v7219_v35  ;;  %vm15019_vm9 = vmmov %vm14957_vm1  ;;  %v7230_v35 = vld [vmem:[%s13689_s4 + $0x70] sm:$0xff] }
 0xb81   :  { %6037 = vmatmul.msk.f32.gmra.mxu3 %vm15016_vm2, %v7220_v12  ;;  %vm15020_vm2 = vmmov %vm14957_vm1  ;;  %v7231_v12 = vld [vmem:[%s13689_s4 + $0x78] sm:$0xff] }
 0xb89   :  { %6038 = vmatmul.msk.f32.gmra.mxu3 %vm15017_vm6, %v7221_v38  ;;  %vm15021_vm6 = vmmov %vm14957_vm1  ;;  %v7232_v38 = vld [vmem:[%s13689_s4 + $0x80] sm:$0xff] }
 0xb91   :  { %6039 = vmatmul.msk.f32.gmra.mxu3 %vm15018_vm7, %v7222_v22  ;;  %vm15022_vm7 = vmmov %vm14957_vm1 }
 0xb99   :  { %6040 = vmatmul.msk.f32.gmra.mxu3 %vm14957_vm1, %v7223_v2 }
 0xba1   :  { %6041 = vmatmul.msk.f32.gmra.mxu3 %vm15019_vm9, %v7224_v23  ;;  %vm15023_vm9 = vmmov %vm14957_vm1 }
 0xba9   :  { %6042 = vmatmul.msk.f32.gmra.mxu3 %vm15020_vm2, %v7225_v58  ;;  %vm15024_vm2 = vmmov %vm14957_vm1  ;;  %v7233_v58 = vld [vmem:[%s13689_s4 + $0x88] sm:$0xff] }
 0xbb1   :  { %6043 = vmatmul.msk.f32.gmra.mxu3 %vm15021_vm6, %v7226_v0  ;;  %vm15025_vm6 = vmmov %vm14957_vm1 }
 0xbb9   :  { %6044 = vmatmul.msk.f32.gmra.mxu3 %vm15022_vm7, %v7227_v42  ;;  %vm15026_vm7 = vmmov %vm14957_vm1 }
 0xbc1   :  { %6045 = vmatmul.msk.f32.gmra.mxu3 %vm14957_vm1, %v7228_v32 }
 0xbc9   :  { %6046 = vmatmul.msk.f32.gmra.mxu3 %vm15023_vm9, %v7229_v17  ;;  %vm15027_vm9 = vcmp.eq.f32.partialorder %v14644_v9, 0.0  ;;  %v15095_v9 = vld [vmem:[#allocation134_spill] sm:$0xff] }
 0xbd1   :  { %6047 = vmatmul.msk.f32.gmra.mxu3 %vm15024_vm2, %v7230_v35  ;;  %vm15028_vm2 = vmmov %vm14957_vm1 }
 0xbd9   :  { %6048 = vmatmul.msk.f32.gmra.mxu3 %vm15025_vm6, %v7231_v12  ;;  %vm15029_vm6 = vcmp.eq.f32.partialorder %v14638_v53, 0.0 }
 0xbe1   :  { %6049 = vmatmul.msk.f32.gmra.mxu3 %vm15026_vm7, %v7232_v38  ;;  %vm15030_vm7 = vmmov %vm14957_vm1 }
 0xbe4   :  { %v3305_v22 = vpop.f32.mrf.mxu3 }
 0xbe5   :  { %v3452_v2 = vsub.f32 %v11116_v49, %v3305_v22  ;;  %v7234_v49 = vld [vmem:[%s13689_s4 + $0x90] sm:$0xff] }
 0xbe7   :  { %v3501_v23 = vmul.f32 1.442695, %v3452_v2 }
 0xbe9   :  { %6763 = vpow2.f32 %v3501_v23  ;;  %6050 = vmatmul.msk.f32.gmra.mxu3 %vm14957_vm1, %v7233_v58  ;;  %v7235_v23 = vld [vmem:[%s13689_s4 + $0x98] sm:$0xff]  ;;  %vm15031_vm1 = vcmp.eq.f32.partialorder %v14632_v1, 0.0 }
 0xbea   :  { %v15094_v1 = vld [vmem:[#allocation131_spill] sm:$0xff] }
 0xbec   :  { %v3308_v0 = vpop.f32.mrf.mxu3 }
 0xbed   :  { %v3453_v42 = vsub.f32 %v11057_v6, %v3308_v0 }
 0xbef   :  { %v11266_v32 = vpop.eup %6763  ;;  %v3503_v17 = vmul.f32 1.442695, %v3453_v42 }
 0xbf0   :  { %v3599_v35 = vsel %vm15027_vm9, 0.0, %v11266_v32  ;;  %vm15032_vm9 = vmmov %vm15028_vm2 }
 0xbf1   :  { %6765 = vpow2.f32 %v3503_v17  ;;  %6051 = vmatmul.msk.f32.gmra.mxu3 %vm15028_vm2, %v7234_v49  ;;  %3650 = vperm.xlu1 %6459, %v3599_v35   ;;  %v7236_v35 = vld [vmem:[%s13689_s4 + $0xa0] sm:$0xff]  ;;  %vm15033_vm2 = vcmp.eq.f32.partialorder %v14626_v11, 0.0  ;;  %v7263_v11 = vld [vmem:[%s13689_s4 + $0x178] sm:$0xff] }
 0xbf4   :  { %v3311_v12 = vpop.f32.mrf.mxu3 }
 0xbf5   :  { %v3454_v38 = vsub.f32 %v11030_v29, %v3311_v12 }
 0xbf7   :  { %v11276_v22 = vpop.eup %6765  ;;  %v3505_v6 = vmul.f32 1.442695, %v3454_v38 }
 0xbf8   :  { %v3600_v2 = vsel %vm15029_vm6, 0.0, %v11276_v22  ;;  %vm15034_vm6 = vmmov %vm15030_vm7 }
 0xbf9   :  { %6767 = vpow2.f32 %v3505_v6  ;;  %6052 = vmatmul.msk.f32.gmra.mxu3 %vm15030_vm7, %v7235_v23  ;;  %3655 = vperm.xlu2 %6461, %v3600_v2   ;;  %v7237_v2 = vld [vmem:[%s13689_s4 + $0xa8] sm:$0xff]  ;;  %vm15035_vm7 = vcmp.eq.f32.partialorder %v14620_v30, 0.0 }
 0xbfc   :  { %v3314_v58 = vpop.f32.mrf.mxu3 }
 0xbfd   :  { %v3455_v0 = vsub.f32 %v11007_v52, %v3314_v58 }
 0xbff   :  { %v11286_v42 = vpop.eup %6767  ;;  %v3507_v29 = vmul.f32 1.442695, %v3455_v0 }
 0xc00   :  { %v3601_v17 = vsel %vm15031_vm1, 0.0, %v11286_v42  ;;  %vm15036_vm1 = vmmov %vm15034_vm6 }
 0xc01   :  { %6769 = vpow2.f32 %v3507_v29  ;;  %6053 = vmatmul.msk.f32.gmra.mxu3 %vm15032_vm9, %v7236_v35  ;;  %3660 = vperm.xlu0 %6460, %v3601_v17   ;;  %v7238_v17 = vld [vmem:[%s13689_s4 + $0xb0] sm:$0xff]  ;;  %vm15037_vm9 = vcmp.eq.f32.partialorder %v14614_v44, 0.0 }
 0xc04   :  { %v3317_v49 = vpop.f32.mrf.mxu3 }
 0xc05   :  { %v3456_v12 = vsub.f32 %v10937_v13, %v3317_v49 }
 0xc07   :  { %v11296_v38 = vpop.eup %6769  ;;  %v3509_v52 = vmul.f32 1.442695, %v3456_v12 }
 0xc08   :  { %v3602_v6 = vsel %vm15033_vm2, 0.0, %v11296_v38  ;;  %vm15038_vm2 = vmmov %vm15036_vm1 }
 0xc09   :  { %6771 = vpow2.f32 %v3509_v52  ;;  %6054 = vmatmul.msk.f32.gmra.mxu3 %vm15034_vm6, %v7237_v2  ;;  %3665 = vperm.xlu1 %6459, %v3602_v6   ;;  %v7239_v6 = vld [vmem:[%s13689_s4 + $0xb8] sm:$0xff]  ;;  %vm15039_vm6 = vcmp.eq.f32.partialorder %v14609_v7, 0.0  ;;  %v7262_v7 = vld [vmem:[%s13689_s4 + $0x170] sm:$0xff] }
 0xc0c   :  { %v3320_v23 = vpop.f32.mrf.mxu3 }
 0xc0d   :  { %v3457_v58 = vsub.f32 %v10932_v59, %v3320_v23 }
 0xc0f   :  { %v11306_v0 = vpop.eup %6771  ;;  %v3511_v13 = vmul.f32 1.442695, %v3457_v58 }
 0xc10   :  { %v3603_v29 = vsel %vm15035_vm7, 0.0, %v11306_v0  ;;  %vm15040_vm7 = vmmov %vm15036_vm1 }
 0xc11   :  { %6773 = vpow2.f32 %v3511_v13  ;;  %6055 = vmatmul.msk.f32.gmra.mxu3 %vm15036_vm1, %v7238_v17  ;;  %3670 = vperm.xlu0 %6460, %v3603_v29   ;;  %v7240_v29 = vld [vmem:[%s13689_s4 + $0xc0] sm:$0xff]  ;;  %vm15041_vm1 = vcmp.eq.f32.partialorder %v14604_v46, 0.0 }
 0xc14   :  { %v3323_v35 = vpop.f32.mrf.mxu3 }
 0xc15   :  { %v3458_v49 = vsub.f32 %v10927_v4, %v3323_v35 }
 0xc17   :  { %v11316_v12 = vpop.eup %6773  ;;  %v3513_v59 = vmul.f32 1.442695, %v3458_v49 }
 0xc18   :  { %v3604_v52 = vsel %vm15037_vm9, 0.0, %v11316_v12  ;;  %vm15042_vm9 = vmmov %vm15038_vm2 }
 0xc19   :  { %6775 = vpow2.f32 %v3513_v59  ;;  %6056 = vmatmul.msk.f32.gmra.mxu3 %vm15038_vm2, %v7239_v6  ;;  %3675 = vperm.xlu2 %6461, %v3604_v52   ;;  %v7241_v52 = vld [vmem:[%s13689_s4 + $0xc8] sm:$0xff]  ;;  %vm15043_vm2 = vcmp.eq.f32.partialorder %v14599_v48, 0.0 }
 0xc1c   :  { %v3326_v2 = vpop.f32.mrf.mxu3 }
 0xc1d   :  { %v3459_v23 = vsub.f32 %v10921_v37, %v3326_v2 }
 0xc1f   :  { %v11326_v58 = vpop.eup %6775  ;;  %v3515_v4 = vmul.f32 1.442695, %v3459_v23 }
 0xc20   :  { %v3605_v13 = vsel %vm15039_vm6, 0.0, %v11326_v58  ;;  %vm15044_vm6 = vmmov %vm15040_vm7 }
 0xc21   :  { %6777 = vpow2.f32 %v3515_v4  ;;  %6057 = vmatmul.msk.f32.gmra.mxu3 %vm15040_vm7, %v7240_v29  ;;  %3680 = vperm.xlu1 %6459, %v3605_v13   ;;  %v7242_v13 = vld [vmem:[%s13689_s4 + $0xd0] sm:$0xff]  ;;  %vm15045_vm7 = vcmp.eq.f32.partialorder %v14594_v33, 0.0 }
 0xc24   :  { %v3329_v17 = vpop.f32.mrf.mxu3 }
 0xc25   :  { %v3460_v35 = vsub.f32 %v10914_v43, %v3329_v17 }
 0xc27   :  { %v11336_v49 = vpop.eup %6777  ;;  %v3517_v37 = vmul.f32 1.442695, %v3460_v35 }
 0xc28   :  { %v3606_v59 = vsel %vm15041_vm1, 0.0, %v11336_v49  ;;  %vm15046_vm1 = vmmov %vm15044_vm6 }
 0xc29   :  { %6779 = vpow2.f32 %v3517_v37  ;;  %6058 = vmatmul.msk.f32.gmra.mxu3 %vm15042_vm9, %v7241_v52  ;;  %3685 = vperm.xlu0 %6460, %v3606_v59   ;;  %v7243_v59 = vld [vmem:[%s13689_s4 + $0xd8] sm:$0xff]  ;;  %vm15047_vm9 = vcmp.eq.f32.partialorder %v14589_v20, 0.0 }
 0xc2c   :  { %v3332_v6 = vpop.f32.mrf.mxu3 }
 0xc2d   :  { %v3461_v2 = vsub.f32 %v10909_v18, %v3332_v6 }
 0xc2f   :  { %v11346_v23 = vpop.eup %6779  ;;  %v3519_v43 = vmul.f32 1.442695, %v3461_v2 }
 0xc30   :  { %v3607_v4 = vsel %vm15043_vm2, 0.0, %v11346_v23  ;;  %vm15048_vm2 = vmmov %vm15046_vm1 }
 0xc31   :  { %6781 = vpow2.f32 %v3519_v43  ;;  %6059 = vmatmul.msk.f32.gmra.mxu3 %vm15044_vm6, %v7242_v13  ;;  %3690 = vperm.xlu2 %6461, %v3607_v4   ;;  %v7244_v4 = vld [vmem:[%s13689_s4 + $0xe0] sm:$0xff]  ;;  %vm15049_vm6 = vcmp.eq.f32.partialorder %v14584_v14, 0.0 }
 0xc34   :  { %v3335_v29 = vpop.f32.mrf.mxu3 }
 0xc35   :  { %v3462_v17 = vsub.f32 %v10898_v25, %v3335_v29 }
 0xc37   :  { %v11356_v35 = vpop.eup %6781  ;;  %v3521_v18 = vmul.f32 1.442695, %v3462_v17 }
 0xc38   :  { %v3608_v37 = vsel %vm15045_vm7, 0.0, %v11356_v35  ;;  %vm15050_vm7 = vmmov %vm15046_vm1 }
 0xc39   :  { %6783 = vpow2.f32 %v3521_v18  ;;  %6060 = vmatmul.msk.f32.gmra.mxu3 %vm15046_vm1, %v7243_v59  ;;  %3695 = vperm.xlu1 %6459, %v3608_v37   ;;  %v7245_v37 = vld [vmem:[%s13689_s4 + $0xe8] sm:$0xff]  ;;  %vm15051_vm1 = vcmp.eq.f32.partialorder %v14579_v21, 0.0 }
 0xc3c   :  { %v3338_v52 = vpop.f32.mrf.mxu3 }
 0xc3d   :  { %v3463_v6 = vsub.f32 %v10892_v3, %v3338_v52 }
 0xc3f   :  { %v11366_v2 = vpop.eup %6783  ;;  %v3523_v25 = vmul.f32 1.442695, %v3463_v6 }
 0xc40   :  { %v3609_v43 = vsel %vm15047_vm9, 0.0, %v11366_v2  ;;  %vm15052_vm9 = vmmov %vm15048_vm2 }
 0xc41   :  { %6785 = vpow2.f32 %v3523_v25  ;;  %6061 = vmatmul.msk.f32.gmra.mxu3 %vm15048_vm2, %v7244_v4  ;;  %3700 = vperm.xlu0 %6460, %v3609_v43   ;;  %v7246_v43 = vld [vmem:[%s13689_s4 + $0xf0] sm:$0xff]  ;;  %vm15053_vm2 = vcmp.eq.f32.partialorder %v14574_v47, 0.0 }
 0xc44   :  { %v3341_v13 = vpop.f32.mrf.mxu3 }
 0xc45   :  { %v3464_v29 = vsub.f32 %v10886_v62, %v3341_v13 }
 0xc47   :  { %v11376_v17 = vpop.eup %6785  ;;  %v3525_v3 = vmul.f32 1.442695, %v3464_v29 }
 0xc48   :  { %v3610_v18 = vsel %vm15049_vm6, 0.0, %v11376_v17  ;;  %vm15054_vm6 = vmmov %vm15050_vm7 }
 0xc49   :  { %6787 = vpow2.f32 %v3525_v3  ;;  %6062 = vmatmul.msk.f32.gmra.mxu3 %vm15050_vm7, %v7245_v37  ;;  %3705 = vperm.xlu2 %6461, %v3610_v18   ;;  %v7247_v18 = vld [vmem:[%s13689_s4 + $0xf8] sm:$0xff] }
 0xc4c   :  { %v3344_v59 = vpop.f32.mrf.mxu3 }
 0xc4d   :  { %v3465_v52 = vsub.f32 %v10880_v19, %v3344_v59 }
 0xc4f   :  { %v11386_v6 = vpop.eup %6787  ;;  %v3527_v62 = vmul.f32 1.442695, %v3465_v52 }
 0xc50   :  { %v3611_v25 = vsel %vm15051_vm1, 0.0, %v11386_v6  ;;  %vm15057_vm1 = vmmov %vm15054_vm6 }
 0xc51   :  { %6789 = vpow2.f32 %v3527_v62  ;;  %6063 = vmatmul.msk.f32.gmra.mxu3 %vm15052_vm9, %v7246_v43  ;;  %3710 = vperm.xlu0 %6460, %v3611_v25   ;;  %v15055_v62 = vld [vmem:[#allocation118_spill] sm:$0xff]  ;;  %v7248_v43 = vld [vmem:[%s13689_s4 + $0x100] sm:$0xff] }
 0xc52   :  { %vm15056_vm7 = vcmp.eq.f32.partialorder %v15055_v62, 0.0 }
 0xc54   :  { %v3347_v4 = vpop.f32.mrf.mxu3 }
 0xc55   :  { %v3466_v13 = vsub.f32 %v10871_v41, %v3347_v4 }
 0xc57   :  { %v11396_v29 = vpop.eup %6789  ;;  %v3529_v19 = vmul.f32 1.442695, %v3466_v13 }
 0xc58   :  { %v3612_v3 = vsel %vm15053_vm2, 0.0, %v11396_v29  ;;  %vm15060_vm2 = vmmov %vm15057_vm1 }
 0xc59   :  { %6791 = vpow2.f32 %v3529_v19  ;;  %6064 = vmatmul.msk.f32.gmra.mxu3 %vm15054_vm6, %v7247_v18  ;;  %3715 = vperm.xlu1 %6459, %v3612_v3   ;;  %v7249_v3 = vld [vmem:[%s13689_s4 + $0x108] sm:$0xff]  ;;  %vm15061_vm6 = vmmov %vm15057_vm1 }
 0xc5c   :  { %v3350_v37 = vpop.f32.mrf.mxu3 }
 0xc5d   :  { %v3467_v59 = vsub.f32 %v10864_v45, %v3350_v37  ;;  %v15058_v45 = vld [vmem:[#allocation116_spill] sm:$0xff]  ;;  %v7250_v37 = vld [vmem:[%s13689_s4 + $0x110] sm:$0xff] }
 0xc5e   :  { %vm15059_vm9 = vcmp.eq.f32.partialorder %v15058_v45, 0.0  ;;  %v7253_v45 = vld [vmem:[%s13689_s4 + $0x128] sm:$0xff] }
 0xc5f   :  { %v11406_v52 = vpop.eup %6791  ;;  %v3531_v41 = vmul.f32 1.442695, %v3467_v59 }
 0xc60   :  { %v3613_v25 = vsel %vm15056_vm7, 0.0, %v11406_v52  ;;  %vm15062_vm7 = vmmov %vm15057_vm1 }
 0xc61   :  { %6793 = vpow2.f32 %v3531_v41  ;;  %6065 = vmatmul.msk.f32.gmra.mxu3 %vm15057_vm1, %v7248_v43  ;;  %3720 = vperm.xlu2 %6461, %v3613_v25   ;;  %v7251_v41 = vld [vmem:[%s13689_s4 + $0x118] sm:$0xff]  ;;  %v7252_v43 = vld [vmem:[%s13689_s4 + $0x120] sm:$0xff] }
 0xc64   :  { %v11415_v4 = vpop.f32.mrf.mxu3 }
 0xc67   :  { %v11417_v13 = vpop.eup %6793 }
 0xc68   :  { %v3614_v19 = vsel %vm15059_vm9, 0.0, %v11417_v13  ;;  %vm15063_vm9 = vmmov %vm15057_vm1 }
 0xc69   :  { %6066 = vmatmul.msk.f32.gmra.mxu3 %vm15060_vm2, %v7249_v3  ;;  %3725 = vperm.xlu0 %6460, %v3614_v19   ;;  %vm15065_vm2 = vcmp.eq.f32.partialorder %v9274_v10, 0.0 }
 0xc6c   :  { %v11426_v18 = vpop.f32.mrf.mxu3 }
 0xc71   :  { %6067 = vmatmul.msk.f32.gmra.mxu3 %vm15061_vm6, %v7250_v37  ;;  %vm15066_vm6 = vmmov %vm15057_vm1 }
 0xc74   :  { %v11432_v59 = vpop.f32.mrf.mxu3 }
 0xc79   :  { %6068 = vmatmul.msk.f32.gmra.mxu3 %vm15062_vm7, %v7251_v41  ;;  %vm15068_vm7 = vcmp.eq.f32.partialorder %v9239_v36, 0.0 }
 0xc7c   :  { %v11438_v25 = vpop.f32.mrf.mxu3 }
 0xc81   :  { %6069 = vmatmul.msk.f32.gmra.mxu3 %vm15057_vm1, %v7252_v43 }
 0xc84   :  { %v3365_v19 = vpop.f32.mrf.mxu3 }
 0xc85   :  { %v3472_v3 = vsub.f32 %v11076_v57, %v3365_v19  ;;  %v7254_v57 = vld [vmem:[%s13689_s4 + $0x130] sm:$0xff] }
 0xc87   :  { %v3541_v37 = vmul.f32 1.442695, %v3472_v3 }
 0xc89   :  { %6795 = vpow2.f32 %v3541_v37  ;;  %6070 = vmatmul.msk.f32.gmra.mxu3 %vm15063_vm9, %v7253_v45  ;;  %vm15070_vm9 = vcmp.eq.f32.partialorder %v14696_v50, 0.0 }
 0xc8c   :  { %v3368_v41 = vpop.f32.mrf.mxu3 }
 0xc8d   :  { %v3473_v62 = vsub.f32 %v11069_v39, %v3368_v41 }
 0xc8f   :  { %v11450_v47 = vpop.eup %6795  ;;  %v3543_v21 = vmul.f32 1.442695, %v3473_v62 }
 0xc90   :  { %15064 = vst [vmem:[#allocation79_spill] sm:$0xff] %v11450_v47  ;;  %v3619_v43 = vsel %vm15065_vm2, 0.0, %v11450_v47  ;;  %vm15071_vm2 = vmmov %vm15057_vm1 }
 0xc91   :  { %6797 = vpow2.f32 %v3543_v21  ;;  %6071 = vmatmul.msk.f32.gmra.mxu3 %vm15066_vm6, %v7254_v57  ;;  %3750 = vperm.xlu0 %6460, %v3619_v43   ;;  %v7255_v21 = vld [vmem:[%s13689_s4 + $0x138] sm:$0xff] }
 0xc94   :  { %v3371_v19 = vpop.f32.mrf.mxu3 }
 0xc95   :  { %v3474_v45 = vsub.f32 %v11062_v60, %v3371_v19  ;;  %v7256_v19 = vld [vmem:[%s13689_s4 + $0x140] sm:$0xff] }
 0xc97   :  { %v11460_v3 = vpop.eup %6797  ;;  %v3545_v39 = vmul.f32 1.442695, %v3474_v45 }
 0xc98   :  { %15067 = vst [vmem:[#allocation77_spill] sm:$0xff] %v11460_v3  ;;  %v3620_v62 = vsel %vm15068_vm7, 0.0, %v11460_v3  ;;  %vm15075_vm7 = vmmov %vm15057_vm1  ;;  %v15096_v3 = vld [vmem:[#allocation136_spill] sm:$0xff] }
 0xc99   :  { %6799 = vpow2.f32 %v3545_v39  ;;  %6072 = vmatmul.msk.f32.gmra.mxu3 %vm15057_vm1, %v7255_v21  ;;  %3755 = vperm.xlu1 %6459, %v3620_v62   ;;  %v15073_v21 = vld [vmem:[#allocation162_spill] sm:$0xff] }
 0xc9a   :  { %vm15074_vm6 = vcmp.eq.f32.partialorder %v15073_v21, 0.0  ;;  %v15079_v21 = vld [vmem:[#allocation164_spill] sm:$0xff] }
 0xc9c   :  { %v3374_v37 = vpop.f32.mrf.mxu3 }
 0xc9d   :  { %v3475_v41 = vsub.f32 %v11054_v15, %v3374_v37 }
 0xc9f   :  { %v11470_v43 = vpop.eup %6799  ;;  %v3547_v60 = vmul.f32 1.442695, %v3475_v41  ;;  %v7257_v41 = vld [vmem:[%s13689_s4 + $0x148] sm:$0xff] }
 0xca0   :  { %15069 = vst [vmem:[#allocation75_spill] sm:$0xff] %v11470_v43  ;;  %v3621_v57 = vsel %vm15070_vm9, 0.0, %v11470_v43  ;;  %vm15078_vm9 = vmmov %vm15071_vm2 }
 0xca1   :  { %6801 = vpow2.f32 %v3547_v60  ;;  %6073 = vmatmul.msk.f32.gmra.mxu3 %vm15071_vm2, %v7256_v19  ;;  %3760 = vperm.xlu2 %6461, %v3621_v57   ;;  %vm15080_vm2 = vcmp.eq.f32.partialorder %v15079_v21, 0.0 }
 0xca4   :  { %v3377_v45 = vpop.f32.mrf.mxu3 }
 0xca5   :  { %v3476_v39 = vsub.f32 %v11049_v26, %v3377_v45  ;;  %v15076_v45 = vld [vmem:[#allocation148_spill] sm:$0xff] }
 0xca6   :  { %vm15077_vm1 = vcmp.eq.f32.partialorder %v15076_v45, 0.0 }
 0xca7   :  { %v11480_v62 = vpop.eup %6801  ;;  %v3549_v15 = vmul.f32 1.442695, %v3476_v39 }
 0xca8   :  { %15072 = vst [vmem:[#allocation74_spill] sm:$0xff] %v11480_v62  ;;  %v3622_v37 = vsel %vm15074_vm6, 0.0, %v11480_v62  ;;  %vm15081_vm6 = vmmov %vm15075_vm7  ;;  %v15139_v62 = vld [vmem:[#allocation100_spill] sm:$0xff] }
 0xca9   :  { %6803 = vpow2.f32 %v3549_v15  ;;  %6074 = vmatmul.msk.f32.gmra.mxu3 %vm15075_vm7, %v7257_v41  ;;  %3765 = vperm.xlu0 %6460, %v3622_v37   ;;  %v7258_v15 = vld [vmem:[%s13689_s4 + $0x150] sm:$0xff]  ;;  %v11499_v41 = vpop.permute.xlu0 %3660 }
 0xcac   :  { %v3380_v60 = vpop.f32.mrf.mxu3 }
 0xcad   :  { %v3477_v57 = vsub.f32 %v11043_v34, %v3380_v60 }
 0xcaf   :  { %v11490_v19 = vpop.eup %6803  ;;  %v3551_v26 = vmul.f32 1.442695, %v3477_v57 }
 0xcb0   :  { %v3623_v39 = vsel %vm15077_vm1, 0.0, %v11490_v19  ;;  %vm15084_vm1 = vmmov %vm15081_vm6 }
 0xcb1   :  { %6805 = vpow2.f32 %v3551_v26  ;;  %6075 = vmatmul.msk.f32.gmra.mxu3 %vm15078_vm9, %v7258_v15  ;;  %3770 = vperm.xlu1 %6459, %v3623_v39   ;;  %v7259_v26 = vld [vmem:[%s13689_s4 + $0x158] sm:$0xff]  ;;  %v11511_v39 = vpop.permute.xlu2 %3655  ;;  %v11513_v15 = vpop.permute.xlu0 %3670 }
 0xcb4   :  { %v3383_v37 = vpop.f32.mrf.mxu3 }
 0xcb5   :  { %v3478_v34 = vsub.f32 %v11037_v63, %v3383_v37  ;;  %v11515_v37 = vpop.permute.xlu1 %3650 }
 0xcb7   :  { %v11502_v60 = vpop.eup %6805  ;;  %v3553_v57 = vmul.f32 1.442695, %v3478_v34 }
 0xcb8   :  { %v3624_v45 = vsel %vm15080_vm2, 0.0, %v11502_v60  ;;  %vm15087_vm2 = vmmov %vm15084_vm1 }
 0xcb9   :  { %6807 = vpow2.f32 %v3553_v57  ;;  %6076 = vmatmul.msk.f32.gmra.mxu3 %vm15081_vm6, %v7259_v26  ;;  %3775 = vperm.xlu2 %6461, %v3624_v45   ;;  %v15082_v57 = vld [vmem:[#allocation154_spill] sm:$0xff]  ;;  %v7260_v45 = vld [vmem:[%s13689_s4 + $0x160] sm:$0xff]  ;;  %v11527_v26 = vpop.permute.xlu2 %3675  ;;  %v11529_v10 = vpop.permute.xlu0 %3685 }
 0xcba   :  { %vm15083_vm7 = vcmp.eq.f32.partialorder %v15082_v57, 0.0 }
 0xcbc   :  { %v3386_v63 = vpop.f32.mrf.mxu3 }
 0xcbd   :  { %v3479_v34 = vsub.f32 %v11027_v55, %v3386_v63  ;;  %v11531_v63 = vpop.permute.xlu1 %3665 }
 0xcbf   :  { %v11518_v50 = vpop.eup %6807  ;;  %v3555_v21 = vmul.f32 1.442695, %v3479_v34 }
 0xcc0   :  { %v3625_v36 = vsel %vm15083_vm7, 0.0, %v11518_v50  ;;  %vm15090_vm7 = vmmov %vm15084_vm1 }
 0xcc1   :  { %6809 = vpow2.f32 %v3555_v21  ;;  %6077 = vmatmul.msk.f32.gmra.mxu3 %vm15084_vm1, %v7260_v45  ;;  %3780 = vperm.xlu0 %6460, %v3625_v36   ;;  %v15085_v21 = vld [vmem:[#allocation143_spill] sm:$0xff]  ;;  %v7261_v36 = vld [vmem:[%s13689_s4 + $0x168] sm:$0xff]  ;;  %v3691_v45 = vpop.permute.xlu2 %3690  ;;  %v3701_v33 = vpop.permute.xlu0 %3700 }
 0xcc2   :  { %vm15086_vm9 = vcmp.eq.f32.partialorder %v15085_v21, 0.0  ;;  %v15088_v21 = vld [vmem:[#allocation156_spill] sm:$0xff] }
 0xcc3   :  { %vm15089_vm6 = vcmp.eq.f32.partialorder %v15088_v21, 0.0  ;;  %v15091_v21 = vld [vmem:[#allocation147_spill] sm:$0xff] }
 0xcc4   :  { %v3389_v55 = vpop.f32.mrf.mxu3  ;;  %vm15092_vm1 = vcmp.eq.f32.partialorder %v15091_v21, 0.0 }
 0xcc5   :  { %v3480_v34 = vsub.f32 %v11023_v40, %v3389_v55  ;;  %v3681_v46 = vpop.permute.xlu1 %3680 }
 0xcc7   :  { %v11534_v14 = vpop.eup %6809  ;;  %v3557_v57 = vmul.f32 1.442695, %v3480_v34 }
 0xcc8   :  { %v3626_v20 = vsel %vm15086_vm9, 0.0, %v11534_v14  ;;  %vm15093_vm9 = vmmov %vm15087_vm2 }
 0xcc9   :  { %6811 = vpow2.f32 %v3557_v57  ;;  %6078 = vmatmul.msk.f32.gmra.mxu3 %vm15087_vm2, %v7261_v36  ;;  %3785 = vperm.xlu1 %6459, %v3626_v20   ;;  %v3706_v20 = vpop.permute.xlu2 %3705  ;;  %v3711_v36 = vpop.permute.xlu0 %3710 }
 0xccc   :  { %v3392_v48 = vpop.f32.mrf.mxu3 }
 0xccd   :  { %v3481_v40 = vsub.f32 %v11017_v27, %v3392_v48  ;;  %v3696_v30 = vpop.permute.xlu1 %3695 }
 0xccf   :  { %v11544_v55 = vpop.eup %6811  ;;  %v3559_v34 = vmul.f32 1.442695, %v3481_v40 }
 0xcd0   :  { %v3627_v57 = vsel %vm15089_vm6, 0.0, %v11544_v55  ;;  %vm15099_vm6 = vmmov %vm15090_vm7 }
 0xcd1   :  { %6813 = vpow2.f32 %v3559_v34  ;;  %6079 = vmatmul.msk.f32.gmra.mxu3 %vm15090_vm7, %v7262_v7  ;;  %3790 = vperm.xlu2 %6461, %v3627_v57   ;;  %v3721_v7 = vpop.permute.xlu2 %3720 }
 0xcd2   :  { %v3907_v47 = vmul.f32 %v3721_v7, %v15095_v9  ;;  %v15100_v9 = vld [vmem:[#allocation137_spill] sm:$0xff] }
 0xcd4   :  { %v3395_v44 = vpop.f32.mrf.mxu3 }
 0xcd5   :  { %v3482_v48 = vsub.f32 %v11011_v16, %v3395_v44  ;;  %v3716_v16 = vpop.permute.xlu1 %3715 }
 0xcd6   :  { %v3906_v43 = vmul.f32 %v3716_v16, %v15096_v3  ;;  %v15103_v16 = vld [vmem:[#allocation140_spill] sm:$0xff] }
 0xcd7   :  { %v11554_v27 = vpop.eup %6813  ;;  %v3561_v40 = vmul.f32 1.442695, %v3482_v48 }
 0xcd8   :  { %v3628_v34 = vsel %vm15092_vm1, 0.0, %v11554_v27 }
 0xcd9   :  { %6815 = vpow2.f32 %v3561_v40  ;;  %6080 = vmatmul.msk.f32.gmra.mxu3 %vm15093_vm9, %v7263_v11  ;;  %3795 = vperm.xlu0 %6460, %v3628_v34   ;;  %v15097_v11 = vld [vmem:[#allocation127_spill] sm:$0xff] }
 0xcda   :  { %vm15098_vm2 = vcmp.eq.f32.partialorder %v15097_v11, 0.0 }
 0xcdb   :  { %v3726_v57 = vpop.permute.xlu0 %3725 }
 0xcdc   :  { %v3908_v53 = vmul.f32 %v3726_v57, %v15094_v1  ;;  %v3398_v44 = vpop.f32.mrf.mxu3  ;;  %v7264_v1 = vld [vmem:[%s13689_s4 + $0x180] sm:$0xff] }
 0xcdd   :  { %v3483_v48 = vsub.f32 %v11004_v61, %v3398_v44  ;;  %v15101_v61 = vld [vmem:[#allocation138_spill] sm:$0xff] }
 0xcde   :  { %3942 = vmatpush.msrb.mxu0 %v3908_v53  ;;  %v3905_v53 = vmul.f32 %v3711_v36, %v15100_v9  ;;  %v3904_v7 = vmul.f32 %v3706_v20, %v15101_v61  ;;  %v15106_v36 = vld [vmem:[#allocation141_spill] sm:$0xff]  ;;  %v15107_v20 = vld [vmem:[#allocation142_spill] sm:$0xff] }
 0xcdf   :  { %v11566_v21 = vpop.eup %6815  ;;  %v3563_v40 = vmul.f32 1.442695, %v3483_v48  ;;  %v3902_v48 = vmul.f32 %v3696_v30, %v15103_v16  ;;  %v15109_v61 = vld [vmem:[#allocation146_spill] sm:$0xff] }
 0xce0   :  { %3943 = vmatpush.msrb.mxu0 %v3907_v47  ;;  %v3629_v34 = vsel %vm15098_vm2, 0.0, %v11566_v21  ;;  %v15102_v47 = vld [vmem:[#allocation139_spill] sm:$0xff]  ;;  %v3898_v30 = vmul.f32 %v11527_v26, %v15109_v61  ;;  %v3893_v26 = vmul.f32 %v11515_v37, %v10466_v24 }
 0xce1   :  { %6817 = vpow2.f32 %v3563_v40  ;;  %6081 = vmatmul.msk.f32.gmra.mxu3 %vm15099_vm6, %v7264_v1  ;;  %3800 = vperm.xlu1 %6459, %v3629_v34   ;;  %v3903_v3 = vmul.f32 %v3701_v33, %v15102_v47  ;;  %v15104_v40 = vld [vmem:[#allocation129_spill] sm:$0xff]  ;;  %v3900_v1 = vmul.f32 %v11529_v10, %v15107_v20  ;;  %v15108_v33 = vld [vmem:[#allocation144_spill] sm:$0xff] }
 0xce2   :  { %3944 = vmatpush.msrb.mxu0 %v3906_v43  ;;  %vm15105_vm7 = vcmp.eq.f32.partialorder %v15104_v40, 0.0  ;;  %v3901_v43 = vmul.f32 %v3691_v45, %v15106_v36  ;;  %v15112_v10 = vld [vmem:[#allocation153_spill] sm:$0xff]  ;;  %v15132_v40 = vld [vmem:[#allocation28_spill] sm:$0xff] }
 0xce4   :  { %v11578_v57 = vpop.f32.mrf.mxu3  ;;  %3945 = vmatpush.msrb.mxu0 %v3905_v53  ;;  %v3899_v53 = vmul.f32 %v3681_v46, %v15108_v33  ;;  %v15113_v46 = vld [vmem:[#allocation157_spill] sm:$0xff] }
 0xce6   :  { %3946 = vmatpush.msrb.mxu0 %v3904_v7  ;;  %v15110_v7 = vld [vmem:[#allocation149_spill] sm:$0xff] }
 0xce7   :  { %v11581_v44 = vpop.eup %6817  ;;  %v3897_v47 = vmul.f32 %v11513_v15, %v15110_v7 }
 0xce8   :  { %3947 = vmatpush.msrb.mxu0 %v3903_v3  ;;  %v3630_v34 = vsel %vm15105_vm7, 0.0, %v11581_v44  ;;  %v15111_v3 = vld [vmem:[#allocation151_spill] sm:$0xff] }
 0xce9   :  { %3805 = vperm.xlu2 %6461, %v3630_v34   ;;  %v3896_v45 = vmul.f32 %v11531_v63, %v15111_v3  ;;  %v3894_v34 = vmul.f32 %v11511_v39, %v15113_v46  ;;  %v15118_v3 = vld [vmem:[#allocation163_spill] sm:$0xff] }
 0xcea   :  { %3948 = vmatpush.msrb.mxu0 %v3902_v48  ;;  %v3895_v48 = vmul.f32 %v11499_v41, %v15112_v10  ;;  %vm15119_vm9 = vcmp.eq.f32.partialorder %v15118_v3, 0.0 }
 0xcec   :  { %v11590_v9 = vpop.f32.mrf.mxu3  ;;  %3949 = vmatpush.msrb.mxu0 %v3901_v43 }
 0xcee   :  { %3950 = vmatpush.msrb.mxu0 %v3900_v1 }
 0xcf0   :  { %3951 = vmatpush.msrb.mxu0 %v3899_v53  ;;  %v15115_v53 = vld [vmem:[#allocation170_spill] sm:$0xff] }
 0xcf1   :  { %vm15116_vm1 = vcmp.eq.f32.partialorder %v15115_v53, 0.0 }
 0xcf2   :  { %3952 = vmatpush.msrb.mxu0 %v3898_v30 }
 0xcf4   :  { %v11599_v16 = vpop.f32.mrf.mxu3  ;;  %3953 = vmatpush.msrb.mxu0 %v3897_v47 }
 0xcf6   :  { %3954 = vmatpush.msrb.mxu0 %v3896_v45 }
 0xcf8   :  { %3955 = vmatpush.msrb.mxu0 %v3895_v48 }
 0xcfa   :  { %3956 = vmatpush.msrb.mxu0 %v3894_v34 }
 0xcfb   :  { %v11623_v61 = vpop.permute.xlu2 %3760 }
 0xcfc   :  { %v11607_v15 = vpop.f32.mrf.mxu3  ;;  %3957 = vmatpush.msrb.mxu0 %v3893_v26  ;;  %v15121_v26 = vld [vmem:[#allocation155_spill] sm:$0xff] }
 0xcfd   :  { %3958 = vmatmul.f32.vlgmr.msrb.gmra.mxu0 %v11129_v28  ;;  %vm15122_vm2 = vcmp.eq.f32.partialorder %v15121_v26, 0.0  ;;  %v15128_v26 = vld [vmem:[#allocation26_spill] sm:$0xff] }
 0xd04   :  { %v11610_v63 = vpop.f32.mrf.mxu3 }
 0xd0c   :  { %v11612_v36 = vpop.f32.mrf.mxu3 }
 0xd13   :  { %v11631_v45 = vpop.permute.xlu2 %3775 }
 0xd14   :  { %v11614_v43 = vpop.f32.mrf.mxu3 }
 0xd1c   :  { %v3422_v41 = vpop.f32.mrf.mxu3 }
 0xd1d   :  { %v3491_v20 = vsub.f32 %v11157_v54, %v3422_v41  ;;  %v11639_v41 = vpop.permute.xlu0 %3750 }
 0xd1f   :  { %v3579_v39 = vmul.f32 1.442695, %v3491_v20  ;;  %v11641_v20 = vpop.permute.xlu1 %3755 }
 0xd21   :  { %6819 = vpow2.f32 %v3579_v39 }
 0xd24   :  { %v3425_v1 = vpop.f32.mrf.mxu3 }
 0xd25   :  { %v3492_v24 = vsub.f32 %v11153_v51, %v3425_v1 }
 0xd27   :  { %v11618_v37 = vpop.eup %6819  ;;  %v3581_v33 = vmul.f32 1.442695, %v3492_v24  ;;  %v15123_v24 = vld [vmem:[#allocation24_spill] sm:$0xff] }
 0xd28   :  { %15114 = vst [vmem:[#allocation72_spill] sm:$0xff] %v11618_v37  ;;  %v3638_v28 = vsel %vm15116_vm1, 0.0, %v11618_v37 }
 0xd29   :  { %6821 = vpow2.f32 %v3581_v33  ;;  %3845 = vperm.xlu1 %6459, %v3638_v28  }
 0xd2b   :  { %v3791_v39 = vpop.permute.xlu2 %3790 }
 0xd2c   :  { %v3428_v30 = vpop.f32.mrf.mxu3 }
 0xd2d   :  { %v3493_v7 = vsub.f32 %v11149_v5, %v3428_v30  ;;  %v15125_v30 = vld [vmem:[#allocation152_spill] sm:$0xff] }
 0xd2e   :  { %vm15126_vm6 = vcmp.eq.f32.partialorder %v15125_v30, 0.0 }
 0xd2f   :  { %v11626_v54 = vpop.eup %6821  ;;  %v3583_v47 = vmul.f32 1.442695, %v3493_v7 }
 0xd30   :  { %15117 = vst [vmem:[#allocation70_spill] sm:$0xff] %v11626_v54  ;;  %v3639_v51 = vsel %vm15119_vm9, 0.0, %v11626_v54 }
 0xd31   :  { %6823 = vpow2.f32 %v3583_v47  ;;  %3850 = vperm.xlu2 %6461, %v3639_v51   ;;  %v11649_v47 = vpop.permute.xlu0 %3765  ;;  %v3771_v51 = vpop.permute.xlu1 %3770 }
 0xd34   :  { %v3431_v10 = vpop.f32.mrf.mxu3 }
 0xd35   :  { %v3494_v48 = vsub.f32 %v11145_v31, %v3431_v10 }
 0xd37   :  { %v11634_v46 = vpop.eup %6823  ;;  %v3585_v34 = vmul.f32 1.442695, %v3494_v48  ;;  %v15127_v48 = vld [vmem:[#allocation18_spill] sm:$0xff] }
 0xd38   :  { %15120 = vst [vmem:[#allocation68_spill] sm:$0xff] %v11634_v46  ;;  %v3640_v5 = vsel %vm15122_vm2, 0.0, %v11634_v46 }
 0xd39   :  { %6825 = vpow2.f32 %v3585_v34  ;;  %3855 = vperm.xlu0 %6460, %v3640_v5  }
 0xd3c   :  { %v3434_v1 = vpop.f32.mrf.mxu3 }
 0xd3d   :  { %v3495_v33 = vsub.f32 %v15123_v24, %v3434_v1 }
 0xd3f   :  { %v11644_v28 = vpop.eup %6825  ;;  %v3587_v31 = vmul.f32 1.442695, %v3495_v33  ;;  %v15130_v33 = vld [vmem:[#allocation167_spill] sm:$0xff] }
 0xd40   :  { %15124 = vst [vmem:[#allocation66_spill] sm:$0xff] %v11644_v28  ;;  %v3641_v7 = vsel %vm15126_vm6, 0.0, %v11644_v28  ;;  %vm15131_vm7 = vcmp.eq.f32.partialorder %v15130_v33, 0.0  ;;  %v15136_v33 = vld [vmem:[#allocation19_spill] sm:$0xff]  ;;  %v15137_v28 = vld [vmem:[#allocation30_spill] sm:$0xff] }
 0xd41   :  { %6827 = vpow2.f32 %v3587_v31  ;;  %3860 = vperm.xlu1 %6459, %v3641_v7   ;;  %v3781_v31 = vpop.permute.xlu0 %3780  ;;  %v3786_v7 = vpop.permute.xlu1 %3785 }
 0xd43   :  { %v3806_v10 = vpop.permute.xlu2 %3805 }
 0xd44   :  { %v3924_v34 = vmul.f32 %v3806_v10, %v15127_v48  ;;  %v3437_v5 = vpop.f32.mrf.mxu3  ;;  %v15133_v10 = vld [vmem:[#allocation40_spill] sm:$0xff] }
 0xd45   :  { %v3496_v3 = vsub.f32 %v15128_v26, %v3437_v5  ;;  %v3470_v26 = vsub.f32 %v15133_v10, %v11432_v59  ;;  %v15140_v10 = vld [vmem:[#allocation86_spill] sm:$0xff] }
 0xd46   :  { %3962 = vmatpush.msra.mxu0 %v3924_v34  ;;  %v15134_v34 = vld [vmem:[#allocation158_spill] sm:$0xff] }
 0xd47   :  { %v11653_v1 = vpop.eup %6827  ;;  %v3589_v24 = vmul.f32 1.442695, %v3496_v3  ;;  %vm15135_vm1 = vcmp.eq.f32.partialorder %v15134_v34, 0.0  ;;  %v3537_v5 = vmul.f32 1.442695, %v3470_v26 }
 0xd48   :  { %15129 = vst [vmem:[#allocation65_spill] sm:$0xff] %v11653_v1  ;;  %v3642_v30 = vsel %vm15131_vm7, 0.0, %v11653_v1 }
 0xd49   :  { %6829 = vpow2.f32 %v3589_v24  ;;  %3865 = vperm.xlu2 %6461, %v3642_v30  }
 0xd4b   :  { %v3796_v24 = vpop.permute.xlu0 %3795 }
 0xd4c   :  { %v3440_v53 = vpop.f32.mrf.mxu3  ;;  %v3922_v59 = vmul.f32 %v3796_v24, %v15139_v62  ;;  %v15145_v24 = vld [vmem:[#allocation103_spill] sm:$0xff] }
 0xd4d   :  { %v3497_v11 = vsub.f32 %v15132_v40, %v3440_v53  ;;  %v15138_v53 = vld [vmem:[#allocation43_spill] sm:$0xff] }
 0xd4e   :  { %v3471_v1 = vsub.f32 %v15138_v53, %v11438_v25  ;;  %v15147_v53 = vld [vmem:[#allocation81_spill] sm:$0xff] }
 0xd4f   :  { %v11659_v37 = vpop.eup %6829  ;;  %v3591_v48 = vmul.f32 1.442695, %v3497_v11 }
 0xd50   :  { %v3643_v3 = vsel %vm15135_vm1, 0.0, %v11659_v37  ;;  %v3539_v25 = vmul.f32 1.442695, %v3471_v1 }
 0xd51   :  { %6831 = vpow2.f32 %v3591_v48  ;;  %3870 = vperm.xlu0 %6460, %v3643_v3   ;;  %v3488_v48 = vsub.f32 %v15140_v10, %v11610_v63  ;;  %v15141_v3 = vld [vmem:[#allocation101_spill] sm:$0xff] }
 0xd52   :  { %6833 = vpow2.f32 %v3537_v5  ;;  %v3921_v34 = vmul.f32 %v3791_v39, %v15141_v3  ;;  %v3919_v5 = vmul.f32 %v3781_v31, %v15145_v24  ;;  %v15148_v10 = vld [vmem:[#allocation105_spill] sm:$0xff] }
 0xd53   :  { %v3801_v30 = vpop.permute.xlu1 %3800 }
 0xd54   :  { %v3923_v54 = vmul.f32 %v3801_v30, %v15136_v33  ;;  %v3443_v46 = vpop.f32.mrf.mxu3  ;;  %v15142_v33 = vld [vmem:[#allocation145_spill] sm:$0xff] }
 0xd55   :  { %v3498_v40 = vsub.f32 %v15137_v28, %v3443_v46  ;;  %vm15143_vm9 = vcmp.eq.f32.partialorder %v15142_v33, 0.0  ;;  %v15144_v28 = vld [vmem:[#allocation52_spill] sm:$0xff] }
 0xd56   :  { %3963 = vmatpush.msra.mxu0 %v3923_v54  ;;  %v3920_v62 = vmul.f32 %v3786_v7, %v15144_v28  ;;  %v3573_v54 = vmul.f32 1.442695, %v3488_v48  ;;  %v15149_v7 = vld [vmem:[#allocation42_spill] sm:$0xff]  ;;  %v15195_v33 = vld [vmem:[#allocation48_spill] sm:$0xff] }
 0xd57   :  { %v11671_v11 = vpop.eup %6831  ;;  %v3593_v26 = vmul.f32 1.442695, %v3498_v40  ;;  %v15146_v40 = vld [vmem:[#allocation32_spill] sm:$0xff]  ;;  %v3489_v31 = vsub.f32 %v15149_v7, %v11612_v36  ;;  %v15150_v48 = vld [vmem:[#allocation22_spill] sm:$0xff]  ;;  %v15156_v36 = vld [vmem:[#allocation9_spill] sm:$0xff] }
 0xd58   :  { %3964 = vmatpush.msra.mxu0 %v3922_v59  ;;  %v3644_v46 = vsel %vm15143_vm9, 0.0, %v11671_v11  ;;  %v11681_v63 = vpop.eup %6833  ;;  %v3486_v59 = vsub.f32 %v15147_v53, %v11599_v16  ;;  %v3490_v3 = vsub.f32 %v15150_v48, %v11614_v43  ;;  %v3916_v24 = vmul.f32 %v11649_v47, %v15156_v36 }
 0xd59   :  { %6835 = vpow2.f32 %v3593_v26  ;;  %3875 = vperm.xlu1 %6459, %v3644_v46   ;;  %v3918_v26 = vmul.f32 %v11631_v45, %v15148_v10  ;;  %v15151_v46 = vld [vmem:[#allocation104_spill] sm:$0xff]  ;;  %v3575_v43 = vmul.f32 1.442695, %v3489_v31  ;;  %v15160_v31 = vld [vmem:[#allocation38_spill] sm:$0xff] }
 0xd5a   :  { %3965 = vmatpush.msra.mxu0 %v3921_v34  ;;  %6837 = vpow2.f32 %v3539_v25  ;;  %v3917_v28 = vmul.f32 %v3771_v51, %v15151_v46  ;;  %v15152_v25 = vld [vmem:[#allocation173_spill] sm:$0xff]  ;;  %v15154_v45 = vld [vmem:[#allocation160_spill] sm:$0xff]  ;;  %v15157_v51 = vld [vmem:[#allocation10_spill] sm:$0xff] }
 0xd5b   :  { %6839 = vpow2.f32 %v3573_v54  ;;  %vm15153_vm2 = vcmp.eq.f32.partialorder %v15152_v25, 0.0  ;;  %vm15155_vm6 = vcmp.eq.f32.partialorder %v15154_v45, 0.0  ;;  %v3569_v54 = vmul.f32 1.442695, %v3486_v59  ;;  %v15158_v10 = vld [vmem:[#allocation36_spill] sm:$0xff]  ;;  %v15159_v59 = vld [vmem:[#allocation177_spill] sm:$0xff] }
 0xd5c   :  { %v3446_v30 = vpop.f32.mrf.mxu3  ;;  %3966 = vmatpush.msra.mxu0 %v3920_v62  ;;  %v3617_v16 = vsel %vm15153_vm2, 0.0, %v11681_v63  ;;  %v3914_v7 = vmul.f32 %v11641_v20, %v15159_v59  ;;  %v15165_v20 = vld [vmem:[#allocation175_spill] sm:$0xff]  ;;  %v15194_v45 = vld [vmem:[#allocation185_spill] sm:$0xff] }
 0xd5d   :  { %v3499_v39 = vsub.f32 %v15146_v40, %v3446_v30  ;;  %v3915_v30 = vmul.f32 %v11623_v61, %v15157_v51  ;;  %v3577_v40 = vmul.f32 1.442695, %v3490_v3  ;;  %v15161_v61 = vld [vmem:[#allocation34_spill] sm:$0xff]  ;;  %v15162_v3 = vld [vmem:[#allocation168_spill] sm:$0xff]  ;;  %vm15166_vm1 = vcmp.eq.f32.partialorder %v15165_v20, 0.0  ;;  %v15172_v59 = vld [vmem:[#allocation171_spill] sm:$0xff] }
 0xd5e   :  { %3967 = vmatpush.msra.mxu0 %v3919_v5  ;;  %vm15163_vm7 = vcmp.eq.f32.partialorder %v15162_v3, 0.0  ;;  %v15193_v20 = vld [vmem:[#allocation184_spill] sm:$0xff] }
 0xd5f   :  { %v11688_v1 = vpop.eup %6835  ;;  %v3595_v34 = vmul.f32 1.442695, %v3499_v39 }
 0xd60   :  { %3968 = vmatpush.msra.mxu0 %v3918_v26  ;;  %v3645_v62 = vsel %vm15155_vm6, 0.0, %v11688_v1  ;;  %v11703_v5 = vpop.eup %6837  ;;  %v3468_v26 = vsub.f32 %v15158_v10, %v11415_v4  ;;  %v15170_v10 = vld [vmem:[#allocation178_spill] sm:$0xff]  ;;  %vm15173_vm6 = vcmp.eq.f32.partialorder %v15172_v59, 0.0 }
 0xd61   :  { %6841 = vpow2.f32 %v3595_v34  ;;  %3740 = vperm.xlu1 %6459, %v3617_v16   ;;  %3880 = vperm.xlu2 %6461, %v3645_v62   ;;  %v11707_v53 = vpop.eup %6839  ;;  %v3469_v34 = vsub.f32 %v15160_v31, %v11426_v18  ;;  %v3618_v46 = vsel %vm15163_vm7, 0.0, %v11703_v5  ;;  %v15167_v62 = vld [vmem:[#allocation150_spill] sm:$0xff]  ;;  %vm15171_vm2 = vcmp.eq.f32.partialorder %v15170_v10, 0.0  ;;  %v15174_v31 = vld [vmem:[#allocation169_spill] sm:$0xff] }
 0xd62   :  { %3969 = vmatpush.msra.mxu0 %v3917_v28  ;;  %6843 = vpow2.f32 %v3569_v54  ;;  %v15164_v28 = vld [vmem:[#allocation180_spill] sm:$0xff]  ;;  %v3635_v16 = vsel %vm15166_vm1, 0.0, %v11707_v53  ;;  %vm15168_vm9 = vcmp.eq.f32.partialorder %v15167_v62, 0.0  ;;  %v3533_v54 = vmul.f32 1.442695, %v3468_v26 }
 0xd63   :  { %6845 = vpow2.f32 %v3575_v43  ;;  %v3913_v4 = vmul.f32 %v11639_v41, %v15164_v28  ;;  %v3535_v43 = vmul.f32 1.442695, %v3469_v34  ;;  %vm15175_vm7 = vcmp.eq.f32.partialorder %v15174_v31, 0.0  ;;  %v15177_v28 = vld [vmem:[#allocation174_spill] sm:$0xff] }
 0xd64   :  { %v3449_v39 = vpop.f32.mrf.mxu3  ;;  %3970 = vmatpush.msra.mxu0 %v3916_v24  ;;  %6847 = vpow2.f32 %v3577_v40  ;;  %v15169_v40 = vld [vmem:[#allocation84_spill] sm:$0xff]  ;;  %vm15178_vm1 = vcmp.eq.f32.partialorder %v15177_v28, 0.0  ;;  %v15192_v28 = vld [vmem:[#allocation183_spill] sm:$0xff] }
 0xd65   :  { %v3500_v48 = vsub.f32 %v15161_v61, %v3449_v39  ;;  %6849 = vpow2.f32 %v3533_v54  ;;  %v3487_v39 = vsub.f32 %v15169_v40, %v11607_v15  ;;  %v15181_v54 = vld [vmem:[#allocation172_spill] sm:$0xff] }
 0xd66   :  { %3971 = vmatpush.msra.mxu0 %v3915_v30  ;;  %v3485_v30 = vsub.f32 %v11181_v56, %v11590_v9 }
 0xd67   :  { %v11713_v47 = vpop.eup %6841  ;;  %v3597_v36 = vmul.f32 1.442695, %v3500_v48  ;;  %v3571_v61 = vmul.f32 1.442695, %v3487_v39  ;;  %v15186_v39 = vld [vmem:[#allocation176_spill] sm:$0xff] }
 0xd68   :  { %3972 = vmatpush.msra.mxu0 %v3914_v7  ;;  %v3646_v18 = vsel %vm15168_vm9, 0.0, %v11713_v47  ;;  %v11729_v24 = vpop.eup %6843  ;;  %v3567_v56 = vmul.f32 1.442695, %v3485_v30 }
 0xd69   :  { %3830 = vperm.xlu1 %6459, %v3635_v16   ;;  %3745 = vperm.xlu2 %6461, %v3618_v46   ;;  %v11731_v41 = vpop.eup %6845  ;;  %6851 = vpow2.f32 %v3597_v36  ;;  %v3633_v26 = vsel %vm15171_vm2, 0.0, %v11729_v24  ;;  %v3484_v46 = vsub.f32 %v11185_v8, %v11578_v57  ;;  %v15179_v16 = vld [vmem:[#allocation49_spill] sm:$0xff]  ;;  %vm15182_vm2 = vcmp.eq.f32.partialorder %v15181_v54, 0.0  ;;  %v15184_v57 = vld [vmem:[#allocation179_spill] sm:$0xff] }
 0xd6a   :  { %3885 = vperm.xlu0 %6460, %v3646_v18   ;;  %3973 = vmatpush.msra.mxu0 %v3913_v4  ;;  %v11733_v51 = vpop.eup %6847  ;;  %6853 = vpow2.f32 %v3535_v43  ;;  %v3636_v7 = vsel %vm15173_vm6, 0.0, %v11731_v41  ;;  %vm15180_vm9 = vcmp.eq.f32.partialorder %v15179_v16, 0.0  ;;  %vm15185_vm6 = vcmp.eq.f32.partialorder %v15184_v57, 0.0  ;;  %v15191_v57 = vld [vmem:[#allocation182_spill] sm:$0xff] }
 0xd6b   :  { %v3637_v34 = vsel %vm15175_vm7, 0.0, %v11733_v51  ;;  %v11748_v9 = vpop.eup %6849  ;;  %6855 = vpow2.f32 %v3567_v56  ;;  %v3565_v43 = vmul.f32 1.442695, %v3484_v46  ;;  %vm15187_vm7 = vcmp.eq.f32.partialorder %v15186_v39, 0.0 }
 0xd6c   :  { %6857 = vpow2.f32 %v3571_v61  ;;  %v3615_v4 = vsel %vm15178_vm1, 0.0, %v11748_v9 }
 0xd6d   :  { %6859 = vpow2.f32 %v3565_v43 }
 0xd6f   :  { %v11750_v15 = vpop.eup %6851 }
 0xd70   :  { %15176 = vst [vmem:[#allocation62_spill] sm:$0xff] %v11750_v15  ;;  %v11752_v48 = vpop.eup %6853  ;;  %v3647_v18 = vsel %vm15180_vm9, 0.0, %v11750_v15  ;;  %vm15216_vm9 = vcmask 64512  }
 0xd71   :  { %3820 = vperm.xlu1 %6459, %v3633_v26   ;;  %3835 = vperm.xlu2 %6461, %v3636_v7   ;;  %v3616_v36 = vsel %vm15182_vm2, 0.0, %v11752_v48  ;;  %v11765_v30 = vpop.eup %6855 }
 0xd72   :  { %3840 = vperm.xlu0 %6460, %v3637_v34   ;;  %15183 = vst [vmem:[#allocation82_spill] sm:$0xff] %v11765_v30  ;;  %v11767_v8 = vpop.eup %6857  ;;  %v3632_v40 = vsel %vm15185_vm6, 0.0, %v11765_v30  ;;  %v15189_v34 = vld [vmem:[#allocation181_spill] sm:$0xff] }
 0xd73   :  { %v3634_v26 = vsel %vm15187_vm7, 0.0, %v11767_v8  ;;  %v11775_v7 = vpop.eup %6859  ;;  %vm15190_vm1 = vcmp.eq.f32.partialorder %v15189_v34, 0.0 }
 0xd74   :  { %15188 = vst [vmem:[#allocation88_spill] sm:$0xff] %v11775_v7  ;;  %v3631_v56 = vsel %vm15190_vm1, 0.0, %v11775_v7  ;;  %v15202_v7 = vld [vmem:[#allocation50_spill] sm:$0xff] }
 0xd79   :  { %3730 = vperm.xlu2 %6461, %v3615_v4   ;;  %3890 = vperm.xlu1 %6459, %v3647_v18  }
 0xd7a   :  { %3735 = vperm.xlu0 %6460, %v3616_v36  }
 0xd81   :  { %3815 = vperm.xlu2 %6461, %v3632_v40  }
 0xd82   :  { %3825 = vperm.xlu0 %6460, %v3634_v26  }
 0xd8a   :  { %3810 = vperm.xlu0 %6460, %v3631_v56  }
 0xd8b   :  { %v3851_v61 = vpop.permute.xlu2 %3850 }
 0xd8c   :  { %v3933_v30 = vmul.f32 %v3851_v61, %v15202_v7  ;;  %v15208_v7 = vld [vmem:[#allocation15_spill] sm:$0xff] }
 0xd9b   :  { %v3846_v4 = vpop.permute.xlu1 %3845 }
 0xda3   :  { %v3866_v46 = vpop.permute.xlu2 %3865 }
 0xdab   :  { %v3856_v39 = vpop.permute.xlu0 %3855 }
 0xdb3   :  { %v3861_v36 = vpop.permute.xlu1 %3860 }
 0xdbb   :  { %v3881_v18 = vpop.permute.xlu2 %3880 }
 0xdc3   :  { %v3746_v43 = vpop.permute.xlu2 %3745  ;;  %v3871_v26 = vpop.permute.xlu0 %3870 }
 0xdc4   :  { %v3912_v40 = vmul.f32 %v3746_v43, %v15191_v57  ;;  %v11788_v43 = vld [vmem:[%s13688_s3 + $0x8] sm:$0xff] }
 0xdc6   :  { %3974 = vmatpush.msra.mxu0 %v3912_v40 }
 0xdcb   :  { %v3876_v54 = vpop.permute.xlu1 %3875  ;;  %v3836_v34 = vpop.permute.xlu2 %3835 }
 0xdd3   :  { %v3741_v16 = vpop.permute.xlu1 %3740  ;;  %v3731_v56 = vpop.permute.xlu2 %3730 }
 0xdd4   :  { %v3911_v31 = vmul.f32 %v3741_v16, %v15192_v28  ;;  %v3909_v25 = vmul.f32 %v3731_v56, %v15194_v45  ;;  %v15197_v16 = vld [vmem:[#allocation89_spill] sm:$0xff]  ;;  %v15199_v45 = vld [vmem:[#allocation90_spill] sm:$0xff] }
 0xdd5   :  { %v3938_v40 = vmul.f32 %v3876_v54, %v15197_v16  ;;  %v15201_v56 = vld [vmem:[#allocation53_spill] sm:$0xff] }
 0xdd6   :  { %3975 = vmatpush.msra.mxu0 %v3911_v31  ;;  %v15196_v31 = vld [vmem:[#allocation51_spill] sm:$0xff]  ;;  %v3934_v15 = vmul.f32 %v3856_v39, %v15201_v56 }
 0xdd7   :  { %v3939_v28 = vmul.f32 %v3881_v18, %v15196_v31  ;;  %v15203_v18 = vld [vmem:[#allocation47_spill] sm:$0xff] }
 0xdd8   :  { %v15204_v31 = vld [vmem:[#allocation11_spill] sm:$0xff] }
 0xddc   :  { %v3886_v59 = vpop.permute.xlu0 %3885 }
 0xddd   :  { %v3940_v57 = vmul.f32 %v3886_v59, %v15195_v33  ;;  %v3831_v33 = vpop.permute.xlu1 %3830 }
 0xde4   :  { %v3841_v10 = vpop.permute.xlu0 %3840 }
 0xdec   :  { %v3736_v62 = vpop.permute.xlu0 %3735 }
 0xded   :  { %v3910_v3 = vmul.f32 %v3736_v62, %v15193_v20  ;;  %v15198_v20 = vld [vmem:[#allocation57_spill] sm:$0xff] }
 0xdee   :  { %v3937_v62 = vmul.f32 %v3871_v26, %v15198_v20  ;;  %v3931_v26 = vmul.f32 %v3841_v10, %v15204_v31  ;;  %v15207_v20 = vld [vmem:[#allocation14_spill] sm:$0xff] }
 0xdef   :  { %3976 = vmatpush.msra.mxu0 %v3910_v3  ;;  %v3936_v3 = vmul.f32 %v3866_v46, %v15199_v45  ;;  %v15205_v46 = vld [vmem:[#allocation12_spill] sm:$0xff]  ;;  %v15210_v45 = vld [vmem:[#allocation17_spill] sm:$0xff] }
 0xdf0   :  { %v3930_v16 = vmul.f32 %v3836_v34, %v15205_v46  ;;  %v15211_v34 = vld [vmem:[#allocation45_spill] sm:$0xff]  ;;  %v15251_v46 = vld [vmem:[#allocation110_spill] sm:$0xff] }
 0xdf1   :  { %3977 = vmatpush.msra.mxu0 %v3909_v25  ;;  %v15200_v25 = vld [vmem:[#allocation85_spill] sm:$0xff] }
 0xdf2   :  { %3978 = vmatmul.f32.vlgmr.msra.gmra.mxu0 %v11788_v43  ;;  %v3935_v59 = vmul.f32 %v3861_v36, %v15200_v25 }
 0xdf3   :  { %3982 = vmatpush.msrb.mxu0 %v3940_v57  ;;  %v3932_v57 = vmul.f32 %v3846_v4, %v15203_v18 }
 0xdf4   :  { %v3826_v54 = vpop.permute.xlu0 %3825 }
 0xdf5   :  { %3983 = vmatpush.msrb.mxu0 %v3939_v28  ;;  %v3821_v28 = vpop.permute.xlu1 %3820  ;;  %v3928_v39 = vmul.f32 %v3826_v54, %v15207_v20  ;;  %v7267_v54 = vld [vmem:[%s13688_s3 + $0x18] sm:$0xff] }
 0xdf6   :  { %v15266_v20 = vld [vmem:[#allocation115_spill] sm:$0xff] }
 0xdf7   :  { %3984 = vmatpush.msrb.mxu0 %v3938_v40  ;;  %v15206_v40 = vld [vmem:[#allocation13_spill] sm:$0xff] }
 0xdf8   :  { %v3929_v36 = vmul.f32 %v3831_v33, %v15206_v40  ;;  %v7266_v33 = vld [vmem:[%s13688_s3 + $0x10] sm:$0xff]  ;;  %v15257_v40 = vld [vmem:[#allocation27_spill] sm:$0xff] }
 0xdf9   :  { %3985 = vmatpush.msrb.mxu0 %v3937_v62  ;;  %v3816_v62 = vpop.permute.xlu2 %3815 }
 0xdfb   :  { %3986 = vmatpush.msrb.mxu0 %v3936_v3 }
 0xdfc   :  { %v3811_v61 = vpop.permute.xlu0 %3810 }
 0xdfd   :  { %3987 = vmatpush.msrb.mxu0 %v3935_v59  ;;  %v3891_v10 = vpop.permute.xlu1 %3890  ;;  %v3925_v3 = vmul.f32 %v3811_v61, %v15210_v45  ;;  %v15285_v61 = vld [vmem:[#allocation69_spill] sm:$0xff]  ;;  %v15297_v45 = vld [vmem:[#allocation63_spill] sm:$0xff] }
 0xdfe   :  { %v3941_v25 = vmul.f32 %v3891_v10, %v15211_v34  ;;  %v15295_v10 = vld [vmem:[#allocation59_spill] sm:$0xff]  ;;  %v15301_v34 = vld [vmem:[#allocation58_spill] sm:$0xff] }
 0xdff   :  { %3988 = vmatpush.msrb.mxu0 %v3934_v15  ;;  %v3927_v15 = vmul.f32 %v3821_v28, %v15208_v7  ;;  %v15246_v28 = vld [vmem:[#allocation113_spill] sm:$0xff] }
 0xe00   :  { %v15278_v7 = vld [vmem:[#allocation65_spill] sm:$0xff] }
 0xe01   :  { %3989 = vmatpush.msrb.mxu0 %v3933_v30  ;;  %v15209_v30 = vld [vmem:[#allocation16_spill] sm:$0xff] }
 0xe02   :  { %v3926_v4 = vmul.f32 %v3816_v62, %v15209_v30  ;;  %v15270_v62 = vld [vmem:[#allocation83_spill] sm:$0xff] }
 0xe03   :  { %3990 = vmatpush.msrb.mxu0 %v3932_v57  ;;  %v15288_v30 = vld [vmem:[#allocation67_spill] sm:$0xff] }
 0xe05   :  { %3991 = vmatpush.msrb.mxu0 %v3931_v26 }
 0xe07   :  { %3992 = vmatpush.msrb.mxu0 %v3930_v16  ;;  %v15254_v16 = vld [vmem:[#allocation29_spill] sm:$0xff] }
 0xe09   :  { %3993 = vmatpush.msrb.mxu0 %v3929_v36  ;;  %v15260_v36 = vld [vmem:[#allocation25_spill] sm:$0xff] }
 0xe0b   :  { %3994 = vmatpush.msrb.mxu0 %v3928_v39  ;;  %v15268_v39 = vld [vmem:[#allocation20_spill] sm:$0xff] }
 0xe0d   :  { %3995 = vmatpush.msrb.mxu0 %v3927_v15  ;;  %v15282_v15 = vld [vmem:[#allocation71_spill] sm:$0xff] }
 0xe0f   :  { %3996 = vmatpush.msrb.mxu0 %v3926_v4  ;;  %v15291_v4 = vld [vmem:[#allocation64_spill] sm:$0xff] }
 0xe11   :  { %3997 = vmatpush.msrb.mxu0 %v3925_v3  ;;  %v15299_v3 = vld [vmem:[#allocation60_spill] sm:$0xff] }
 0xe12   :  { %3998 = vmatmul.f32.vlgmr.msrb.gmra.mxu0 %v7266_v33 }
 0xe13   :  { %4017 = vmatpush.msra.mxu0 %v3941_v25  ;;  %v15303_v25 = vld [vmem:[#allocation82_spill] sm:$0xff] }
 0xe15   :  { %6084 = vmatpush.msk.msrb.mxu0 %vm9746_vm8, %v11417_v13 }
 0xe17   :  { %6086 = vmatpush.msk.msrb.mxu0 %vm9755_vm5, %v11406_v52 }
 0xe19   :  { %6088 = vmatpush.msk.msrb.mxu0 %vm9764_vm4, %v11396_v29 }
 0xe1a   :  { %6082 = vmatmul.msk.f32.vlgmr.msra.gmra.mxu0 %vm15216_vm9, %v7267_v54 }
 0xe1b   :  { %6090 = vmatpush.msk.msrb.mxu0 %vm9773_vm3, %v11386_v6 }
 0xe1d   :  { %6092 = vmatpush.msk.msrb.mxu0 %vm9782_vm0, %v11376_v17 }
 0xe1f   :  { %6094 = vmatpush.msk.msrb.mxu0 %vm9791_vm15, %v11366_v2  ;;  %v15224_v2 = vld [vmem:[#allocation35_spill] sm:$0xff] }
 0xe20   :  { %vm15225_vm2 = vnez %v15224_v2 }
 0xe21   :  { %6096 = vmatpush.msk.msrb.mxu0 %vm9800_vm14, %v11356_v35  ;;  %v15226_v35 = vld [vmem:[#allocation33_spill] sm:$0xff] }
 0xe22   :  { %vm15227_vm6 = vnez %v15226_v35 }
 0xe23   :  { %6098 = vmatpush.msk.msrb.mxu0 %vm9809_vm13, %v11346_v23  ;;  %v15228_v23 = vld [vmem:[#allocation31_spill] sm:$0xff] }
 0xe24   :  { %vm15229_vm7 = vnez %v15228_v23 }
 0xe25   :  { %6100 = vmatpush.msk.msrb.mxu0 %vm9818_vm12, %v11336_v49  ;;  %v15230_v49 = vld [vmem:[#allocation95_spill] sm:$0xff] }
 0xe26   :  { %vm15231_vm1 = vnez %v15230_v49 }
 0xe27   :  { %6102 = vmatpush.msk.msrb.mxu0 %vm9827_vm11, %v11326_v58  ;;  %v15232_v58 = vld [vmem:[#allocation108_spill] sm:$0xff] }
 0xe28   :  { %vm15233_vm9 = vnez %v15232_v58 }
 0xe29   :  { %6104 = vmatpush.msk.msrb.mxu0 %vm9836_vm10, %v11316_v12  ;;  %v15234_v12 = vld [vmem:[#allocation96_spill] sm:$0xff] }
 0xe2a   :  { %vm15235_vm10 = vnez %v15234_v12 }
 0xe2b   :  { %6106 = vmatpush.msk.msrb.mxu0 %vm15225_vm2, %v11306_v0  ;;  %v15242_v0 = vld [vmem:[#allocation111_spill] sm:$0xff]  ;;  %vm15247_vm2 = vnez %v15246_v28 }
 0xe2d   :  { %6108 = vmatpush.msk.msrb.mxu0 %vm15227_vm6, %v11296_v38  ;;  %v11868_v38 = vld [vmem:[%s13688_s3] sm:$0xff] }
 0xe2f   :  { %6110 = vmatpush.msk.msrb.mxu0 %vm15229_vm7, %v11286_v42  ;;  %v15236_v42 = vld [vmem:[#allocation109_spill] sm:$0xff] }
 0xe30   :  { %vm15237_vm7 = vnez %v15236_v42 }
 0xe31   :  { %6112 = vmatpush.msk.msrb.mxu0 %vm15231_vm1, %v11276_v22  ;;  %v15238_v22 = vld [vmem:[#allocation97_spill] sm:$0xff] }
 0xe32   :  { %vm15239_vm1 = vnez %v15238_v22 }
 0xe33   :  { %6114 = vmatpush.msk.msrb.mxu0 %vm15233_vm9, %v11266_v32  ;;  %v15240_v32 = vld [vmem:[#allocation102_spill] sm:$0xff] }
 0xe34   :  { %4038 = vmatmul.f32.vlgmr.msrb.gmra.mxu0 %v11868_v38  ;;  %vm15241_vm9 = vnez %v15240_v32 }
 0xe35   :  { %6116 = vmatpush.msk.msra.mxu0 %vm15235_vm10, %v11581_v44  ;;  %vm15243_vm10 = vnez %v15242_v0  ;;  %v15244_v44 = vld [vmem:[#allocation112_spill] sm:$0xff] }
 0xe36   :  { %vm15245_vm6 = vnez %v15244_v44 }
 0xe37   :  { %6118 = vmatpush.msk.msra.mxu0 %vm15237_vm7, %v11566_v21  ;;  %v15248_v21 = vld [vmem:[#allocation114_spill] sm:$0xff] }
 0xe38   :  { %vm15249_vm7 = vnez %v15248_v21 }
 0xe39   :  { %6120 = vmatpush.msk.msra.mxu0 %vm15239_vm1, %v11554_v27  ;;  %v15250_v27 = vld [vmem:[#allocation74_spill] sm:$0xff]  ;;  %vm15252_vm1 = vnez %v15251_v46 }
 0xe3b   :  { %6122 = vmatpush.msk.msra.mxu0 %vm15241_vm9, %v11544_v55  ;;  %v15253_v55 = vld [vmem:[#allocation75_spill] sm:$0xff]  ;;  %vm15255_vm9 = vnez %v15254_v16 }
 0xe3d   :  { %6124 = vmatpush.msk.msra.mxu0 %vm15243_vm10, %v11534_v14  ;;  %v15256_v14 = vld [vmem:[#allocation77_spill] sm:$0xff]  ;;  %vm15258_vm10 = vnez %v15257_v40  ;;  %v7346_v40 = vld [vmem:[%s13685_s0 + $0x140] sm:$0xff] }
 0xe3f   :  { %6126 = vmatpush.msk.msra.mxu0 %vm15245_vm6, %v11518_v50  ;;  %v15259_v50 = vld [vmem:[#allocation79_spill] sm:$0xff]  ;;  %vm15261_vm6 = vnez %v15260_v36 }
 0xe41   :  { %6128 = vmatpush.msk.msra.mxu0 %vm15247_vm2, %v11502_v60  ;;  %v15262_v60 = vld [vmem:[#allocation23_spill] sm:$0xff] }
 0xe42   :  { %vm15263_vm2 = vnez %v15262_v60 }
 0xe43   :  { %6130 = vmatpush.msk.msra.mxu0 %vm15249_vm7, %v11490_v19  ;;  %v15264_v19 = vld [vmem:[#allocation21_spill] sm:$0xff] }
 0xe44   :  { %vm15265_vm7 = vnez %v15264_v19  ;;  %v7344_v19 = vld [vmem:[%s13685_s0 + $0x138] sm:$0xff] }
 0xe45   :  { %6132 = vmatpush.msk.msra.mxu0 %vm15252_vm1, %v15250_v27  ;;  %vm15267_vm1 = vnez %v15266_v20  ;;  %v15304_v27 = vld [vmem:[#allocation56_spill] sm:$0xff] }
 0xe47   :  { %6134 = vmatpush.msk.msra.mxu0 %vm15255_vm9, %v15253_v55  ;;  %vm15269_vm9 = vnez %v15268_v39  ;;  %v15307_v55 = vld [vmem:[#allocation54_spill] sm:$0xff]  ;;  %v7340_v39 = vld [vmem:[%s13685_s0 + $0x128] sm:$0xff] }
 0xe49   :  { %6136 = vmatpush.msk.msra.mxu0 %vm15258_vm10, %v15256_v14  ;;  %vm15283_vm10 = vnez %v15282_v15  ;;  %v15310_v14 = vld [vmem:[#allocation94_spill] sm:$0xff] }
 0xe4b   :  { %6138 = vmatpush.msk.msra.mxu0 %vm15261_vm6, %v15259_v50  ;;  %vm15271_vm6 = vnez %v15270_v62 }
 0xe4d   :  { %6140 = vmatpush.msk.msra.mxu0 %vm15263_vm2, %v11703_v5  ;;  %v15272_v5 = vld [vmem:[#allocation80_spill] sm:$0xff] }
 0xe4e   :  { %vm15273_vm2 = vnez %v15272_v5 }
 0xe4f   :  { %6142 = vmatpush.msk.msra.mxu0 %vm15265_vm7, %v11681_v63  ;;  %v15274_v63 = vld [vmem:[#allocation78_spill] sm:$0xff] }
 0xe50   :  { %vm15275_vm7 = vnez %v15274_v63 }
 0xe51   :  { %6144 = vmatpush.msk.msra.mxu0 %vm15267_vm1, %v11752_v48  ;;  %v15276_v48 = vld [vmem:[#allocation76_spill] sm:$0xff] }
 0xe52   :  { %vm15277_vm1 = vnez %v15276_v48 }
 0xe53   :  { %6146 = vmatpush.msk.msra.mxu0 %vm15269_vm9, %v11748_v9  ;;  %v15279_v9 = vld [vmem:[#allocation73_spill] sm:$0xff] }
 0xe54   :  { %4058 = vmatmul.f32.vlgmr.msra.gmra.mxu0 %v11788_v43  ;;  %vm15280_vm9 = vnez %v15279_v9  ;;  %v15281_v43 = vld [vmem:[#allocation66_spill] sm:$0xff] }
 0xe55   :  { %6148 = vmatpush.msk.msrb.mxu0 %vm15271_vm6, %v11713_v47  ;;  %v15284_v47 = vld [vmem:[#allocation68_spill] sm:$0xff]  ;;  %vm15286_vm6 = vnez %v15285_v61 }
 0xe57   :  { %6150 = vmatpush.msk.msrb.mxu0 %vm15273_vm2, %v11688_v1  ;;  %v15287_v1 = vld [vmem:[#allocation70_spill] sm:$0xff]  ;;  %vm15289_vm2 = vnez %v15288_v30 }
 0xe59   :  { %6152 = vmatpush.msk.msrb.mxu0 %vm15275_vm7, %v11671_v11  ;;  %v15290_v11 = vld [vmem:[#allocation72_spill] sm:$0xff]  ;;  %vm15292_vm7 = vnez %v15291_v4 }
 0xe5b   :  { %6154 = vmatpush.msk.msrb.mxu0 %vm15277_vm1, %v11659_v37  ;;  %v15293_v37 = vld [vmem:[#allocation61_spill] sm:$0xff] }
 0xe5c   :  { %vm15294_vm1 = vnez %v15293_v37 }
 0xe5d   :  { %6156 = vmatpush.msk.msrb.mxu0 %vm15280_vm9, %v15278_v7  ;;  %vm15296_vm9 = vnez %v15295_v10 }
 0xe5f   :  { %6158 = vmatpush.msk.msrb.mxu0 %vm15283_vm10, %v15281_v43  ;;  %vm15298_vm10 = vnez %v15297_v45 }
 0xe61   :  { %6160 = vmatpush.msk.msrb.mxu0 %vm15286_vm6, %v15284_v47  ;;  %vm15300_vm6 = vnez %v15299_v3  ;;  %v6197_v47 = vld [vmem:[%s13693_s8 + $0xf8] sm:$0xff] }
 0xe63   :  { %6162 = vmatpush.msk.msrb.mxu0 %vm15289_vm2, %v15287_v1  ;;  %vm15302_vm2 = vnez %v15301_v34  ;;  %v6195_v1 = vld [vmem:[%s13693_s8 + $0xe8] sm:$0xff] }
 0xe65   :  { %6164 = vmatpush.msk.msrb.mxu0 %vm15292_vm7, %v15290_v11  ;;  %vm15305_vm7 = vnez %v15304_v27  ;;  %v6194_v11 = vld [vmem:[%s13693_s8 + $0xe0] sm:$0xff] }
 0xe67   :  { %6166 = vmatpush.msk.msrb.mxu0 %vm15294_vm1, %v11733_v51  ;;  %v15306_v51 = vld [vmem:[#allocation88_spill] sm:$0xff]  ;;  %vm15308_vm1 = vnez %v15307_v55 }
 0xe69   :  { %6168 = vmatpush.msk.msrb.mxu0 %vm15296_vm9, %v11731_v41  ;;  %v15309_v41 = vld [vmem:[#allocation62_spill] sm:$0xff]  ;;  %vm15312_vm9 = vcmask 64512  }
 0xe6b   :  { %6170 = vmatpush.msk.msrb.mxu0 %vm15298_vm10, %v11707_v53  ;;  %vm15311_vm10 = vnez %v15310_v14  ;;  %v3959_v53 = vpop.f32.mrf.mxu0 }
 0xe6d   :  { %6172 = vmatpush.msk.msrb.mxu0 %vm15300_vm6, %v11767_v8 }
 0xe6f   :  { %6174 = vmatpush.msk.msrb.mxu0 %vm15302_vm2, %v11729_v24 }
 0xe71   :  { %6176 = vmatpush.msk.msrb.mxu0 %vm15305_vm7, %v15303_v25  ;;  %v6193_v25 = vld [vmem:[%s13693_s8 + $0xd8] sm:$0xff] }
 0xe73   :  { %6178 = vmatpush.msk.msrb.mxu0 %vm15308_vm1, %v15306_v51  ;;  %v3979_v8 = vpop.f32.mrf.mxu0 }
 0xe74   :  { %4078 = vmatmul.f32.vlgmr.msrb.gmra.mxu0 %v7266_v33  ;;  %v6196_v33 = vld [vmem:[%s13693_s8 + $0xf0] sm:$0xff] }
 0xe75   :  { %6180 = vmatpush.msk.msra.mxu0 %vm15311_vm10, %v15309_v41  ;;  %v6192_v41 = vld [vmem:[%s13693_s8 + $0xd0] sm:$0xff] }
 0xe77   :  { %4144 = vmatpush.msrb.mxu0 %v6197_v47 }
 0xe79   :  { %4145 = vmatpush.msrb.mxu0 %v6196_v33  ;;  %v6191_v33 = vld [vmem:[%s13693_s8 + $0xc8] sm:$0xff] }
 0xe7b   :  { %4146 = vmatpush.msrb.mxu0 %v6195_v1  ;;  %v6190_v1 = vld [vmem:[%s13693_s8 + $0xc0] sm:$0xff] }
 0xe7c   :  { %6181 = vmatmul.msk.f32.vlgmr.msra.gmra.mxu0 %vm15312_vm9, %v7267_v54 }
 0xe7d   :  { %4147 = vmatpush.msrb.mxu0 %v6194_v11  ;;  %v6186_v11 = vld [vmem:[%s13693_s8 + $0xa0] sm:$0xff] }
 0xe7f   :  { %4148 = vmatpush.msrb.mxu0 %v6193_v25 }
 0xe81   :  { %4149 = vmatpush.msrb.mxu0 %v6192_v41 }
 0xe83   :  { %4150 = vmatpush.msrb.mxu0 %v6191_v33  ;;  %v6184_v33 = vld [vmem:[%s13693_s8 + $0x90] sm:$0xff] }
 0xe85   :  { %4151 = vmatpush.msrb.mxu0 %v6190_v1 }
 0xe8f   :  { %v3999_v50 = vpop.f32.mrf.mxu0 }
 0xe97   :  { %v4019_v7 = vpop.f32.mrf.mxu0 }
 0xeb1   :  { %v4039_v24 = vpop.f32.mrf.mxu0 }
 0xed1   :  { %v4059_v43 = vpop.f32.mrf.mxu0 }
 0xed2   :  { %v4060_v51 = vadd.f32 %v4059_v43, %v4039_v24  ;;  %v6189_v24 = vld [vmem:[%s13693_s8 + $0xb8] sm:$0xff]  ;;  %v6188_v43 = vld [vmem:[%s13693_s8 + $0xb0] sm:$0xff] }
 0xed3   :  { %4152 = vmatpush.msrb.mxu0 %v6189_v24 }
 0xed5   :  { %4153 = vmatpush.msrb.mxu0 %v6188_v43 }
 0xef1   :  { %v4079_v54 = vpop.f32.mrf.mxu0 }
 0xef2   :  { %v4080_v47 = vadd.f32 %v4079_v54, %v4060_v51  ;;  %v6185_v51 = vld [vmem:[%s13693_s8 + $0x98] sm:$0xff] }
 0xef9   :  { %v4099_v14 = vpop.f32.mrf.mxu0 }
 0xefa   :  { %v4100_v55 = vadd.f32 %v4099_v14, %v4080_v47  ;;  %v6187_v14 = vld [vmem:[%s13693_s8 + $0xa8] sm:$0xff] }
 0xefb   :  { %4154 = vmatpush.msrb.mxu0 %v6187_v14 }
 0xefc   :  { %6861 = vrcp.f32 %v4100_v55  ;;  %v4114_v47 = vand.u32 2147483648, %v4100_v55  ;;  %v4112_v24 = vand.u32 2147483647, %v4100_v55  ;;  %vm4108_vm10 = vweird.f32 %v4100_v55 }
 0xefd   :  { %4155 = vmatpush.msrb.mxu0 %v6186_v11  ;;  %vm4102_vm2 = vcmp.gt.f32.partialorder %v4100_v55, 0.0  ;;  %v6183_v11 = vld [vmem:[%s13693_s8 + $0x88] sm:$0xff] }
 0xefe   :  { %v4115_v14 = vor.u32 1.1754944e-38, %v4114_v47  ;;  %vm4113_vm7 = vcmp.eq.f32.partialorder %v4112_v24, 8.507059e+37  ;;  %v15313_v24 = vld [vmem:[#allocation161_spill] sm:$0xff] }
 0xeff   :  { %4156 = vmatpush.msrb.mxu0 %v6185_v51  ;;  %v6182_v51 = vld [vmem:[%s13693_s8 + $0x80] sm:$0xff] }
 0xf01   :  { %4157 = vmatpush.msrb.mxu0 %v6184_v33 }
 0xf02   :  { %v6862_v54 = vpop.eup %6861 }
 0xf03   :  { %v4104_v25 = vmul.f32 %v6862_v54, %v4100_v55  ;;  %vm4109_vm9 = vweird.f32 %v6862_v54  ;;  %4158 = vmatpush.msrb.mxu0 %v6183_v11 }
 0xf04   :  { %vm4110_vm1 = vmor %vm4108_vm10, %vm4109_vm9  ;;  %vm15315_vm10 = vcmask 261120   ;;  %vm15319_vm9 = vcmask 64512  }
 0xf05   :  { %v4105_v41 = vsub.f32 1.0, %v4104_v25  ;;  %4159 = vmatpush.msrb.mxu0 %v6182_v51  ;;  %v7272_v51 = vld [vmem:[%s13685_s0 + $0x18] sm:$0xff] }
 0xf07   :  { %v4106_v1 = vmul.f32 %v6862_v54, %v4105_v41  ;;  %v3980_v41 = vadd.f32 %v3979_v8, %v3959_v53  ;;  %v6199_v53 = vld [vmem:[%s13695_s10 + $0x28] sm:$0xff]  ;;  %v6198_v8 = vld [vmem:[%s13695_s10 + $0x20] sm:$0xff] }
 0xf09   :  { %v4107_v43 = vadd.f32 %v6862_v54, %v4106_v1  ;;  %v4000_v33 = vadd.f32 %v3999_v50, %v3980_v41  ;;  %v7269_v50 = vld [vmem:[%s13685_s0] sm:$0xff] }
 0xf0a   :  { %v7273_v41 = vld [vmem:[%s13689_s4] sm:$0xff] }
 0xf0b   :  { %v4111_v27 = vsel %vm4110_vm1, %v6862_v54, %v4107_v43  ;;  %v4020_v1 = vadd.f32 %v4019_v7, %v4000_v33  ;;  %v7270_v7 = vld [vmem:[%s13685_s0 + $0x8] sm:$0xff]  ;;  %v7271_v43 = vld [vmem:[%s13685_s0 + $0x10] sm:$0xff]  ;;  %v7274_v33 = vld [vmem:[%s13685_s0 + $0x20] sm:$0xff] }
 0xf0c   :  { %v4116_v34 = vsel %vm4113_vm7, %v4115_v14, %v4111_v27  ;;  %v6200_v27 = vld [vmem:[%s13695_s10 + $0x30] sm:$0xff]  ;;  %v6465_v14 = vld [vmem:[%s13694_s9 + $0x1] ss:$0 sm:$0xff] }
 0xf0d   :  { %v4117_v25 = vsel %vm4102_vm2, %v4116_v34, 0.0  ;;  %v6201_v34 = vld [vmem:[%s13695_s10 + $0x38] sm:$0xff]  ;;  %vm15316_vm2 = vmmov %vm15315_vm10 }
 0xf0e   :  { %4120 = vperm.xlu2 %6461, %v4117_v25   ;;  %4181 = vmatpush.msra.mxu0 %v6201_v34  ;;  %vm15317_vm7 = vmmov %vm15316_vm2  ;;  %v7279_v34 = vld [vmem:[%s13689_s4 + $0x18] sm:$0xff] }
 0xf0f   :  { %vm15318_vm1 = vmmov %vm15316_vm2 }
 0xf10   :  { %4182 = vmatpush.msra.mxu0 %v6200_v27  ;;  %v7280_v27 = vld [vmem:[%s13685_s0 + $0x38] sm:$0xff] }
 0xf12   :  { %4183 = vmatpush.msra.mxu0 %v6199_v53  ;;  %v7281_v53 = vld [vmem:[%s13689_s4 + $0x20] sm:$0xff] }
 0xf14   :  { %4184 = vmatpush.msra.mxu0 %v6198_v8  ;;  %v7282_v8 = vld [vmem:[%s13685_s0 + $0x40] sm:$0xff] }
 0xf68   :  { %v4121_v47 = vpop.permute.xlu2 %4120 }
 0xf69   :  { %v4123_v54 = vmul.f32 %v4121_v47, %v4020_v1  ;;  %v7275_v1 = vld [vmem:[%s13689_s4 + $0x8] sm:$0xff] }
 0xf6a   :  { %v7276_v47 = vld [vmem:[%s13685_s0 + $0x28] sm:$0xff] }
 0xf6b   :  { %v12018_v55 = vadd.f32 %v4123_v54, %v15313_v24  ;;  %v7277_v54 = vld [vmem:[%s13689_s4 + $0x10] sm:$0xff] }
 0xf6c   :  { %v7278_v24 = vld [vmem:[%s13685_s0 + $0x30] sm:$0xff] }
 0xf6d   :  { %15314 = vst [vmem:[#allocation55_spill] sm:$0xff] %v12018_v55  ;;  %4160 = vmatmul.f32.vlgmr.msrb.gmra.mxu0 %v12018_v55 }
 0xf75   :  { %6202 = vmatmul.msk.f32.vlgmr.msra.gmra.mxu0 %vm15315_vm10, %v7269_v50  ;;  %vm15320_vm10 = vmmov %vm15318_vm1  ;;  %v7283_v50 = vld [vmem:[%s13689_s4 + $0x28] sm:$0xff] }
 0xf7d   :  { %6203 = vmatmul.msk.f32.gmra.mxu0 %vm15316_vm2, %v7270_v7  ;;  %vm15321_vm2 = vmmov %vm15319_vm9  ;;  %v7284_v7 = vld [vmem:[%s13685_s0 + $0x48] sm:$0xff] }
 0xf85   :  { %6204 = vmatmul.msk.f32.gmra.mxu0 %vm15317_vm7, %v7271_v43  ;;  %vm15322_vm7 = vmmov %vm15318_vm1  ;;  %v7285_v43 = vld [vmem:[%s13689_s4 + $0x30] sm:$0xff] }
 0xf8d   :  { %6205 = vmatmul.msk.f32.gmra.mxu0 %vm15318_vm1, %v7272_v51  ;;  %vm15323_vm1 = vmmov %vm15321_vm2  ;;  %v7289_v51 = vld [vmem:[%s13689_s4 + $0x40] sm:$0xff] }
 0xf95   :  { %6206 = vmatmul.msk.f32.gmra.mxu0 %vm15320_vm10, %v7274_v33  ;;  %vm15325_vm10 = vmmov %vm15323_vm1  ;;  %v7291_v33 = vld [vmem:[%s13689_s4 + $0x48] sm:$0xff] }
 0xf9d   :  { %6207 = vmatmul.msk.f32.gmra.mxu0 %vm15322_vm7, %v7276_v47  ;;  %v7293_v47 = vld [vmem:[%s13689_s4 + $0x50] sm:$0xff] }
 0xfea   :  { %v4161_v25 = vpop.f32.mrf.mxu0 }
 0xfeb   :  { %v4162_v11 = vadd.f32 %v6465_v14, %v4161_v25  ;;  %v7286_v14 = vld [vmem:[%s13685_s0 + $0x50] sm:$0xff]  ;;  %v7287_v25 = vld [vmem:[%s13689_s4 + $0x38] sm:$0xff] }
 0xfed   :  { %4348 = vmatpush.msra.mxu2 %v4162_v11  ;;  %v7288_v11 = vld [vmem:[%s13685_s0 + $0x58] sm:$0xff] }
 0xfee   :  { %6251 = vmatmul.msk.f32.vlgmr.msra.gmra.mxu2 %vm15319_vm9, %v7273_v41  ;;  %vm15324_vm9 = vmmov %vm15322_vm7  ;;  %v7290_v41 = vld [vmem:[%s13685_s0 + $0x60] sm:$0xff] }
 0xfef   :  { %6208 = vmatmul.msk.f32.gmra.mxu0 %vm15324_vm9, %v7278_v24  ;;  %v7295_v24 = vld [vmem:[%s13689_s4 + $0x58] sm:$0xff] }
 0xff6   :  { %6252 = vmatmul.msk.f32.gmra.mxu2 %vm15321_vm2, %v7275_v1  ;;  %vm15326_vm2 = vmmov %vm15322_vm7  ;;  %v7292_v1 = vld [vmem:[%s13685_s0 + $0x68] sm:$0xff] }
 0xff7   :  { %6209 = vmatmul.msk.f32.gmra.mxu0 %vm15326_vm2, %v7280_v27  ;;  %vm15327_vm7 = vmmov %vm15323_vm1  ;;  %v7297_v27 = vld [vmem:[%s13689_s4 + $0x60] sm:$0xff] }
 0xff8   :  { %vm15329_vm9 = vmmov %vm15327_vm7 }
 0xffe   :  { %6253 = vmatmul.msk.f32.gmra.mxu2 %vm15323_vm1, %v7277_v54  ;;  %vm15328_vm1 = vmmov %vm15326_vm2  ;;  %v7294_v54 = vld [vmem:[%s13685_s0 + $0x70] sm:$0xff] }
 0xfff   :  { %6210 = vmatmul.msk.f32.gmra.mxu0 %vm15328_vm1, %v7282_v8  ;;  %vm15331_vm2 = vmmov %vm15327_vm7  ;;  %v7298_v8 = vld [vmem:[%s13685_s0 + $0x80] sm:$0xff] }
0x1006   :  { %6254 = vmatmul.msk.f32.gmra.mxu2 %vm15325_vm10, %v7279_v34  ;;  %vm15330_vm10 = vmmov %vm15328_vm1  ;;  %v7296_v34 = vld [vmem:[%s13685_s0 + $0x78] sm:$0xff] }
0x1007   :  { %6211 = vmatmul.msk.f32.gmra.mxu0 %vm15330_vm10, %v7284_v7 }
0x100e   :  { %6255 = vmatmul.msk.f32.gmra.mxu2 %vm15327_vm7, %v7281_v53  ;;  %vm15332_vm7 = vmmov %vm15328_vm1  ;;  %v12152_v53 = vpop.f32.mrf.mxu0 }
0x100f   :  { %6212 = vmatmul.msk.f32.gmra.mxu0 %vm15332_vm7, %v7286_v14  ;;  %vm15333_vm1 = vmmov %vm15331_vm2  ;;  %v7301_v14 = vld [vmem:[%s13689_s4 + $0x70] sm:$0xff] }
0x1010   :  { %vm15335_vm10 = vmmov %vm15333_vm1 }
0x1016   :  { %6256 = vmatmul.msk.f32.gmra.mxu2 %vm15329_vm9, %v7283_v50  ;;  %vm15334_vm9 = vmmov %vm15332_vm7  ;;  %v7299_v50 = vld [vmem:[%s13689_s4 + $0x68] sm:$0xff]  ;;  %v12162_v7 = vpop.f32.mrf.mxu0 }
0x1017   :  { %6213 = vmatmul.msk.f32.gmra.mxu0 %vm15334_vm9, %v7288_v11  ;;  %v7302_v11 = vld [vmem:[%s13685_s0 + $0x90] sm:$0xff] }
0x101e   :  { %6257 = vmatmul.msk.f32.gmra.mxu2 %vm15331_vm2, %v7285_v43  ;;  %vm15336_vm2 = vmmov %vm15332_vm7  ;;  %v7300_v43 = vld [vmem:[%s13685_s0 + $0x88] sm:$0xff] }
0x101f   :  { %6214 = vmatmul.msk.f32.gmra.mxu0 %vm15336_vm2, %v7290_v41  ;;  %vm15337_vm7 = vmmov %vm15333_vm1 }
0x1020   :  { %vm15339_vm9 = vmmov %vm15337_vm7 }
0x1026   :  { %6258 = vmatmul.msk.f32.gmra.mxu2 %vm15333_vm1, %v7287_v25  ;;  %vm15338_vm1 = vmmov %vm15336_vm2  ;;  %v12172_v25 = vpop.f32.mrf.mxu0 }
0x1027   :  { %6215 = vmatmul.msk.f32.gmra.mxu0 %vm15338_vm1, %v7292_v1  ;;  %vm15341_vm2 = vmmov %vm15337_vm7  ;;  %v7305_v1 = vld [vmem:[%s13689_s4 + $0x80] sm:$0xff] }
0x102e   :  { %6259 = vmatmul.msk.f32.gmra.mxu2 %vm15335_vm10, %v7289_v51  ;;  %vm15340_vm10 = vmmov %vm15338_vm1  ;;  %v7303_v51 = vld [vmem:[%s13689_s4 + $0x78] sm:$0xff]  ;;  %v12182_v41 = vpop.f32.mrf.mxu0 }
0x102f   :  { %6216 = vmatmul.msk.f32.gmra.mxu0 %vm15340_vm10, %v7294_v54 }
0x1036   :  { %6260 = vmatmul.msk.f32.gmra.mxu2 %vm15337_vm7, %v7291_v33  ;;  %vm15342_vm7 = vmmov %vm15338_vm1  ;;  %v7304_v33 = vld [vmem:[%s13685_s0 + $0x98] sm:$0xff]  ;;  %v12194_v54 = vpop.f32.mrf.mxu0 }
0x1037   :  { %6217 = vmatmul.msk.f32.gmra.mxu0 %vm15342_vm7, %v7296_v34  ;;  %vm15343_vm1 = vmmov %vm15341_vm2  ;;  %v7307_v34 = vld [vmem:[%s13689_s4 + $0x88] sm:$0xff] }
0x1038   :  { %vm15345_vm10 = vmmov %vm15343_vm1 }
0x103e   :  { %6261 = vmatmul.msk.f32.gmra.mxu2 %vm15339_vm9, %v7293_v47  ;;  %vm15344_vm9 = vmmov %vm15342_vm7 }
0x103f   :  { %6218 = vmatmul.msk.f32.gmra.mxu0 %vm15344_vm9, %v7298_v8  ;;  %v12206_v8 = vpop.f32.mrf.mxu0 }
0x1046   :  { %6262 = vmatmul.msk.f32.gmra.mxu2 %vm15341_vm2, %v7295_v24  ;;  %vm15346_vm2 = vmmov %vm15342_vm7  ;;  %v7306_v24 = vld [vmem:[%s13685_s0 + $0xa0] sm:$0xff] }
0x1047   :  { %6219 = vmatmul.msk.f32.gmra.mxu0 %vm15346_vm2, %v7300_v43  ;;  %vm15347_vm7 = vmmov %vm15343_vm1  ;;  %v7309_v43 = vld [vmem:[%s13689_s4 + $0x90] sm:$0xff] }
0x1048   :  { %vm15349_vm9 = vmmov %vm15347_vm7 }
0x104e   :  { %6263 = vmatmul.msk.f32.gmra.mxu2 %vm15343_vm1, %v7297_v27  ;;  %vm15348_vm1 = vmmov %vm15346_vm2 }
0x104f   :  { %6220 = vmatmul.msk.f32.gmra.mxu0 %vm15348_vm1, %v7302_v11  ;;  %vm15351_vm2 = vmmov %vm15347_vm7 }
0x1056   :  { %6264 = vmatmul.msk.f32.gmra.mxu2 %vm15345_vm10, %v7299_v50  ;;  %vm15350_vm10 = vmmov %vm15348_vm1  ;;  %v7308_v50 = vld [vmem:[%s13685_s0 + $0xa8] sm:$0xff] }
0x1057   :  { %6221 = vmatmul.msk.f32.gmra.mxu0 %vm15350_vm10, %v7304_v33  ;;  %v7310_v33 = vld [vmem:[%s13685_s0 + $0xb0] sm:$0xff] }
0x105e   :  { %6265 = vmatmul.msk.f32.gmra.mxu2 %vm15347_vm7, %v7301_v14  ;;  %vm15352_vm7 = vmmov %vm15348_vm1 }
0x105f   :  { %6222 = vmatmul.msk.f32.gmra.mxu0 %vm15352_vm7, %v7306_v24  ;;  %vm15353_vm1 = vmmov %vm15351_vm2 }
0x1060   :  { %vm15355_vm10 = vmmov %vm15353_vm1 }
0x1066   :  { %6266 = vmatmul.msk.f32.gmra.mxu2 %vm15349_vm9, %v7303_v51  ;;  %vm15354_vm9 = vmmov %vm15352_vm7 }
0x1067   :  { %6223 = vmatmul.msk.f32.gmra.mxu0 %vm15354_vm9, %v7308_v50 }
0x106c   :  { %v12216_v11 = vpop.f32.mrf.mxu0 }
0x106e   :  { %6267 = vmatmul.msk.f32.gmra.mxu2 %vm15351_vm2, %v7305_v1  ;;  %vm15356_vm2 = vmmov %vm15352_vm7  ;;  %v7311_v1 = vld [vmem:[%s13689_s4 + $0x98] sm:$0xff] }
0x106f   :  { %6224 = vmatmul.msk.f32.gmra.mxu0 %vm15356_vm2, %v7310_v33  ;;  %vm15357_vm7 = vmmov %vm15353_vm1  ;;  %v7312_v33 = vld [vmem:[%s13685_s0 + $0xb8] sm:$0xff] }
0x1070   :  { %vm15359_vm9 = vmmov %vm15357_vm7 }
0x1071   :  { %v12192_v47 = vpop.f32.mrf.mxu2 }
0x1074   :  { %v12232_v50 = vpop.f32.mrf.mxu0 }
0x1076   :  { %6268 = vmatmul.msk.f32.gmra.mxu2 %vm15353_vm1, %v7307_v34  ;;  %v12230_v34 = vld [vmem:[%s13696_s11 + $0x1] ss:$0 sm:$0xff]  ;;  %vm15358_vm1 = vmmov %vm15356_vm2  ;;  %s5675_s11 = sshll.u32 %s13699_s14, 4  ;;  %s5676_s11 = int_to_ptr.hbm [resolvable:$true] %s5675_s11 }
0x1077   :  { %6225 = vmatmul.msk.f32.gmra.mxu0 %vm15358_vm1, %v7312_v33  ;;  %v7314_v33 = vld [vmem:[%s13685_s0 + $0xc0] sm:$0xff]  ;;  %vm15361_vm2 = vmmov %vm15357_vm7 }
0x1079   :  { %v12204_v27 = vpop.f32.mrf.mxu2 }
0x107c   :  { %v12244_v3 = vpop.f32.mrf.mxu0 }
0x107e   :  { %6269 = vmatmul.msk.f32.gmra.mxu2 %vm15355_vm10, %v7309_v43  ;;  %vm15360_vm10 = vmmov %vm15358_vm1 }
0x107f   :  { %6226 = vmatmul.msk.f32.gmra.mxu0 %vm15360_vm10, %v7314_v33  ;;  %v7316_v33 = vld [vmem:[%s13685_s0 + $0xc8] sm:$0xff] }
0x1081   :  { %v4356_v14 = vpop.f32.mrf.mxu2 }
0x1082   :  { %v4357_v51 = vadd.f32 %v4356_v14, %v12172_v25 }
0x1084   :  { %6863 = vtanh.f32 %v4357_v51  ;;  %v12256_v45 = vpop.f32.mrf.mxu0 }
0x1086   :  { %6270 = vmatmul.msk.f32.gmra.mxu2 %vm15357_vm7, %v7311_v1  ;;  %v7313_v1 = vld [vmem:[%s13689_s4 + $0xa0] sm:$0xff]  ;;  %vm15362_vm7 = vmmov %vm15358_vm1 }
0x1087   :  { %6227 = vmatmul.msk.f32.gmra.mxu0 %vm15362_vm7, %v7316_v33  ;;  %vm15363_vm1 = vmmov %vm15361_vm2  ;;  %v7318_v33 = vld [vmem:[%s13685_s0 + $0xd0] sm:$0xff] }
0x1088   :  { %vm15365_vm10 = vmmov %vm15363_vm1 }
0x1089   :  { %v4359_v24 = vpop.f32.mrf.mxu2 }
0x108a   :  { %v6864_v43 = vpop.eup %6863  ;;  %v4360_v14 = vadd.f32 %v4359_v24, %v12182_v41 }
0x108b   :  { %v4553_v51 = vmul.f32 %v6864_v43, %v12230_v34 }
0x108c   :  { %6865 = vtanh.f32 %v4360_v14  ;;  %v12268_v10 = vpop.f32.mrf.mxu0 }
0x108d   :  { %4604 = vadd.xlane.f32.xlu1 %v4553_v51  ;;  %v7315_v51 = vld [vmem:[%s13689_s4 + $0xa8] sm:$0xff] }
0x108e   :  { %6271 = vmatmul.msk.f32.gmra.mxu2 %vm15359_vm9, %v7313_v1  ;;  %vm15364_vm9 = vmmov %vm15362_vm7 }
0x108f   :  { %6228 = vmatmul.msk.f32.gmra.mxu0 %vm15364_vm9, %v7318_v33  ;;  %v7320_v33 = vld [vmem:[%s13685_s0 + $0xd8] sm:$0xff] }
0x1091   :  { %v4362_v55 = vpop.f32.mrf.mxu2 }
0x1092   :  { %v6866_v24 = vpop.eup %6865  ;;  %v4363_v43 = vadd.f32 %v4362_v55, %v12194_v54 }
0x1093   :  { %v4554_v14 = vmul.f32 %v6866_v24, %v12230_v34 }
0x1094   :  { %6867 = vtanh.f32 %v4363_v43  ;;  %v12280_v37 = vpop.f32.mrf.mxu0 }
0x1095   :  { %4606 = vadd.xlane.f32.xlu1 %v4554_v14  ;;  %v7317_v14 = vld [vmem:[%s13689_s4 + $0xb0] sm:$0xff] }
0x1096   :  { %6272 = vmatmul.msk.f32.gmra.mxu2 %vm15361_vm2, %v7315_v51  ;;  %vm15366_vm2 = vmmov %vm15362_vm7 }
0x1097   :  { %6229 = vmatmul.msk.f32.gmra.mxu0 %vm15366_vm2, %v7320_v33  ;;  %vm15367_vm7 = vmmov %vm15363_vm1  ;;  %v7322_v33 = vld [vmem:[%s13685_s0 + $0xe0] sm:$0xff] }
0x1098   :  { %vm15369_vm9 = vmmov %vm15367_vm7 }
0x1099   :  { %v4365_v1 = vpop.f32.mrf.mxu2 }
0x109a   :  { %v6868_v55 = vpop.eup %6867  ;;  %v4366_v24 = vadd.f32 %v4365_v1, %v12206_v8 }
0x109b   :  { %v4555_v43 = vmul.f32 %v6868_v55, %v12230_v34 }
0x109c   :  { %6869 = vtanh.f32 %v4366_v24  ;;  %v12292_v4 = vpop.f32.mrf.mxu0 }
0x109d   :  { %4608 = vadd.xlane.f32.xlu1 %v4555_v43  ;;  %v7319_v43 = vld [vmem:[%s13689_s4 + $0xb8] sm:$0xff] }
0x109e   :  { %6273 = vmatmul.msk.f32.gmra.mxu2 %vm15363_vm1, %v7317_v14  ;;  %vm15368_vm1 = vmmov %vm15366_vm2 }
0x109f   :  { %6230 = vmatmul.msk.f32.gmra.mxu0 %vm15368_vm1, %v7322_v33  ;;  %v7324_v33 = vld [vmem:[%s13685_s0 + $0xe8] sm:$0xff]  ;;  %vm15371_vm2 = vmmov %vm15367_vm7 }
0x10a1   :  { %v4368_v51 = vpop.f32.mrf.mxu2 }
0x10a2   :  { %v6870_v1 = vpop.eup %6869  ;;  %v4369_v55 = vadd.f32 %v4368_v51, %v12216_v11 }
0x10a3   :  { %v4556_v24 = vmul.f32 %v6870_v1, %v12230_v34 }
0x10a4   :  { %6871 = vtanh.f32 %v4369_v55  ;;  %v12304_v30 = vpop.f32.mrf.mxu0 }
0x10a5   :  { %4610 = vadd.xlane.f32.xlu1 %v4556_v24  ;;  %v7321_v24 = vld [vmem:[%s13689_s4 + $0xc0] sm:$0xff] }
0x10a6   :  { %6274 = vmatmul.msk.f32.gmra.mxu2 %vm15365_vm10, %v7319_v43  ;;  %vm15370_vm10 = vmmov %vm15368_vm1 }
0x10a7   :  { %6231 = vmatmul.msk.f32.gmra.mxu0 %vm15370_vm10, %v7324_v33  ;;  %v7326_v33 = vld [vmem:[%s13685_s0 + $0xf0] sm:$0xff] }
0x10a9   :  { %v4371_v14 = vpop.f32.mrf.mxu2 }
0x10aa   :  { %v6872_v51 = vpop.eup %6871  ;;  %v4372_v1 = vadd.f32 %v4371_v14, %v12232_v50 }
0x10ab   :  { %v4557_v55 = vmul.f32 %v6872_v51, %v12230_v34 }
0x10ac   :  { %6873 = vtanh.f32 %v4372_v1  ;;  %v12316_v61 = vpop.f32.mrf.mxu0 }
0x10ad   :  { %4612 = vadd.xlane.f32.xlu1 %v4557_v55  ;;  %v7323_v55 = vld [vmem:[%s13689_s4 + $0xc8] sm:$0xff] }
0x10ae   :  { %6275 = vmatmul.msk.f32.gmra.mxu2 %vm15367_vm7, %v7321_v24  ;;  %vm15372_vm7 = vmmov %vm15368_vm1 }
0x10af   :  { %6232 = vmatmul.msk.f32.gmra.mxu0 %vm15372_vm7, %v7326_v33  ;;  %vm15373_vm1 = vmmov %vm15371_vm2  ;;  %v7328_v33 = vld [vmem:[%s13685_s0 + $0xf8] sm:$0xff] }
0x10b0   :  { %vm15375_vm10 = vmmov %vm15373_vm1 }
0x10b1   :  { %v4374_v43 = vpop.f32.mrf.mxu2 }
0x10b2   :  { %v6874_v14 = vpop.eup %6873  ;;  %v4375_v51 = vadd.f32 %v4374_v43, %v12244_v3 }
0x10b3   :  { %v4558_v1 = vmul.f32 %v6874_v14, %v12230_v34 }
0x10b4   :  { %6875 = vtanh.f32 %v4375_v51  ;;  %v12328_v15 = vpop.f32.mrf.mxu0 }
0x10b5   :  { %4614 = vadd.xlane.f32.xlu1 %v4558_v1  ;;  %v7325_v1 = vld [vmem:[%s13689_s4 + $0xd0] sm:$0xff] }
0x10b6   :  { %6276 = vmatmul.msk.f32.gmra.mxu2 %vm15369_vm9, %v7323_v55  ;;  %vm15374_vm9 = vmmov %vm15372_vm7 }
0x10b7   :  { %6233 = vmatmul.msk.f32.gmra.mxu0 %vm15374_vm9, %v7328_v33  ;;  %v7330_v33 = vld [vmem:[%s13685_s0 + $0x100] sm:$0xff] }
0x10b9   :  { %v4377_v24 = vpop.f32.mrf.mxu2 }
0x10ba   :  { %v6876_v43 = vpop.eup %6875  ;;  %v4378_v14 = vadd.f32 %v4377_v24, %v12256_v45 }
0x10bb   :  { %v4559_v51 = vmul.f32 %v6876_v43, %v12230_v34 }
0x10bc   :  { %6877 = vtanh.f32 %v4378_v14  ;;  %v12340_v9 = vpop.f32.mrf.mxu0 }
0x10bd   :  { %4616 = vadd.xlane.f32.xlu1 %v4559_v51  ;;  %v7327_v51 = vld [vmem:[%s13689_s4 + $0xd8] sm:$0xff]  ;;  %15376 = vst [vmem:[#allocation87_spill] sm:$0xff] %v12340_v9 }
0x10be   :  { %6277 = vmatmul.msk.f32.gmra.mxu2 %vm15371_vm2, %v7325_v1  ;;  %vm15377_vm2 = vmmov %vm15372_vm7 }
0x10bf   :  { %6234 = vmatmul.msk.f32.gmra.mxu0 %vm15377_vm2, %v7330_v33  ;;  %vm15378_vm7 = vmmov %vm15373_vm1  ;;  %v7332_v33 = vld [vmem:[%s13685_s0 + $0x108] sm:$0xff] }
0x10c0   :  { %vm15381_vm9 = vmmov %vm15378_vm7 }
0x10c1   :  { %v4380_v55 = vpop.f32.mrf.mxu2 }
0x10c2   :  { %v6878_v24 = vpop.eup %6877  ;;  %v4381_v43 = vadd.f32 %v4380_v55, %v12268_v10 }
0x10c3   :  { %v4560_v14 = vmul.f32 %v6878_v24, %v12230_v34 }
0x10c4   :  { %6879 = vtanh.f32 %v4381_v43  ;;  %v12352_v48 = vpop.f32.mrf.mxu0 }
0x10c5   :  { %4618 = vadd.xlane.f32.xlu1 %v4560_v14  ;;  %v7329_v14 = vld [vmem:[%s13689_s4 + $0xe0] sm:$0xff]  ;;  %15379 = vst [vmem:[#allocation93_spill] sm:$0xff] %v12352_v48 }
0x10c6   :  { %6278 = vmatmul.msk.f32.gmra.mxu2 %vm15373_vm1, %v7327_v51  ;;  %vm15380_vm1 = vmmov %vm15377_vm2 }
0x10c7   :  { %6235 = vmatmul.msk.f32.gmra.mxu0 %vm15380_vm1, %v7332_v33  ;;  %v7334_v33 = vld [vmem:[%s13685_s0 + $0x110] sm:$0xff]  ;;  %vm15384_vm2 = vmmov %vm15378_vm7 }
0x10c9   :  { %v4383_v1 = vpop.f32.mrf.mxu2 }
0x10ca   :  { %v6880_v55 = vpop.eup %6879  ;;  %v4384_v24 = vadd.f32 %v4383_v1, %v12280_v37 }
0x10cb   :  { %v4561_v43 = vmul.f32 %v6880_v55, %v12230_v34 }
0x10cc   :  { %6881 = vtanh.f32 %v4384_v24  ;;  %v12364_v63 = vpop.f32.mrf.mxu0 }
0x10cd   :  { %4620 = vadd.xlane.f32.xlu1 %v4561_v43  ;;  %v7331_v43 = vld [vmem:[%s13689_s4 + $0xe8] sm:$0xff]  ;;  %15382 = vst [vmem:[#allocation131_spill] sm:$0xff] %v12364_v63 }
0x10ce   :  { %6279 = vmatmul.msk.f32.gmra.mxu2 %vm15375_vm10, %v7329_v14  ;;  %vm15383_vm10 = vmmov %vm15380_vm1 }
0x10cf   :  { %6236 = vmatmul.msk.f32.gmra.mxu0 %vm15383_vm10, %v7334_v33  ;;  %v7337_v33 = vld [vmem:[%s13689_s4 + $0x100] sm:$0xff] }
0x10d1   :  { %v4386_v51 = vpop.f32.mrf.mxu2 }
0x10d2   :  { %v6882_v1 = vpop.eup %6881  ;;  %v4387_v55 = vadd.f32 %v4386_v51, %v12292_v4 }
0x10d3   :  { %v4562_v24 = vmul.f32 %v6882_v1, %v12230_v34 }
0x10d4   :  { %6883 = vtanh.f32 %v4387_v55  ;;  %v12378_v5 = vpop.f32.mrf.mxu0 }
0x10d5   :  { %4622 = vadd.xlane.f32.xlu1 %v4562_v24  ;;  %v7333_v24 = vld [vmem:[%s13689_s4 + $0xf0] sm:$0xff]  ;;  %15385 = vst [vmem:[#allocation134_spill] sm:$0xff] %v12378_v5 }
0x10d6   :  { %6280 = vmatmul.msk.f32.gmra.mxu2 %vm15378_vm7, %v7331_v43  ;;  %vm15386_vm7 = vmmov %vm15380_vm1 }
0x10d7   :  { %vm15387_vm1 = vmmov %vm15384_vm2 }
0x10d8   :  { %vm15390_vm10 = vmmov %vm15387_vm1 }
0x10d9   :  { %v4389_v14 = vpop.f32.mrf.mxu2 }
0x10da   :  { %v6884_v51 = vpop.eup %6883  ;;  %v4390_v1 = vadd.f32 %v4389_v14, %v12304_v30 }
0x10db   :  { %v4563_v55 = vmul.f32 %v6884_v51, %v12230_v34 }
0x10dc   :  { %6885 = vtanh.f32 %v4390_v1 }
0x10dd   :  { %4624 = vadd.xlane.f32.xlu0 %v4563_v55  ;;  %v4354_v55 = vadd.f32 %v12204_v27, %v12162_v7  ;;  %v7336_v27 = vld [vmem:[%s13685_s0 + $0x118] sm:$0xff] }
0x10de   :  { %6281 = vmatmul.msk.f32.gmra.mxu2 %vm15381_vm9, %v7333_v24  ;;  %v7335_v24 = vld [vmem:[%s13689_s4 + $0xf8] sm:$0xff]  ;;  %6237 = vmatmul.msk.f32.gmra.mxu0 %vm15386_vm7, %v7336_v27  ;;  %vm15389_vm9 = vmmov %vm15386_vm7  ;;  %v7339_v27 = vld [vmem:[%s13689_s4 + $0x108] sm:$0xff] }
0x10e1   :  { %v4392_v43 = vpop.f32.mrf.mxu2 }
0x10e2   :  { %v6886_v14 = vpop.eup %6885  ;;  %v4393_v51 = vadd.f32 %v4392_v43, %v12316_v61 }
0x10e3   :  { %v4564_v1 = vmul.f32 %v6886_v14, %v12230_v34 }
0x10e4   :  { %6887 = vtanh.f32 %v4393_v51 }
0x10e5   :  { %4626 = vadd.xlane.f32.xlu2 %v4564_v1  ;;  %6889 = vtanh.f32 %v4354_v55  ;;  %v4351_v1 = vadd.f32 %v12192_v47, %v12152_v53  ;;  %v7338_v47 = vld [vmem:[%s13685_s0 + $0x120] sm:$0xff] }
0x10e6   :  { %6282 = vmatmul.msk.f32.gmra.mxu2 %vm15384_vm2, %v7335_v24  ;;  %6238 = vmatmul.msk.f32.gmra.mxu0 %vm15389_vm9, %v7338_v47  ;;  %vm15392_vm2 = vmmov %vm15386_vm7 }
0x10e7   :  { %vm15393_vm7 = vmmov %vm15387_vm1 }
0x10e8   :  { %vm15396_vm9 = vmmov %vm15393_vm7 }
0x10e9   :  { %v4395_v43 = vpop.f32.mrf.mxu2 }
0x10ea   :  { %v6888_v14 = vpop.eup %6887  ;;  %v4396_v51 = vadd.f32 %v4395_v43, %v12328_v15  ;;  %v12394_v43 = vpop.f32.mrf.mxu0 }
0x10eb   :  { %v4565_v62 = vmul.f32 %v6888_v14, %v12230_v34  ;;  %v6890_v55 = vpop.eup %6889  ;;  %15388 = vst [vmem:[#allocation136_spill] sm:$0xff] %v12394_v43 }
0x10ec   :  { %6891 = vtanh.f32 %v4396_v51 }
0x10ed   :  { %4628 = vadd.xlane.f32.xlu1 %v4565_v62  ;;  %6893 = vtanh.f32 %v4351_v1  ;;  %v4552_v62 = vmul.f32 %v6890_v55, %v12230_v34 }
0x10ee   :  { %6283 = vmatmul.msk.f32.gmra.mxu2 %vm15387_vm1, %v7337_v33  ;;  %6239 = vmatmul.msk.f32.gmra.mxu0 %vm15392_vm2, %v7340_v39  ;;  %vm15395_vm1 = vmmov %vm15392_vm2  ;;  %v7343_v39 = vld [vmem:[%s13689_s4 + $0x118] sm:$0xff] }
0x10ef   :  { %vm15399_vm2 = vmmov %vm15393_vm7 }
0x10f1   :  { %v12392_v24 = vpop.f32.mrf.mxu2 }
0x10f2   :  { %v6892_v14 = vpop.eup %6891 }
0x10f3   :  { %v4566_v51 = vmul.f32 %v6892_v14, %v12230_v34  ;;  %v6894_v33 = vpop.eup %6893  ;;  %v12408_v14 = vpop.f32.mrf.mxu0 }
0x10f4   :  { %15391 = vst [vmem:[#allocation137_spill] sm:$0xff] %v12408_v14  ;;  %v4551_v55 = vmul.f32 %v6894_v33, %v12230_v34 }
0x10f5   :  { %4630 = vadd.xlane.f32.xlu0 %v4566_v51  ;;  %4602 = vadd.xlane.f32.xlu1 %v4552_v62  ;;  %v7341_v51 = vld [vmem:[%s13689_s4 + $0x110] sm:$0xff] }
0x10f6   :  { %6284 = vmatmul.msk.f32.gmra.mxu2 %vm15390_vm10, %v7339_v27  ;;  %v7342_v27 = vld [vmem:[%s13685_s0 + $0x130] sm:$0xff]  ;;  %vm15398_vm10 = vmmov %vm15395_vm1 }
0x10f7   :  { %6240 = vmatmul.msk.f32.gmra.mxu0 %vm15395_vm1, %v7342_v27  ;;  %v7345_v27 = vld [vmem:[%s13689_s4 + $0x120] sm:$0xff] }
0x10f9   :  { %v12406_v1 = vpop.f32.mrf.mxu2 }
0x10fb   :  { %v12421_v47 = vpop.f32.mrf.mxu0 }
0x10fc   :  { %15394 = vst [vmem:[#allocation138_spill] sm:$0xff] %v12421_v47 }
0x10fd   :  { %4600 = vadd.xlane.f32.xlu1 %v4551_v55 }
0x10fe   :  { %6285 = vmatmul.msk.f32.gmra.mxu2 %vm15393_vm7, %v7341_v51  ;;  %vm15401_vm7 = vmmov %vm15395_vm1 }
0x10ff   :  { %6241 = vmatmul.msk.f32.gmra.mxu0 %vm15398_vm10, %v7344_v19  ;;  %v7347_v19 = vld [vmem:[%s13689_s4 + $0x128] sm:$0xff]  ;;  %vm15402_vm1 = vmmov %vm15399_vm2 }
0x1100   :  { %v12431_v33 = vpop.xlane.xlu1 %4604  ;;  %vm15405_vm10 = vmmov %vm15402_vm1 }
0x1101   :  { %v12419_v62 = vpop.f32.mrf.mxu2 }
0x1103   :  { %v12433_v51 = vpop.f32.mrf.mxu0 }
0x1104   :  { %15397 = vst [vmem:[#allocation139_spill] sm:$0xff] %v12433_v51 }
0x1106   :  { %6286 = vmatmul.msk.f32.gmra.mxu2 %vm15396_vm9, %v7343_v39  ;;  %vm15404_vm9 = vmmov %vm15401_vm7 }
0x1107   :  { %6242 = vmatmul.msk.f32.gmra.mxu0 %vm15401_vm7, %v7346_v40  ;;  %v7349_v40 = vld [vmem:[%s13689_s4 + $0x130] sm:$0xff] }
0x1108   :  { %v12444_v39 = vpop.xlane.xlu1 %4606 }
0x1109   :  { %v4407_v55 = vpop.f32.mrf.mxu2 }
0x110a   :  { %v4408_v20 = vadd.f32 %v4407_v55, %v12378_v5 }
0x110b   :  { %v12448_v36 = vpop.f32.mrf.mxu0 }
0x110c   :  { %6895 = vtanh.f32 %v4408_v20  ;;  %15400 = vst [vmem:[#allocation140_spill] sm:$0xff] %v12448_v36 }
0x110e   :  { %6287 = vmatmul.msk.f32.gmra.mxu2 %vm15399_vm2, %v7345_v27  ;;  %vm15407_vm2 = vmmov %vm15401_vm7 }
0x110f   :  { %vm15408_vm7 = vmmov %vm15402_vm1 }
0x1110   :  { %v12462_v21 = vpop.xlane.xlu1 %4608 }
0x1111   :  { %v12446_v60 = vpop.f32.mrf.mxu2 }
0x1112   :  { %v6896_v55 = vpop.eup %6895 }
0x1113   :  { %v4570_v20 = vmul.f32 %v6896_v55, %v12230_v34  ;;  %v12459_v16 = vpop.f32.mrf.mxu0  ;;  %v7348_v55 = vld [vmem:[%s13685_s0 + $0x148] sm:$0xff] }
0x1114   :  { %15403 = vst [vmem:[#allocation141_spill] sm:$0xff] %v12459_v16  ;;  %6243 = vmatmul.msk.f32.gmra.mxu0 %vm15404_vm9, %v7348_v55  ;;  %v7350_v55 = vld [vmem:[%s13685_s0 + $0x150] sm:$0xff]  ;;  %vm15411_vm9 = vmmov %vm15408_vm7 }
0x1115   :  { %4638 = vadd.xlane.f32.xlu1 %v4570_v20 }
0x1116   :  { %6288 = vmatmul.msk.f32.gmra.mxu2 %vm15402_vm1, %v7347_v19  ;;  %vm15410_vm1 = vmmov %vm15407_vm2 }
0x1118   :  { %v12476_v44 = vpop.xlane.xlu1 %4610 }
0x1119   :  { %v4413_v27 = vpop.f32.mrf.mxu2 }
0x111a   :  { %v4414_v46 = vadd.f32 %v4413_v27, %v12408_v14 }
0x111b   :  { %v12472_v19 = vpop.f32.mrf.mxu0 }
0x111c   :  { %6897 = vtanh.f32 %v4414_v46  ;;  %15406 = vst [vmem:[#allocation142_spill] sm:$0xff] %v12472_v19  ;;  %6244 = vmatmul.msk.f32.gmra.mxu0 %vm15407_vm2, %v7350_v55  ;;  %v7352_v55 = vld [vmem:[%s13685_s0 + $0x158] sm:$0xff]  ;;  %vm15414_vm2 = vmmov %vm15408_vm7 }
0x111e   :  { %6289 = vmatmul.msk.f32.gmra.mxu2 %vm15405_vm10, %v7349_v40  ;;  %v7351_v40 = vld [vmem:[%s13689_s4 + $0x138] sm:$0xff]  ;;  %vm15413_vm10 = vmmov %vm15410_vm1 }
0x1121   :  { %v4416_v20 = vpop.f32.mrf.mxu2 }
0x1122   :  { %v6898_v28 = vpop.eup %6897  ;;  %v4417_v27 = vadd.f32 %v4416_v20, %v12421_v47 }
0x1123   :  { %v4572_v46 = vmul.f32 %v6898_v28, %v12230_v34  ;;  %v12486_v20 = vpop.f32.mrf.mxu0 }
0x1124   :  { %6899 = vtanh.f32 %v4417_v27  ;;  %15409 = vst [vmem:[#allocation144_spill] sm:$0xff] %v12486_v20  ;;  %6245 = vmatmul.msk.f32.gmra.mxu0 %vm15410_vm1, %v7352_v55  ;;  %v7355_v55 = vld [vmem:[%s13689_s4 + $0x148] sm:$0xff] }
0x1125   :  { %4642 = vadd.xlane.f32.xlu2 %v4572_v46  ;;  %v7353_v46 = vld [vmem:[%s13689_s4 + $0x140] sm:$0xff] }
0x1126   :  { %6290 = vmatmul.msk.f32.gmra.mxu2 %vm15408_vm7, %v7351_v40  ;;  %v12498_v40 = vpop.xlane.xlu1 %4612  ;;  %vm15416_vm7 = vmmov %vm15410_vm1 }
0x1127   :  { %vm15417_vm1 = vmmov %vm15414_vm2 }
0x1129   :  { %v4419_v0 = vpop.f32.mrf.mxu2 }
0x112a   :  { %v6900_v28 = vpop.eup %6899  ;;  %v4420_v27 = vadd.f32 %v4419_v0, %v12433_v51 }
0x112b   :  { %v4573_v32 = vmul.f32 %v6900_v28, %v12230_v34  ;;  %v12500_v0 = vpop.f32.mrf.mxu0 }
0x112c   :  { %6901 = vtanh.f32 %v4420_v27  ;;  %15412 = vst [vmem:[#allocation146_spill] sm:$0xff] %v12500_v0 }
0x112d   :  { %4644 = vadd.xlane.f32.xlu2 %v4573_v32  ;;  %v7354_v32 = vld [vmem:[%s13685_s0 + $0x160] sm:$0xff] }
0x112e   :  { %6291 = vmatmul.msk.f32.gmra.mxu2 %vm15411_vm9, %v7353_v46  ;;  %6246 = vmatmul.msk.f32.gmra.mxu0 %vm15413_vm10, %v7354_v32  ;;  %v12512_v46 = vpop.xlane.xlu1 %4614  ;;  %v7357_v32 = vld [vmem:[%s13689_s4 + $0x150] sm:$0xff]  ;;  %vm15419_vm9 = vmmov %vm15416_vm7 }
0x112f   :  { %vm15420_vm10 = vmmov %vm15417_vm1 }
0x1131   :  { %v4422_v22 = vpop.f32.mrf.mxu2 }
0x1132   :  { %v6902_v28 = vpop.eup %6901  ;;  %v4423_v27 = vadd.f32 %v4422_v22, %v12448_v36 }
0x1133   :  { %v4574_v42 = vmul.f32 %v6902_v28, %v12230_v34  ;;  %v12514_v22 = vpop.f32.mrf.mxu0 }
0x1134   :  { %6903 = vtanh.f32 %v4423_v27  ;;  %15415 = vst [vmem:[#allocation149_spill] sm:$0xff] %v12514_v22 }
0x1135   :  { %4646 = vadd.xlane.f32.xlu2 %v4574_v42  ;;  %v7356_v42 = vld [vmem:[%s13685_s0 + $0x168] sm:$0xff] }
0x1136   :  { %6292 = vmatmul.msk.f32.gmra.mxu2 %vm15414_vm2, %v7355_v55  ;;  %6247 = vmatmul.msk.f32.gmra.mxu0 %vm15416_vm7, %v7356_v42  ;;  %v12528_v23 = vpop.xlane.xlu1 %4616  ;;  %v7359_v42 = vld [vmem:[%s13689_s4 + $0x158] sm:$0xff]  ;;  %vm15422_vm2 = vmmov %vm15416_vm7 }
0x1137   :  { %vm15423_vm7 = vmmov %vm15417_vm1 }
0x1139   :  { %v4425_v12 = vpop.f32.mrf.mxu2 }
0x113a   :  { %v6904_v28 = vpop.eup %6903  ;;  %v4426_v27 = vadd.f32 %v4425_v12, %v12459_v16 }
0x113b   :  { %v4575_v58 = vmul.f32 %v6904_v28, %v12230_v34  ;;  %v12526_v49 = vpop.f32.mrf.mxu0 }
0x113c   :  { %6905 = vtanh.f32 %v4426_v27  ;;  %15418 = vst [vmem:[#allocation151_spill] sm:$0xff] %v12526_v49 }
0x113d   :  { %4648 = vadd.xlane.f32.xlu2 %v4575_v58  ;;  %v7358_v58 = vld [vmem:[%s13685_s0 + $0x170] sm:$0xff] }
0x113e   :  { %6293 = vmatmul.msk.f32.gmra.mxu2 %vm15417_vm1, %v7357_v32  ;;  %6248 = vmatmul.msk.f32.gmra.mxu0 %vm15419_vm9, %v7358_v58  ;;  %v12544_v2 = vpop.xlane.xlu1 %4618  ;;  %v7361_v58 = vld [vmem:[%s13689_s4 + $0x160] sm:$0xff]  ;;  %vm15425_vm1 = vmmov %vm15422_vm2 }
0x113f   :  { %vm15426_vm9 = vmmov %vm15423_vm7 }
0x1141   :  { %v4428_v55 = vpop.f32.mrf.mxu2 }
0x1142   :  { %v6906_v12 = vpop.eup %6905  ;;  %v4429_v28 = vadd.f32 %v4428_v55, %v12472_v19 }
0x1143   :  { %v4576_v27 = vmul.f32 %v6906_v12, %v12230_v34  ;;  %v12540_v35 = vpop.f32.mrf.mxu0 }
0x1144   :  { %6907 = vtanh.f32 %v4429_v28  ;;  %15421 = vst [vmem:[#allocation153_spill] sm:$0xff] %v12540_v35 }
0x1145   :  { %4650 = vadd.xlane.f32.xlu2 %v4576_v27  ;;  %v7360_v27 = vld [vmem:[%s13685_s0 + $0x178] sm:$0xff] }
0x1146   :  { %6294 = vmatmul.msk.f32.gmra.mxu2 %vm15420_vm10, %v7359_v42  ;;  %6249 = vmatmul.msk.f32.gmra.mxu0 %vm15422_vm2, %v7360_v27  ;;  %v7362_v27 = vld [vmem:[%s13685_s0 + $0x180] sm:$0xff]  ;;  %vm15428_vm10 = vmmov %vm15423_vm7 }
0x1147   :  { %vm15430_vm2 = vmmov %vm15423_vm7 }
0x1149   :  { %v4431_v32 = vpop.f32.mrf.mxu2 }
0x114a   :  { %v6908_v55 = vpop.eup %6907  ;;  %v4432_v12 = vadd.f32 %v4431_v32, %v12486_v20 }
0x114b   :  { %v4577_v28 = vmul.f32 %v6908_v55, %v12230_v34  ;;  %v12554_v32 = vpop.f32.mrf.mxu0 }
0x114c   :  { %6909 = vtanh.f32 %v4432_v12  ;;  %15424 = vst [vmem:[#allocation157_spill] sm:$0xff] %v12554_v32 }
0x114d   :  { %4652 = vadd.xlane.f32.xlu2 %v4577_v28  ;;  %v4621_v28 = vpop.xlane.xlu1 %4620 }
0x114e   :  { %6295 = vmatmul.msk.f32.gmra.mxu2 %vm15423_vm7, %v7361_v58  ;;  %6250 = vmatmul.msk.f32.gmra.mxu0 %vm15425_vm1, %v7362_v27  ;;  %v7363_v58 = vld [vmem:[%s13689_s4 + $0x168] sm:$0xff]  ;;  %vm15431_vm7 = vmmov %vm15430_vm2 }
0x114f   :  { %vm15458_vm1 = vmmov %vm15430_vm2 }
0x1150   :  { %v4625_v6 = vpop.xlane.xlu0 %4624 }
0x1151   :  { %v4434_v42 = vpop.f32.mrf.mxu2 }
0x1152   :  { %v6910_v55 = vpop.eup %6909  ;;  %v4435_v17 = vadd.f32 %v4434_v42, %v12500_v0 }
0x1153   :  { %v4578_v12 = vmul.f32 %v6910_v55, %v12230_v34  ;;  %v12568_v55 = vpop.f32.mrf.mxu0 }
0x1154   :  { %6911 = vtanh.f32 %v4435_v17  ;;  %15427 = vst [vmem:[#allocation24_spill] sm:$0xff] %v12568_v55 }
0x1155   :  { %4654 = vadd.xlane.f32.xlu2 %v4578_v12  ;;  %v7364_v12 = vld [vmem:[%s13689_s4 + $0x170] sm:$0xff]  ;;  %v4623_v27 = vpop.xlane.xlu1 %4622 }
0x1156   :  { %6296 = vmatmul.msk.f32.gmra.mxu2 %vm15426_vm9, %v7363_v58  ;;  %vm15459_vm9 = vmmov %vm15458_vm1 }
0x1159   :  { %v4437_v26 = vpop.f32.mrf.mxu2 }
0x115a   :  { %v6912_v31 = vpop.eup %6911  ;;  %v4438_v42 = vadd.f32 %v4437_v26, %v12514_v22 }
0x115b   :  { %v4579_v17 = vmul.f32 %v6912_v31, %v12230_v34  ;;  %v12576_v31 = vpop.f32.mrf.mxu0 }
0x115c   :  { %6913 = vtanh.f32 %v4438_v42  ;;  %15429 = vst [vmem:[#allocation18_spill] sm:$0xff] %v12576_v31  ;;  %v7365_v42 = vld [vmem:[%s13689_s4 + $0x178] sm:$0xff] }
0x115d   :  { %4656 = vadd.xlane.f32.xlu2 %v4579_v17  ;;  %v12582_v17 = vstv %s6301_s5 }
0x115e   :  { %6297 = vmatmul.msk.f32.gmra.mxu2 %vm15428_vm10, %v7364_v12  ;;  %v12645_v5 = vadd.f32 %v12582_v17, %v12476_v44  ;;  %v12661_v44 = vadd.f32 %v12582_v17, %v12431_v33  ;;  %vm15460_vm10 = vmmov %vm15458_vm1 }
0x1160   :  { %v4629_v12 = vpop.xlane.xlu1 %4628 }
0x1161   :  { %v4440_v58 = vpop.f32.mrf.mxu2 }
0x1162   :  { %v6914_v29 = vpop.eup %6913  ;;  %v4441_v52 = vadd.f32 %v4440_v58, %v12526_v49 }
0x1163   :  { %v4580_v26 = vmul.f32 %v6914_v29, %v12230_v34  ;;  %v4627_v29 = vpop.xlane.xlu2 %4626 }
0x1164   :  { %6915 = vtanh.f32 %v4441_v52 }
0x1165   :  { %4658 = vadd.xlane.f32.xlu2 %v4580_v26  ;;  %v12589_v26 = vadd.f32 %v12582_v17, %v4629_v12  ;;  %v12604_v12 = vadd.f32 %v12582_v17, %v4625_v6 }
0x1166   :  { %6298 = vmatmul.msk.f32.gmra.mxu2 %vm15430_vm2, %v7365_v42  ;;  %v12594_v42 = vadd.f32 %v12582_v17, %v4627_v29  ;;  %v12614_v29 = vadd.f32 %v12582_v17, %v4621_v28  ;;  %v12630_v28 = vadd.f32 %v12582_v17, %v12512_v46  ;;  %v12650_v46 = vadd.f32 %v12582_v17, %v12462_v21  ;;  %vm15461_vm2 = vmmov %vm15458_vm1 }
0x1168   :  { %v4631_v13 = vpop.xlane.xlu0 %4630 }
0x1169   :  { %v12585_v57 = vadd.f32 %v12582_v17, %v4631_v13  ;;  %v4443_v58 = vpop.f32.mrf.mxu2  ;;  %v4411_v13 = vadd.f32 %v12446_v60, %v12394_v43 }
0x116a   :  { %v6916_v18 = vpop.eup %6915  ;;  %v4444_v52 = vadd.f32 %v4443_v58, %v12540_v35  ;;  %v7366_v58 = vld [vmem:[%s13689_s4 + $0x180] sm:$0xff] }
0x116b   :  { %4749 = vmatpush.msra.mxu1 %v12585_v57  ;;  %v4581_v56 = vmul.f32 %v6916_v18, %v12230_v34  ;;  %v12607_v18 = vpop.f32.mrf.mxu0 }
0x116c   :  { %6917 = vtanh.f32 %v4444_v52  ;;  %15432 = vst [vmem:[#allocation26_spill] sm:$0xff] %v12607_v18 }
0x116d   :  { %4660 = vadd.xlane.f32.xlu2 %v4581_v56  ;;  %4750 = vmatpush.msra.mxu1 %v12589_v26  ;;  %v12610_v56 = vadd.f32 %v12582_v17, %v4623_v27  ;;  %6919 = vtanh.f32 %v4411_v13  ;;  %v12625_v27 = vadd.f32 %v12582_v17, %v12528_v23 }
0x116e   :  { %6299 = vmatmul.msk.f32.gmra.mxu2 %vm15431_vm7, %v7366_v58  ;;  %v12620_v58 = vadd.f32 %v12582_v17, %v12544_v2  ;;  %vm15462_vm7 = vmmov %vm15458_vm1 }
0x116f   :  { %4751 = vmatpush.msra.mxu1 %v12594_v42 }
0x1171   :  { %v4446_v52 = vpop.f32.mrf.mxu2  ;;  %4752 = vmatpush.msra.mxu1 %v12604_v12 }
0x1172   :  { %v6918_v60 = vpop.eup %6917 }
0x1173   :  { %4753 = vmatpush.msra.mxu1 %v12610_v56  ;;  %v4582_v6 = vmul.f32 %v6918_v60, %v12230_v34  ;;  %v6920_v13 = vpop.eup %6919  ;;  %v12635_v2 = vpop.f32.mrf.mxu0 }
0x1174   :  { %15433 = vst [vmem:[#allocation28_spill] sm:$0xff] %v12635_v2  ;;  %v4603_v60 = vpop.xlane.xlu1 %4602  ;;  %v4571_v23 = vmul.f32 %v6920_v13, %v12230_v34 }
0x1175   :  { %4662 = vadd.xlane.f32.xlu2 %v4582_v6  ;;  %4754 = vmatpush.msra.mxu1 %v12614_v29  ;;  %v12639_v6 = vadd.f32 %v12582_v17, %v12498_v40  ;;  %v12655_v40 = vadd.f32 %v12582_v17, %v12444_v39  ;;  %v12667_v14 = vadd.f32 %v12582_v17, %v4603_v60 }
0x1176   :  { %v4399_v39 = vadd.f32 %v12392_v24, %v12340_v9  ;;  %v4402_v24 = vadd.f32 %v12406_v1, %v12352_v48 }
0x1177   :  { %4755 = vmatpush.msra.mxu1 %v12620_v58 }
0x1179   :  { %v12632_v59 = vpop.f32.mrf.mxu2  ;;  %4756 = vmatpush.msra.mxu1 %v12625_v27 }
0x117b   :  { %4757 = vmatpush.msra.mxu1 %v12630_v28 }
0x117c   :  { %v4601_v21 = vpop.xlane.xlu1 %4600 }
0x117d   :  { %4640 = vadd.xlane.f32.xlu2 %v4571_v23  ;;  %4758 = vmatpush.msra.mxu1 %v12639_v6  ;;  %v12664_v23 = vpop.f32.mrf.mxu0 }
0x117e   :  { %15434 = vst [vmem:[#allocation40_spill] sm:$0xff] %v12664_v23 }
0x117f   :  { %4759 = vmatpush.msra.mxu1 %v12645_v5 }
0x1181   :  { %v4452_v43 = vpop.f32.mrf.mxu2  ;;  %4760 = vmatpush.msra.mxu1 %v12650_v46 }
0x1182   :  { %v4453_v13 = vadd.f32 %v4452_v43, %v12576_v31  ;;  %v12673_v43 = vadd.f32 %v12582_v17, %v4601_v21 }
0x1183   :  { %4761 = vmatpush.msra.mxu1 %v12655_v40 }
0x1184   :  { %6921 = vtanh.f32 %v4453_v13 }
0x1185   :  { %4762 = vmatpush.msra.mxu1 %v12661_v44  ;;  %6923 = vtanh.f32 %v4399_v39  ;;  %v12680_v47 = vpop.f32.mrf.mxu0 }
0x1186   :  { %15435 = vst [vmem:[#allocation19_spill] sm:$0xff] %v12680_v47 }
0x1187   :  { %4763 = vmatpush.msra.mxu1 %v12667_v14 }
0x1189   :  { %v4455_v33 = vpop.f32.mrf.mxu2  ;;  %4764 = vmatpush.msra.mxu1 %v12673_v43 }
0x118a   :  { %v6922_v31 = vpop.eup %6921  ;;  %v4456_v13 = vadd.f32 %v4455_v33, %v12607_v18  ;;  %4765 = vmatmul.f32.vlgmr.msra.gmra.mxu1 %v11868_v38  ;;  %v4447_v38 = vadd.f32 %v4446_v52, %v12554_v32 }
0x118b   :  { %v4585_v60 = vmul.f32 %v6922_v31, %v12230_v34  ;;  %v6924_v21 = vpop.eup %6923 }
0x118c   :  { %6925 = vtanh.f32 %v4456_v13  ;;  %v4567_v33 = vmul.f32 %v6924_v21, %v12230_v34 }
0x118d   :  { %4668 = vadd.xlane.f32.xlu1 %v4585_v60  ;;  %6927 = vtanh.f32 %v4402_v24  ;;  %v12689_v31 = vpop.f32.mrf.mxu0 }
0x118e   :  { %15436 = vst [vmem:[#allocation30_spill] sm:$0xff] %v12689_v31  ;;  %6929 = vtanh.f32 %v4447_v38 }
0x1191   :  { %v12684_v9 = vpop.f32.mrf.mxu2 }
0x1192   :  { %v6926_v51 = vpop.eup %6925 }
0x1193   :  { %v4586_v39 = vmul.f32 %v6926_v51, %v12230_v34  ;;  %v6928_v13 = vpop.eup %6927 }
0x1194   :  { %v4568_v1 = vmul.f32 %v6928_v13, %v12230_v34  ;;  %v6930_v24 = vpop.eup %6929 }
0x1195   :  { %4670 = vadd.xlane.f32.xlu2 %v4586_v39  ;;  %4632 = vadd.xlane.f32.xlu1 %v4567_v33  ;;  %v12698_v21 = vpop.f32.mrf.mxu0  ;;  %v4583_v52 = vmul.f32 %v6930_v24, %v12230_v34 }
0x1196   :  { %15437 = vst [vmem:[#allocation43_spill] sm:$0xff] %v12698_v21 }
0x1198   :  { %v12691_v60 = vpop.xlane.xlu2 %4642 }
0x1199   :  { %v12693_v18 = vpop.f32.mrf.mxu2 }
0x119d   :  { %4634 = vadd.xlane.f32.xlu2 %v4568_v1  ;;  %v12706_v1 = vpop.f32.mrf.mxu0 }
0x119e   :  { %15438 = vst [vmem:[#allocation100_spill] sm:$0xff] %v12706_v1 }
0x11a0   :  { %v12696_v48 = vpop.xlane.xlu2 %4644 }
0x11a1   :  { %v4464_v51 = vpop.f32.mrf.mxu2 }
0x11a2   :  { %v4465_v39 = vadd.f32 %v4464_v51, %v12680_v47 }
0x11a4   :  { %6931 = vtanh.f32 %v4465_v39 }
0x11a5   :  { %4664 = vadd.xlane.f32.xlu2 %v4583_v52  ;;  %v12712_v52 = vpop.f32.mrf.mxu0 }
0x11a6   :  { %15439 = vst [vmem:[#allocation86_spill] sm:$0xff] %v12712_v52 }
0x11a8   :  { %v12702_v33 = vpop.xlane.xlu2 %4646 }
0x11a9   :  { %v4467_v32 = vpop.f32.mrf.mxu2 }
0x11aa   :  { %v6932_v36 = vpop.eup %6931  ;;  %v4468_v38 = vadd.f32 %v4467_v32, %v12689_v31 }
0x11ab   :  { %v4589_v13 = vmul.f32 %v6932_v36, %v12230_v34 }
0x11ac   :  { %6933 = vtanh.f32 %v4468_v38 }
0x11ad   :  { %4676 = vadd.xlane.f32.xlu0 %v4589_v13  ;;  %v12718_v13 = vpop.f32.mrf.mxu0 }
0x11ae   :  { %15440 = vst [vmem:[#allocation101_spill] sm:$0xff] %v12718_v13 }
0x11b0   :  { %v12708_v16 = vpop.xlane.xlu2 %4648 }
0x11b1   :  { %v4470_v19 = vpop.f32.mrf.mxu2 }
0x11b2   :  { %v6934_v51 = vpop.eup %6933  ;;  %v4471_v24 = vadd.f32 %v4470_v19, %v12698_v21 }
0x11b3   :  { %v4590_v39 = vmul.f32 %v6934_v51, %v12230_v34 }
0x11b4   :  { %6935 = vtanh.f32 %v4471_v24 }
0x11b5   :  { %4678 = vadd.xlane.f32.xlu0 %v4590_v39  ;;  %v12722_v22 = vpop.f32.mrf.mxu0 }
0x11b6   :  { %15441 = vst [vmem:[#allocation52_spill] sm:$0xff] %v12722_v22 }
0x11b8   :  { %v12714_v47 = vpop.xlane.xlu2 %4650 }
0x11b9   :  { %v4473_v32 = vpop.f32.mrf.mxu2 }
0x11ba   :  { %v6936_v36 = vpop.eup %6935  ;;  %v4474_v31 = vadd.f32 %v4473_v32, %v12706_v1 }
0x11bb   :  { %v4591_v38 = vmul.f32 %v6936_v36, %v12230_v34 }
0x11bc   :  { %6937 = vtanh.f32 %v4474_v31 }
0x11bd   :  { %4680 = vadd.xlane.f32.xlu0 %v4591_v38 }
0x11c0   :  { %v4653_v20 = vpop.xlane.xlu2 %4652 }
0x11c1   :  { %v4476_v19 = vpop.f32.mrf.mxu2 }
0x11c2   :  { %v6938_v21 = vpop.eup %6937  ;;  %v4477_v51 = vadd.f32 %v4476_v19, %v12712_v52 }
0x11c3   :  { %v4592_v24 = vmul.f32 %v6938_v21, %v12230_v34 }
0x11c4   :  { %6939 = vtanh.f32 %v4477_v51  ;;  %v12728_v51 = vpop.f32.mrf.mxu0 }
0x11c5   :  { %4682 = vadd.xlane.f32.xlu0 %v4592_v24  ;;  %15442 = vst [vmem:[#allocation103_spill] sm:$0xff] %v12728_v51 }
0x11c8   :  { %v4655_v39 = vpop.xlane.xlu2 %4654 }
0x11c9   :  { %v4479_v0 = vpop.f32.mrf.mxu2 }
0x11ca   :  { %v6940_v32 = vpop.eup %6939  ;;  %v4480_v36 = vadd.f32 %v4479_v0, %v12718_v13 }
0x11cb   :  { %v4593_v31 = vmul.f32 %v6940_v32, %v12230_v34 }
0x11cc   :  { %6941 = vtanh.f32 %v4480_v36  ;;  %v12732_v36 = vpop.f32.mrf.mxu0 }
0x11cd   :  { %4684 = vadd.xlane.f32.xlu0 %v4593_v31  ;;  %15443 = vst [vmem:[#allocation32_spill] sm:$0xff] %v12732_v36 }
0x11d0   :  { %v4657_v38 = vpop.xlane.xlu2 %4656 }
0x11d1   :  { %v4482_v1 = vpop.f32.mrf.mxu2 }
0x11d2   :  { %v6942_v49 = vpop.eup %6941  ;;  %v4483_v19 = vadd.f32 %v4482_v1, %v12722_v22 }
0x11d3   :  { %v4594_v21 = vmul.f32 %v6942_v49, %v12230_v34 }
0x11d4   :  { %6943 = vtanh.f32 %v4483_v19  ;;  %v12736_v19 = vpop.f32.mrf.mxu0 }
0x11d5   :  { %4686 = vadd.xlane.f32.xlu0 %v4594_v21  ;;  %15444 = vst [vmem:[#allocation81_spill] sm:$0xff] %v12736_v19 }
0x11d8   :  { %v4659_v24 = vpop.xlane.xlu2 %4658 }
0x11d9   :  { %v4485_v52 = vpop.f32.mrf.mxu2 }
0x11da   :  { %v6944_v35 = vpop.eup %6943  ;;  %v4486_v0 = vadd.f32 %v4485_v52, %v12728_v51 }
0x11db   :  { %v4595_v32 = vmul.f32 %v6944_v35, %v12230_v34 }
0x11dc   :  { %6945 = vtanh.f32 %v4486_v0 }
0x11dd   :  { %4688 = vadd.xlane.f32.xlu0 %v4595_v32 }
0x11e0   :  { %v4661_v31 = vpop.xlane.xlu2 %4660 }
0x11e1   :  { %v4488_v13 = vpop.f32.mrf.mxu2  ;;  %v12743_v51 = vadd.f32 %v12582_v17, %v4661_v31  ;;  %v12758_v31 = vadd.f32 %v12582_v17, %v4655_v39  ;;  %v4459_v39 = vadd.f32 %v12684_v9, %v12635_v2 }
0x11e2   :  { %v6946_v1 = vpop.eup %6945  ;;  %v4489_v49 = vadd.f32 %v4488_v13, %v12732_v36 }
0x11e3   :  { %v4596_v22 = vmul.f32 %v6946_v1, %v12230_v34  ;;  %v4462_v1 = vadd.f32 %v12693_v18, %v12664_v23  ;;  %v12768_v18 = vadd.f32 %v12582_v17, %v12714_v47  ;;  %v12785_v47 = vadd.f32 %v12582_v17, %v12696_v48 }
0x11e4   :  { %6947 = vtanh.f32 %v4489_v49  ;;  %v12754_v49 = vadd.f32 %v12582_v17, %v4657_v38  ;;  %v12775_v38 = vadd.f32 %v12582_v17, %v12708_v16 }
0x11e5   :  { %4690 = vadd.xlane.f32.xlu0 %v4596_v22  ;;  %v12748_v22 = vadd.f32 %v12582_v17, %v4659_v24  ;;  %v12762_v24 = vadd.f32 %v12582_v17, %v4653_v20 }
0x11e8   :  { %v4663_v21 = vpop.xlane.xlu2 %4662 }
0x11e9   :  { %v12739_v52 = vadd.f32 %v12582_v17, %v4663_v21  ;;  %v4491_v35 = vpop.f32.mrf.mxu2 }
0x11ea   :  { %v6948_v0 = vpop.eup %6947  ;;  %v4492_v32 = vadd.f32 %v4491_v35, %v12736_v19 }
0x11eb   :  { %4769 = vmatpush.msrb.mxu1 %v12739_v52  ;;  %v4597_v13 = vmul.f32 %v6948_v0, %v12230_v34  ;;  %v12780_v0 = vadd.f32 %v12582_v17, %v12702_v33  ;;  %v4405_v33 = vadd.f32 %v12419_v62, %v12364_v63  ;;  %v4450_v62 = vadd.f32 %v12632_v59, %v12568_v55 }
0x11ec   :  { %6949 = vtanh.f32 %v4492_v32  ;;  %v12791_v32 = vadd.f32 %v12582_v17, %v12691_v60 }
0x11ed   :  { %4692 = vadd.xlane.f32.xlu0 %v4597_v13  ;;  %4770 = vmatpush.msrb.mxu1 %v12743_v51  ;;  %6951 = vtanh.f32 %v4462_v1  ;;  %v4639_v13 = vpop.xlane.xlu1 %4638 }
0x11ee   :  { %6953 = vtanh.f32 %v4459_v39  ;;  %v12808_v39 = vpop.f32.mrf.mxu0 }
0x11ef   :  { %4771 = vmatpush.msrb.mxu1 %v12748_v22  ;;  %6955 = vtanh.f32 %v4405_v33  ;;  %15446 = vst [vmem:[#allocation42_spill] sm:$0xff] %v12808_v39 }
0x11f0   :  { %v4641_v16 = vpop.xlane.xlu2 %4640  ;;  %6957 = vtanh.f32 %v4450_v62 }
0x11f1   :  { %4772 = vmatpush.msrb.mxu1 %v12754_v49  ;;  %v12797_v1 = vadd.f32 %v12582_v17, %v4641_v16 }
0x11f2   :  { %v6950_v21 = vpop.eup %6949 }
0x11f3   :  { %4773 = vmatpush.msrb.mxu1 %v12758_v31  ;;  %v4598_v35 = vmul.f32 %v6950_v21, %v12230_v34  ;;  %v6952_v20 = vpop.eup %6951  ;;  %v12801_v21 = vadd.f32 %v12582_v17, %v4639_v13 }
0x11f4   :  { %v4588_v9 = vmul.f32 %v6952_v20, %v12230_v34  ;;  %v6954_v48 = vpop.eup %6953  ;;  %v4494_v20 = vpop.f32.mrf.mxu2 }
0x11f5   :  { %4694 = vadd.xlane.f32.xlu0 %v4598_v35  ;;  %4774 = vmatpush.msrb.mxu1 %v12762_v24  ;;  %15445 = vst [vmem:[#allocation105_spill] sm:$0xff] %v12801_v21  ;;  %v4587_v60 = vmul.f32 %v6954_v48, %v12230_v34  ;;  %v6956_v35 = vpop.eup %6955  ;;  %v4495_v16 = vadd.f32 %v4494_v20, %v12808_v39 }
0x11f6   :  { %v6958_v13 = vpop.eup %6957 }
0x11f7   :  { %4775 = vmatpush.msrb.mxu1 %v12768_v18  ;;  %6959 = vtanh.f32 %v4495_v16  ;;  %v4584_v33 = vmul.f32 %v6958_v13, %v12230_v34 }
0x11f9   :  { %4776 = vmatpush.msrb.mxu1 %v12775_v38 }
0x11fb   :  { %4777 = vmatpush.msrb.mxu1 %v12780_v0 }
0x11fd   :  { %4674 = vadd.xlane.f32.xlu0 %v4588_v9  ;;  %4778 = vmatpush.msrb.mxu1 %v12785_v47  ;;  %v4569_v9 = vmul.f32 %v6956_v35, %v12230_v34  ;;  %v6960_v48 = vpop.eup %6959 }
0x11ff   :  { %4779 = vmatpush.msrb.mxu1 %v12791_v32 }
0x1201   :  { %4780 = vmatpush.msrb.mxu1 %v12797_v1 }
0x1203   :  { %4781 = vmatpush.msrb.mxu1 %v12801_v21 }
0x1205   :  { %4672 = vadd.xlane.f32.xlu0 %v4587_v60  ;;  %v4599_v60 = vmul.f32 %v6960_v48, %v12230_v34 }
0x120d   :  { %4636 = vadd.xlane.f32.xlu0 %v4569_v9 }
0x1215   :  { %4666 = vadd.xlane.f32.xlu0 %v4584_v33 }
0x121d   :  { %4696 = vadd.xlane.f32.xlu0 %v4599_v60  ;;  %v4671_v60 = vpop.xlane.xlu2 %4670 }
0x121e   :  { %v12862_v21 = vadd.f32 %v12582_v17, %v4671_v60 }
0x1220   :  { %v4677_v59 = vpop.xlane.xlu0 %4676  ;;  %15452 = vst [vmem:[#allocation177_spill] sm:$0xff] %v12862_v21 }
0x1228   :  { %v4679_v55 = vpop.xlane.xlu0 %4678 }
0x1229   :  { %v12846_v39 = vadd.f32 %v12582_v17, %v4679_v55 }
0x1230   :  { %v4681_v2 = vpop.xlane.xlu0 %4680 }
0x1238   :  { %v4683_v23 = vpop.xlane.xlu0 %4682 }
0x1240   :  { %v4685_v36 = vpop.xlane.xlu0 %4684 }
0x1248   :  { %v4687_v62 = vpop.xlane.xlu0 %4686 }
0x1249   :  { %v12830_v48 = vadd.f32 %v12582_v17, %v4687_v62  ;;  %v4669_v62 = vpop.xlane.xlu1 %4668 }
0x1250   :  { %v4689_v19 = vpop.xlane.xlu0 %4688 }
0x1251   :  { %v12826_v13 = vadd.f32 %v12582_v17, %v4689_v19  ;;  %v12842_v19 = vadd.f32 %v12582_v17, %v4681_v2  ;;  %v4635_v2 = vpop.xlane.xlu2 %4634 }
0x1258   :  { %v4691_v35 = vpop.xlane.xlu0 %4690 }
0x1259   :  { %v12822_v34 = vadd.f32 %v12582_v17, %v4691_v35  ;;  %v12838_v35 = vadd.f32 %v12582_v17, %v4683_v23  ;;  %v4665_v60 = vpop.xlane.xlu2 %4664 }
0x1260   :  { %v4693_v63 = vpop.xlane.xlu0 %4692 }
0x1261   :  { %v12818_v16 = vadd.f32 %v12582_v17, %v4693_v63  ;;  %v12834_v63 = vadd.f32 %v12582_v17, %v4685_v36  ;;  %v12850_v36 = vadd.f32 %v12582_v17, %v4677_v59 }
0x1263   :  { %15448 = vst [vmem:[#allocation104_spill] sm:$0xff] %v12818_v16 }
0x1264   :  { %15449 = vst [vmem:[#allocation9_spill] sm:$0xff] %v12850_v36 }
0x1268   :  { %v4695_v20 = vpop.xlane.xlu0 %4694 }
0x1269   :  { %v12815_v9 = vadd.f32 %v12582_v17, %v4695_v20 }
0x126b   :  { %15447 = vst [vmem:[#allocation22_spill] sm:$0xff] %v12815_v9  ;;  %4789 = vmatpush.msrb.mxu3 %v12815_v9 }
0x126d   :  { %4790 = vmatpush.msrb.mxu3 %v12818_v16  ;;  %v4633_v16 = vpop.xlane.xlu1 %4632 }
0x126f   :  { %4791 = vmatpush.msrb.mxu3 %v12822_v34 }
0x1270   :  { %v4675_v33 = vpop.xlane.xlu0 %4674 }
0x1271   :  { %4792 = vmatpush.msrb.mxu3 %v12826_v13  ;;  %v12854_v23 = vadd.f32 %v12582_v17, %v4675_v33  ;;  %v12869_v33 = vadd.f32 %v12582_v17, %v4669_v62  ;;  %v7367_v62 = vld [vmem:[%s13688_s3 + $0x8] sm:$0xff] }
0x1273   :  { %4793 = vmatpush.msrb.mxu3 %v12830_v48  ;;  %15450 = vst [vmem:[#allocation10_spill] sm:$0xff] %v12854_v23 }
0x1274   :  { %15453 = vst [vmem:[#allocation38_spill] sm:$0xff] %v12869_v33 }
0x1275   :  { %4794 = vmatpush.msrb.mxu3 %v12834_v63 }
0x1277   :  { %4795 = vmatpush.msrb.mxu3 %v12838_v35 }
0x1278   :  { %v4673_v20 = vpop.xlane.xlu0 %4672 }
0x1279   :  { %4796 = vmatpush.msrb.mxu3 %v12842_v19  ;;  %v12858_v9 = vadd.f32 %v12582_v17, %v4673_v20  ;;  %v12877_v20 = vadd.f32 %v12582_v17, %v4633_v16  ;;  %v7368_v16 = vld [vmem:[%s13688_s3 + $0x10] sm:$0xff] }
0x127b   :  { %4797 = vmatpush.msrb.mxu3 %v12846_v39  ;;  %15451 = vst [vmem:[#allocation36_spill] sm:$0xff] %v12858_v9 }
0x127c   :  { %15455 = vst [vmem:[#allocation180_spill] sm:$0xff] %v12877_v20 }
0x127d   :  { %4798 = vmatpush.msrb.mxu3 %v12850_v36  ;;  %v12872_v36 = vadd.f32 %v12582_v17, %v4635_v2 }
0x127f   :  { %4799 = vmatpush.msrb.mxu3 %v12854_v23  ;;  %15454 = vst [vmem:[#allocation34_spill] sm:$0xff] %v12872_v36 }
0x1280   :  { %v4637_v55 = vpop.xlane.xlu0 %4636 }
0x1281   :  { %v12865_v59 = vadd.f32 %v12582_v17, %v4637_v55  ;;  %4800 = vmatpush.msrb.mxu3 %v12858_v9 }
0x1283   :  { %4782 = vmatpush.msrb.mxu1 %v12865_v59  ;;  %4801 = vmatpush.msrb.mxu3 %v12862_v21  ;;  %v12889_v21 = vadd.f32 %v12582_v17, %v4665_v60  ;;  %v7369_v60 = vld [vmem:[%s13688_s3 + $0x18] sm:$0xff] }
0x1285   :  { %4783 = vmatpush.msrb.mxu1 %v12872_v36  ;;  %4802 = vmatpush.msrb.mxu3 %v12869_v33  ;;  %15457 = vst [vmem:[#allocation182_spill] sm:$0xff] %v12889_v21 }
0x1287   :  { %4784 = vmatpush.msrb.mxu1 %v12877_v20 }
0x1288   :  { %v4667_v55 = vpop.xlane.xlu0 %4666  ;;  %4785 = vmatmul.f32.vlgmr.msrb.gmra.mxu1 %v7367_v62 }
0x1289   :  { %v12886_v2 = vadd.f32 %v12582_v17, %v4667_v55  ;;  %v4766_v55 = vpop.f32.mrf.mxu1 }
0x128b   :  { %15456 = vst [vmem:[#allocation84_spill] sm:$0xff] %v12886_v2  ;;  %4803 = vmatpush.msrb.mxu3 %v12886_v2 }
0x128d   :  { %4804 = vmatpush.msrb.mxu3 %v12889_v21 }
0x128e   :  { %4805 = vmatmul.f32.vlgmr.msrb.gmra.mxu3 %v7368_v16 }
0x1290   :  { %v4697_v36 = vpop.xlane.xlu0 %4696 }
0x1291   :  { %v12897_v20 = vadd.f32 %v12582_v17, %v4697_v36  ;;  %v7370_v17 = vld [vmem:[%s13689_s4] sm:$0xff]  ;;  %v7371_v36 = vld [vmem:[%s13689_s4 + $0x8] sm:$0xff] }
0x1293   :  { %4824 = vmatpush.msra.mxu1 %v12897_v20 }
0x1294   :  { %6302 = vmatmul.msk.f32.vlgmr.msra.gmra.mxu1 %vm15458_vm1, %v7369_v60  ;;  %v7372_v60 = vld [vmem:[%s13689_s4 + $0x10] sm:$0xff] }
0x1305   :  { %v4786_v62 = vpop.f32.mrf.mxu1 }
0x1306   :  { %v4787_v21 = vadd.f32 %v4786_v62, %v4766_v55  ;;  %v7378_v55 = vld [vmem:[%s13689_s4 + $0x40] sm:$0xff]  ;;  %v7379_v62 = vld [vmem:[%s13689_s4 + $0x48] sm:$0xff] }
0x1311   :  { %v4806_v2 = vpop.f32.mrf.mxu3  ;;  %v4826_v23 = vpop.f32.mrf.mxu1 }
0x1312   :  { %v4807_v33 = vadd.f32 %v4806_v2, %v4787_v21  ;;  %v7373_v21 = vld [vmem:[%s13689_s4 + $0x18] sm:$0xff] }
0x1313   :  { %v7377_v2 = vld [vmem:[%s13689_s4 + $0x38] sm:$0xff] }
0x1314   :  { %v4827_v9 = vadd.f32 %v4826_v23, %v4807_v33  ;;  %v7375_v23 = vld [vmem:[%s13689_s4 + $0x28] sm:$0xff]  ;;  %v7376_v33 = vld [vmem:[%s13689_s4 + $0x30] sm:$0xff] }
0x1316   :  { %v4829_v16 = vmul.f32 0.020408163, %v4827_v9  ;;  %v7374_v9 = vld [vmem:[%s13689_s4 + $0x20] sm:$0xff] }
0x1318   :  { %4845 = vmatpush.msrb.mxu1 %v4829_v16  ;;  %v7380_v16 = vld [vmem:[%s13689_s4 + $0x50] sm:$0xff] }
0x1319   :  { %6303 = vmatmul.msk.f32.vlgmr.msrb.gmra.mxu1 %vm15459_vm9, %v7370_v17  ;;  %vm15463_vm9 = vmmov %vm15458_vm1  ;;  %v7381_v17 = vld [vmem:[%s13689_s4 + $0x58] sm:$0xff] }
0x1321   :  { %6304 = vmatmul.msk.f32.gmra.mxu1 %vm15460_vm10, %v7371_v36  ;;  %vm15464_vm10 = vmmov %vm15458_vm1  ;;  %v7382_v36 = vld [vmem:[%s13689_s4 + $0x60] sm:$0xff] }
0x1329   :  { %6305 = vmatmul.msk.f32.gmra.mxu1 %vm15461_vm2, %v7372_v60  ;;  %vm15465_vm2 = vmmov %vm15458_vm1  ;;  %v7383_v60 = vld [vmem:[%s13689_s4 + $0x68] sm:$0xff] }
0x1331   :  { %6306 = vmatmul.msk.f32.gmra.mxu1 %vm15462_vm7, %v7373_v21  ;;  %vm15466_vm7 = vmmov %vm15458_vm1  ;;  %v7384_v21 = vld [vmem:[%s13689_s4 + $0x70] sm:$0xff] }
0x1339   :  { %6307 = vmatmul.msk.f32.gmra.mxu1 %vm15458_vm1, %v7374_v9  ;;  %v7385_v9 = vld [vmem:[%s13689_s4 + $0x78] sm:$0xff] }
0x1341   :  { %6308 = vmatmul.msk.f32.gmra.mxu1 %vm15463_vm9, %v7375_v23  ;;  %vm15467_vm9 = vmmov %vm15458_vm1 }
0x1349   :  { %6309 = vmatmul.msk.f32.gmra.mxu1 %vm15464_vm10, %v7376_v33  ;;  %vm15468_vm10 = vmmov %vm15458_vm1 }
0x1351   :  { %6310 = vmatmul.msk.f32.gmra.mxu1 %vm15465_vm2, %v7377_v2  ;;  %vm15469_vm2 = vmmov %vm15458_vm1 }
0x1359   :  { %6311 = vmatmul.msk.f32.gmra.mxu1 %vm15466_vm7, %v7378_v55  ;;  %vm15470_vm7 = vmmov %vm15458_vm1  ;;  %v7386_v55 = vld [vmem:[%s13689_s4 + $0x80] sm:$0xff] }
0x1361   :  { %6312 = vmatmul.msk.f32.gmra.mxu1 %vm15458_vm1, %v7379_v62 }
0x1369   :  { %6313 = vmatmul.msk.f32.gmra.mxu1 %vm15467_vm9, %v7380_v16  ;;  %vm15471_vm9 = vmmov %vm15458_vm1 }
0x1371   :  { %6314 = vmatmul.msk.f32.gmra.mxu1 %vm15468_vm10, %v7381_v17  ;;  %vm15472_vm10 = vmmov %vm15458_vm1 }
0x1379   :  { %6315 = vmatmul.msk.f32.gmra.mxu1 %vm15469_vm2, %v7382_v36  ;;  %vm15474_vm2 = vmmov %vm15458_vm1 }
0x1381   :  { %6316 = vmatmul.msk.f32.gmra.mxu1 %vm15470_vm7, %v7383_v60  ;;  %v7387_v60 = vld [vmem:[%s13689_s4 + $0x88] sm:$0xff] }
0x1389   :  { %6317 = vmatmul.msk.f32.gmra.mxu1 %vm15458_vm1, %v7384_v21 }
0x1391   :  { %6318 = vmatmul.msk.f32.gmra.mxu1 %vm15471_vm9, %v7385_v9 }
0x1396   :  { %v4847_v23 = vpop.f32.mrf.mxu1 }
0x1397   :  { %v4994_v33 = vsub.f32 %v12673_v43, %v4847_v23  ;;  %v15475_v43 = vld [vmem:[#allocation130_spill] sm:$0xff] }
0x1398   :  { %vm15476_vm7 = vcmp.eq.f32.partialorder %v15475_v43, 0.0  ;;  %v7389_v43 = vld [vmem:[%s13689_s4 + $0x98] sm:$0xff] }
0x1399   :  { %v5043_v2 = vmul.f32 1.442695, %v4994_v33  ;;  %6319 = vmatmul.msk.f32.gmra.mxu1 %vm15472_vm10, %v7386_v55  ;;  %v15478_v55 = vld [vmem:[#allocation133_spill] sm:$0xff]  ;;  %vm15481_vm10 = vmmov %vm15458_vm1 }
0x139a   :  { %vm15479_vm9 = vcmp.eq.f32.partialorder %v15478_v55, 0.0  ;;  %v7390_v55 = vld [vmem:[%s13689_s4 + $0xa0] sm:$0xff] }
0x139b   :  { %6961 = vpow2.f32 %v5043_v2  ;;  %v7388_v2 = vld [vmem:[%s13689_s4 + $0x90] sm:$0xff] }
0x139e   :  { %v4850_v62 = vpop.f32.mrf.mxu1 }
0x139f   :  { %v4995_v16 = vsub.f32 %v12667_v14, %v4850_v62 }
0x13a1   :  { %v12974_v17 = vpop.eup %6961  ;;  %v5045_v36 = vmul.f32 1.442695, %v4995_v16  ;;  %6320 = vmatmul.msk.f32.gmra.mxu1 %vm15474_vm2, %v7387_v60 }
0x13a2   :  { %15473 = vst [vmem:[#allocation183_spill] sm:$0xff] %v12974_v17  ;;  %v5141_v21 = vsel %vm15476_vm7, 0.0, %v12974_v17  ;;  %vm15485_vm7 = vmmov %vm15458_vm1 }
0x13a3   :  { %6963 = vpow2.f32 %v5045_v36  ;;  %5192 = vperm.xlu1 %6459, %v5141_v21   ;;  %v15482_v21 = vld [vmem:[#allocation135_spill] sm:$0xff] }
0x13a4   :  { %vm15483_vm2 = vcmp.eq.f32.partialorder %v15482_v21, 0.0  ;;  %v7391_v21 = vld [vmem:[%s13689_s4 + $0xa8] sm:$0xff] }
0x13a6   :  { %v4853_v9 = vpop.f32.mrf.mxu1 }
0x13a7   :  { %v4996_v23 = vsub.f32 %v12661_v44, %v4853_v9 }
0x13a9   :  { %v12984_v33 = vpop.eup %6963  ;;  %v5047_v14 = vmul.f32 1.442695, %v4996_v23  ;;  %6321 = vmatmul.msk.f32.gmra.mxu1 %vm15458_vm1, %v7388_v2 }
0x13aa   :  { %15477 = vst [vmem:[#allocation184_spill] sm:$0xff] %v12984_v33  ;;  %v5142_v62 = vsel %vm15479_vm9, 0.0, %v12984_v33  ;;  %vm15489_vm9 = vmmov %vm15485_vm7 }
0x13ab   :  { %6965 = vpow2.f32 %v5047_v14  ;;  %5197 = vperm.xlu2 %6461, %v5142_v62   ;;  %v15486_v62 = vld [vmem:[#allocation124_spill] sm:$0xff] }
0x13ac   :  { %vm15487_vm1 = vcmp.eq.f32.partialorder %v15486_v62, 0.0  ;;  %v7392_v62 = vld [vmem:[%s13689_s4 + $0xb0] sm:$0xff] }
0x13ae   :  { %v4856_v16 = vpop.f32.mrf.mxu1 }
0x13af   :  { %v4997_v36 = vsub.f32 %v12655_v40, %v4856_v16 }
0x13b1   :  { %v12994_v60 = vpop.eup %6965  ;;  %v5049_v44 = vmul.f32 1.442695, %v4997_v36  ;;  %6322 = vmatmul.msk.f32.gmra.mxu1 %vm15481_vm10, %v7389_v43 }
0x13b2   :  { %15480 = vst [vmem:[#allocation185_spill] sm:$0xff] %v12994_v60  ;;  %v5143_v9 = vsel %vm15483_vm2, 0.0, %v12994_v60  ;;  %vm15493_vm2 = vmmov %vm15485_vm7 }
0x13b3   :  { %6967 = vpow2.f32 %v5049_v44  ;;  %5202 = vperm.xlu0 %6460, %v5143_v9   ;;  %v15490_v9 = vld [vmem:[#allocation132_spill] sm:$0xff] }
0x13b4   :  { %vm15491_vm10 = vcmp.eq.f32.partialorder %v15490_v9, 0.0  ;;  %v7393_v9 = vld [vmem:[%s13689_s4 + $0xb8] sm:$0xff] }
0x13b6   :  { %v4859_v23 = vpop.f32.mrf.mxu1 }
0x13b7   :  { %v4998_v14 = vsub.f32 %v12650_v46, %v4859_v23 }
0x13b9   :  { %v13004_v2 = vpop.eup %6967  ;;  %v5051_v40 = vmul.f32 1.442695, %v4998_v14  ;;  %6323 = vmatmul.msk.f32.gmra.mxu1 %vm15485_vm7, %v7390_v55 }
0x13ba   :  { %15484 = vst [vmem:[#allocation48_spill] sm:$0xff] %v13004_v2  ;;  %v5144_v16 = vsel %vm15487_vm1, 0.0, %v13004_v2  ;;  %vm15497_vm1 = vmmov %vm15493_vm2  ;;  %v7415_v2 = vld [vmem:[%s13689_s4 + $0x168] sm:$0xff] }
0x13bb   :  { %6969 = vpow2.f32 %v5051_v40  ;;  %5207 = vperm.xlu1 %6459, %v5144_v16   ;;  %v15494_v16 = vld [vmem:[#allocation126_spill] sm:$0xff] }
0x13bc   :  { %vm15495_vm7 = vcmp.eq.f32.partialorder %v15494_v16, 0.0  ;;  %v7394_v16 = vld [vmem:[%s13689_s4 + $0xc0] sm:$0xff] }
0x13be   :  { %v4862_v36 = vpop.f32.mrf.mxu1 }
0x13bf   :  { %v4999_v44 = vsub.f32 %v12645_v5, %v4862_v36 }
0x13c1   :  { %v13014_v43 = vpop.eup %6969  ;;  %v5053_v46 = vmul.f32 1.442695, %v4999_v44  ;;  %6324 = vmatmul.msk.f32.gmra.mxu1 %vm15489_vm9, %v7391_v21 }
0x13c2   :  { %15488 = vst [vmem:[#allocation51_spill] sm:$0xff] %v13014_v43  ;;  %v5145_v23 = vsel %vm15491_vm10, 0.0, %v13014_v43  ;;  %vm15501_vm10 = vmmov %vm15497_vm1 }
0x13c3   :  { %6971 = vpow2.f32 %v5053_v46  ;;  %5212 = vperm.xlu0 %6460, %v5145_v23   ;;  %v15498_v23 = vld [vmem:[#allocation121_spill] sm:$0xff] }
0x13c4   :  { %vm15499_vm9 = vcmp.eq.f32.partialorder %v15498_v23, 0.0  ;;  %v7395_v23 = vld [vmem:[%s13689_s4 + $0xc8] sm:$0xff] }
0x13c6   :  { %v4865_v14 = vpop.f32.mrf.mxu1 }
0x13c7   :  { %v5000_v40 = vsub.f32 %v12639_v6, %v4865_v14 }
0x13c9   :  { %v13024_v55 = vpop.eup %6971  ;;  %v5055_v5 = vmul.f32 1.442695, %v5000_v40  ;;  %6325 = vmatmul.msk.f32.gmra.mxu1 %vm15493_vm2, %v7392_v62 }
0x13ca   :  { %15492 = vst [vmem:[#allocation89_spill] sm:$0xff] %v13024_v55  ;;  %v5146_v36 = vsel %vm15495_vm7, 0.0, %v13024_v55  ;;  %vm15504_vm7 = vmmov %vm15497_vm1  ;;  %v7416_v55 = vld [vmem:[%s13689_s4 + $0x170] sm:$0xff] }
0x13cb   :  { %6973 = vpow2.f32 %v5055_v5  ;;  %5217 = vperm.xlu2 %6461, %v5146_v36   ;;  %v15502_v36 = vld [vmem:[#allocation128_spill] sm:$0xff] }
0x13cc   :  { %vm15503_vm2 = vcmp.eq.f32.partialorder %v15502_v36, 0.0  ;;  %v7396_v36 = vld [vmem:[%s13689_s4 + $0xd0] sm:$0xff] }
0x13ce   :  { %v4868_v44 = vpop.f32.mrf.mxu1 }
0x13cf   :  { %v5001_v46 = vsub.f32 %v12630_v28, %v4868_v44 }
0x13d1   :  { %v13034_v21 = vpop.eup %6973  ;;  %v5057_v6 = vmul.f32 1.442695, %v5001_v46  ;;  %6326 = vmatmul.msk.f32.gmra.mxu1 %vm15497_vm1, %v7393_v9 }
0x13d2   :  { %15496 = vst [vmem:[#allocation57_spill] sm:$0xff] %v13034_v21  ;;  %v5147_v14 = vsel %vm15499_vm9, 0.0, %v13034_v21  ;;  %vm15507_vm9 = vmmov %vm15504_vm7 }
0x13d3   :  { %6975 = vpow2.f32 %v5057_v6  ;;  %5222 = vperm.xlu1 %6459, %v5147_v14   ;;  %v15505_v14 = vld [vmem:[#allocation123_spill] sm:$0xff] }
0x13d4   :  { %vm15506_vm1 = vcmp.eq.f32.partialorder %v15505_v14, 0.0  ;;  %v7397_v14 = vld [vmem:[%s13689_s4 + $0xd8] sm:$0xff] }
0x13d6   :  { %v4871_v40 = vpop.f32.mrf.mxu1 }
0x13d7   :  { %v5002_v5 = vsub.f32 %v12625_v27, %v4871_v40 }
0x13d9   :  { %v13044_v62 = vpop.eup %6975  ;;  %v5059_v28 = vmul.f32 1.442695, %v5002_v5  ;;  %6327 = vmatmul.msk.f32.gmra.mxu1 %vm15501_vm10, %v7394_v16 }
0x13da   :  { %15500 = vst [vmem:[#allocation90_spill] sm:$0xff] %v13044_v62  ;;  %v5148_v44 = vsel %vm15503_vm2, 0.0, %v13044_v62  ;;  %vm15510_vm2 = vmmov %vm15504_vm7 }
0x13db   :  { %6977 = vpow2.f32 %v5059_v28  ;;  %5227 = vperm.xlu0 %6460, %v5148_v44   ;;  %v15508_v44 = vld [vmem:[#allocation119_spill] sm:$0xff] }
0x13dc   :  { %vm15509_vm10 = vcmp.eq.f32.partialorder %v15508_v44, 0.0  ;;  %v7398_v44 = vld [vmem:[%s13689_s4 + $0xe0] sm:$0xff] }
0x13de   :  { %v4874_v46 = vpop.f32.mrf.mxu1 }
0x13df   :  { %v5003_v6 = vsub.f32 %v12620_v58, %v4874_v46 }
0x13e1   :  { %v13054_v9 = vpop.eup %6977  ;;  %v5061_v27 = vmul.f32 1.442695, %v5003_v6  ;;  %6328 = vmatmul.msk.f32.gmra.mxu1 %vm15504_vm7, %v7395_v23 }
0x13e2   :  { %v5149_v40 = vsel %vm15506_vm1, 0.0, %v13054_v9  ;;  %vm15513_vm1 = vmmov %vm15510_vm2 }
0x13e3   :  { %6979 = vpow2.f32 %v5061_v27  ;;  %5232 = vperm.xlu2 %6461, %v5149_v40   ;;  %v15511_v40 = vld [vmem:[#allocation125_spill] sm:$0xff] }
0x13e4   :  { %vm15512_vm7 = vcmp.eq.f32.partialorder %v15511_v40, 0.0  ;;  %v7399_v40 = vld [vmem:[%s13689_s4 + $0xe8] sm:$0xff] }
0x13e6   :  { %v4877_v5 = vpop.f32.mrf.mxu1 }
0x13e7   :  { %v5004_v28 = vsub.f32 %v12614_v29, %v4877_v5 }
0x13e9   :  { %v13064_v16 = vpop.eup %6979  ;;  %v5063_v58 = vmul.f32 1.442695, %v5004_v28  ;;  %6329 = vmatmul.msk.f32.gmra.mxu1 %vm15507_vm9, %v7396_v36 }
0x13ea   :  { %v5150_v46 = vsel %vm15509_vm10, 0.0, %v13064_v16  ;;  %vm15516_vm10 = vmmov %vm15513_vm1 }
0x13eb   :  { %6981 = vpow2.f32 %v5063_v58  ;;  %5237 = vperm.xlu1 %6459, %v5150_v46   ;;  %v15514_v46 = vld [vmem:[#allocation120_spill] sm:$0xff] }
0x13ec   :  { %vm15515_vm9 = vcmp.eq.f32.partialorder %v15514_v46, 0.0  ;;  %v7400_v46 = vld [vmem:[%s13689_s4 + $0xf0] sm:$0xff] }
0x13ee   :  { %v4880_v6 = vpop.f32.mrf.mxu1 }
0x13ef   :  { %v5005_v27 = vsub.f32 %v12610_v56, %v4880_v6 }
0x13f1   :  { %v13074_v23 = vpop.eup %6981  ;;  %v5065_v29 = vmul.f32 1.442695, %v5005_v27  ;;  %6330 = vmatmul.msk.f32.gmra.mxu1 %vm15510_vm2, %v7397_v14 }
0x13f2   :  { %v5151_v5 = vsel %vm15512_vm7, 0.0, %v13074_v23  ;;  %vm15519_vm7 = vmmov %vm15513_vm1 }
0x13f3   :  { %6983 = vpow2.f32 %v5065_v29  ;;  %5242 = vperm.xlu0 %6460, %v5151_v5   ;;  %v15517_v5 = vld [vmem:[#allocation117_spill] sm:$0xff] }
0x13f4   :  { %vm15518_vm2 = vcmp.eq.f32.partialorder %v15517_v5, 0.0  ;;  %v7401_v5 = vld [vmem:[%s13689_s4 + $0xf8] sm:$0xff] }
0x13f6   :  { %v4883_v28 = vpop.f32.mrf.mxu1 }
0x13f7   :  { %v5006_v58 = vsub.f32 %v12604_v12, %v4883_v28 }
0x13f9   :  { %v13084_v36 = vpop.eup %6983  ;;  %v5067_v56 = vmul.f32 1.442695, %v5006_v58  ;;  %6331 = vmatmul.msk.f32.gmra.mxu1 %vm15513_vm1, %v7398_v44 }
0x13fa   :  { %v5152_v6 = vsel %vm15515_vm9, 0.0, %v13084_v36  ;;  %vm15522_vm9 = vmmov %vm15519_vm7 }
0x13fb   :  { %6985 = vpow2.f32 %v5067_v56  ;;  %5247 = vperm.xlu2 %6461, %v5152_v6   ;;  %v15520_v6 = vld [vmem:[#allocation122_spill] sm:$0xff] }
0x13fc   :  { %vm15521_vm1 = vcmp.eq.f32.partialorder %v15520_v6, 0.0 }
0x13fe   :  { %v4886_v27 = vpop.f32.mrf.mxu1 }
0x13ff   :  { %v5007_v29 = vsub.f32 %v12594_v42, %v4886_v27 }
0x1401   :  { %v13094_v14 = vpop.eup %6985  ;;  %v5069_v12 = vmul.f32 1.442695, %v5007_v29  ;;  %6332 = vmatmul.msk.f32.gmra.mxu1 %vm15516_vm10, %v7399_v40 }
0x1402   :  { %v5153_v28 = vsel %vm15518_vm2, 0.0, %v13094_v14  ;;  %vm15525_vm2 = vmmov %vm15519_vm7 }
0x1403   :  { %6987 = vpow2.f32 %v5069_v12  ;;  %5252 = vperm.xlu1 %6459, %v5153_v28   ;;  %v15523_v28 = vld [vmem:[#allocation118_spill] sm:$0xff] }
0x1404   :  { %vm15524_vm10 = vcmp.eq.f32.partialorder %v15523_v28, 0.0  ;;  %v7405_v28 = vld [vmem:[%s13689_s4 + $0x118] sm:$0xff] }
0x1406   :  { %v4889_v58 = vpop.f32.mrf.mxu1 }
0x1407   :  { %v5008_v56 = vsub.f32 %v12589_v26, %v4889_v58 }
0x1409   :  { %v13104_v44 = vpop.eup %6987  ;;  %v5071_v42 = vmul.f32 1.442695, %v5008_v56  ;;  %6333 = vmatmul.msk.f32.gmra.mxu1 %vm15519_vm7, %v7400_v46  ;;  %v15526_v46 = vld [vmem:[#allocation116_spill] sm:$0xff] }
0x140a   :  { %v5154_v27 = vsel %vm15521_vm1, 0.0, %v13104_v44  ;;  %vm15527_vm7 = vcmp.eq.f32.partialorder %v15526_v46, 0.0  ;;  %vm15528_vm1 = vmmov %vm15525_vm2 }
0x140b   :  { %6989 = vpow2.f32 %v5071_v42  ;;  %5257 = vperm.xlu0 %6460, %v5154_v27  }
0x140e   :  { %v4892_v29 = vpop.f32.mrf.mxu1 }
0x140f   :  { %v5009_v12 = vsub.f32 %v12585_v57, %v4892_v29  ;;  %v7402_v57 = vld [vmem:[%s13689_s4 + $0x100] sm:$0xff]  ;;  %v7403_v29 = vld [vmem:[%s13689_s4 + $0x108] sm:$0xff] }
0x1411   :  { %v13114_v40 = vpop.eup %6989  ;;  %v5073_v26 = vmul.f32 1.442695, %v5009_v12  ;;  %6334 = vmatmul.msk.f32.gmra.mxu1 %vm15522_vm9, %v7401_v5  ;;  %vm15529_vm9 = vmmov %vm15528_vm1 }
0x1412   :  { %v5155_v58 = vsel %vm15524_vm10, 0.0, %v13114_v40  ;;  %vm15530_vm10 = vmmov %vm15528_vm1 }
0x1413   :  { %6991 = vpow2.f32 %v5073_v26  ;;  %5262 = vperm.xlu2 %6461, %v5155_v58   ;;  %v7404_v26 = vld [vmem:[%s13689_s4 + $0x110] sm:$0xff] }
0x1416   :  { %v13123_v56 = vpop.f32.mrf.mxu1 }
0x1419   :  { %v13125_v42 = vpop.eup %6991  ;;  %6335 = vmatmul.msk.f32.gmra.mxu1 %vm15525_vm2, %v7402_v57  ;;  %vm15531_vm2 = vmmov %vm15528_vm1 }
0x141a   :  { %v5156_v6 = vsel %vm15527_vm7, 0.0, %v13125_v42  ;;  %vm15533_vm7 = vmmov %vm15528_vm1 }
0x141b   :  { %5267 = vperm.xlu1 %6459, %v5156_v6   ;;  %v7406_v6 = vld [vmem:[%s13689_s4 + $0x120] sm:$0xff] }
0x141e   :  { %v13134_v27 = vpop.f32.mrf.mxu1 }
0x1421   :  { %6336 = vmatmul.msk.f32.gmra.mxu1 %vm15528_vm1, %v7403_v29 }
0x1426   :  { %v13140_v12 = vpop.f32.mrf.mxu1 }
0x1429   :  { %6337 = vmatmul.msk.f32.gmra.mxu1 %vm15529_vm9, %v7404_v26  ;;  %vm15537_vm9 = vmmov %vm15531_vm2 }
0x142e   :  { %v13146_v5 = vpop.f32.mrf.mxu1 }
0x1431   :  { %6338 = vmatmul.msk.f32.gmra.mxu1 %vm15530_vm10, %v7405_v28  ;;  %v7407_v28 = vld [vmem:[%s13689_s4 + $0x128] sm:$0xff] }
0x1436   :  { %v4907_v58 = vpop.f32.mrf.mxu1 }
0x1437   :  { %v5014_v57 = vsub.f32 %v12797_v1, %v4907_v58  ;;  %v15534_v1 = vld [vmem:[#allocation166_spill] sm:$0xff] }
0x1438   :  { %vm15535_vm1 = vcmp.eq.f32.partialorder %v15534_v1, 0.0 }
0x1439   :  { %v5083_v46 = vmul.f32 1.442695, %v5014_v57  ;;  %6339 = vmatmul.msk.f32.gmra.mxu1 %vm15531_vm2, %v7406_v6 }
0x143b   :  { %6993 = vpow2.f32 %v5083_v46 }
0x143e   :  { %v4910_v29 = vpop.f32.mrf.mxu1 }
0x143f   :  { %v5015_v26 = vsub.f32 %v12791_v32, %v4910_v29  ;;  %v7408_v29 = vld [vmem:[%s13689_s4 + $0x130] sm:$0xff] }
0x1441   :  { %v13158_v17 = vpop.eup %6993  ;;  %v5085_v33 = vmul.f32 1.442695, %v5015_v26  ;;  %6340 = vmatmul.msk.f32.gmra.mxu1 %vm15533_vm7, %v7407_v28  ;;  %v15538_v26 = vld [vmem:[#allocation159_spill] sm:$0xff] }
0x1442   :  { %15532 = vst [vmem:[#allocation85_spill] sm:$0xff] %v13158_v17  ;;  %v5161_v58 = vsel %vm15535_vm1, 0.0, %v13158_v17  ;;  %vm15539_vm10 = vcmp.eq.f32.partialorder %v15538_v26, 0.0  ;;  %vm15544_vm1 = vmmov %vm15531_vm2 }
0x1443   :  { %6995 = vpow2.f32 %v5085_v33  ;;  %5292 = vperm.xlu0 %6460, %v5161_v58  }
0x1446   :  { %v4913_v57 = vpop.f32.mrf.mxu1 }
0x1447   :  { %v5016_v46 = vsub.f32 %v12785_v47, %v4913_v57  ;;  %v7409_v57 = vld [vmem:[%s13689_s4 + $0x138] sm:$0xff] }
0x1449   :  { %v13168_v6 = vpop.eup %6995  ;;  %v5087_v32 = vmul.f32 1.442695, %v5016_v46  ;;  %6341 = vmatmul.msk.f32.gmra.mxu1 %vm15537_vm9, %v7408_v29  ;;  %v15541_v46 = vld [vmem:[#allocation165_spill] sm:$0xff] }
0x144a   :  { %15536 = vst [vmem:[#allocation53_spill] sm:$0xff] %v13168_v6  ;;  %v5162_v28 = vsel %vm15539_vm10, 0.0, %v13168_v6  ;;  %vm15542_vm7 = vcmp.eq.f32.partialorder %v15541_v46, 0.0  ;;  %vm15548_vm10 = vmmov %vm15544_vm1 }
0x144b   :  { %6997 = vpow2.f32 %v5087_v32  ;;  %5297 = vperm.xlu1 %6459, %v5162_v28  }
0x144e   :  { %v4916_v33 = vpop.f32.mrf.mxu1 }
0x144f   :  { %v5017_v1 = vsub.f32 %v12780_v0, %v4916_v33  ;;  %v7410_v33 = vld [vmem:[%s13689_s4 + $0x140] sm:$0xff] }
0x1451   :  { %v13178_v58 = vpop.eup %6997  ;;  %v5089_v47 = vmul.f32 1.442695, %v5017_v1  ;;  %6342 = vmatmul.msk.f32.gmra.mxu1 %vm15531_vm2, %v7409_v57  ;;  %v15545_v1 = vld [vmem:[#allocation162_spill] sm:$0xff] }
0x1452   :  { %15540 = vst [vmem:[#allocation50_spill] sm:$0xff] %v13178_v58  ;;  %v5163_v29 = vsel %vm15542_vm7, 0.0, %v13178_v58  ;;  %vm15546_vm9 = vcmp.eq.f32.partialorder %v15545_v1, 0.0  ;;  %vm15552_vm7 = vmmov %vm15544_vm1 }
0x1453   :  { %6999 = vpow2.f32 %v5089_v47  ;;  %5302 = vperm.xlu2 %6461, %v5163_v29  }
0x1456   :  { %v4919_v32 = vpop.f32.mrf.mxu1 }
0x1457   :  { %v5018_v26 = vsub.f32 %v12775_v38, %v4919_v32  ;;  %v7411_v32 = vld [vmem:[%s13689_s4 + $0x148] sm:$0xff] }
0x1459   :  { %v13188_v28 = vpop.eup %6999  ;;  %v5091_v0 = vmul.f32 1.442695, %v5018_v26  ;;  %6343 = vmatmul.msk.f32.gmra.mxu1 %vm15544_vm1, %v7410_v33  ;;  %v15549_v26 = vld [vmem:[#allocation148_spill] sm:$0xff] }
0x145a   :  { %15543 = vst [vmem:[#allocation47_spill] sm:$0xff] %v13188_v28  ;;  %v5164_v57 = vsel %vm15546_vm9, 0.0, %v13188_v28  ;;  %vm15550_vm2 = vcmp.eq.f32.partialorder %v15549_v26, 0.0  ;;  %vm15556_vm9 = vmmov %vm15552_vm7 }
0x145b   :  { %7001 = vpow2.f32 %v5091_v0  ;;  %5307 = vperm.xlu0 %6460, %v5164_v57   ;;  %v13207_v0 = vpop.permute.xlu1 %5192 }
0x145e   :  { %v4922_v47 = vpop.f32.mrf.mxu1 }
0x145f   :  { %v5019_v46 = vsub.f32 %v12768_v18, %v4922_v47 }
0x1461   :  { %v13198_v29 = vpop.eup %7001  ;;  %v5093_v38 = vmul.f32 1.442695, %v5019_v46  ;;  %6344 = vmatmul.msk.f32.gmra.mxu1 %vm15548_vm10, %v7411_v32  ;;  %v7412_v46 = vld [vmem:[%s13689_s4 + $0x150] sm:$0xff]  ;;  %v15553_v32 = vld [vmem:[#allocation164_spill] sm:$0xff] }
0x1462   :  { %15547 = vst [vmem:[#allocation11_spill] sm:$0xff] %v13198_v29  ;;  %v5165_v33 = vsel %vm15550_vm2, 0.0, %v13198_v29  ;;  %vm15554_vm1 = vcmp.eq.f32.partialorder %v15553_v32, 0.0  ;;  %vm15560_vm2 = vmmov %vm15552_vm7 }
0x1463   :  { %7003 = vpow2.f32 %v5093_v38  ;;  %5312 = vperm.xlu1 %6459, %v5165_v33   ;;  %v13219_v38 = vpop.permute.xlu2 %5197  ;;  %v13221_v33 = vpop.permute.xlu1 %5207 }
0x1466   :  { %v4925_v1 = vpop.f32.mrf.mxu1 }
0x1467   :  { %v5020_v18 = vsub.f32 %v12762_v24, %v4925_v1  ;;  %v13223_v1 = vpop.permute.xlu0 %5202 }
0x1469   :  { %v13210_v57 = vpop.eup %7003  ;;  %v5095_v47 = vmul.f32 1.442695, %v5020_v18  ;;  %6345 = vmatmul.msk.f32.gmra.mxu1 %vm15552_vm7, %v7412_v46  ;;  %v7413_v46 = vld [vmem:[%s13689_s4 + $0x158] sm:$0xff] }
0x146a   :  { %15551 = vst [vmem:[#allocation12_spill] sm:$0xff] %v13210_v57  ;;  %v5166_v26 = vsel %vm15554_vm1, 0.0, %v13210_v57  ;;  %vm15564_vm1 = vmmov %vm15560_vm2 }
0x146b   :  { %7005 = vpow2.f32 %v5095_v47  ;;  %5317 = vperm.xlu2 %6461, %v5166_v26   ;;  %v15557_v47 = vld [vmem:[#allocation154_spill] sm:$0xff]  ;;  %v13235_v26 = vpop.permute.xlu2 %5217  ;;  %v13237_v58 = vpop.permute.xlu1 %5222 }
0x146c   :  { %vm15558_vm10 = vcmp.eq.f32.partialorder %v15557_v47, 0.0 }
0x146e   :  { %v4928_v24 = vpop.f32.mrf.mxu1 }
0x146f   :  { %v5021_v18 = vsub.f32 %v12758_v31, %v4928_v24  ;;  %v13239_v24 = vpop.permute.xlu0 %5212 }
0x1471   :  { %v13226_v17 = vpop.eup %7005  ;;  %v5097_v6 = vmul.f32 1.442695, %v5021_v18  ;;  %6346 = vmatmul.msk.f32.gmra.mxu1 %vm15556_vm9, %v7413_v46  ;;  %v7414_v46 = vld [vmem:[%s13689_s4 + $0x160] sm:$0xff] }
0x1472   :  { %15555 = vst [vmem:[#allocation13_spill] sm:$0xff] %v13226_v17  ;;  %v5167_v32 = vsel %vm15558_vm10, 0.0, %v13226_v17  ;;  %vm15567_vm10 = vmmov %vm15564_vm1 }
0x1473   :  { %7007 = vpow2.f32 %v5097_v6  ;;  %5322 = vperm.xlu0 %6460, %v5167_v32   ;;  %v15561_v6 = vld [vmem:[#allocation143_spill] sm:$0xff]  ;;  %v5233_v32 = vpop.permute.xlu2 %5232  ;;  %v5238_v57 = vpop.permute.xlu1 %5237 }
0x1474   :  { %vm15562_vm7 = vcmp.eq.f32.partialorder %v15561_v6, 0.0 }
0x1476   :  { %v4931_v31 = vpop.f32.mrf.mxu1 }
0x1477   :  { %v5022_v18 = vsub.f32 %v12754_v49, %v4931_v31  ;;  %v5228_v60 = vpop.permute.xlu0 %5227 }
0x1479   :  { %v13242_v28 = vpop.eup %7007  ;;  %v5099_v29 = vmul.f32 1.442695, %v5022_v18  ;;  %6347 = vmatmul.msk.f32.gmra.mxu1 %vm15560_vm2, %v7414_v46  ;;  %v15565_v46 = vld [vmem:[#allocation156_spill] sm:$0xff] }
0x147a   :  { %15559 = vst [vmem:[#allocation14_spill] sm:$0xff] %v13242_v28  ;;  %v5168_v47 = vsel %vm15562_vm7, 0.0, %v13242_v28  ;;  %vm15566_vm9 = vcmp.eq.f32.partialorder %v15565_v46, 0.0  ;;  %vm15570_vm7 = vmmov %vm15564_vm1 }
0x147b   :  { %7009 = vpow2.f32 %v5099_v29  ;;  %5327 = vperm.xlu1 %6459, %v5168_v47   ;;  %v5248_v6 = vpop.permute.xlu2 %5247  ;;  %v5253_v47 = vpop.permute.xlu1 %5252 }
0x147e   :  { %v4934_v17 = vpop.f32.mrf.mxu1 }
0x147f   :  { %v5023_v49 = vsub.f32 %v12748_v22, %v4934_v17  ;;  %v5243_v43 = vpop.permute.xlu0 %5242 }
0x1481   :  { %v13252_v31 = vpop.eup %7009  ;;  %v5101_v18 = vmul.f32 1.442695, %v5023_v49  ;;  %6348 = vmatmul.msk.f32.gmra.mxu1 %vm15564_vm1, %v7415_v2  ;;  %v15568_v2 = vld [vmem:[#allocation147_spill] sm:$0xff] }
0x1482   :  { %15563 = vst [vmem:[#allocation15_spill] sm:$0xff] %v13252_v31  ;;  %v5169_v29 = vsel %vm15566_vm9, 0.0, %v13252_v31  ;;  %vm15569_vm2 = vcmp.eq.f32.partialorder %v15568_v2, 0.0  ;;  %v7417_v2 = vld [vmem:[%s13689_s4 + $0x178] sm:$0xff]  ;;  %vm15573_vm9 = vmmov %vm15570_vm7 }
0x1483   :  { %7011 = vpow2.f32 %v5101_v18  ;;  %5332 = vperm.xlu2 %6461, %v5169_v29   ;;  %v5263_v46 = vpop.permute.xlu2 %5262 }
0x1484   :  { %v5449_v21 = vmul.f32 %v5263_v46, %v12316_v61  ;;  %v5447_v61 = vmul.f32 %v5253_v47, %v12292_v4  ;;  %v5445_v46 = vmul.f32 %v5243_v43, %v12268_v10  ;;  %v15574_v4 = vld [vmem:[#allocation129_spill] sm:$0xff]  ;;  %v5442_v10 = vmul.f32 %v5228_v60, %v12232_v50 }
0x1485   :  { %v5441_v47 = vmul.f32 %v13237_v58, %v12216_v11  ;;  %v5437_v50 = vmul.f32 %v13223_v1, %v12172_v25  ;;  %v5436_v11 = vmul.f32 %v13219_v38, %v12162_v7 }
0x1486   :  { %v4937_v28 = vpop.f32.mrf.mxu1 }
0x1487   :  { %v5024_v22 = vsub.f32 %v12743_v51, %v4937_v28  ;;  %v5258_v28 = vpop.permute.xlu0 %5257 }
0x1489   :  { %v13262_v17 = vpop.eup %7011  ;;  %v5103_v49 = vmul.f32 1.442695, %v5024_v22  ;;  %6349 = vmatmul.msk.f32.gmra.mxu1 %vm15567_vm10, %v7416_v55  ;;  %vm15575_vm10 = vcmp.eq.f32.partialorder %v15574_v4, 0.0 }
0x148a   :  { %v5170_v18 = vsel %vm15569_vm2, 0.0, %v13262_v17 }
0x148b   :  { %7013 = vpow2.f32 %v5103_v49  ;;  %5337 = vperm.xlu0 %6460, %v5170_v18   ;;  %v5448_v49 = vmul.f32 %v5258_v28, %v12304_v30  ;;  %v7418_v30 = vld [vmem:[%s13689_s4 + $0x180] sm:$0xff] }
0x148d   :  { %v5268_v29 = vpop.permute.xlu1 %5267 }
0x148e   :  { %v5450_v31 = vmul.f32 %v5268_v29, %v12328_v15  ;;  %v4940_v51 = vpop.f32.mrf.mxu1  ;;  %v15571_v15 = vld [vmem:[#allocation127_spill] sm:$0xff] }
0x148f   :  { %v5025_v22 = vsub.f32 %v12739_v52, %v4940_v51  ;;  %vm15572_vm1 = vcmp.eq.f32.partialorder %v15571_v15, 0.0  ;;  %v5446_v52 = vmul.f32 %v5248_v6, %v12280_v37  ;;  %v5443_v6 = vmul.f32 %v5233_v32, %v12244_v3 }
0x1490   :  { %5484 = vmatpush.msra.mxu3 %v5450_v31  ;;  %v5438_v3 = vmul.f32 %v13221_v33, %v12182_v41  ;;  %v13324_v41 = vld [vmem:[%s13688_s3] sm:$0xff] }
0x1491   :  { %v13274_v62 = vpop.eup %7013  ;;  %v5105_v55 = vmul.f32 1.442695, %v5025_v22  ;;  %6350 = vmatmul.msk.f32.gmra.mxu1 %vm15570_vm7, %v7417_v2 }
0x1492   :  { %5485 = vmatpush.msra.mxu3 %v5449_v21  ;;  %v5171_v18 = vsel %vm15572_vm1, 0.0, %v13274_v62  ;;  %v5444_v21 = vmul.f32 %v5238_v57, %v12256_v45  ;;  %v5440_v45 = vmul.f32 %v13235_v26, %v12206_v8  ;;  %v5439_v57 = vmul.f32 %v13239_v24, %v12194_v54  ;;  %v15576_v24 = vld [vmem:[#allocation170_spill] sm:$0xff] }
0x1493   :  { %7015 = vpow2.f32 %v5105_v55  ;;  %5342 = vperm.xlu1 %6459, %v5171_v18   ;;  %v5435_v8 = vmul.f32 %v13207_v0, %v12152_v53  ;;  %vm15577_vm2 = vcmp.eq.f32.partialorder %v15576_v24, 0.0 }
0x1494   :  { %5486 = vmatpush.msra.mxu3 %v5448_v49  ;;  %v15578_v49 = vld [vmem:[#allocation163_spill] sm:$0xff] }
0x1495   :  { %vm15579_vm7 = vcmp.eq.f32.partialorder %v15578_v49, 0.0 }
0x1496   :  { %v13286_v31 = vpop.f32.mrf.mxu1  ;;  %5487 = vmatpush.msra.mxu3 %v5447_v61 }
0x1498   :  { %5488 = vmatpush.msra.mxu3 %v5446_v52 }
0x1499   :  { %v13289_v29 = vpop.eup %7015  ;;  %6351 = vmatmul.msk.f32.gmra.mxu1 %vm15573_vm9, %v7418_v30  ;;  %v15580_v30 = vld [vmem:[#allocation155_spill] sm:$0xff] }
0x149a   :  { %5489 = vmatpush.msra.mxu3 %v5445_v46  ;;  %v5172_v37 = vsel %vm15575_vm10, 0.0, %v13289_v29  ;;  %vm15581_vm1 = vcmp.eq.f32.partialorder %v15580_v30, 0.0 }
0x149b   :  { %5347 = vperm.xlu2 %6461, %v5172_v37  }
0x149c   :  { %5490 = vmatpush.msra.mxu3 %v5444_v21 }
0x149e   :  { %v13301_v43 = vpop.f32.mrf.mxu1  ;;  %5491 = vmatpush.msra.mxu3 %v5443_v6 }
0x14a0   :  { %5492 = vmatpush.msra.mxu3 %v5442_v10 }
0x14a2   :  { %5493 = vmatpush.msra.mxu3 %v5441_v47 }
0x14a4   :  { %5494 = vmatpush.msra.mxu3 %v5440_v45  ;;  %v15582_v45 = vld [vmem:[#allocation152_spill] sm:$0xff] }
0x14a5   :  { %vm15583_vm9 = vcmp.eq.f32.partialorder %v15582_v45, 0.0  ;;  %v15591_v45 = vld [vmem:[#allocation105_spill] sm:$0xff] }
0x14a6   :  { %v13311_v32 = vpop.f32.mrf.mxu1  ;;  %5495 = vmatpush.msra.mxu3 %v5439_v57 }
0x14a8   :  { %5496 = vmatpush.msra.mxu3 %v5438_v3 }
0x14aa   :  { %5497 = vmatpush.msra.mxu3 %v5437_v50 }
0x14ac   :  { %5498 = vmatpush.msra.mxu3 %v5436_v11 }
0x14ad   :  { %v13340_v28 = vpop.permute.xlu2 %5302 }
0x14ae   :  { %v13319_v54 = vpop.f32.mrf.mxu1  ;;  %5499 = vmatpush.msra.mxu3 %v5435_v8  ;;  %v15584_v8 = vld [vmem:[#allocation153_spill] sm:$0xff] }
0x14af   :  { %5500 = vmatmul.f32.vlgmr.msra.gmra.mxu3 %v13324_v41 }
0x14b5   :  { %v13356_v21 = vpop.permute.xlu0 %5292 }
0x14b6   :  { %v13327_v25 = vpop.f32.mrf.mxu1 }
0x14bd   :  { %v13358_v4 = vpop.permute.xlu1 %5297 }
0x14be   :  { %v13329_v60 = vpop.f32.mrf.mxu1 }
0x14c5   :  { %v13348_v15 = vpop.permute.xlu2 %5317 }
0x14c6   :  { %v13331_v7 = vpop.f32.mrf.mxu1 }
0x14cd   :  { %v13366_v3 = vpop.permute.xlu0 %5307 }
0x14ce   :  { %v4964_v58 = vpop.f32.mrf.mxu1 }
0x14cf   :  { %v5033_v53 = vsub.f32 %v12846_v39, %v4964_v58 }
0x14d1   :  { %v5121_v0 = vmul.f32 1.442695, %v5033_v53 }
0x14d3   :  { %7017 = vpow2.f32 %v5121_v0 }
0x14d5   :  { %v5313_v50 = vpop.permute.xlu1 %5312 }
0x14d6   :  { %v4967_v38 = vpop.f32.mrf.mxu1 }
0x14d7   :  { %v5034_v33 = vsub.f32 %v12842_v19, %v4967_v38 }
0x14d9   :  { %v13335_v1 = vpop.eup %7017  ;;  %v5123_v26 = vmul.f32 1.442695, %v5034_v33  ;;  %v15585_v33 = vld [vmem:[#allocation167_spill] sm:$0xff] }
0x14da   :  { %v5180_v51 = vsel %vm15577_vm2, 0.0, %v13335_v1  ;;  %vm15586_vm10 = vcmp.eq.f32.partialorder %v15585_v33, 0.0  ;;  %v15595_v33 = vld [vmem:[#allocation145_spill] sm:$0xff] }
0x14db   :  { %7019 = vpow2.f32 %v5123_v26  ;;  %5387 = vperm.xlu1 %6459, %v5180_v51  }
0x14dd   :  { %v5333_v37 = vpop.permute.xlu2 %5332 }
0x14de   :  { %v4970_v22 = vpop.f32.mrf.mxu1 }
0x14df   :  { %v5035_v55 = vsub.f32 %v12838_v35, %v4970_v22 }
0x14e1   :  { %v13343_v39 = vpop.eup %7019  ;;  %v5125_v2 = vmul.f32 1.442695, %v5035_v55 }
0x14e2   :  { %v5181_v19 = vsel %vm15579_vm7, 0.0, %v13343_v39  ;;  %vm15596_vm7 = vcmp.eq.f32.partialorder %v15595_v33, 0.0 }
0x14e3   :  { %7021 = vpow2.f32 %v5125_v2  ;;  %5392 = vperm.xlu2 %6461, %v5181_v19   ;;  %v15587_v19 = vld [vmem:[#allocation158_spill] sm:$0xff] }
0x14e4   :  { %vm15588_vm2 = vcmp.eq.f32.partialorder %v15587_v19, 0.0 }
0x14e5   :  { %v5323_v24 = vpop.permute.xlu0 %5322 }
0x14e6   :  { %v4973_v18 = vpop.f32.mrf.mxu1 }
0x14e7   :  { %v5036_v61 = vsub.f32 %v12834_v63, %v4973_v18 }
0x14e9   :  { %v13351_v52 = vpop.eup %7021  ;;  %v5127_v46 = vmul.f32 1.442695, %v5036_v61 }
0x14ea   :  { %v5182_v35 = vsel %vm15581_vm1, 0.0, %v13351_v52 }
0x14eb   :  { %7023 = vpow2.f32 %v5127_v46  ;;  %5397 = vperm.xlu0 %6460, %v5182_v35   ;;  %v15589_v35 = vld [vmem:[#allocation151_spill] sm:$0xff] }
0x14ed   :  { %v5328_v51 = vpop.permute.xlu1 %5327 }
0x14ee   :  { %v4976_v6 = vpop.f32.mrf.mxu1 }
0x14ef   :  { %v5037_v10 = vsub.f32 %v12830_v48, %v4976_v6 }
0x14f1   :  { %v13361_v47 = vpop.eup %7023  ;;  %v5129_v63 = vmul.f32 1.442695, %v5037_v10 }
0x14f2   :  { %v5183_v57 = vsel %vm15583_vm9, 0.0, %v13361_v47 }
0x14f3   :  { %7025 = vpow2.f32 %v5129_v63  ;;  %5402 = vperm.xlu1 %6459, %v5183_v57   ;;  %v15590_v63 = vld [vmem:[#allocation104_spill] sm:$0xff]  ;;  %v5013_v57 = vsub.f32 %v15591_v45, %v13146_v5 }
0x14f5   :  { %v5348_v11 = vpop.permute.xlu2 %5347  ;;  %v5081_v5 = vmul.f32 1.442695, %v5013_v57  ;;  %v15604_v57 = vld [vmem:[#allocation140_spill] sm:$0xff] }
0x14f6   :  { %v5466_v58 = vmul.f32 %v5348_v11, %v15584_v8  ;;  %v4979_v53 = vpop.f32.mrf.mxu1  ;;  %v15592_v11 = vld [vmem:[#allocation149_spill] sm:$0xff]  ;;  %v15593_v8 = vld [vmem:[#allocation36_spill] sm:$0xff] }
0x14f7   :  { %v5038_v0 = vsub.f32 %v12826_v13, %v4979_v53  ;;  %v5012_v13 = vsub.f32 %v12865_v59, %v13140_v12 }
0x14f8   :  { %5504 = vmatpush.msrb.mxu3 %v5466_v58  ;;  %v5030_v58 = vsub.f32 %v15593_v8, %v13327_v25 }
0x14f9   :  { %v13370_v48 = vpop.eup %7025  ;;  %v5131_v38 = vmul.f32 1.442695, %v5038_v0  ;;  %v5079_v61 = vmul.f32 1.442695, %v5012_v13  ;;  %v15594_v0 = vld [vmem:[#allocation146_spill] sm:$0xff] }
0x14fa   :  { %v5184_v26 = vsel %vm15586_vm10, 0.0, %v13370_v48  ;;  %v5115_v13 = vmul.f32 1.442695, %v5030_v58 }
0x14fb   :  { %7027 = vpow2.f32 %v5131_v38  ;;  %5407 = vperm.xlu2 %6461, %v5184_v26   ;;  %v5463_v38 = vmul.f32 %v5333_v37, %v15594_v0 }
0x14fd   :  { %v5338_v46 = vpop.permute.xlu0 %5337 }
0x14fe   :  { %v4982_v22 = vpop.f32.mrf.mxu1  ;;  %v5464_v59 = vmul.f32 %v5338_v46, %v15592_v11  ;;  %v15600_v46 = vld [vmem:[#allocation38_spill] sm:$0xff]  ;;  %v5459_v11 = vmul.f32 %v5313_v50, %v15604_v57  ;;  %v15622_v57 = vld [vmem:[#allocation177_spill] sm:$0xff] }
0x14ff   :  { %v5039_v55 = vsub.f32 %v12822_v34, %v4982_v22  ;;  %v15597_v22 = vld [vmem:[#allocation144_spill] sm:$0xff]  ;;  %v15610_v50 = vld [vmem:[#allocation138_spill] sm:$0xff] }
0x1501   :  { %v13376_v2 = vpop.eup %7027  ;;  %v5133_v49 = vmul.f32 1.442695, %v5039_v55  ;;  %v5462_v55 = vmul.f32 %v5328_v51, %v15597_v22  ;;  %v15602_v51 = vld [vmem:[#allocation10_spill] sm:$0xff]  ;;  %v15611_v22 = vld [vmem:[#allocation180_spill] sm:$0xff] }
0x1502   :  { %v5185_v18 = vsel %vm15588_vm2, 0.0, %v13376_v2 }
0x1503   :  { %7029 = vpow2.f32 %v5133_v49  ;;  %5412 = vperm.xlu0 %6460, %v5185_v18   ;;  %v15598_v49 = vld [vmem:[#allocation142_spill] sm:$0xff] }
0x1504   :  { %7031 = vpow2.f32 %v5079_v61  ;;  %v5461_v19 = vmul.f32 %v5323_v24, %v15598_v49  ;;  %v15599_v61 = vld [vmem:[#allocation22_spill] sm:$0xff]  ;;  %v5031_v24 = vsub.f32 %v15602_v51, %v13329_v60  ;;  %v15609_v60 = vld [vmem:[#allocation139_spill] sm:$0xff] }
0x1505   :  { %v5343_v30 = vpop.permute.xlu1 %5342 }
0x1506   :  { %v5465_v6 = vmul.f32 %v5343_v30, %v15589_v35  ;;  %v4985_v10 = vpop.f32.mrf.mxu1  ;;  %v5028_v30 = vsub.f32 %v15600_v46, %v13311_v32  ;;  %v15601_v35 = vld [vmem:[#allocation141_spill] sm:$0xff]  ;;  %v15616_v46 = vld [vmem:[#allocation136_spill] sm:$0xff] }
0x1507   :  { %v5040_v34 = vsub.f32 %v15590_v63, %v4985_v10 }
0x1508   :  { %5505 = vmatpush.msrb.mxu3 %v5465_v6  ;;  %v5460_v6 = vmul.f32 %v13348_v15, %v15601_v35  ;;  %v15607_v15 = vld [vmem:[#allocation160_spill] sm:$0xff]  ;;  %v5111_v58 = vmul.f32 1.442695, %v5028_v30  ;;  %v15619_v35 = vld [vmem:[#allocation150_spill] sm:$0xff] }
0x1509   :  { %v13388_v12 = vpop.eup %7029  ;;  %v5135_v53 = vmul.f32 1.442695, %v5040_v34  ;;  %v15603_v34 = vld [vmem:[#allocation9_spill] sm:$0xff]  ;;  %vm15608_vm9 = vcmp.eq.f32.partialorder %v15607_v15, 0.0  ;;  %v15625_v15 = vld [vmem:[#allocation171_spill] sm:$0xff] }
0x150a   :  { %5506 = vmatpush.msrb.mxu3 %v5464_v59  ;;  %v5186_v26 = vsel %vm15596_vm7, 0.0, %v13388_v12  ;;  %v13398_v25 = vpop.eup %7031  ;;  %v5032_v45 = vsub.f32 %v15603_v34, %v13331_v7  ;;  %v15605_v59 = vld [vmem:[#allocation173_spill] sm:$0xff]  ;;  %v5117_v7 = vmul.f32 1.442695, %v5031_v24  ;;  %vm15620_vm7 = vcmp.eq.f32.partialorder %v15619_v35, 0.0  ;;  %v15621_v34 = vld [vmem:[#allocation84_spill] sm:$0xff] }
0x150b   :  { %7033 = vpow2.f32 %v5135_v53  ;;  %5417 = vperm.xlu1 %6459, %v5186_v26   ;;  %vm15606_vm1 = vcmp.eq.f32.partialorder %v15605_v59, 0.0  ;;  %v5458_v53 = vmul.f32 %v13366_v3, %v15609_v60  ;;  %v15623_v59 = vld [vmem:[#allocation178_spill] sm:$0xff] }
0x150c   :  { %5507 = vmatpush.msrb.mxu3 %v5463_v38  ;;  %7035 = vpow2.f32 %v5081_v5  ;;  %v5159_v32 = vsel %vm15606_vm1, 0.0, %v13398_v25  ;;  %v5457_v38 = vmul.f32 %v13340_v28, %v15610_v50  ;;  %v5119_v33 = vmul.f32 1.442695, %v5032_v45 }
0x150d   :  { %7037 = vpow2.f32 %v5115_v13  ;;  %v15612_v13 = vld [vmem:[#allocation137_spill] sm:$0xff]  ;;  %v5027_v45 = vsub.f32 %v15621_v34, %v13301_v43  ;;  %vm15624_vm1 = vcmp.eq.f32.partialorder %v15623_v59, 0.0 }
0x150e   :  { %v4988_v18 = vpop.f32.mrf.mxu1  ;;  %5508 = vmatpush.msrb.mxu3 %v5462_v55  ;;  %v5010_v55 = vsub.f32 %v15611_v22, %v13123_v56  ;;  %v5456_v49 = vmul.f32 %v13358_v4, %v15612_v13  ;;  %v5455_v56 = vmul.f32 %v13356_v21, %v15616_v46  ;;  %v15617_v4 = vld [vmem:[#allocation175_spill] sm:$0xff]  ;;  %v15638_v46 = vld [vmem:[#allocation176_spill] sm:$0xff] }
0x150f   :  { %v5041_v37 = vsub.f32 %v15599_v61, %v4988_v18  ;;  %v15614_v61 = vld [vmem:[#allocation168_spill] sm:$0xff]  ;;  %vm15618_vm2 = vcmp.eq.f32.partialorder %v15617_v4, 0.0  ;;  %v5109_v43 = vmul.f32 1.442695, %v5027_v45 }
0x1510   :  { %5509 = vmatpush.msrb.mxu3 %v5461_v19  ;;  %v15613_v19 = vld [vmem:[#allocation34_spill] sm:$0xff]  ;;  %vm15615_vm10 = vcmp.eq.f32.partialorder %v15614_v61, 0.0  ;;  %v15636_v61 = vld [vmem:[#allocation179_spill] sm:$0xff] }
0x1511   :  { %v13405_v10 = vpop.eup %7033  ;;  %v5137_v63 = vmul.f32 1.442695, %v5041_v37  ;;  %v5011_v18 = vsub.f32 %v15613_v19, %v13134_v27 }
0x1512   :  { %5510 = vmatpush.msrb.mxu3 %v5460_v6  ;;  %v5187_v8 = vsel %vm15608_vm9, 0.0, %v13405_v10  ;;  %v13420_v0 = vpop.eup %7035  ;;  %vm15626_vm9 = vcmp.eq.f32.partialorder %v15625_v15, 0.0 }
0x1513   :  { %7039 = vpow2.f32 %v5137_v63  ;;  %5282 = vperm.xlu1 %6459, %v5159_v32   ;;  %5422 = vperm.xlu2 %6461, %v5187_v8   ;;  %v13424_v5 = vpop.eup %7037  ;;  %v5160_v37 = vsel %vm15615_vm10, 0.0, %v13420_v0  ;;  %v5077_v24 = vmul.f32 1.442695, %v5011_v18 }
0x1514   :  { %5511 = vmatpush.msrb.mxu3 %v5459_v11  ;;  %7041 = vpow2.f32 %v5111_v58  ;;  %v5177_v30 = vsel %vm15618_vm2, 0.0, %v13424_v5  ;;  %v5029_v11 = vsub.f32 %v15622_v57, %v13319_v54  ;;  %v15627_v58 = vld [vmem:[#allocation169_spill] sm:$0xff]  ;;  %v15642_v57 = vld [vmem:[#allocation134_spill] sm:$0xff] }
0x1515   :  { %7043 = vpow2.f32 %v5117_v7  ;;  %vm15628_vm10 = vcmp.eq.f32.partialorder %v15627_v58, 0.0  ;;  %v15643_v58 = vld [vmem:[#allocation131_spill] sm:$0xff] }
0x1516   :  { %v4991_v26 = vpop.f32.mrf.mxu1  ;;  %5512 = vmatpush.msrb.mxu3 %v5458_v53  ;;  %7045 = vpow2.f32 %v5119_v33  ;;  %v5113_v7 = vmul.f32 1.442695, %v5029_v11 }
0x1517   :  { %v5042_v28 = vsub.f32 %v12897_v20, %v4991_v26  ;;  %v5075_v20 = vmul.f32 1.442695, %v5010_v55  ;;  %v15630_v26 = vld [vmem:[#allocation174_spill] sm:$0xff]  ;;  %v15632_v55 = vld [vmem:[#allocation49_spill] sm:$0xff] }
0x1518   :  { %5513 = vmatpush.msrb.mxu3 %v5457_v38  ;;  %v15629_v38 = vld [vmem:[#allocation182_spill] sm:$0xff]  ;;  %vm15631_vm2 = vcmp.eq.f32.partialorder %v15630_v26, 0.0 }
0x1519   :  { %v13430_v3 = vpop.eup %7039  ;;  %v5139_v6 = vmul.f32 1.442695, %v5042_v28  ;;  %7047 = vpow2.f32 %v5075_v20  ;;  %v5026_v33 = vsub.f32 %v15629_v38, %v13286_v31 }
0x151a   :  { %5514 = vmatpush.msrb.mxu3 %v5456_v49  ;;  %v5188_v27 = vsel %vm15620_vm7, 0.0, %v13430_v3  ;;  %v13446_v51 = vpop.eup %7041  ;;  %vm15633_vm7 = vcmp.eq.f32.partialorder %v15632_v55, 0.0  ;;  %v15634_v49 = vld [vmem:[#allocation172_spill] sm:$0xff] }
0x151b   :  { %5372 = vperm.xlu1 %6459, %v5177_v30   ;;  %5287 = vperm.xlu2 %6461, %v5160_v37   ;;  %v13448_v21 = vpop.eup %7043  ;;  %7049 = vpow2.f32 %v5139_v6  ;;  %v5175_v32 = vsel %vm15624_vm1, 0.0, %v13446_v51  ;;  %vm15635_vm1 = vcmp.eq.f32.partialorder %v15634_v49, 0.0  ;;  %v5107_v18 = vmul.f32 1.442695, %v5026_v33  ;;  %v15640_v30 = vld [vmem:[#allocation181_spill] sm:$0xff] }
0x151c   :  { %5427 = vperm.xlu0 %6460, %v5188_v27   ;;  %5515 = vmatpush.msrb.mxu3 %v5455_v56  ;;  %v13450_v63 = vpop.eup %7045  ;;  %7051 = vpow2.f32 %v5077_v24  ;;  %v5178_v8 = vsel %vm15626_vm9, 0.0, %v13448_v21  ;;  %vm15637_vm9 = vcmp.eq.f32.partialorder %v15636_v61, 0.0  ;;  %v15647_v61 = vld [vmem:[#allocation32_spill] sm:$0xff] }
0x151d   :  { %v5179_v60 = vsel %vm15628_vm10, 0.0, %v13450_v63  ;;  %7053 = vpow2.f32 %v5109_v43  ;;  %vm15639_vm10 = vcmp.eq.f32.partialorder %v15638_v46, 0.0  ;;  %v13506_v46 = vld [vmem:[%s13688_s3 + $0x8] sm:$0xff] }
0x151e   :  { %7055 = vpow2.f32 %v5113_v7 }
0x151f   :  { %v13465_v53 = vpop.eup %7047  ;;  %7057 = vpow2.f32 %v5107_v18 }
0x1520   :  { %v5157_v22 = vsel %vm15631_vm2, 0.0, %v13465_v53  ;;  %vm15641_vm2 = vcmp.eq.f32.partialorder %v15640_v30, 0.0 }
0x1521   :  { %v13467_v54 = vpop.eup %7049 }
0x1522   :  { %v13469_v50 = vpop.eup %7051  ;;  %v5189_v13 = vsel %vm15633_vm7, 0.0, %v13467_v54  ;;  %vm15667_vm7 = vcmask 64512  }
0x1523   :  { %5362 = vperm.xlu1 %6459, %v5175_v32   ;;  %5377 = vperm.xlu2 %6461, %v5178_v8   ;;  %v5158_v19 = vsel %vm15635_vm1, 0.0, %v13469_v50  ;;  %v13482_v28 = vpop.eup %7053 }
0x1524   :  { %5382 = vperm.xlu0 %6460, %v5179_v60   ;;  %v13484_v31 = vpop.eup %7055  ;;  %v5174_v37 = vsel %vm15637_vm9, 0.0, %v13482_v28 }
0x1525   :  { %v5176_v56 = vsel %vm15639_vm10, 0.0, %v13484_v31  ;;  %v13492_v4 = vpop.eup %7057 }
0x1526   :  { %v5173_v35 = vsel %vm15641_vm2, 0.0, %v13492_v4 }
0x152b   :  { %5272 = vperm.xlu2 %6461, %v5157_v22   ;;  %5432 = vperm.xlu1 %6459, %v5189_v13   ;;  %v15644_v22 = vld [vmem:[#allocation93_spill] sm:$0xff]  ;;  %v15645_v13 = vld [vmem:[#allocation87_spill] sm:$0xff] }
0x152c   :  { %5277 = vperm.xlu0 %6460, %v5158_v19   ;;  %v15646_v19 = vld [vmem:[#allocation81_spill] sm:$0xff] }
0x1533   :  { %5357 = vperm.xlu2 %6461, %v5174_v37  }
0x1534   :  { %5367 = vperm.xlu0 %6460, %v5176_v56   ;;  %v15648_v56 = vld [vmem:[#allocation103_spill] sm:$0xff] }
0x153c   :  { %5352 = vperm.xlu0 %6460, %v5173_v35   ;;  %v15649_v35 = vld [vmem:[#allocation52_spill] sm:$0xff] }
0x153d   :  { %v5393_v27 = vpop.permute.xlu2 %5392 }
0x154d   :  { %v5388_v6 = vpop.permute.xlu1 %5387 }
0x1555   :  { %v5408_v20 = vpop.permute.xlu2 %5407 }
0x155d   :  { %v5398_v32 = vpop.permute.xlu0 %5397 }
0x1565   :  { %v5403_v34 = vpop.permute.xlu1 %5402 }
0x156d   :  { %v5423_v24 = vpop.permute.xlu2 %5422 }
0x156e   :  { %v5481_v37 = vmul.f32 %v5423_v24, %v15647_v61  ;;  %v15658_v61 = vld [vmem:[#allocation26_spill] sm:$0xff] }
0x1575   :  { %v5288_v45 = vpop.permute.xlu2 %5287  ;;  %v5413_v8 = vpop.permute.xlu0 %5412 }
0x1576   :  { %v5454_v11 = vmul.f32 %v5288_v45, %v15642_v57  ;;  %v5479_v45 = vmul.f32 %v5413_v8, %v15649_v35  ;;  %v15650_v57 = vld [vmem:[#allocation101_spill] sm:$0xff]  ;;  %v15655_v8 = vld [vmem:[#allocation19_spill] sm:$0xff] }
0x1578   :  { %5516 = vmatpush.msrb.mxu3 %v5454_v11  ;;  %v5478_v11 = vmul.f32 %v5408_v20, %v15650_v57  ;;  %v15656_v20 = vld [vmem:[#allocation40_spill] sm:$0xff] }
0x157d   :  { %v5418_v59 = vpop.permute.xlu1 %5417  ;;  %v5378_v7 = vpop.permute.xlu2 %5377 }
0x157e   :  { %v5480_v30 = vmul.f32 %v5418_v59, %v15648_v56 }
0x1585   :  { %v5283_v15 = vpop.permute.xlu1 %5282  ;;  %v5273_v33 = vpop.permute.xlu2 %5272 }
0x1586   :  { %v5453_v60 = vmul.f32 %v5283_v15, %v15643_v58  ;;  %v5451_v49 = vmul.f32 %v5273_v33, %v15645_v13  ;;  %v15651_v58 = vld [vmem:[#allocation86_spill] sm:$0xff]  ;;  %v15653_v33 = vld [vmem:[#allocation43_spill] sm:$0xff] }
0x1587   :  { %v5477_v24 = vmul.f32 %v5403_v34, %v15651_v58  ;;  %v15719_v58 = vld [vmem:[#allocation29_spill] sm:$0xff] }
0x1588   :  { %5517 = vmatpush.msrb.mxu3 %v5453_v60  ;;  %v15652_v60 = vld [vmem:[#allocation100_spill] sm:$0xff] }
0x158d   :  { %v5373_v15 = vpop.permute.xlu1 %5372 }
0x158e   :  { %v5428_v43 = vpop.permute.xlu0 %5427 }
0x158f   :  { %v5482_v18 = vmul.f32 %v5428_v43, %v15646_v19  ;;  %v5476_v43 = vmul.f32 %v5398_v32, %v15652_v60  ;;  %v5472_v19 = vmul.f32 %v5378_v7, %v15656_v20  ;;  %v15662_v7 = vld [vmem:[#allocation42_spill] sm:$0xff]  ;;  %v15686_v20 = vld [vmem:[#allocation31_spill] sm:$0xff] }
0x1590   :  { %v15722_v60 = vld [vmem:[#allocation27_spill] sm:$0xff] }
0x1595   :  { %v5363_v13 = vpop.permute.xlu1 %5362 }
0x1596   :  { %v5383_v38 = vpop.permute.xlu0 %5382 }
0x159e   :  { %v5278_v26 = vpop.permute.xlu0 %5277 }
0x159f   :  { %v5452_v55 = vmul.f32 %v5278_v26, %v15644_v22  ;;  %v5475_v26 = vmul.f32 %v5393_v27, %v15653_v33  ;;  %v15654_v22 = vld [vmem:[#allocation30_spill] sm:$0xff]  ;;  %v7422_v33 = vld [vmem:[%s13688_s3 + $0x18] sm:$0xff] }
0x15a0   :  { %v15659_v27 = vld [vmem:[#allocation18_spill] sm:$0xff] }
0x15a1   :  { %5518 = vmatpush.msrb.mxu3 %v5452_v55  ;;  %v5474_v55 = vmul.f32 %v5388_v6, %v15654_v22  ;;  %v5469_v56 = vmul.f32 %v5363_v13, %v15659_v27  ;;  %v15677_v13 = vld [vmem:[#allocation107_spill] sm:$0xff]  ;;  %v15698_v27 = vld [vmem:[#allocation97_spill] sm:$0xff] }
0x15a2   :  { %v15735_v22 = vld [vmem:[#allocation83_spill] sm:$0xff] }
0x15a3   :  { %5519 = vmatpush.msrb.mxu3 %v5451_v49  ;;  %v5473_v49 = vmul.f32 %v5383_v38, %v15655_v8  ;;  %v15661_v38 = vld [vmem:[#allocation157_spill] sm:$0xff]  ;;  %v15680_v8 = vld [vmem:[#allocation35_spill] sm:$0xff] }
0x15a4   :  { %5520 = vmatmul.f32.vlgmr.msrb.gmra.mxu3 %v13506_v46 }
0x15a5   :  { %5524 = vmatpush.msra.mxu3 %v5482_v18  ;;  %v15657_v18 = vld [vmem:[#allocation28_spill] sm:$0xff] }
0x15a6   :  { %v5368_v59 = vpop.permute.xlu0 %5367  ;;  %v5471_v34 = vmul.f32 %v5373_v15, %v15657_v18  ;;  %v7421_v15 = vld [vmem:[%s13688_s3 + $0x10] sm:$0xff]  ;;  %v15689_v18 = vld [vmem:[#allocation95_spill] sm:$0xff]  ;;  %s7465_s3 = smov [#allocation6]  }
0x15a7   :  { %5525 = vmatpush.msra.mxu3 %v5481_v37  ;;  %v5470_v32 = vmul.f32 %v5368_v59, %v15658_v61  ;;  %v5358_v37 = vpop.permute.xlu2 %5357  ;;  %v15692_v61 = vld [vmem:[#allocation108_spill] sm:$0xff]  ;;  %s5673_s18 = sshll.u32 %s7465_s3, 4  ;;  %s5674_s18 = int_to_ptr.vmem [resolvable:$true] %s5673_s18 }
0x15a9   :  { %5526 = vmatpush.msra.mxu3 %v5480_v30  ;;  %v15660_v30 = vld [vmem:[#allocation24_spill] sm:$0xff] }
0x15aa   :  { %v5468_v35 = vmul.f32 %v5358_v37, %v15660_v30  ;;  %v15696_v37 = vld [vmem:[#allocation109_spill] sm:$0xff]  ;;  %v15703_v30 = vld [vmem:[#allocation14_spill] sm:$0xff] }
0x15ab   :  { %5527 = vmatpush.msra.mxu3 %v5479_v45  ;;  %v5433_v45 = vpop.permute.xlu1 %5432 }
0x15ad   :  { %5528 = vmatpush.msra.mxu3 %v5478_v11  ;;  %v5483_v11 = vmul.f32 %v5433_v45, %v15662_v7  ;;  %v15706_v45 = vld [vmem:[#allocation13_spill] sm:$0xff]  ;;  %v15716_v7 = vld [vmem:[#allocation110_spill] sm:$0xff] }
0x15ae   :  { %v5353_v6 = vpop.permute.xlu0 %5352 }
0x15af   :  { %5529 = vmatpush.msra.mxu3 %v5477_v24  ;;  %v5467_v57 = vmul.f32 %v5353_v6, %v15661_v38  ;;  %v15701_v6 = vld [vmem:[#allocation102_spill] sm:$0xff]  ;;  %v15710_v38 = vld [vmem:[#allocation113_spill] sm:$0xff] }
0x15b0   :  { %vm15711_vm10 = vnez %v15710_v38  ;;  %v15721_v24 = vld [vmem:[#allocation53_spill] sm:$0xff] }
0x15b1   :  { %5530 = vmatpush.msra.mxu3 %v5476_v43  ;;  %v15724_v43 = vld [vmem:[#allocation85_spill] sm:$0xff] }
0x15b3   :  { %5531 = vmatpush.msra.mxu3 %v5475_v26  ;;  %v15672_v26 = vld [vmem:[#allocation90_spill] sm:$0xff] }
0x15b5   :  { %5532 = vmatpush.msra.mxu3 %v5474_v55  ;;  %v15674_v55 = vld [vmem:[#allocation57_spill] sm:$0xff] }
0x15b7   :  { %5533 = vmatpush.msra.mxu3 %v5473_v49  ;;  %v15683_v49 = vld [vmem:[#allocation33_spill] sm:$0xff] }
0x15b9   :  { %5534 = vmatpush.msra.mxu3 %v5472_v19  ;;  %v15688_v19 = vld [vmem:[#allocation184_spill] sm:$0xff] }
0x15bb   :  { %5535 = vmatpush.msra.mxu3 %v5471_v34  ;;  %v15691_v34 = vld [vmem:[#allocation183_spill] sm:$0xff] }
0x15bd   :  { %5536 = vmatpush.msra.mxu3 %v5470_v32  ;;  %v15694_v32 = vld [vmem:[#allocation96_spill] sm:$0xff] }
0x15bf   :  { %5537 = vmatpush.msra.mxu3 %v5469_v56  ;;  %v15700_v56 = vld [vmem:[#allocation15_spill] sm:$0xff] }
0x15c1   :  { %5538 = vmatpush.msra.mxu3 %v5468_v35  ;;  %v15704_v35 = vld [vmem:[#allocation111_spill] sm:$0xff] }
0x15c2   :  { %vm15705_vm1 = vnez %v15704_v35 }
0x15c3   :  { %5539 = vmatpush.msra.mxu3 %v5467_v57  ;;  %v15713_v57 = vld [vmem:[#allocation114_spill] sm:$0xff] }
0x15c4   :  { %5540 = vmatmul.f32.vlgmr.msra.gmra.mxu3 %v7421_v15  ;;  %vm15714_vm2 = vnez %v15713_v57 }
0x15c5   :  { %5559 = vmatpush.msrb.mxu3 %v5483_v11  ;;  %v15718_v11 = vld [vmem:[#allocation50_spill] sm:$0xff] }
0x15c7   :  { %6354 = vmatpush.msk.msra.mxu3 %vm9746_vm8, %v13125_v42  ;;  %vm15687_vm8 = vnez %v15686_v20  ;;  %v15725_v42 = vld [vmem:[#allocation25_spill] sm:$0xff] }
0x15c9   :  { %6356 = vmatpush.msk.msra.mxu3 %vm9755_vm5, %v13114_v40  ;;  %vm15684_vm5 = vnez %v15683_v49  ;;  %v15727_v40 = vld [vmem:[#allocation23_spill] sm:$0xff] }
0x15cb   :  { %6358 = vmatpush.msk.msra.mxu3 %vm9764_vm4, %v13104_v44  ;;  %vm15681_vm4 = vnez %v15680_v8  ;;  %v15729_v44 = vld [vmem:[#allocation21_spill] sm:$0xff] }
0x15cc   :  { %6352 = vmatmul.msk.f32.vlgmr.msrb.gmra.mxu3 %vm15667_vm7, %v7422_v33  ;;  %vm15717_vm7 = vnez %v15716_v7 }
0x15cd   :  { %6360 = vmatpush.msk.msra.mxu3 %vm9773_vm3, %v13094_v14  ;;  %vm15678_vm3 = vnez %v15677_v13  ;;  %v15731_v14 = vld [vmem:[#allocation115_spill] sm:$0xff] }
0x15cf   :  { %6362 = vmatpush.msk.msra.mxu3 %vm9782_vm0, %v13084_v36  ;;  %v15676_v36 = vld [vmem:[#allocation89_spill] sm:$0xff]  ;;  %vm15702_vm0 = vnez %v15701_v6 }
0x15d1   :  { %6364 = vmatpush.msk.msra.mxu3 %vm9791_vm15, %v13074_v23  ;;  %v15679_v23 = vld [vmem:[#allocation51_spill] sm:$0xff]  ;;  %vm15699_vm15 = vnez %v15698_v27 }
0x15d3   :  { %6366 = vmatpush.msk.msra.mxu3 %vm9800_vm14, %v13064_v16  ;;  %v15682_v16 = vld [vmem:[#allocation48_spill] sm:$0xff]  ;;  %vm15697_vm14 = vnez %v15696_v37 }
0x15d5   :  { %6368 = vmatpush.msk.msra.mxu3 %vm9809_vm13, %v13054_v9  ;;  %v15685_v9 = vld [vmem:[#allocation185_spill] sm:$0xff]  ;;  %vm15695_vm13 = vnez %v15694_v32 }
0x15d7   :  { %6370 = vmatpush.msk.msra.mxu3 %vm9818_vm12, %v15672_v26  ;;  %vm15690_vm12 = vnez %v15689_v18  ;;  %v15733_v26 = vld [vmem:[#allocation20_spill] sm:$0xff] }
0x15d9   :  { %6372 = vmatpush.msk.msra.mxu3 %vm9827_vm11, %v15674_v55  ;;  %vm15693_vm11 = vnez %v15692_v61  ;;  %v15762_v55 = vld [vmem:[#allocation56_spill] sm:$0xff] }
0x15db   :  { %6374 = vmatpush.msk.msra.mxu3 %vm15678_vm3, %v15676_v36  ;;  %vm15720_vm3 = vnez %v15719_v58 }
0x15dd   :  { %6376 = vmatpush.msk.msra.mxu3 %vm15681_vm4, %v15679_v23  ;;  %vm15723_vm4 = vnez %v15722_v60 }
0x15df   :  { %6378 = vmatpush.msk.msra.mxu3 %vm15684_vm5, %v15682_v16  ;;  %vm15726_vm5 = vnez %v15725_v42 }
0x15e1   :  { %6380 = vmatpush.msk.msra.mxu3 %vm15687_vm8, %v15685_v9  ;;  %vm15728_vm8 = vnez %v15727_v40 }
0x15e3   :  { %6382 = vmatpush.msk.msra.mxu3 %vm15690_vm12, %v15688_v19  ;;  %vm15730_vm12 = vnez %v15729_v44 }
0x15e5   :  { %6384 = vmatpush.msk.msra.mxu3 %vm15693_vm11, %v15691_v34  ;;  %vm15732_vm11 = vnez %v15731_v14 }
0x15e6   :  { %5580 = vmatmul.f32.vlgmr.msra.gmra.mxu3 %v13324_v41  ;;  %v15709_v41 = vld [vmem:[#allocation12_spill] sm:$0xff] }
0x15e7   :  { %6386 = vmatpush.msk.msrb.mxu3 %vm15695_vm13, %v13289_v29  ;;  %v15707_v29 = vld [vmem:[#allocation112_spill] sm:$0xff]  ;;  %vm15734_vm13 = vnez %v15733_v26 }
0x15e8   :  { %vm15708_vm9 = vnez %v15707_v29 }
0x15e9   :  { %6388 = vmatpush.msk.msrb.mxu3 %vm15697_vm14, %v13274_v62  ;;  %v15712_v62 = vld [vmem:[#allocation11_spill] sm:$0xff]  ;;  %vm15736_vm14 = vnez %v15735_v22 }
0x15eb   :  { %6390 = vmatpush.msk.msrb.mxu3 %vm15699_vm15, %v13262_v17  ;;  %v15715_v17 = vld [vmem:[#allocation47_spill] sm:$0xff] }
0x15ed   :  { %6392 = vmatpush.msk.msrb.mxu3 %vm15702_vm0, %v15700_v56 }
0x15ef   :  { %6394 = vmatpush.msk.msrb.mxu3 %vm15705_vm1, %v15703_v30  ;;  %v15769_v30 = vld [vmem:[#allocation55_spill] sm:$0xff] }
0x15f1   :  { %6396 = vmatpush.msk.msrb.mxu3 %vm15708_vm9, %v15706_v45 }
0x15f3   :  { %6398 = vmatpush.msk.msrb.mxu3 %vm15711_vm10, %v15709_v41 }
0x15f5   :  { %6400 = vmatpush.msk.msrb.mxu3 %vm15714_vm2, %v15712_v62 }
0x15f7   :  { %6402 = vmatpush.msk.msrb.mxu3 %vm15717_vm7, %v15715_v17 }
0x15f9   :  { %6404 = vmatpush.msk.msrb.mxu3 %vm15720_vm3, %v15718_v11 }
0x15fb   :  { %6406 = vmatpush.msk.msrb.mxu3 %vm15723_vm4, %v15721_v24 }
0x15fd   :  { %6408 = vmatpush.msk.msrb.mxu3 %vm15726_vm5, %v15724_v43 }
0x15ff   :  { %6410 = vmatpush.msk.msrb.mxu3 %vm15728_vm8, %v13420_v0  ;;  %v15737_v0 = vld [vmem:[#allocation80_spill] sm:$0xff] }
0x1600   :  { %vm15738_vm15 = vnez %v15737_v0 }
0x1601   :  { %6412 = vmatpush.msk.msrb.mxu3 %vm15730_vm12, %v13398_v25  ;;  %v15739_v25 = vld [vmem:[#allocation78_spill] sm:$0xff] }
0x1602   :  { %vm15740_vm0 = vnez %v15739_v25 }
0x1603   :  { %6414 = vmatpush.msk.msrb.mxu3 %vm15732_vm11, %v13469_v50  ;;  %v15741_v50 = vld [vmem:[#allocation76_spill] sm:$0xff]  ;;  %vm15763_vm11 = vnez %v15762_v55 }
0x1604   :  { %vm15742_vm1 = vnez %v15741_v50 }
0x1605   :  { %6416 = vmatpush.msk.msrb.mxu3 %vm15734_vm13, %v13465_v53  ;;  %v15743_v53 = vld [vmem:[#allocation73_spill] sm:$0xff] }
0x1606   :  { %5600 = vmatmul.f32.vlgmr.msrb.gmra.mxu3 %v13506_v46  ;;  %vm15744_vm9 = vnez %v15743_v53  ;;  %v15747_v46 = vld [vmem:[#allocation69_spill] sm:$0xff] }
0x1607   :  { %6418 = vmatpush.msk.msra.mxu3 %vm15736_vm14, %v13430_v3  ;;  %v15745_v3 = vld [vmem:[#allocation71_spill] sm:$0xff]  ;;  %vm15748_vm2 = vnez %v15747_v46 }
0x1608   :  { %vm15746_vm10 = vnez %v15745_v3 }
0x1609   :  { %6420 = vmatpush.msk.msra.mxu3 %vm15738_vm15, %v13405_v10  ;;  %v15749_v10 = vld [vmem:[#allocation67_spill] sm:$0xff] }
0x160a   :  { %vm15750_vm7 = vnez %v15749_v10 }
0x160b   :  { %6422 = vmatpush.msk.msra.mxu3 %vm15740_vm0, %v13388_v12  ;;  %v15751_v12 = vld [vmem:[#allocation64_spill] sm:$0xff] }
0x160c   :  { %vm15752_vm3 = vnez %v15751_v12 }
0x160d   :  { %6424 = vmatpush.msk.msra.mxu3 %vm15742_vm1, %v13376_v2  ;;  %v15753_v2 = vld [vmem:[#allocation61_spill] sm:$0xff] }
0x160e   :  { %vm15754_vm4 = vnez %v15753_v2 }
0x160f   :  { %6426 = vmatpush.msk.msra.mxu3 %vm15744_vm9, %v13370_v48  ;;  %v15755_v48 = vld [vmem:[#allocation59_spill] sm:$0xff] }
0x1610   :  { %vm15756_vm5 = vnez %v15755_v48 }
0x1611   :  { %6428 = vmatpush.msk.msra.mxu3 %vm15746_vm10, %v13361_v47  ;;  %v15757_v47 = vld [vmem:[#allocation63_spill] sm:$0xff] }
0x1612   :  { %vm15758_vm8 = vnez %v15757_v47 }
0x1613   :  { %6430 = vmatpush.msk.msra.mxu3 %vm15748_vm2, %v13351_v52 }
0x1615   :  { %6432 = vmatpush.msk.msra.mxu3 %vm15750_vm7, %v13343_v39  ;;  %v15760_v39 = vld [vmem:[#allocation58_spill] sm:$0xff] }
0x1616   :  { %vm15761_vm12 = vnez %v15760_v39 }
0x1617   :  { %6434 = vmatpush.msk.msra.mxu3 %vm15752_vm3, %v13335_v1  ;;  %v5501_v1 = vpop.f32.mrf.mxu3 }
0x1619   :  { %6436 = vmatpush.msk.msra.mxu3 %vm15754_vm4, %v13450_v63  ;;  %v15764_v63 = vld [vmem:[#allocation54_spill] sm:$0xff] }
0x161a   :  { %vm15765_vm13 = vnez %v15764_v63 }
0x161b   :  { %6438 = vmatpush.msk.msra.mxu3 %vm15756_vm5, %v13448_v21 }
0x161d   :  { %6440 = vmatpush.msk.msra.mxu3 %vm15758_vm8, %v13424_v5  ;;  %v15766_v5 = vld [vmem:[#allocation94_spill] sm:$0xff] }
0x161e   :  { %vm15767_vm14 = vnez %v15766_v5 }
0x161f   :  { %6442 = vmatpush.msk.msra.mxu3 %vm15300_vm6, %v13484_v31  ;;  %vm15768_vm6 = vcmask 64512  }
0x1621   :  { %6444 = vmatpush.msk.msra.mxu3 %vm15761_vm12, %v13446_v51 }
0x1623   :  { %6446 = vmatpush.msk.msra.mxu3 %vm15763_vm11, %v13482_v28 }
0x1625   :  { %6448 = vmatpush.msk.msra.mxu3 %vm15765_vm13, %v13492_v4 }
0x1626   :  { %5620 = vmatmul.f32.vlgmr.msra.gmra.mxu3 %v7421_v15 }
0x1627   :  { %6450 = vmatpush.msk.msrb.mxu3 %vm15767_vm14, %v13467_v54  ;;  %v5521_v21 = vpop.f32.mrf.mxu3 }
0x1628   :  { %v5522_v31 = vadd.f32 %v5521_v21, %v5501_v1 }
0x162e   :  { %6451 = vmatmul.msk.f32.vlgmr.msrb.gmra.mxu3 %vm15768_vm6, %v7422_v33 }
0x1647   :  { %v5541_v59 = vpop.f32.mrf.mxu3 }
0x1648   :  { %v5542_v51 = vadd.f32 %v5541_v59, %v5522_v31 }
0x164f   :  { %v5561_v36 = vpop.f32.mrf.mxu3 }
0x1650   :  { %v5562_v13 = vadd.f32 %v5561_v36, %v5542_v51 }
0x1669   :  { %v5581_v23 = vpop.f32.mrf.mxu3 }
0x1689   :  { %v5601_v8 = vpop.f32.mrf.mxu3 }
0x168a   :  { %v5602_v16 = vadd.f32 %v5601_v8, %v5581_v23 }
0x16a9   :  { %v5621_v28 = vpop.f32.mrf.mxu3 }
0x16aa   :  { %v5622_v49 = vadd.f32 %v5621_v28, %v5602_v16 }
0x16b1   :  { %v5641_v9 = vpop.f32.mrf.mxu3 }
0x16b2   :  { %v5642_v4 = vadd.f32 %v5641_v9, %v5622_v49 }
0x16b4   :  { %7059 = vrcp.f32 %v5642_v4  ;;  %v5656_v54 = vand.u32 2147483648, %v5642_v4  ;;  %v5654_v34 = vand.u32 2147483647, %v5642_v4  ;;  %vm5650_vm0 = vweird.f32 %v5642_v4 }
0x16b5   :  { %vm5644_vm10 = vcmp.gt.f32.partialorder %v5642_v4, 0.0 }
0x16b6   :  { %v5657_v61 = vor.u32 1.1754944e-38, %v5656_v54  ;;  %vm5655_vm9 = vcmp.eq.f32.partialorder %v5654_v34, 8.507059e+37 }
0x16ba   :  { %v7060_v15 = vpop.eup %7059 }
0x16bb   :  { %v5646_v20 = vmul.f32 %v7060_v15, %v5642_v4  ;;  %vm5651_vm15 = vweird.f32 %v7060_v15 }
0x16bc   :  { %vm5652_vm1 = vmor %vm5650_vm0, %vm5651_vm15 }
0x16bd   :  { %v5647_v19 = vsub.f32 1.0, %v5646_v20 }
0x16bf   :  { %v5648_v18 = vmul.f32 %v7060_v15, %v5647_v19 }
0x16c1   :  { %v5649_v33 = vadd.f32 %v7060_v15, %v5648_v18 }
0x16c3   :  { %v5653_v32 = vsel %vm5652_vm1, %v7060_v15, %v5649_v33 }
0x16c4   :  { %v5658_v37 = vsel %vm5655_vm9, %v5657_v61, %v5653_v32 }
0x16c5   :  { %v5659_v27 = vsel %vm5644_vm10, %v5658_v37, 0.0 }
0x16c6   :  { %5662 = vperm.xlu2 %6461, %v5659_v27  }
0x1720   :  { %v5663_v56 = vpop.permute.xlu2 %5662 }
0x1721   :  { %v5665_v6 = vmul.f32 %v5663_v56, %v5562_v13 }
0x1723   :  { %v5666_v35 = vadd.f32 %v5665_v6, %v15769_v30 }
0x1725   :  { %5667 = vst [vmem:[#allocation6] sm:$0xff] %v5666_v35 }
0x1726   :  { %5678 = dma.vmem_to_hbm [thread:$0]  %s5674_s18, 128, %s5676_s11, [#allocation4]  }
0x1727   :  { %7461 = dma.done.wait [#allocation4], 128  }
0x1728   :  { %7462 = vsyncadd [#allocation4], 4294967168 }
0x1729   :  { %5683 = vsyncpa [#allocation4], 1 }
0x172a   :  { %5684 = vsyncpa [#allocation5], 1 }

</bundles_post_ra>
